<compile_context>
chip_gen: v5e
topology: v5e:2x2
jax: 0.10.0
libtpu: 0.0.40
codegen_flags: <defaults>
</compile_context>

<pallas_src>
import functools

import jax
import jax.numpy as jnp
from jax.experimental import pallas as pl
from jax.experimental.pallas import tpu as pltpu


def _round_up(x, m):
    return (x + m - 1) // m * m


# ----------------------------- Pallas kernels -------------------------------

def _matmul_bias_kernel(a_ref, b_ref, bias_ref, o_ref, acc_ref):
    # Tiled C = A @ B + bias.  K (grid axis 2) is the reduction axis.
    k = pl.program_id(2)

    @pl.when(k == 0)
    def _():
        acc_ref[...] = jnp.zeros_like(acc_ref)

    acc_ref[...] += jnp.dot(a_ref[...], b_ref[...],
                            preferred_element_type=jnp.float32)

    @pl.when(k == pl.num_programs(2) - 1)
    def _():
        o_ref[...] = (acc_ref[...] + bias_ref[...]).astype(o_ref.dtype)


def _bn_stats_kernel(x_ref, sum_ref, sq_ref):
    # Per-channel sum / sum-of-squares accumulated across the row-block grid.
    @pl.when(pl.program_id(0) == 0)
    def _():
        sum_ref[...] = jnp.zeros_like(sum_ref)
        sq_ref[...] = jnp.zeros_like(sq_ref)

    x = x_ref[...]
    sum_ref[...] += jnp.sum(x, axis=0, keepdims=True)
    sq_ref[...] += jnp.sum(x * x, axis=0, keepdims=True)


def _bn_act_kernel(x_ref, scale_ref, shift_ref, o_ref, *, relu):
    y = x_ref[...] * scale_ref[...] + shift_ref[...]
    if relu:
        y = jnp.maximum(y, 0.0)
    o_ref[...] = y


def _bn_add_relu_kernel(x_ref, scale_ref, shift_ref, res_ref, o_ref):
    y = x_ref[...] * scale_ref[...] + shift_ref[...] + res_ref[...]
    o_ref[...] = jnp.maximum(y, 0.0)


def _mean_hw_kernel(x_ref, o_ref):
    # x: [N, H*W, C] -> mean over spatial axis
    o_ref[...] = jnp.mean(x_ref[...], axis=1)


# ----------------------------- Pallas wrappers ------------------------------

def pallas_matmul_bias(a, b, bias, *, tm=256, tn=256, tk=256):
    """out = a @ b + bias.  bf16 MXU inputs, f32 accumulate, tiled grid."""
    M, K = a.shape
    _, N = b.shape
    tm = min(tm, _round_up(M, 16))      # bf16 sublane packing: multiples of 16
    tn = min(tn, _round_up(N, 128))     # lane-dense output tiles
    tk = min(tk, _round_up(K, 128))
    Mp, Kp, Np = _round_up(M, tm), _round_up(K, tk), _round_up(N, tn)

    a_p = jnp.pad(a, ((0, Mp - M), (0, Kp - K))).astype(jnp.bfloat16)
    b_p = jnp.pad(b, ((0, Kp - K), (0, Np - N))).astype(jnp.bfloat16)
    bias_p = jnp.pad(bias.astype(jnp.float32).reshape(1, N),
                     ((0, 0), (0, Np - N)))

    out = pl.pallas_call(
        _matmul_bias_kernel,
        out_shape=jax.ShapeDtypeStruct((Mp, Np), jnp.float32),
        grid_spec=pltpu.PrefetchScalarGridSpec(
            num_scalar_prefetch=0,
            grid=(Mp // tm, Np // tn, Kp // tk),
            in_specs=[
                pl.BlockSpec((tm, tk), lambda i, j, k: (i, k)),
                pl.BlockSpec((tk, tn), lambda i, j, k: (k, j)),
                pl.BlockSpec((1, tn), lambda i, j, k: (0, j)),
            ],
            out_specs=pl.BlockSpec((tm, tn), lambda i, j, k: (i, j)),
            scratch_shapes=[pltpu.VMEM((tm, tn), jnp.float32)],
        ),
        compiler_params=pltpu.CompilerParams(
            dimension_semantics=("parallel", "parallel", "arbitrary")),
    )(a_p, b_p, bias_p)
    return out[:M, :N]


def conv2d(x, w, b, stride, padding):
    """x: NHWC float32.  w: torch layout (Cout, Cin, KH, KW).  b: (Cout,) or None."""
    Nb, H, W, Cin = x.shape
    Cout, _, KH, KW = w.shape
    Ho = (H + 2 * padding - KH) // stride + 1
    Wo = (W + 2 * padding - KW) // stride + 1
    xb = x.astype(jnp.bfloat16)                       # halve im2col HBM bytes
    xp = jnp.pad(xb, ((0, 0), (padding, padding), (padding, padding), (0, 0)))
    # TODO(synk): im2col patches are still materialized (bf16); folding the
    # (kh,kw) taps into the matmul K grid via element-offset BlockSpecs would
    # remove the KH*KW x HBM blow-up entirely.
    taps = []
    for kh in range(KH):
        for kw in range(KW):
            taps.append(
                xp[:, kh:kh + stride * (Ho - 1) + 1:stride,
                      kw:kw + stride * (Wo - 1) + 1:stride, :]
            )
    patches = jnp.concatenate(taps, axis=-1)          # (N, Ho, Wo, KH*KW*Cin)
    a = patches.reshape(Nb * Ho * Wo, KH * KW * Cin)
    wm = jnp.transpose(w, (2, 3, 1, 0)).reshape(KH * KW * Cin, Cout)
    bias = b if b is not None else jnp.zeros((Cout,), jnp.float32)
    out = pallas_matmul_bias(a, wm, bias)
    return out.reshape(Nb, Ho, Wo, Cout)


def batchnorm(x, gamma, beta, *, relu=False, residual=None, eps=1e-5):
    """Training-mode BatchNorm2d (batch stats), fused with ReLU / residual-add."""
    Nb, H, W, C = x.shape
    R = Nb * H * W
    tr = min(1024, _round_up(R, 8))
    Rp = _round_up(R, tr)
    nblk = Rp // tr
    x2 = jnp.pad(x.reshape(R, C), ((0, Rp - R), (0, 0)))   # zero rows: exact stats

    s, sq = pl.pallas_call(
        _bn_stats_kernel,
        out_shape=(jax.ShapeDtypeStruct((1, C), jnp.float32),
                   jax.ShapeDtypeStruct((1, C), jnp.float32)),
        grid_spec=pltpu.PrefetchScalarGridSpec(
            num_scalar_prefetch=0,
            grid=(nblk,),
            in_specs=[pl.BlockSpec((tr, C), lambda i: (i, 0))],
            out_specs=(pl.BlockSpec((1, C), lambda i: (0, 0)),
                       pl.BlockSpec((1, C), lambda i: (0, 0))),
        ),
        compiler_params=pltpu.CompilerParams(
            dimension_semantics=("arbitrary",)),
    )(x2)
    mean = s / R
    var = jnp.maximum(sq / R - mean * mean, 0.0)   # biased var (torch training BN)
    scale = gamma.reshape(1, C) * jax.lax.rsqrt(var + eps)
    shift = beta.reshape(1, C) - mean * scale

    row_spec = pl.BlockSpec((tr, C), lambda i: (i, 0))
    vec_spec = pl.BlockSpec((1, C), lambda i: (0, 0))
    ew_params = pltpu.CompilerParams(dimension_semantics=("parallel",))

    if residual is not None:
        r2 = jnp.pad(residual.reshape(R, C), ((0, Rp - R), (0, 0)))
        y = pl.pallas_call(
            _bn_add_relu_kernel,
            out_shape=jax.ShapeDtypeStruct((Rp, C), jnp.float32),
            grid_spec=pltpu.PrefetchScalarGridSpec(
                num_scalar_prefetch=0, grid=(nblk,),
                in_specs=[row_spec, vec_spec, vec_spec, row_spec],
                out_specs=row_spec),
            compiler_params=ew_params,
        )(x2, scale, shift, r2)
    else:
        y = pl.pallas_call(
            functools.partial(_bn_act_kernel, relu=relu),
            out_shape=jax.ShapeDtypeStruct((Rp, C), jnp.float32),
            grid_spec=pltpu.PrefetchScalarGridSpec(
                num_scalar_prefetch=0, grid=(nblk,),
                in_specs=[row_spec, vec_spec, vec_spec],
                out_specs=row_spec),
            compiler_params=ew_params,
        )(x2, scale, shift)
    return y[:R].reshape(Nb, H, W, C)


def maxpool3x3_s2_p1(x):
    # TODO(synk): strided 3x3/s2 windows have no clean BlockSpec expression;
    # the tap reduction is a fused XLA pairwise max (no 9x HBM tap stack).
    Nb, H, W, C = x.shape
    Ho = (H + 2 - 3) // 2 + 1
    Wo = (W + 2 - 3) // 2 + 1
    xp = jnp.pad(x, ((0, 0), (1, 1), (1, 1), (0, 0)), constant_values=-jnp.inf)
    out = None
    for kh in range(3):
        for kw in range(3):
            tap = xp[:, kh:kh + 2 * (Ho - 1) + 1:2,
                        kw:kw + 2 * (Wo - 1) + 1:2, :]
            out = tap if out is None else jnp.maximum(out, tap)
    return out


def global_avgpool(x):
    Nb, H, W, C = x.shape
    return pl.pallas_call(
        _mean_hw_kernel,
        out_shape=jax.ShapeDtypeStruct((Nb, C), jnp.float32),
    )(x.reshape(Nb, H * W, C))


# ----------------------------- Model (params + forward) ---------------------

def _normal(key, shape, scale=0.05):
    return scale * jax.random.normal(key, shape, dtype=jnp.float32)


def init_params(key, num_blocks=(1, 1, 1, 1), num_classes=7):
    params = {}
    key, k = jax.random.split(key)
    params["conv1_w"] = _normal(k, (64, 3, 7, 7))      # torch layout (Cout,Cin,KH,KW)
    key, k = jax.random.split(key)
    params["conv1_b"] = _normal(k, (64,))
    params["bn1_g"] = jnp.ones((64,), jnp.float32)
    params["bn1_b"] = jnp.zeros((64,), jnp.float32)

    in_planes = 64
    blocks = []
    for out_planes, nb, stride in zip((64, 128, 256, 512), num_blocks, (1, 2, 2, 2)):
        for s in [stride] + [1] * (nb - 1):
            bp = {}
            key, k = jax.random.split(key)
            bp["conv1_w"] = _normal(k, (out_planes, in_planes, 3, 3))
            bp["bn1_g"] = jnp.ones((out_planes,), jnp.float32)
            bp["bn1_b"] = jnp.zeros((out_planes,), jnp.float32)
            key, k = jax.random.split(key)
            bp["conv2_w"] = _normal(k, (out_planes, out_planes, 3, 3))
            bp["bn2_g"] = jnp.ones((out_planes,), jnp.float32)
            bp["bn2_b"] = jnp.zeros((out_planes,), jnp.float32)
            if s != 1 or in_planes != out_planes:      # BasicBlock.mul == 1
                key, k = jax.random.split(key)
                bp["sc_conv_w"] = _normal(k, (out_planes, in_planes, 1, 1))
                bp["sc_bn_g"] = jnp.ones((out_planes,), jnp.float32)
                bp["sc_bn_b"] = jnp.zeros((out_planes,), jnp.float32)
            blocks.append(bp)
            in_planes = out_planes
    params["blocks"] = blocks

    key, k = jax.random.split(key)
    params["fc_w_t"] = jnp.transpose(_normal(k, (num_classes, 512)))  # pre-transposed (512, C)
    key, k = jax.random.split(key)
    params["fc_b"] = _normal(k, (num_classes,))
    return params


def _block_strides(num_blocks):
    strides = []
    for nb, s0 in zip(num_blocks, (1, 2, 2, 2)):
        strides += [s0] + [1] * (nb - 1)
    return strides


def basic_block(x, p, stride):
    out = conv2d(x, p["conv1_w"], None, stride=stride, padding=1)
    out = batchnorm(out, p["bn1_g"], p["bn1_b"], relu=True)
    out = conv2d(out, p["conv2_w"], None, stride=1, padding=1)
    if "sc_conv_w" in p:
        sc = conv2d(x, p["sc_conv_w"], None, stride=stride, padding=0)
        sc = batchnorm(sc, p["sc_bn_g"], p["sc_bn_b"], relu=False)
    else:
        sc = x
    # bn2 + residual add + relu fused in one tiled Pallas kernel
    return batchnorm(out, p["bn2_g"], p["bn2_b"], residual=sc)


def resnet_forward(x_nchw, params, num_blocks=(1, 1, 1, 1)):
    x = jnp.transpose(x_nchw, (0, 2, 3, 1)).astype(jnp.float32)   # NCHW -> NHWC
    out = conv2d(x, params["conv1_w"], params["conv1_b"], stride=2, padding=3)
    out = batchnorm(out, params["bn1_g"], params["bn1_b"], relu=True)
    out = maxpool3x3_s2_p1(out)
    for bp, s in zip(params["blocks"], _block_strides(num_blocks)):
        out = basic_block(out, bp, s)
    pooled = global_avgpool(out)                                   # (N, 512)
    logits = pallas_matmul_bias(pooled, params["fc_w_t"], params["fc_b"])
    return logits                                                  # (N, num_classes)


# ----------------------------- Main ------------------------------------------

if __name__ == "__main__":
    key = jax.random.PRNGKey(0)
    key_x, key_p = jax.random.split(key)
    x = jax.random.normal(key_x, (2, 3, 32, 32), dtype=jnp.float32)   # NCHW like PyTorch
    params = init_params(key_p, num_blocks=(1, 1, 1, 1), num_classes=7)

    fwd = jax.jit(resnet_forward)
    logits = jax.block_until_ready(fwd(x, params))
    assert logits.shape == (2, 7) and logits.dtype == jnp.float32
    print("KERNEL_OK")
</pallas_src>

<mosaic_0001>
module attributes {stable_mosaic.version = 11 : i64} {
  func.func @_matmul_bias_kernel(%arg0: i32, %arg1: i32, %arg2: i32, %arg3: memref<256x256xbf16, #tpu.memory_space<vmem>>, %arg4: memref<256x128xbf16, #tpu.memory_space<vmem>>, %arg5: memref<1x128xf32, #tpu.memory_space<vmem>>, %arg6: memref<256x128xf32, #tpu.memory_space<vmem>>, %arg7: memref<256x128xf32, #tpu.memory_space<vmem>>) attributes {dimension_semantics = [#tpu.dimension_semantics<parallel>, #tpu.dimension_semantics<parallel>, #tpu.dimension_semantics<arbitrary>], iteration_bounds = array<i64: 2, 1, 1>, scalar_prefetch = 0 : i64, scratch_operands = 1 : i64, tpu.core_type = #tpu.core_type<tc>, window_params = [{transform_indices = @transform_0, window_bounds = array<i64: 256, 256>}, {transform_indices = @transform_1, window_bounds = array<i64: 256, 128>}, {transform_indices = @transform_2, window_bounds = array<i64: 1, 128>}, {transform_indices = @transform_3, window_bounds = array<i64: 256, 128>}]} {
    %c0_i32 = arith.constant 0 : i32
    %0 = arith.cmpi eq, %arg2, %c0_i32 : i32
    %1 = arith.extui %0 : i1 to i32
    %c0_i32_0 = arith.constant 0 : i32
    %2 = arith.cmpi ne, %1, %c0_i32_0 : i32
    scf.if %2 {
      %cst_10 = arith.constant 0.000000e+00 : f32
      %12 = vector.broadcast %cst_10 : f32 to vector<256x128xf32>
      %c0_11 = arith.constant 0 : index
      %c0_12 = arith.constant 0 : index
      %13 = vector.load %arg7[%c0_11, %c0_12] : memref<256x128xf32, #tpu.memory_space<vmem>>, vector<256x128xf32>
      tpu.vector_store %arg7[%c0_11, %c0_12], %12 {strides = array<i32>} : memref<256x128xf32, #tpu.memory_space<vmem>>, vector<256x128xf32>,
    } else {
    }
    %c0 = arith.constant 0 : index
    %c0_1 = arith.constant 0 : index
    %3 = vector.load %arg7[%c0, %c0_1] : memref<256x128xf32, #tpu.memory_space<vmem>>, vector<256x128xf32>
    %c0_2 = arith.constant 0 : index
    %c0_3 = arith.constant 0 : index
    %4 = vector.load %arg3[%c0_2, %c0_3] : memref<256x256xbf16, #tpu.memory_space<vmem>>, vector<256x256xbf16>
    %c0_4 = arith.constant 0 : index
    %c0_5 = arith.constant 0 : index
    %5 = vector.load %arg4[%c0_4, %c0_5] : memref<256x128xbf16, #tpu.memory_space<vmem>>, vector<256x128xbf16>
    %cst = arith.constant dense<0.000000e+00> : vector<256x128xf32>
    %6 = tpu.matmul %4, %5, %cst {dimension_numbers = #tpu.dot_dimension_numbers<[1], [0], [0], [1], [0, 0, 1, 1], [], []>} : vector<256x256xbf16>, vector<256x128xbf16>, vector<256x128xf32> -> vector<256x128xf32>
    %7 = arith.addf %3, %6 : vector<256x128xf32>
    %c0_6 = arith.constant 0 : index
    %c0_7 = arith.constant 0 : index
    %8 = vector.load %arg7[%c0_6, %c0_7] : memref<256x128xf32, #tpu.memory_space<vmem>>, vector<256x128xf32>
    tpu.vector_store %arg7[%c0_6, %c0_7], %7 {strides = array<i32>} : memref<256x128xf32, #tpu.memory_space<vmem>>, vector<256x128xf32>,
    %c0_i32_8 = arith.constant 0 : i32
    %9 = arith.cmpi eq, %arg2, %c0_i32_8 : i32
    %10 = arith.extui %9 : i1 to i32
    %c0_i32_9 = arith.constant 0 : i32
    %11 = arith.cmpi ne, %10, %c0_i32_9 : i32
    scf.if %11 {
      %c0_10 = arith.constant 0 : index
      %c0_11 = arith.constant 0 : index
      %12 = vector.load %arg7[%c0_10, %c0_11] : memref<256x128xf32, #tpu.memory_space<vmem>>, vector<256x128xf32>
      %c0_12 = arith.constant 0 : index
      %c0_13 = arith.constant 0 : index
      %13 = vector.load %arg5[%c0_12, %c0_13] : memref<1x128xf32, #tpu.memory_space<vmem>>, vector<1x128xf32>
      %14 = vector.broadcast %13 : vector<1x128xf32> to vector<256x128xf32>
      %15 = arith.addf %12, %14 : vector<256x128xf32>
      %c0_14 = arith.constant 0 : index
      %c0_15 = arith.constant 0 : index
      %16 = vector.load %arg6[%c0_14, %c0_15] : memref<256x128xf32, #tpu.memory_space<vmem>>, vector<256x128xf32>
      tpu.vector_store %arg6[%c0_14, %c0_15], %15 {strides = array<i32>} : memref<256x128xf32, #tpu.memory_space<vmem>>, vector<256x128xf32>,
    } else {
    }
    return
  }
  func.func @transform_0(%arg0: i32, %arg1: i32, %arg2: i32) -> (i32, i32) {
    %c0_i32 = arith.constant 0 : i32
    return %arg0, %arg2 : i32, i32
  }
  func.func @transform_1(%arg0: i32, %arg1: i32, %arg2: i32) -> (i32, i32) {
    %c0_i32 = arith.constant 0 : i32
    return %arg2, %arg1 : i32, i32
  }
  func.func @transform_2(%arg0: i32, %arg1: i32, %arg2: i32) -> (i32, i32) {
    %c0_i32 = arith.constant 0 : i32
    %c0_i32_0 = arith.constant 0 : i32
    return %c0_i32, %arg1 : i32, i32
  }
  func.func @transform_3(%arg0: i32, %arg1: i32, %arg2: i32) -> (i32, i32) {
    %c0_i32 = arith.constant 0 : i32
    return %arg0, %arg1 : i32, i32
  }
}

module attributes {stable_mosaic.version = 11 : i64} {
  func.func @_bn_stats_kernel(%arg0: i32, %arg1: memref<512x64xf32, #tpu.memory_space<vmem>>, %arg2: memref<1x64xf32, #tpu.memory_space<vmem>>, %arg3: memref<1x64xf32, #tpu.memory_space<vmem>>) attributes {dimension_semantics = [#tpu.dimension_semantics<arbitrary>], iteration_bounds = array<i64: 1>, scalar_prefetch = 0 : i64, scratch_operands = 0 : i64, tpu.core_type = #tpu.core_type<tc>, window_params = [{transform_indices = @transform_0, window_bounds = array<i64: 512, 64>}, {pipeline_mode = #tpu.pipeline_mode<synchronous>, transform_indices = @transform_1, window_bounds = array<i64: 1, 64>}, {pipeline_mode = #tpu.pipeline_mode<synchronous>, transform_indices = @transform_2, window_bounds = array<i64: 1, 64>}]} {
    %c0_i32 = arith.constant 0 : i32
    %0 = arith.cmpi eq, %arg0, %c0_i32 : i32
    %1 = arith.extui %0 : i1 to i32
    %c0_i32_0 = arith.constant 0 : i32
    %2 = arith.cmpi ne, %1, %c0_i32_0 : i32
    scf.if %2 {
      %cst_11 = arith.constant 0.000000e+00 : f32
      %15 = vector.broadcast %cst_11 : f32 to vector<1x64xf32>
      %c0_12 = arith.constant 0 : index
      %c0_13 = arith.constant 0 : index
      %16 = vector.load %arg2[%c0_12, %c0_13] : memref<1x64xf32, #tpu.memory_space<vmem>>, vector<1x64xf32>
      tpu.vector_store %arg2[%c0_12, %c0_13], %15 {strides = array<i32>} : memref<1x64xf32, #tpu.memory_space<vmem>>, vector<1x64xf32>,
      %cst_14 = arith.constant 0.000000e+00 : f32
      %17 = vector.broadcast %cst_14 : f32 to vector<1x64xf32>
      %c0_15 = arith.constant 0 : index
      %c0_16 = arith.constant 0 : index
      %18 = vector.load %arg3[%c0_15, %c0_16] : memref<1x64xf32, #tpu.memory_space<vmem>>, vector<1x64xf32>
      tpu.vector_store %arg3[%c0_15, %c0_16], %17 {strides = array<i32>} : memref<1x64xf32, #tpu.memory_space<vmem>>, vector<1x64xf32>,
    } else {
    }
    %c0 = arith.constant 0 : index
    %c0_1 = arith.constant 0 : index
    %3 = vector.load %arg1[%c0, %c0_1] : memref<512x64xf32, #tpu.memory_space<vmem>>, vector<512x64xf32>
    %c0_2 = arith.constant 0 : index
    %c0_3 = arith.constant 0 : index
    %4 = vector.load %arg2[%c0_2, %c0_3] : memref<1x64xf32, #tpu.memory_space<vmem>>, vector<1x64xf32>
    %cst = arith.constant dense<0.000000e+00> : vector<64xf32>
    %5 = vector.multi_reduction <add>, %3, %cst [0] : vector<512x64xf32> to vector<64xf32>
    %6 = vector.shape_cast %5 : vector<64xf32> to vector<1x64xf32>
    %7 = arith.addf %4, %6 : vector<1x64xf32>
    %c0_4 = arith.constant 0 : index
    %c0_5 = arith.constant 0 : index
    %8 = vector.load %arg2[%c0_4, %c0_5] : memref<1x64xf32, #tpu.memory_space<vmem>>, vector<1x64xf32>
    tpu.vector_store %arg2[%c0_4, %c0_5], %7 {strides = array<i32>} : memref<1x64xf32, #tpu.memory_space<vmem>>, vector<1x64xf32>,
    %c0_6 = arith.constant 0 : index
    %c0_7 = arith.constant 0 : index
    %9 = vector.load %arg3[%c0_6, %c0_7] : memref<1x64xf32, #tpu.memory_space<vmem>>, vector<1x64xf32>
    %10 = arith.mulf %3, %3 : vector<512x64xf32>
    %cst_8 = arith.constant dense<0.000000e+00> : vector<64xf32>
    %11 = vector.multi_reduction <add>, %10, %cst_8 [0] : vector<512x64xf32> to vector<64xf32>
    %12 = vector.shape_cast %11 : vector<64xf32> to vector<1x64xf32>
    %13 = arith.addf %9, %12 : vector<1x64xf32>
    %c0_9 = arith.constant 0 : index
    %c0_10 = arith.constant 0 : index
    %14 = vector.load %arg3[%c0_9, %c0_10] : memref<1x64xf32, #tpu.memory_space<vmem>>, vector<1x64xf32>
    tpu.vector_store %arg3[%c0_9, %c0_10], %13 {strides = array<i32>} : memref<1x64xf32, #tpu.memory_space<vmem>>, vector<1x64xf32>,
    return
  }
  func.func @transform_0(%arg0: i32) -> (i32, i32) {
    %c0_i32 = arith.constant 0 : i32
    %c0_i32_0 = arith.constant 0 : i32
    return %arg0, %c0_i32 : i32, i32
  }
  func.func @transform_1(%arg0: i32) -> (i32, i32) {
    %c0_i32 = arith.constant 0 : i32
    %c0_i32_0 = arith.constant 0 : i32
    %c0_i32_1 = arith.constant 0 : i32
    return %c0_i32, %c0_i32_0 : i32, i32
  }
  func.func @transform_2(%arg0: i32) -> (i32, i32) {
    %c0_i32 = arith.constant 0 : i32
    %c0_i32_0 = arith.constant 0 : i32
    %c0_i32_1 = arith.constant 0 : i32
    return %c0_i32, %c0_i32_0 : i32, i32
  }
}

module attributes {stable_mosaic.version = 11 : i64} {
  func.func @_bn_act_kernel(%arg0: i32, %arg1: memref<512x64xf32, #tpu.memory_space<vmem>>, %arg2: memref<1x64xf32, #tpu.memory_space<vmem>>, %arg3: memref<1x64xf32, #tpu.memory_space<vmem>>, %arg4: memref<512x64xf32, #tpu.memory_space<vmem>>) attributes {dimension_semantics = [#tpu.dimension_semantics<parallel>], iteration_bounds = array<i64: 1>, scalar_prefetch = 0 : i64, scratch_operands = 0 : i64, tpu.core_type = #tpu.core_type<tc>, window_params = [{transform_indices = @transform_0, window_bounds = array<i64: 512, 64>}, {pipeline_mode = #tpu.pipeline_mode<synchronous>, transform_indices = @transform_1, window_bounds = array<i64: 1, 64>}, {pipeline_mode = #tpu.pipeline_mode<synchronous>, transform_indices = @transform_2, window_bounds = array<i64: 1, 64>}, {transform_indices = @transform_3, window_bounds = array<i64: 512, 64>}]} {
    %c0 = arith.constant 0 : index
    %c0_0 = arith.constant 0 : index
    %0 = vector.load %arg1[%c0, %c0_0] : memref<512x64xf32, #tpu.memory_space<vmem>>, vector<512x64xf32>
    %c0_1 = arith.constant 0 : index
    %c0_2 = arith.constant 0 : index
    %1 = vector.load %arg2[%c0_1, %c0_2] : memref<1x64xf32, #tpu.memory_space<vmem>>, vector<1x64xf32>
    %2 = vector.broadcast %1 : vector<1x64xf32> to vector<512x64xf32>
    %3 = arith.mulf %0, %2 : vector<512x64xf32>
    %c0_3 = arith.constant 0 : index
    %c0_4 = arith.constant 0 : index
    %4 = vector.load %arg3[%c0_3, %c0_4] : memref<1x64xf32, #tpu.memory_space<vmem>>, vector<1x64xf32>
    %5 = vector.broadcast %4 : vector<1x64xf32> to vector<512x64xf32>
    %6 = arith.addf %3, %5 : vector<512x64xf32>
    %cst = arith.constant 0.000000e+00 : f32
    %7 = vector.broadcast %cst : f32 to vector<512x64xf32>
    %8 = arith.maximumf %6, %7 : vector<512x64xf32>
    %c0_5 = arith.constant 0 : index
    %c0_6 = arith.constant 0 : index
    %9 = vector.load %arg4[%c0_5, %c0_6] : memref<512x64xf32, #tpu.memory_space<vmem>>, vector<512x64xf32>
    tpu.vector_store %arg4[%c0_5, %c0_6], %8 {strides = array<i32>} : memref<512x64xf32, #tpu.memory_space<vmem>>, vector<512x64xf32>,
    return
  }
  func.func @transform_0(%arg0: i32) -> (i32, i32) {
    %c0_i32 = arith.constant 0 : i32
    %c0_i32_0 = arith.constant 0 : i32
    return %arg0, %c0_i32 : i32, i32
  }
  func.func @transform_1(%arg0: i32) -> (i32, i32) {
    %c0_i32 = arith.constant 0 : i32
    %c0_i32_0 = arith.constant 0 : i32
    %c0_i32_1 = arith.constant 0 : i32
    return %c0_i32, %c0_i32_0 : i32, i32
  }
  func.func @transform_2(%arg0: i32) -> (i32, i32) {
    %c0_i32 = arith.constant 0 : i32
    %c0_i32_0 = arith.constant 0 : i32
    %c0_i32_1 = arith.constant 0 : i32
    return %c0_i32, %c0_i32_0 : i32, i32
  }
  func.func @transform_3(%arg0: i32) -> (i32, i32) {
    %c0_i32 = arith.constant 0 : i32
    %c0_i32_0 = arith.constant 0 : i32
    return %arg0, %c0_i32 : i32, i32
  }
}

module attributes {stable_mosaic.version = 11 : i64} {
  func.func @_matmul_bias_kernel(%arg0: i32, %arg1: i32, %arg2: i32, %arg3: memref<128x256xbf16, #tpu.memory_space<vmem>>, %arg4: memref<256x128xbf16, #tpu.memory_space<vmem>>, %arg5: memref<1x128xf32, #tpu.memory_space<vmem>>, %arg6: memref<128x128xf32, #tpu.memory_space<vmem>>, %arg7: memref<128x128xf32, #tpu.memory_space<vmem>>) attributes {dimension_semantics = [#tpu.dimension_semantics<parallel>, #tpu.dimension_semantics<parallel>, #tpu.dimension_semantics<arbitrary>], iteration_bounds = array<i64: 1, 1, 3>, scalar_prefetch = 0 : i64, scratch_operands = 1 : i64, tpu.core_type = #tpu.core_type<tc>, window_params = [{transform_indices = @transform_0, window_bounds = array<i64: 128, 256>}, {transform_indices = @transform_1, window_bounds = array<i64: 256, 128>}, {transform_indices = @transform_2, window_bounds = array<i64: 1, 128>}, {transform_indices = @transform_3, window_bounds = array<i64: 128, 128>}]} {
    %c0_i32 = arith.constant 0 : i32
    %0 = arith.cmpi eq, %arg2, %c0_i32 : i32
    %1 = arith.extui %0 : i1 to i32
    %c0_i32_0 = arith.constant 0 : i32
    %2 = arith.cmpi ne, %1, %c0_i32_0 : i32
    scf.if %2 {
      %cst_9 = arith.constant 0.000000e+00 : f32
      %12 = vector.broadcast %cst_9 : f32 to vector<128x128xf32>
      %c0_10 = arith.constant 0 : index
      %c0_11 = arith.constant 0 : index
      %13 = vector.load %arg7[%c0_10, %c0_11] : memref<128x128xf32, #tpu.memory_space<vmem>>, vector<128x128xf32>
      tpu.vector_store %arg7[%c0_10, %c0_11], %12 {strides = array<i32>} : memref<128x128xf32, #tpu.memory_space<vmem>>, vector<128x128xf32>,
    } else {
    }
    %c0 = arith.constant 0 : index
    %c0_1 = arith.constant 0 : index
    %3 = vector.load %arg7[%c0, %c0_1] : memref<128x128xf32, #tpu.memory_space<vmem>>, vector<128x128xf32>
    %c0_2 = arith.constant 0 : index
    %c0_3 = arith.constant 0 : index
    %4 = vector.load %arg3[%c0_2, %c0_3] : memref<128x256xbf16, #tpu.memory_space<vmem>>, vector<128x256xbf16>
    %c0_4 = arith.constant 0 : index
    %c0_5 = arith.constant 0 : index
    %5 = vector.load %arg4[%c0_4, %c0_5] : memref<256x128xbf16, #tpu.memory_space<vmem>>, vector<256x128xbf16>
    %cst = arith.constant dense<0.000000e+00> : vector<128x128xf32>
    %6 = tpu.matmul %4, %5, %cst {dimension_numbers = #tpu.dot_dimension_numbers<[1], [0], [0], [1], [0, 0, 1, 1], [], []>} : vector<128x256xbf16>, vector<256x128xbf16>, vector<128x128xf32> -> vector<128x128xf32>
    %7 = arith.addf %3, %6 : vector<128x128xf32>
    %c0_6 = arith.constant 0 : index
    %c0_7 = arith.constant 0 : index
    %8 = vector.load %arg7[%c0_6, %c0_7] : memref<128x128xf32, #tpu.memory_space<vmem>>, vector<128x128xf32>
    tpu.vector_store %arg7[%c0_6, %c0_7], %7 {strides = array<i32>} : memref<128x128xf32, #tpu.memory_space<vmem>>, vector<128x128xf32>,
    %c2_i32 = arith.constant 2 : i32
    %9 = arith.cmpi eq, %arg2, %c2_i32 : i32
    %10 = arith.extui %9 : i1 to i32
    %c0_i32_8 = arith.constant 0 : i32
    %11 = arith.cmpi ne, %10, %c0_i32_8 : i32
    scf.if %11 {
      %c0_9 = arith.constant 0 : index
      %c0_10 = arith.constant 0 : index
      %12 = vector.load %arg7[%c0_9, %c0_10] : memref<128x128xf32, #tpu.memory_space<vmem>>, vector<128x128xf32>
      %c0_11 = arith.constant 0 : index
      %c0_12 = arith.constant 0 : index
      %13 = vector.load %arg5[%c0_11, %c0_12] : memref<1x128xf32, #tpu.memory_space<vmem>>, vector<1x128xf32>
      %14 = vector.broadcast %13 : vector<1x128xf32> to vector<128x128xf32>
      %15 = arith.addf %12, %14 : vector<128x128xf32>
      %c0_13 = arith.constant 0 : index
      %c0_14 = arith.constant 0 : index
      %16 = vector.load %arg6[%c0_13, %c0_14] : memref<128x128xf32, #tpu.memory_space<vmem>>, vector<128x128xf32>
      tpu.vector_store %arg6[%c0_13, %c0_14], %15 {strides = array<i32>} : memref<128x128xf32, #tpu.memory_space<vmem>>, vector<128x128xf32>,
    } else {
    }
    return
  }
  func.func @transform_0(%arg0: i32, %arg1: i32, %arg2: i32) -> (i32, i32) {
    %c0_i32 = arith.constant 0 : i32
    return %arg0, %arg2 : i32, i32
  }
  func.func @transform_1(%arg0: i32, %arg1: i32, %arg2: i32) -> (i32, i32) {
    %c0_i32 = arith.constant 0 : i32
    return %arg2, %arg1 : i32, i32
  }
  func.func @transform_2(%arg0: i32, %arg1: i32, %arg2: i32) -> (i32, i32) {
    %c0_i32 = arith.constant 0 : i32
    %c0_i32_0 = arith.constant 0 : i32
    return %c0_i32, %arg1 : i32, i32
  }
  func.func @transform_3(%arg0: i32, %arg1: i32, %arg2: i32) -> (i32, i32) {
    %c0_i32 = arith.constant 0 : i32
    return %arg0, %arg1 : i32, i32
  }
}

module attributes {stable_mosaic.version = 11 : i64} {
  func.func @_bn_act_kernel(%arg0: i32, %arg1: memref<128x64xf32, #tpu.memory_space<vmem>>, %arg2: memref<1x64xf32, #tpu.memory_space<vmem>>, %arg3: memref<1x64xf32, #tpu.memory_space<vmem>>, %arg4: memref<128x64xf32, #tpu.memory_space<vmem>>) attributes {dimension_semantics = [#tpu.dimension_semantics<parallel>], iteration_bounds = array<i64: 1>, scalar_prefetch = 0 : i64, scratch_operands = 0 : i64, tpu.core_type = #tpu.core_type<tc>, window_params = [{transform_indices = @transform_0, window_bounds = array<i64: 128, 64>}, {pipeline_mode = #tpu.pipeline_mode<synchronous>, transform_indices = @transform_1, window_bounds = array<i64: 1, 64>}, {pipeline_mode = #tpu.pipeline_mode<synchronous>, transform_indices = @transform_2, window_bounds = array<i64: 1, 64>}, {transform_indices = @transform_3, window_bounds = array<i64: 128, 64>}]} {
    %c0 = arith.constant 0 : index
    %c0_0 = arith.constant 0 : index
    %0 = vector.load %arg1[%c0, %c0_0] : memref<128x64xf32, #tpu.memory_space<vmem>>, vector<128x64xf32>
    %c0_1 = arith.constant 0 : index
    %c0_2 = arith.constant 0 : index
    %1 = vector.load %arg2[%c0_1, %c0_2] : memref<1x64xf32, #tpu.memory_space<vmem>>, vector<1x64xf32>
    %2 = vector.broadcast %1 : vector<1x64xf32> to vector<128x64xf32>
    %3 = arith.mulf %0, %2 : vector<128x64xf32>
    %c0_3 = arith.constant 0 : index
    %c0_4 = arith.constant 0 : index
    %4 = vector.load %arg3[%c0_3, %c0_4] : memref<1x64xf32, #tpu.memory_space<vmem>>, vector<1x64xf32>
    %5 = vector.broadcast %4 : vector<1x64xf32> to vector<128x64xf32>
    %6 = arith.addf %3, %5 : vector<128x64xf32>
    %cst = arith.constant 0.000000e+00 : f32
    %7 = vector.broadcast %cst : f32 to vector<128x64xf32>
    %8 = arith.maximumf %6, %7 : vector<128x64xf32>
    %c0_5 = arith.constant 0 : index
    %c0_6 = arith.constant 0 : index
    %9 = vector.load %arg4[%c0_5, %c0_6] : memref<128x64xf32, #tpu.memory_space<vmem>>, vector<128x64xf32>
    tpu.vector_store %arg4[%c0_5, %c0_6], %8 {strides = array<i32>} : memref<128x64xf32, #tpu.memory_space<vmem>>, vector<128x64xf32>,
    return
  }
  func.func @transform_0(%arg0: i32) -> (i32, i32) {
    %c0_i32 = arith.constant 0 : i32
    %c0_i32_0 = arith.constant 0 : i32
    return %arg0, %c0_i32 : i32, i32
  }
  func.func @transform_1(%arg0: i32) -> (i32, i32) {
    %c0_i32 = arith.constant 0 : i32
    %c0_i32_0 = arith.constant 0 : i32
    %c0_i32_1 = arith.constant 0 : i32
    return %c0_i32, %c0_i32_0 : i32, i32
  }
  func.func @transform_2(%arg0: i32) -> (i32, i32) {
    %c0_i32 = arith.constant 0 : i32
    %c0_i32_0 = arith.constant 0 : i32
    %c0_i32_1 = arith.constant 0 : i32
    return %c0_i32, %c0_i32_0 : i32, i32
  }
  func.func @transform_3(%arg0: i32) -> (i32, i32) {
    %c0_i32 = arith.constant 0 : i32
    %c0_i32_0 = arith.constant 0 : i32
    return %arg0, %c0_i32 : i32, i32
  }
}

module attributes {stable_mosaic.version = 11 : i64} {
  func.func @_bn_stats_kernel(%arg0: i32, %arg1: memref<128x64xf32, #tpu.memory_space<vmem>>, %arg2: memref<1x64xf32, #tpu.memory_space<vmem>>, %arg3: memref<1x64xf32, #tpu.memory_space<vmem>>) attributes {dimension_semantics = [#tpu.dimension_semantics<arbitrary>], iteration_bounds = array<i64: 1>, scalar_prefetch = 0 : i64, scratch_operands = 0 : i64, tpu.core_type = #tpu.core_type<tc>, window_params = [{transform_indices = @transform_0, window_bounds = array<i64: 128, 64>}, {pipeline_mode = #tpu.pipeline_mode<synchronous>, transform_indices = @transform_1, window_bounds = array<i64: 1, 64>}, {pipeline_mode = #tpu.pipeline_mode<synchronous>, transform_indices = @transform_2, window_bounds = array<i64: 1, 64>}]} {
    %c0_i32 = arith.constant 0 : i32
    %0 = arith.cmpi eq, %arg0, %c0_i32 : i32
    %1 = arith.extui %0 : i1 to i32
    %c0_i32_0 = arith.constant 0 : i32
    %2 = arith.cmpi ne, %1, %c0_i32_0 : i32
    scf.if %2 {
      %cst_11 = arith.constant 0.000000e+00 : f32
      %15 = vector.broadcast %cst_11 : f32 to vector<1x64xf32>
      %c0_12 = arith.constant 0 : index
      %c0_13 = arith.constant 0 : index
      %16 = vector.load %arg2[%c0_12, %c0_13] : memref<1x64xf32, #tpu.memory_space<vmem>>, vector<1x64xf32>
      tpu.vector_store %arg2[%c0_12, %c0_13], %15 {strides = array<i32>} : memref<1x64xf32, #tpu.memory_space<vmem>>, vector<1x64xf32>,
      %cst_14 = arith.constant 0.000000e+00 : f32
      %17 = vector.broadcast %cst_14 : f32 to vector<1x64xf32>
      %c0_15 = arith.constant 0 : index
      %c0_16 = arith.constant 0 : index
      %18 = vector.load %arg3[%c0_15, %c0_16] : memref<1x64xf32, #tpu.memory_space<vmem>>, vector<1x64xf32>
      tpu.vector_store %arg3[%c0_15, %c0_16], %17 {strides = array<i32>} : memref<1x64xf32, #tpu.memory_space<vmem>>, vector<1x64xf32>,
    } else {
    }
    %c0 = arith.constant 0 : index
    %c0_1 = arith.constant 0 : index
    %3 = vector.load %arg1[%c0, %c0_1] : memref<128x64xf32, #tpu.memory_space<vmem>>, vector<128x64xf32>
    %c0_2 = arith.constant 0 : index
    %c0_3 = arith.constant 0 : index
    %4 = vector.load %arg2[%c0_2, %c0_3] : memref<1x64xf32, #tpu.memory_space<vmem>>, vector<1x64xf32>
    %cst = arith.constant dense<0.000000e+00> : vector<64xf32>
    %5 = vector.multi_reduction <add>, %3, %cst [0] : vector<128x64xf32> to vector<64xf32>
    %6 = vector.shape_cast %5 : vector<64xf32> to vector<1x64xf32>
    %7 = arith.addf %4, %6 : vector<1x64xf32>
    %c0_4 = arith.constant 0 : index
    %c0_5 = arith.constant 0 : index
    %8 = vector.load %arg2[%c0_4, %c0_5] : memref<1x64xf32, #tpu.memory_space<vmem>>, vector<1x64xf32>
    tpu.vector_store %arg2[%c0_4, %c0_5], %7 {strides = array<i32>} : memref<1x64xf32, #tpu.memory_space<vmem>>, vector<1x64xf32>,
    %c0_6 = arith.constant 0 : index
    %c0_7 = arith.constant 0 : index
    %9 = vector.load %arg3[%c0_6, %c0_7] : memref<1x64xf32, #tpu.memory_space<vmem>>, vector<1x64xf32>
    %10 = arith.mulf %3, %3 : vector<128x64xf32>
    %cst_8 = arith.constant dense<0.000000e+00> : vector<64xf32>
    %11 = vector.multi_reduction <add>, %10, %cst_8 [0] : vector<128x64xf32> to vector<64xf32>
    %12 = vector.shape_cast %11 : vector<64xf32> to vector<1x64xf32>
    %13 = arith.addf %9, %12 : vector<1x64xf32>
    %c0_9 = arith.constant 0 : index
    %c0_10 = arith.constant 0 : index
    %14 = vector.load %arg3[%c0_9, %c0_10] : memref<1x64xf32, #tpu.memory_space<vmem>>, vector<1x64xf32>
    tpu.vector_store %arg3[%c0_9, %c0_10], %13 {strides = array<i32>} : memref<1x64xf32, #tpu.memory_space<vmem>>, vector<1x64xf32>,
    return
  }
  func.func @transform_0(%arg0: i32) -> (i32, i32) {
    %c0_i32 = arith.constant 0 : i32
    %c0_i32_0 = arith.constant 0 : i32
    return %arg0, %c0_i32 : i32, i32
  }
  func.func @transform_1(%arg0: i32) -> (i32, i32) {
    %c0_i32 = arith.constant 0 : i32
    %c0_i32_0 = arith.constant 0 : i32
    %c0_i32_1 = arith.constant 0 : i32
    return %c0_i32, %c0_i32_0 : i32, i32
  }
  func.func @transform_2(%arg0: i32) -> (i32, i32) {
    %c0_i32 = arith.constant 0 : i32
    %c0_i32_0 = arith.constant 0 : i32
    %c0_i32_1 = arith.constant 0 : i32
    return %c0_i32, %c0_i32_0 : i32, i32
  }
}

module attributes {stable_mosaic.version = 11 : i64} {
  func.func @_bn_add_relu_kernel(%arg0: i32, %arg1: memref<128x64xf32, #tpu.memory_space<vmem>>, %arg2: memref<1x64xf32, #tpu.memory_space<vmem>>, %arg3: memref<1x64xf32, #tpu.memory_space<vmem>>, %arg4: memref<128x64xf32, #tpu.memory_space<vmem>>, %arg5: memref<128x64xf32, #tpu.memory_space<vmem>>) attributes {dimension_semantics = [#tpu.dimension_semantics<parallel>], iteration_bounds = array<i64: 1>, scalar_prefetch = 0 : i64, scratch_operands = 0 : i64, tpu.core_type = #tpu.core_type<tc>, window_params = [{transform_indices = @transform_0, window_bounds = array<i64: 128, 64>}, {pipeline_mode = #tpu.pipeline_mode<synchronous>, transform_indices = @transform_1, window_bounds = array<i64: 1, 64>}, {pipeline_mode = #tpu.pipeline_mode<synchronous>, transform_indices = @transform_2, window_bounds = array<i64: 1, 64>}, {transform_indices = @transform_3, window_bounds = array<i64: 128, 64>}, {transform_indices = @transform_4, window_bounds = array<i64: 128, 64>}]} {
    %c0 = arith.constant 0 : index
    %c0_0 = arith.constant 0 : index
    %0 = vector.load %arg1[%c0, %c0_0] : memref<128x64xf32, #tpu.memory_space<vmem>>, vector<128x64xf32>
    %c0_1 = arith.constant 0 : index
    %c0_2 = arith.constant 0 : index
    %1 = vector.load %arg2[%c0_1, %c0_2] : memref<1x64xf32, #tpu.memory_space<vmem>>, vector<1x64xf32>
    %2 = vector.broadcast %1 : vector<1x64xf32> to vector<128x64xf32>
    %3 = arith.mulf %0, %2 : vector<128x64xf32>
    %c0_3 = arith.constant 0 : index
    %c0_4 = arith.constant 0 : index
    %4 = vector.load %arg3[%c0_3, %c0_4] : memref<1x64xf32, #tpu.memory_space<vmem>>, vector<1x64xf32>
    %5 = vector.broadcast %4 : vector<1x64xf32> to vector<128x64xf32>
    %6 = arith.addf %3, %5 : vector<128x64xf32>
    %c0_5 = arith.constant 0 : index
    %c0_6 = arith.constant 0 : index
    %7 = vector.load %arg4[%c0_5, %c0_6] : memref<128x64xf32, #tpu.memory_space<vmem>>, vector<128x64xf32>
    %8 = arith.addf %6, %7 : vector<128x64xf32>
    %cst = arith.constant 0.000000e+00 : f32
    %9 = vector.broadcast %cst : f32 to vector<128x64xf32>
    %10 = arith.maximumf %8, %9 : vector<128x64xf32>
    %c0_7 = arith.constant 0 : index
    %c0_8 = arith.constant 0 : index
    %11 = vector.load %arg5[%c0_7, %c0_8] : memref<128x64xf32, #tpu.memory_space<vmem>>, vector<128x64xf32>
    tpu.vector_store %arg5[%c0_7, %c0_8], %10 {strides = array<i32>} : memref<128x64xf32, #tpu.memory_space<vmem>>, vector<128x64xf32>,
    return
  }
  func.func @transform_0(%arg0: i32) -> (i32, i32) {
    %c0_i32 = arith.constant 0 : i32
    %c0_i32_0 = arith.constant 0 : i32
    return %arg0, %c0_i32 : i32, i32
  }
  func.func @transform_1(%arg0: i32) -> (i32, i32) {
    %c0_i32 = arith.constant 0 : i32
    %c0_i32_0 = arith.constant 0 : i32
    %c0_i32_1 = arith.constant 0 : i32
    return %c0_i32, %c0_i32_0 : i32, i32
  }
  func.func @transform_2(%arg0: i32) -> (i32, i32) {
    %c0_i32 = arith.constant 0 : i32
    %c0_i32_0 = arith.constant 0 : i32
    %c0_i32_1 = arith.constant 0 : i32
    return %c0_i32, %c0_i32_0 : i32, i32
  }
  func.func @transform_3(%arg0: i32) -> (i32, i32) {
    %c0_i32 = arith.constant 0 : i32
    %c0_i32_0 = arith.constant 0 : i32
    return %arg0, %c0_i32 : i32, i32
  }
  func.func @transform_4(%arg0: i32) -> (i32, i32) {
    %c0_i32 = arith.constant 0 : i32
    %c0_i32_0 = arith.constant 0 : i32
    return %arg0, %c0_i32 : i32, i32
  }
}

module attributes {stable_mosaic.version = 11 : i64} {
  func.func @_bn_stats_kernel(%arg0: i32, %arg1: memref<32x128xf32, #tpu.memory_space<vmem>>, %arg2: memref<1x128xf32, #tpu.memory_space<vmem>>, %arg3: memref<1x128xf32, #tpu.memory_space<vmem>>) attributes {dimension_semantics = [#tpu.dimension_semantics<arbitrary>], iteration_bounds = array<i64: 1>, scalar_prefetch = 0 : i64, scratch_operands = 0 : i64, tpu.core_type = #tpu.core_type<tc>, window_params = [{transform_indices = @transform_0, window_bounds = array<i64: 32, 128>}, {pipeline_mode = #tpu.pipeline_mode<synchronous>, transform_indices = @transform_1, window_bounds = array<i64: 1, 128>}, {pipeline_mode = #tpu.pipeline_mode<synchronous>, transform_indices = @transform_2, window_bounds = array<i64: 1, 128>}]} {
    %c0_i32 = arith.constant 0 : i32
    %0 = arith.cmpi eq, %arg0, %c0_i32 : i32
    %1 = arith.extui %0 : i1 to i32
    %c0_i32_0 = arith.constant 0 : i32
    %2 = arith.cmpi ne, %1, %c0_i32_0 : i32
    scf.if %2 {
      %cst_11 = arith.constant 0.000000e+00 : f32
      %15 = vector.broadcast %cst_11 : f32 to vector<1x128xf32>
      %c0_12 = arith.constant 0 : index
      %c0_13 = arith.constant 0 : index
      %16 = vector.load %arg2[%c0_12, %c0_13] : memref<1x128xf32, #tpu.memory_space<vmem>>, vector<1x128xf32>
      tpu.vector_store %arg2[%c0_12, %c0_13], %15 {strides = array<i32>} : memref<1x128xf32, #tpu.memory_space<vmem>>, vector<1x128xf32>,
      %cst_14 = arith.constant 0.000000e+00 : f32
      %17 = vector.broadcast %cst_14 : f32 to vector<1x128xf32>
      %c0_15 = arith.constant 0 : index
      %c0_16 = arith.constant 0 : index
      %18 = vector.load %arg3[%c0_15, %c0_16] : memref<1x128xf32, #tpu.memory_space<vmem>>, vector<1x128xf32>
      tpu.vector_store %arg3[%c0_15, %c0_16], %17 {strides = array<i32>} : memref<1x128xf32, #tpu.memory_space<vmem>>, vector<1x128xf32>,
    } else {
    }
    %c0 = arith.constant 0 : index
    %c0_1 = arith.constant 0 : index
    %3 = vector.load %arg1[%c0, %c0_1] : memref<32x128xf32, #tpu.memory_space<vmem>>, vector<32x128xf32>
    %c0_2 = arith.constant 0 : index
    %c0_3 = arith.constant 0 : index
    %4 = vector.load %arg2[%c0_2, %c0_3] : memref<1x128xf32, #tpu.memory_space<vmem>>, vector<1x128xf32>
    %cst = arith.constant dense<0.000000e+00> : vector<128xf32>
    %5 = vector.multi_reduction <add>, %3, %cst [0] : vector<32x128xf32> to vector<128xf32>
    %6 = vector.shape_cast %5 : vector<128xf32> to vector<1x128xf32>
    %7 = arith.addf %4, %6 : vector<1x128xf32>
    %c0_4 = arith.constant 0 : index
    %c0_5 = arith.constant 0 : index
    %8 = vector.load %arg2[%c0_4, %c0_5] : memref<1x128xf32, #tpu.memory_space<vmem>>, vector<1x128xf32>
    tpu.vector_store %arg2[%c0_4, %c0_5], %7 {strides = array<i32>} : memref<1x128xf32, #tpu.memory_space<vmem>>, vector<1x128xf32>,
    %c0_6 = arith.constant 0 : index
    %c0_7 = arith.constant 0 : index
    %9 = vector.load %arg3[%c0_6, %c0_7] : memref<1x128xf32, #tpu.memory_space<vmem>>, vector<1x128xf32>
    %10 = arith.mulf %3, %3 : vector<32x128xf32>
    %cst_8 = arith.constant dense<0.000000e+00> : vector<128xf32>
    %11 = vector.multi_reduction <add>, %10, %cst_8 [0] : vector<32x128xf32> to vector<128xf32>
    %12 = vector.shape_cast %11 : vector<128xf32> to vector<1x128xf32>
    %13 = arith.addf %9, %12 : vector<1x128xf32>
    %c0_9 = arith.constant 0 : index
    %c0_10 = arith.constant 0 : index
    %14 = vector.load %arg3[%c0_9, %c0_10] : memref<1x128xf32, #tpu.memory_space<vmem>>, vector<1x128xf32>
    tpu.vector_store %arg3[%c0_9, %c0_10], %13 {strides = array<i32>} : memref<1x128xf32, #tpu.memory_space<vmem>>, vector<1x128xf32>,
    return
  }
  func.func @transform_0(%arg0: i32) -> (i32, i32) {
    %c0_i32 = arith.constant 0 : i32
    %c0_i32_0 = arith.constant 0 : i32
    return %arg0, %c0_i32 : i32, i32
  }
  func.func @transform_1(%arg0: i32) -> (i32, i32) {
    %c0_i32 = arith.constant 0 : i32
    %c0_i32_0 = arith.constant 0 : i32
    %c0_i32_1 = arith.constant 0 : i32
    return %c0_i32, %c0_i32_0 : i32, i32
  }
  func.func @transform_2(%arg0: i32) -> (i32, i32) {
    %c0_i32 = arith.constant 0 : i32
    %c0_i32_0 = arith.constant 0 : i32
    %c0_i32_1 = arith.constant 0 : i32
    return %c0_i32, %c0_i32_0 : i32, i32
  }
}

module attributes {stable_mosaic.version = 11 : i64} {
  func.func @_matmul_bias_kernel(%arg0: i32, %arg1: i32, %arg2: i32, %arg3: memref<32x128xbf16, #tpu.memory_space<vmem>>, %arg4: memref<128x128xbf16, #tpu.memory_space<vmem>>, %arg5: memref<1x128xf32, #tpu.memory_space<vmem>>, %arg6: memref<32x128xf32, #tpu.memory_space<vmem>>, %arg7: memref<32x128xf32, #tpu.memory_space<vmem>>) attributes {dimension_semantics = [#tpu.dimension_semantics<parallel>, #tpu.dimension_semantics<parallel>, #tpu.dimension_semantics<arbitrary>], iteration_bounds = array<i64: 1, 1, 1>, scalar_prefetch = 0 : i64, scratch_operands = 1 : i64, tpu.core_type = #tpu.core_type<tc>, window_params = [{transform_indices = @transform_0, window_bounds = array<i64: 32, 128>}, {transform_indices = @transform_1, window_bounds = array<i64: 128, 128>}, {transform_indices = @transform_2, window_bounds = array<i64: 1, 128>}, {transform_indices = @transform_3, window_bounds = array<i64: 32, 128>}]} {
    %c0_i32 = arith.constant 0 : i32
    %0 = arith.cmpi eq, %arg2, %c0_i32 : i32
    %1 = arith.extui %0 : i1 to i32
    %c0_i32_0 = arith.constant 0 : i32
    %2 = arith.cmpi ne, %1, %c0_i32_0 : i32
    scf.if %2 {
      %cst_10 = arith.constant 0.000000e+00 : f32
      %12 = vector.broadcast %cst_10 : f32 to vector<32x128xf32>
      %c0_11 = arith.constant 0 : index
      %c0_12 = arith.constant 0 : index
      %13 = vector.load %arg7[%c0_11, %c0_12] : memref<32x128xf32, #tpu.memory_space<vmem>>, vector<32x128xf32>
      tpu.vector_store %arg7[%c0_11, %c0_12], %12 {strides = array<i32>} : memref<32x128xf32, #tpu.memory_space<vmem>>, vector<32x128xf32>,
    } else {
    }
    %c0 = arith.constant 0 : index
    %c0_1 = arith.constant 0 : index
    %3 = vector.load %arg7[%c0, %c0_1] : memref<32x128xf32, #tpu.memory_space<vmem>>, vector<32x128xf32>
    %c0_2 = arith.constant 0 : index
    %c0_3 = arith.constant 0 : index
    %4 = vector.load %arg3[%c0_2, %c0_3] : memref<32x128xbf16, #tpu.memory_space<vmem>>, vector<32x128xbf16>
    %c0_4 = arith.constant 0 : index
    %c0_5 = arith.constant 0 : index
    %5 = vector.load %arg4[%c0_4, %c0_5] : memref<128x128xbf16, #tpu.memory_space<vmem>>, vector<128x128xbf16>
    %cst = arith.constant dense<0.000000e+00> : vector<32x128xf32>
    %6 = tpu.matmul %4, %5, %cst {dimension_numbers = #tpu.dot_dimension_numbers<[1], [0], [0], [1], [0, 0, 1, 1], [], []>} : vector<32x128xbf16>, vector<128x128xbf16>, vector<32x128xf32> -> vector<32x128xf32>
    %7 = arith.addf %3, %6 : vector<32x128xf32>
    %c0_6 = arith.constant 0 : index
    %c0_7 = arith.constant 0 : index
    %8 = vector.load %arg7[%c0_6, %c0_7] : memref<32x128xf32, #tpu.memory_space<vmem>>, vector<32x128xf32>
    tpu.vector_store %arg7[%c0_6, %c0_7], %7 {strides = array<i32>} : memref<32x128xf32, #tpu.memory_space<vmem>>, vector<32x128xf32>,
    %c0_i32_8 = arith.constant 0 : i32
    %9 = arith.cmpi eq, %arg2, %c0_i32_8 : i32
    %10 = arith.extui %9 : i1 to i32
    %c0_i32_9 = arith.constant 0 : i32
    %11 = arith.cmpi ne, %10, %c0_i32_9 : i32
    scf.if %11 {
      %c0_10 = arith.constant 0 : index
      %c0_11 = arith.constant 0 : index
      %12 = vector.load %arg7[%c0_10, %c0_11] : memref<32x128xf32, #tpu.memory_space<vmem>>, vector<32x128xf32>
      %c0_12 = arith.constant 0 : index
      %c0_13 = arith.constant 0 : index
      %13 = vector.load %arg5[%c0_12, %c0_13] : memref<1x128xf32, #tpu.memory_space<vmem>>, vector<1x128xf32>
      %14 = vector.broadcast %13 : vector<1x128xf32> to vector<32x128xf32>
      %15 = arith.addf %12, %14 : vector<32x128xf32>
      %c0_14 = arith.constant 0 : index
      %c0_15 = arith.constant 0 : index
      %16 = vector.load %arg6[%c0_14, %c0_15] : memref<32x128xf32, #tpu.memory_space<vmem>>, vector<32x128xf32>
      tpu.vector_store %arg6[%c0_14, %c0_15], %15 {strides = array<i32>} : memref<32x128xf32, #tpu.memory_space<vmem>>, vector<32x128xf32>,
    } else {
    }
    return
  }
  func.func @transform_0(%arg0: i32, %arg1: i32, %arg2: i32) -> (i32, i32) {
    %c0_i32 = arith.constant 0 : i32
    return %arg0, %arg2 : i32, i32
  }
  func.func @transform_1(%arg0: i32, %arg1: i32, %arg2: i32) -> (i32, i32) {
    %c0_i32 = arith.constant 0 : i32
    return %arg2, %arg1 : i32, i32
  }
  func.func @transform_2(%arg0: i32, %arg1: i32, %arg2: i32) -> (i32, i32) {
    %c0_i32 = arith.constant 0 : i32
    %c0_i32_0 = arith.constant 0 : i32
    return %c0_i32, %arg1 : i32, i32
  }
  func.func @transform_3(%arg0: i32, %arg1: i32, %arg2: i32) -> (i32, i32) {
    %c0_i32 = arith.constant 0 : i32
    return %arg0, %arg1 : i32, i32
  }
}

module attributes {stable_mosaic.version = 11 : i64} {
  func.func @_bn_act_kernel(%arg0: i32, %arg1: memref<32x128xf32, #tpu.memory_space<vmem>>, %arg2: memref<1x128xf32, #tpu.memory_space<vmem>>, %arg3: memref<1x128xf32, #tpu.memory_space<vmem>>, %arg4: memref<32x128xf32, #tpu.memory_space<vmem>>) attributes {dimension_semantics = [#tpu.dimension_semantics<parallel>], iteration_bounds = array<i64: 1>, scalar_prefetch = 0 : i64, scratch_operands = 0 : i64, tpu.core_type = #tpu.core_type<tc>, window_params = [{transform_indices = @transform_0, window_bounds = array<i64: 32, 128>}, {pipeline_mode = #tpu.pipeline_mode<synchronous>, transform_indices = @transform_1, window_bounds = array<i64: 1, 128>}, {pipeline_mode = #tpu.pipeline_mode<synchronous>, transform_indices = @transform_2, window_bounds = array<i64: 1, 128>}, {transform_indices = @transform_3, window_bounds = array<i64: 32, 128>}]} {
    %c0 = arith.constant 0 : index
    %c0_0 = arith.constant 0 : index
    %0 = vector.load %arg1[%c0, %c0_0] : memref<32x128xf32, #tpu.memory_space<vmem>>, vector<32x128xf32>
    %c0_1 = arith.constant 0 : index
    %c0_2 = arith.constant 0 : index
    %1 = vector.load %arg2[%c0_1, %c0_2] : memref<1x128xf32, #tpu.memory_space<vmem>>, vector<1x128xf32>
    %2 = vector.broadcast %1 : vector<1x128xf32> to vector<32x128xf32>
    %3 = arith.mulf %0, %2 : vector<32x128xf32>
    %c0_3 = arith.constant 0 : index
    %c0_4 = arith.constant 0 : index
    %4 = vector.load %arg3[%c0_3, %c0_4] : memref<1x128xf32, #tpu.memory_space<vmem>>, vector<1x128xf32>
    %5 = vector.broadcast %4 : vector<1x128xf32> to vector<32x128xf32>
    %6 = arith.addf %3, %5 : vector<32x128xf32>
    %c0_5 = arith.constant 0 : index
    %c0_6 = arith.constant 0 : index
    %7 = vector.load %arg4[%c0_5, %c0_6] : memref<32x128xf32, #tpu.memory_space<vmem>>, vector<32x128xf32>
    tpu.vector_store %arg4[%c0_5, %c0_6], %6 {strides = array<i32>} : memref<32x128xf32, #tpu.memory_space<vmem>>, vector<32x128xf32>,
    return
  }
  func.func @transform_0(%arg0: i32) -> (i32, i32) {
    %c0_i32 = arith.constant 0 : i32
    %c0_i32_0 = arith.constant 0 : i32
    return %arg0, %c0_i32 : i32, i32
  }
  func.func @transform_1(%arg0: i32) -> (i32, i32) {
    %c0_i32 = arith.constant 0 : i32
    %c0_i32_0 = arith.constant 0 : i32
    %c0_i32_1 = arith.constant 0 : i32
    return %c0_i32, %c0_i32_0 : i32, i32
  }
  func.func @transform_2(%arg0: i32) -> (i32, i32) {
    %c0_i32 = arith.constant 0 : i32
    %c0_i32_0 = arith.constant 0 : i32
    %c0_i32_1 = arith.constant 0 : i32
    return %c0_i32, %c0_i32_0 : i32, i32
  }
  func.func @transform_3(%arg0: i32) -> (i32, i32) {
    %c0_i32 = arith.constant 0 : i32
    %c0_i32_0 = arith.constant 0 : i32
    return %arg0, %c0_i32 : i32, i32
  }
}

module attributes {stable_mosaic.version = 11 : i64} {
  func.func @_matmul_bias_kernel(%arg0: i32, %arg1: i32, %arg2: i32, %arg3: memref<32x256xbf16, #tpu.memory_space<vmem>>, %arg4: memref<256x128xbf16, #tpu.memory_space<vmem>>, %arg5: memref<1x128xf32, #tpu.memory_space<vmem>>, %arg6: memref<32x128xf32, #tpu.memory_space<vmem>>, %arg7: memref<32x128xf32, #tpu.memory_space<vmem>>) attributes {dimension_semantics = [#tpu.dimension_semantics<parallel>, #tpu.dimension_semantics<parallel>, #tpu.dimension_semantics<arbitrary>], iteration_bounds = array<i64: 1, 1, 3>, scalar_prefetch = 0 : i64, scratch_operands = 1 : i64, tpu.core_type = #tpu.core_type<tc>, window_params = [{transform_indices = @transform_0, window_bounds = array<i64: 32, 256>}, {transform_indices = @transform_1, window_bounds = array<i64: 256, 128>}, {transform_indices = @transform_2, window_bounds = array<i64: 1, 128>}, {transform_indices = @transform_3, window_bounds = array<i64: 32, 128>}]} {
    %c0_i32 = arith.constant 0 : i32
    %0 = arith.cmpi eq, %arg2, %c0_i32 : i32
    %1 = arith.extui %0 : i1 to i32
    %c0_i32_0 = arith.constant 0 : i32
    %2 = arith.cmpi ne, %1, %c0_i32_0 : i32
    scf.if %2 {
      %cst_9 = arith.constant 0.000000e+00 : f32
      %12 = vector.broadcast %cst_9 : f32 to vector<32x128xf32>
      %c0_10 = arith.constant 0 : index
      %c0_11 = arith.constant 0 : index
      %13 = vector.load %arg7[%c0_10, %c0_11] : memref<32x128xf32, #tpu.memory_space<vmem>>, vector<32x128xf32>
      tpu.vector_store %arg7[%c0_10, %c0_11], %12 {strides = array<i32>} : memref<32x128xf32, #tpu.memory_space<vmem>>, vector<32x128xf32>,
    } else {
    }
    %c0 = arith.constant 0 : index
    %c0_1 = arith.constant 0 : index
    %3 = vector.load %arg7[%c0, %c0_1] : memref<32x128xf32, #tpu.memory_space<vmem>>, vector<32x128xf32>
    %c0_2 = arith.constant 0 : index
    %c0_3 = arith.constant 0 : index
    %4 = vector.load %arg3[%c0_2, %c0_3] : memref<32x256xbf16, #tpu.memory_space<vmem>>, vector<32x256xbf16>
    %c0_4 = arith.constant 0 : index
    %c0_5 = arith.constant 0 : index
    %5 = vector.load %arg4[%c0_4, %c0_5] : memref<256x128xbf16, #tpu.memory_space<vmem>>, vector<256x128xbf16>
    %cst = arith.constant dense<0.000000e+00> : vector<32x128xf32>
    %6 = tpu.matmul %4, %5, %cst {dimension_numbers = #tpu.dot_dimension_numbers<[1], [0], [0], [1], [0, 0, 1, 1], [], []>} : vector<32x256xbf16>, vector<256x128xbf16>, vector<32x128xf32> -> vector<32x128xf32>
    %7 = arith.addf %3, %6 : vector<32x128xf32>
    %c0_6 = arith.constant 0 : index
    %c0_7 = arith.constant 0 : index
    %8 = vector.load %arg7[%c0_6, %c0_7] : memref<32x128xf32, #tpu.memory_space<vmem>>, vector<32x128xf32>
    tpu.vector_store %arg7[%c0_6, %c0_7], %7 {strides = array<i32>} : memref<32x128xf32, #tpu.memory_space<vmem>>, vector<32x128xf32>,
    %c2_i32 = arith.constant 2 : i32
    %9 = arith.cmpi eq, %arg2, %c2_i32 : i32
    %10 = arith.extui %9 : i1 to i32
    %c0_i32_8 = arith.constant 0 : i32
    %11 = arith.cmpi ne, %10, %c0_i32_8 : i32
    scf.if %11 {
      %c0_9 = arith.constant 0 : index
      %c0_10 = arith.constant 0 : index
      %12 = vector.load %arg7[%c0_9, %c0_10] : memref<32x128xf32, #tpu.memory_space<vmem>>, vector<32x128xf32>
      %c0_11 = arith.constant 0 : index
      %c0_12 = arith.constant 0 : index
      %13 = vector.load %arg5[%c0_11, %c0_12] : memref<1x128xf32, #tpu.memory_space<vmem>>, vector<1x128xf32>
      %14 = vector.broadcast %13 : vector<1x128xf32> to vector<32x128xf32>
      %15 = arith.addf %12, %14 : vector<32x128xf32>
      %c0_13 = arith.constant 0 : index
      %c0_14 = arith.constant 0 : index
      %16 = vector.load %arg6[%c0_13, %c0_14] : memref<32x128xf32, #tpu.memory_space<vmem>>, vector<32x128xf32>
      tpu.vector_store %arg6[%c0_13, %c0_14], %15 {strides = array<i32>} : memref<32x128xf32, #tpu.memory_space<vmem>>, vector<32x128xf32>,
    } else {
    }
    return
  }
  func.func @transform_0(%arg0: i32, %arg1: i32, %arg2: i32) -> (i32, i32) {
    %c0_i32 = arith.constant 0 : i32
    return %arg0, %arg2 : i32, i32
  }
  func.func @transform_1(%arg0: i32, %arg1: i32, %arg2: i32) -> (i32, i32) {
    %c0_i32 = arith.constant 0 : i32
    return %arg2, %arg1 : i32, i32
  }
  func.func @transform_2(%arg0: i32, %arg1: i32, %arg2: i32) -> (i32, i32) {
    %c0_i32 = arith.constant 0 : i32
    %c0_i32_0 = arith.constant 0 : i32
    return %c0_i32, %arg1 : i32, i32
  }
  func.func @transform_3(%arg0: i32, %arg1: i32, %arg2: i32) -> (i32, i32) {
    %c0_i32 = arith.constant 0 : i32
    return %arg0, %arg1 : i32, i32
  }
}

module attributes {stable_mosaic.version = 11 : i64} {
  func.func @_bn_act_kernel(%arg0: i32, %arg1: memref<32x128xf32, #tpu.memory_space<vmem>>, %arg2: memref<1x128xf32, #tpu.memory_space<vmem>>, %arg3: memref<1x128xf32, #tpu.memory_space<vmem>>, %arg4: memref<32x128xf32, #tpu.memory_space<vmem>>) attributes {dimension_semantics = [#tpu.dimension_semantics<parallel>], iteration_bounds = array<i64: 1>, scalar_prefetch = 0 : i64, scratch_operands = 0 : i64, tpu.core_type = #tpu.core_type<tc>, window_params = [{transform_indices = @transform_0, window_bounds = array<i64: 32, 128>}, {pipeline_mode = #tpu.pipeline_mode<synchronous>, transform_indices = @transform_1, window_bounds = array<i64: 1, 128>}, {pipeline_mode = #tpu.pipeline_mode<synchronous>, transform_indices = @transform_2, window_bounds = array<i64: 1, 128>}, {transform_indices = @transform_3, window_bounds = array<i64: 32, 128>}]} {
    %c0 = arith.constant 0 : index
    %c0_0 = arith.constant 0 : index
    %0 = vector.load %arg1[%c0, %c0_0] : memref<32x128xf32, #tpu.memory_space<vmem>>, vector<32x128xf32>
    %c0_1 = arith.constant 0 : index
    %c0_2 = arith.constant 0 : index
    %1 = vector.load %arg2[%c0_1, %c0_2] : memref<1x128xf32, #tpu.memory_space<vmem>>, vector<1x128xf32>
    %2 = vector.broadcast %1 : vector<1x128xf32> to vector<32x128xf32>
    %3 = arith.mulf %0, %2 : vector<32x128xf32>
    %c0_3 = arith.constant 0 : index
    %c0_4 = arith.constant 0 : index
    %4 = vector.load %arg3[%c0_3, %c0_4] : memref<1x128xf32, #tpu.memory_space<vmem>>, vector<1x128xf32>
    %5 = vector.broadcast %4 : vector<1x128xf32> to vector<32x128xf32>
    %6 = arith.addf %3, %5 : vector<32x128xf32>
    %cst = arith.constant 0.000000e+00 : f32
    %7 = vector.broadcast %cst : f32 to vector<32x128xf32>
    %8 = arith.maximumf %6, %7 : vector<32x128xf32>
    %c0_5 = arith.constant 0 : index
    %c0_6 = arith.constant 0 : index
    %9 = vector.load %arg4[%c0_5, %c0_6] : memref<32x128xf32, #tpu.memory_space<vmem>>, vector<32x128xf32>
    tpu.vector_store %arg4[%c0_5, %c0_6], %8 {strides = array<i32>} : memref<32x128xf32, #tpu.memory_space<vmem>>, vector<32x128xf32>,
    return
  }
  func.func @transform_0(%arg0: i32) -> (i32, i32) {
    %c0_i32 = arith.constant 0 : i32
    %c0_i32_0 = arith.constant 0 : i32
    return %arg0, %c0_i32 : i32, i32
  }
  func.func @transform_1(%arg0: i32) -> (i32, i32) {
    %c0_i32 = arith.constant 0 : i32
    %c0_i32_0 = arith.constant 0 : i32
    %c0_i32_1 = arith.constant 0 : i32
    return %c0_i32, %c0_i32_0 : i32, i32
  }
  func.func @transform_2(%arg0: i32) -> (i32, i32) {
    %c0_i32 = arith.constant 0 : i32
    %c0_i32_0 = arith.constant 0 : i32
    %c0_i32_1 = arith.constant 0 : i32
    return %c0_i32, %c0_i32_0 : i32, i32
  }
  func.func @transform_3(%arg0: i32) -> (i32, i32) {
    %c0_i32 = arith.constant 0 : i32
    %c0_i32_0 = arith.constant 0 : i32
    return %arg0, %c0_i32 : i32, i32
  }
}

module attributes {stable_mosaic.version = 11 : i64} {
  func.func @_matmul_bias_kernel(%arg0: i32, %arg1: i32, %arg2: i32, %arg3: memref<32x256xbf16, #tpu.memory_space<vmem>>, %arg4: memref<256x128xbf16, #tpu.memory_space<vmem>>, %arg5: memref<1x128xf32, #tpu.memory_space<vmem>>, %arg6: memref<32x128xf32, #tpu.memory_space<vmem>>, %arg7: memref<32x128xf32, #tpu.memory_space<vmem>>) attributes {dimension_semantics = [#tpu.dimension_semantics<parallel>, #tpu.dimension_semantics<parallel>, #tpu.dimension_semantics<arbitrary>], iteration_bounds = array<i64: 1, 1, 5>, scalar_prefetch = 0 : i64, scratch_operands = 1 : i64, tpu.core_type = #tpu.core_type<tc>, window_params = [{transform_indices = @transform_0, window_bounds = array<i64: 32, 256>}, {transform_indices = @transform_1, window_bounds = array<i64: 256, 128>}, {transform_indices = @transform_2, window_bounds = array<i64: 1, 128>}, {transform_indices = @transform_3, window_bounds = array<i64: 32, 128>}]} {
    %c0_i32 = arith.constant 0 : i32
    %0 = arith.cmpi eq, %arg2, %c0_i32 : i32
    %1 = arith.extui %0 : i1 to i32
    %c0_i32_0 = arith.constant 0 : i32
    %2 = arith.cmpi ne, %1, %c0_i32_0 : i32
    scf.if %2 {
      %cst_9 = arith.constant 0.000000e+00 : f32
      %12 = vector.broadcast %cst_9 : f32 to vector<32x128xf32>
      %c0_10 = arith.constant 0 : index
      %c0_11 = arith.constant 0 : index
      %13 = vector.load %arg7[%c0_10, %c0_11] : memref<32x128xf32, #tpu.memory_space<vmem>>, vector<32x128xf32>
      tpu.vector_store %arg7[%c0_10, %c0_11], %12 {strides = array<i32>} : memref<32x128xf32, #tpu.memory_space<vmem>>, vector<32x128xf32>,
    } else {
    }
    %c0 = arith.constant 0 : index
    %c0_1 = arith.constant 0 : index
    %3 = vector.load %arg7[%c0, %c0_1] : memref<32x128xf32, #tpu.memory_space<vmem>>, vector<32x128xf32>
    %c0_2 = arith.constant 0 : index
    %c0_3 = arith.constant 0 : index
    %4 = vector.load %arg3[%c0_2, %c0_3] : memref<32x256xbf16, #tpu.memory_space<vmem>>, vector<32x256xbf16>
    %c0_4 = arith.constant 0 : index
    %c0_5 = arith.constant 0 : index
    %5 = vector.load %arg4[%c0_4, %c0_5] : memref<256x128xbf16, #tpu.memory_space<vmem>>, vector<256x128xbf16>
    %cst = arith.constant dense<0.000000e+00> : vector<32x128xf32>
    %6 = tpu.matmul %4, %5, %cst {dimension_numbers = #tpu.dot_dimension_numbers<[1], [0], [0], [1], [0, 0, 1, 1], [], []>} : vector<32x256xbf16>, vector<256x128xbf16>, vector<32x128xf32> -> vector<32x128xf32>
    %7 = arith.addf %3, %6 : vector<32x128xf32>
    %c0_6 = arith.constant 0 : index
    %c0_7 = arith.constant 0 : index
    %8 = vector.load %arg7[%c0_6, %c0_7] : memref<32x128xf32, #tpu.memory_space<vmem>>, vector<32x128xf32>
    tpu.vector_store %arg7[%c0_6, %c0_7], %7 {strides = array<i32>} : memref<32x128xf32, #tpu.memory_space<vmem>>, vector<32x128xf32>,
    %c4_i32 = arith.constant 4 : i32
    %9 = arith.cmpi eq, %arg2, %c4_i32 : i32
    %10 = arith.extui %9 : i1 to i32
    %c0_i32_8 = arith.constant 0 : i32
    %11 = arith.cmpi ne, %10, %c0_i32_8 : i32
    scf.if %11 {
      %c0_9 = arith.constant 0 : index
      %c0_10 = arith.constant 0 : index
      %12 = vector.load %arg7[%c0_9, %c0_10] : memref<32x128xf32, #tpu.memory_space<vmem>>, vector<32x128xf32>
      %c0_11 = arith.constant 0 : index
      %c0_12 = arith.constant 0 : index
      %13 = vector.load %arg5[%c0_11, %c0_12] : memref<1x128xf32, #tpu.memory_space<vmem>>, vector<1x128xf32>
      %14 = vector.broadcast %13 : vector<1x128xf32> to vector<32x128xf32>
      %15 = arith.addf %12, %14 : vector<32x128xf32>
      %c0_13 = arith.constant 0 : index
      %c0_14 = arith.constant 0 : index
      %16 = vector.load %arg6[%c0_13, %c0_14] : memref<32x128xf32, #tpu.memory_space<vmem>>, vector<32x128xf32>
      tpu.vector_store %arg6[%c0_13, %c0_14], %15 {strides = array<i32>} : memref<32x128xf32, #tpu.memory_space<vmem>>, vector<32x128xf32>,
    } else {
    }
    return
  }
  func.func @transform_0(%arg0: i32, %arg1: i32, %arg2: i32) -> (i32, i32) {
    %c0_i32 = arith.constant 0 : i32
    return %arg0, %arg2 : i32, i32
  }
  func.func @transform_1(%arg0: i32, %arg1: i32, %arg2: i32) -> (i32, i32) {
    %c0_i32 = arith.constant 0 : i32
    return %arg2, %arg1 : i32, i32
  }
  func.func @transform_2(%arg0: i32, %arg1: i32, %arg2: i32) -> (i32, i32) {
    %c0_i32 = arith.constant 0 : i32
    %c0_i32_0 = arith.constant 0 : i32
    return %c0_i32, %arg1 : i32, i32
  }
  func.func @transform_3(%arg0: i32, %arg1: i32, %arg2: i32) -> (i32, i32) {
    %c0_i32 = arith.constant 0 : i32
    return %arg0, %arg1 : i32, i32
  }
}

module attributes {stable_mosaic.version = 11 : i64} {
  func.func @_bn_add_relu_kernel(%arg0: i32, %arg1: memref<32x128xf32, #tpu.memory_space<vmem>>, %arg2: memref<1x128xf32, #tpu.memory_space<vmem>>, %arg3: memref<1x128xf32, #tpu.memory_space<vmem>>, %arg4: memref<32x128xf32, #tpu.memory_space<vmem>>, %arg5: memref<32x128xf32, #tpu.memory_space<vmem>>) attributes {dimension_semantics = [#tpu.dimension_semantics<parallel>], iteration_bounds = array<i64: 1>, scalar_prefetch = 0 : i64, scratch_operands = 0 : i64, tpu.core_type = #tpu.core_type<tc>, window_params = [{transform_indices = @transform_0, window_bounds = array<i64: 32, 128>}, {pipeline_mode = #tpu.pipeline_mode<synchronous>, transform_indices = @transform_1, window_bounds = array<i64: 1, 128>}, {pipeline_mode = #tpu.pipeline_mode<synchronous>, transform_indices = @transform_2, window_bounds = array<i64: 1, 128>}, {transform_indices = @transform_3, window_bounds = array<i64: 32, 128>}, {transform_indices = @transform_4, window_bounds = array<i64: 32, 128>}]} {
    %c0 = arith.constant 0 : index
    %c0_0 = arith.constant 0 : index
    %0 = vector.load %arg1[%c0, %c0_0] : memref<32x128xf32, #tpu.memory_space<vmem>>, vector<32x128xf32>
    %c0_1 = arith.constant 0 : index
    %c0_2 = arith.constant 0 : index
    %1 = vector.load %arg2[%c0_1, %c0_2] : memref<1x128xf32, #tpu.memory_space<vmem>>, vector<1x128xf32>
    %2 = vector.broadcast %1 : vector<1x128xf32> to vector<32x128xf32>
    %3 = arith.mulf %0, %2 : vector<32x128xf32>
    %c0_3 = arith.constant 0 : index
    %c0_4 = arith.constant 0 : index
    %4 = vector.load %arg3[%c0_3, %c0_4] : memref<1x128xf32, #tpu.memory_space<vmem>>, vector<1x128xf32>
    %5 = vector.broadcast %4 : vector<1x128xf32> to vector<32x128xf32>
    %6 = arith.addf %3, %5 : vector<32x128xf32>
    %c0_5 = arith.constant 0 : index
    %c0_6 = arith.constant 0 : index
    %7 = vector.load %arg4[%c0_5, %c0_6] : memref<32x128xf32, #tpu.memory_space<vmem>>, vector<32x128xf32>
    %8 = arith.addf %6, %7 : vector<32x128xf32>
    %cst = arith.constant 0.000000e+00 : f32
    %9 = vector.broadcast %cst : f32 to vector<32x128xf32>
    %10 = arith.maximumf %8, %9 : vector<32x128xf32>
    %c0_7 = arith.constant 0 : index
    %c0_8 = arith.constant 0 : index
    %11 = vector.load %arg5[%c0_7, %c0_8] : memref<32x128xf32, #tpu.memory_space<vmem>>, vector<32x128xf32>
    tpu.vector_store %arg5[%c0_7, %c0_8], %10 {strides = array<i32>} : memref<32x128xf32, #tpu.memory_space<vmem>>, vector<32x128xf32>,
    return
  }
  func.func @transform_0(%arg0: i32) -> (i32, i32) {
    %c0_i32 = arith.constant 0 : i32
    %c0_i32_0 = arith.constant 0 : i32
    return %arg0, %c0_i32 : i32, i32
  }
  func.func @transform_1(%arg0: i32) -> (i32, i32) {
    %c0_i32 = arith.constant 0 : i32
    %c0_i32_0 = arith.constant 0 : i32
    %c0_i32_1 = arith.constant 0 : i32
    return %c0_i32, %c0_i32_0 : i32, i32
  }
  func.func @transform_2(%arg0: i32) -> (i32, i32) {
    %c0_i32 = arith.constant 0 : i32
    %c0_i32_0 = arith.constant 0 : i32
    %c0_i32_1 = arith.constant 0 : i32
    return %c0_i32, %c0_i32_0 : i32, i32
  }
  func.func @transform_3(%arg0: i32) -> (i32, i32) {
    %c0_i32 = arith.constant 0 : i32
    %c0_i32_0 = arith.constant 0 : i32
    return %arg0, %c0_i32 : i32, i32
  }
  func.func @transform_4(%arg0: i32) -> (i32, i32) {
    %c0_i32 = arith.constant 0 : i32
    %c0_i32_0 = arith.constant 0 : i32
    return %arg0, %c0_i32 : i32, i32
  }
}

module attributes {stable_mosaic.version = 11 : i64} {
  func.func @_matmul_bias_kernel(%arg0: i32, %arg1: i32, %arg2: i32, %arg3: memref<16x128xbf16, #tpu.memory_space<vmem>>, %arg4: memref<128x256xbf16, #tpu.memory_space<vmem>>, %arg5: memref<1x256xf32, #tpu.memory_space<vmem>>, %arg6: memref<16x256xf32, #tpu.memory_space<vmem>>, %arg7: memref<16x256xf32, #tpu.memory_space<vmem>>) attributes {dimension_semantics = [#tpu.dimension_semantics<parallel>, #tpu.dimension_semantics<parallel>, #tpu.dimension_semantics<arbitrary>], iteration_bounds = array<i64: 1, 1, 1>, scalar_prefetch = 0 : i64, scratch_operands = 1 : i64, tpu.core_type = #tpu.core_type<tc>, window_params = [{transform_indices = @transform_0, window_bounds = array<i64: 16, 128>}, {transform_indices = @transform_1, window_bounds = array<i64: 128, 256>}, {transform_indices = @transform_2, window_bounds = array<i64: 1, 256>}, {transform_indices = @transform_3, window_bounds = array<i64: 16, 256>}]} {
    %c0_i32 = arith.constant 0 : i32
    %0 = arith.cmpi eq, %arg2, %c0_i32 : i32
    %1 = arith.extui %0 : i1 to i32
    %c0_i32_0 = arith.constant 0 : i32
    %2 = arith.cmpi ne, %1, %c0_i32_0 : i32
    scf.if %2 {
      %cst_10 = arith.constant 0.000000e+00 : f32
      %12 = vector.broadcast %cst_10 : f32 to vector<16x256xf32>
      %c0_11 = arith.constant 0 : index
      %c0_12 = arith.constant 0 : index
      %13 = vector.load %arg7[%c0_11, %c0_12] : memref<16x256xf32, #tpu.memory_space<vmem>>, vector<16x256xf32>
      tpu.vector_store %arg7[%c0_11, %c0_12], %12 {strides = array<i32>} : memref<16x256xf32, #tpu.memory_space<vmem>>, vector<16x256xf32>,
    } else {
    }
    %c0 = arith.constant 0 : index
    %c0_1 = arith.constant 0 : index
    %3 = vector.load %arg7[%c0, %c0_1] : memref<16x256xf32, #tpu.memory_space<vmem>>, vector<16x256xf32>
    %c0_2 = arith.constant 0 : index
    %c0_3 = arith.constant 0 : index
    %4 = vector.load %arg3[%c0_2, %c0_3] : memref<16x128xbf16, #tpu.memory_space<vmem>>, vector<16x128xbf16>
    %c0_4 = arith.constant 0 : index
    %c0_5 = arith.constant 0 : index
    %5 = vector.load %arg4[%c0_4, %c0_5] : memref<128x256xbf16, #tpu.memory_space<vmem>>, vector<128x256xbf16>
    %cst = arith.constant dense<0.000000e+00> : vector<16x256xf32>
    %6 = tpu.matmul %4, %5, %cst {dimension_numbers = #tpu.dot_dimension_numbers<[1], [0], [0], [1], [0, 0, 1, 1], [], []>} : vector<16x128xbf16>, vector<128x256xbf16>, vector<16x256xf32> -> vector<16x256xf32>
    %7 = arith.addf %3, %6 : vector<16x256xf32>
    %c0_6 = arith.constant 0 : index
    %c0_7 = arith.constant 0 : index
    %8 = vector.load %arg7[%c0_6, %c0_7] : memref<16x256xf32, #tpu.memory_space<vmem>>, vector<16x256xf32>
    tpu.vector_store %arg7[%c0_6, %c0_7], %7 {strides = array<i32>} : memref<16x256xf32, #tpu.memory_space<vmem>>, vector<16x256xf32>,
    %c0_i32_8 = arith.constant 0 : i32
    %9 = arith.cmpi eq, %arg2, %c0_i32_8 : i32
    %10 = arith.extui %9 : i1 to i32
    %c0_i32_9 = arith.constant 0 : i32
    %11 = arith.cmpi ne, %10, %c0_i32_9 : i32
    scf.if %11 {
      %c0_10 = arith.constant 0 : index
      %c0_11 = arith.constant 0 : index
      %12 = vector.load %arg7[%c0_10, %c0_11] : memref<16x256xf32, #tpu.memory_space<vmem>>, vector<16x256xf32>
      %c0_12 = arith.constant 0 : index
      %c0_13 = arith.constant 0 : index
      %13 = vector.load %arg5[%c0_12, %c0_13] : memref<1x256xf32, #tpu.memory_space<vmem>>, vector<1x256xf32>
      %14 = vector.broadcast %13 : vector<1x256xf32> to vector<16x256xf32>
      %15 = arith.addf %12, %14 : vector<16x256xf32>
      %c0_14 = arith.constant 0 : index
      %c0_15 = arith.constant 0 : index
      %16 = vector.load %arg6[%c0_14, %c0_15] : memref<16x256xf32, #tpu.memory_space<vmem>>, vector<16x256xf32>
      tpu.vector_store %arg6[%c0_14, %c0_15], %15 {strides = array<i32>} : memref<16x256xf32, #tpu.memory_space<vmem>>, vector<16x256xf32>,
    } else {
    }
    return
  }
  func.func @transform_0(%arg0: i32, %arg1: i32, %arg2: i32) -> (i32, i32) {
    %c0_i32 = arith.constant 0 : i32
    return %arg0, %arg2 : i32, i32
  }
  func.func @transform_1(%arg0: i32, %arg1: i32, %arg2: i32) -> (i32, i32) {
    %c0_i32 = arith.constant 0 : i32
    return %arg2, %arg1 : i32, i32
  }
  func.func @transform_2(%arg0: i32, %arg1: i32, %arg2: i32) -> (i32, i32) {
    %c0_i32 = arith.constant 0 : i32
    %c0_i32_0 = arith.constant 0 : i32
    return %c0_i32, %arg1 : i32, i32
  }
  func.func @transform_3(%arg0: i32, %arg1: i32, %arg2: i32) -> (i32, i32) {
    %c0_i32 = arith.constant 0 : i32
    return %arg0, %arg1 : i32, i32
  }
}

module attributes {stable_mosaic.version = 11 : i64} {
  func.func @_bn_stats_kernel(%arg0: i32, %arg1: memref<8x256xf32, #tpu.memory_space<vmem>>, %arg2: memref<1x256xf32, #tpu.memory_space<vmem>>, %arg3: memref<1x256xf32, #tpu.memory_space<vmem>>) attributes {dimension_semantics = [#tpu.dimension_semantics<arbitrary>], iteration_bounds = array<i64: 1>, scalar_prefetch = 0 : i64, scratch_operands = 0 : i64, tpu.core_type = #tpu.core_type<tc>, window_params = [{transform_indices = @transform_0, window_bounds = array<i64: 8, 256>}, {pipeline_mode = #tpu.pipeline_mode<synchronous>, transform_indices = @transform_1, window_bounds = array<i64: 1, 256>}, {pipeline_mode = #tpu.pipeline_mode<synchronous>, transform_indices = @transform_2, window_bounds = array<i64: 1, 256>}]} {
    %c0_i32 = arith.constant 0 : i32
    %0 = arith.cmpi eq, %arg0, %c0_i32 : i32
    %1 = arith.extui %0 : i1 to i32
    %c0_i32_0 = arith.constant 0 : i32
    %2 = arith.cmpi ne, %1, %c0_i32_0 : i32
    scf.if %2 {
      %cst_11 = arith.constant 0.000000e+00 : f32
      %15 = vector.broadcast %cst_11 : f32 to vector<1x256xf32>
      %c0_12 = arith.constant 0 : index
      %c0_13 = arith.constant 0 : index
      %16 = vector.load %arg2[%c0_12, %c0_13] : memref<1x256xf32, #tpu.memory_space<vmem>>, vector<1x256xf32>
      tpu.vector_store %arg2[%c0_12, %c0_13], %15 {strides = array<i32>} : memref<1x256xf32, #tpu.memory_space<vmem>>, vector<1x256xf32>,
      %cst_14 = arith.constant 0.000000e+00 : f32
      %17 = vector.broadcast %cst_14 : f32 to vector<1x256xf32>
      %c0_15 = arith.constant 0 : index
      %c0_16 = arith.constant 0 : index
      %18 = vector.load %arg3[%c0_15, %c0_16] : memref<1x256xf32, #tpu.memory_space<vmem>>, vector<1x256xf32>
      tpu.vector_store %arg3[%c0_15, %c0_16], %17 {strides = array<i32>} : memref<1x256xf32, #tpu.memory_space<vmem>>, vector<1x256xf32>,
    } else {
    }
    %c0 = arith.constant 0 : index
    %c0_1 = arith.constant 0 : index
    %3 = vector.load %arg1[%c0, %c0_1] : memref<8x256xf32, #tpu.memory_space<vmem>>, vector<8x256xf32>
    %c0_2 = arith.constant 0 : index
    %c0_3 = arith.constant 0 : index
    %4 = vector.load %arg2[%c0_2, %c0_3] : memref<1x256xf32, #tpu.memory_space<vmem>>, vector<1x256xf32>
    %cst = arith.constant dense<0.000000e+00> : vector<256xf32>
    %5 = vector.multi_reduction <add>, %3, %cst [0] : vector<8x256xf32> to vector<256xf32>
    %6 = vector.shape_cast %5 : vector<256xf32> to vector<1x256xf32>
    %7 = arith.addf %4, %6 : vector<1x256xf32>
    %c0_4 = arith.constant 0 : index
    %c0_5 = arith.constant 0 : index
    %8 = vector.load %arg2[%c0_4, %c0_5] : memref<1x256xf32, #tpu.memory_space<vmem>>, vector<1x256xf32>
    tpu.vector_store %arg2[%c0_4, %c0_5], %7 {strides = array<i32>} : memref<1x256xf32, #tpu.memory_space<vmem>>, vector<1x256xf32>,
    %c0_6 = arith.constant 0 : index
    %c0_7 = arith.constant 0 : index
    %9 = vector.load %arg3[%c0_6, %c0_7] : memref<1x256xf32, #tpu.memory_space<vmem>>, vector<1x256xf32>
    %10 = arith.mulf %3, %3 : vector<8x256xf32>
    %cst_8 = arith.constant dense<0.000000e+00> : vector<256xf32>
    %11 = vector.multi_reduction <add>, %10, %cst_8 [0] : vector<8x256xf32> to vector<256xf32>
    %12 = vector.shape_cast %11 : vector<256xf32> to vector<1x256xf32>
    %13 = arith.addf %9, %12 : vector<1x256xf32>
    %c0_9 = arith.constant 0 : index
    %c0_10 = arith.constant 0 : index
    %14 = vector.load %arg3[%c0_9, %c0_10] : memref<1x256xf32, #tpu.memory_space<vmem>>, vector<1x256xf32>
    tpu.vector_store %arg3[%c0_9, %c0_10], %13 {strides = array<i32>} : memref<1x256xf32, #tpu.memory_space<vmem>>, vector<1x256xf32>,
    return
  }
  func.func @transform_0(%arg0: i32) -> (i32, i32) {
    %c0_i32 = arith.constant 0 : i32
    %c0_i32_0 = arith.constant 0 : i32
    return %arg0, %c0_i32 : i32, i32
  }
  func.func @transform_1(%arg0: i32) -> (i32, i32) {
    %c0_i32 = arith.constant 0 : i32
    %c0_i32_0 = arith.constant 0 : i32
    %c0_i32_1 = arith.constant 0 : i32
    return %c0_i32, %c0_i32_0 : i32, i32
  }
  func.func @transform_2(%arg0: i32) -> (i32, i32) {
    %c0_i32 = arith.constant 0 : i32
    %c0_i32_0 = arith.constant 0 : i32
    %c0_i32_1 = arith.constant 0 : i32
    return %c0_i32, %c0_i32_0 : i32, i32
  }
}

module attributes {stable_mosaic.version = 11 : i64} {
  func.func @_bn_act_kernel(%arg0: i32, %arg1: memref<8x256xf32, #tpu.memory_space<vmem>>, %arg2: memref<1x256xf32, #tpu.memory_space<vmem>>, %arg3: memref<1x256xf32, #tpu.memory_space<vmem>>, %arg4: memref<8x256xf32, #tpu.memory_space<vmem>>) attributes {dimension_semantics = [#tpu.dimension_semantics<parallel>], iteration_bounds = array<i64: 1>, scalar_prefetch = 0 : i64, scratch_operands = 0 : i64, tpu.core_type = #tpu.core_type<tc>, window_params = [{transform_indices = @transform_0, window_bounds = array<i64: 8, 256>}, {pipeline_mode = #tpu.pipeline_mode<synchronous>, transform_indices = @transform_1, window_bounds = array<i64: 1, 256>}, {pipeline_mode = #tpu.pipeline_mode<synchronous>, transform_indices = @transform_2, window_bounds = array<i64: 1, 256>}, {transform_indices = @transform_3, window_bounds = array<i64: 8, 256>}]} {
    %c0 = arith.constant 0 : index
    %c0_0 = arith.constant 0 : index
    %0 = vector.load %arg1[%c0, %c0_0] : memref<8x256xf32, #tpu.memory_space<vmem>>, vector<8x256xf32>
    %c0_1 = arith.constant 0 : index
    %c0_2 = arith.constant 0 : index
    %1 = vector.load %arg2[%c0_1, %c0_2] : memref<1x256xf32, #tpu.memory_space<vmem>>, vector<1x256xf32>
    %2 = vector.broadcast %1 : vector<1x256xf32> to vector<8x256xf32>
    %3 = arith.mulf %0, %2 : vector<8x256xf32>
    %c0_3 = arith.constant 0 : index
    %c0_4 = arith.constant 0 : index
    %4 = vector.load %arg3[%c0_3, %c0_4] : memref<1x256xf32, #tpu.memory_space<vmem>>, vector<1x256xf32>
    %5 = vector.broadcast %4 : vector<1x256xf32> to vector<8x256xf32>
    %6 = arith.addf %3, %5 : vector<8x256xf32>
    %c0_5 = arith.constant 0 : index
    %c0_6 = arith.constant 0 : index
    %7 = vector.load %arg4[%c0_5, %c0_6] : memref<8x256xf32, #tpu.memory_space<vmem>>, vector<8x256xf32>
    tpu.vector_store %arg4[%c0_5, %c0_6], %6 {strides = array<i32>} : memref<8x256xf32, #tpu.memory_space<vmem>>, vector<8x256xf32>,
    return
  }
  func.func @transform_0(%arg0: i32) -> (i32, i32) {
    %c0_i32 = arith.constant 0 : i32
    %c0_i32_0 = arith.constant 0 : i32
    return %arg0, %c0_i32 : i32, i32
  }
  func.func @transform_1(%arg0: i32) -> (i32, i32) {
    %c0_i32 = arith.constant 0 : i32
    %c0_i32_0 = arith.constant 0 : i32
    %c0_i32_1 = arith.constant 0 : i32
    return %c0_i32, %c0_i32_0 : i32, i32
  }
  func.func @transform_2(%arg0: i32) -> (i32, i32) {
    %c0_i32 = arith.constant 0 : i32
    %c0_i32_0 = arith.constant 0 : i32
    %c0_i32_1 = arith.constant 0 : i32
    return %c0_i32, %c0_i32_0 : i32, i32
  }
  func.func @transform_3(%arg0: i32) -> (i32, i32) {
    %c0_i32 = arith.constant 0 : i32
    %c0_i32_0 = arith.constant 0 : i32
    return %arg0, %c0_i32 : i32, i32
  }
}

module attributes {stable_mosaic.version = 11 : i64} {
  func.func @_matmul_bias_kernel(%arg0: i32, %arg1: i32, %arg2: i32, %arg3: memref<16x256xbf16, #tpu.memory_space<vmem>>, %arg4: memref<256x256xbf16, #tpu.memory_space<vmem>>, %arg5: memref<1x256xf32, #tpu.memory_space<vmem>>, %arg6: memref<16x256xf32, #tpu.memory_space<vmem>>, %arg7: memref<16x256xf32, #tpu.memory_space<vmem>>) attributes {dimension_semantics = [#tpu.dimension_semantics<parallel>, #tpu.dimension_semantics<parallel>, #tpu.dimension_semantics<arbitrary>], iteration_bounds = array<i64: 1, 1, 5>, scalar_prefetch = 0 : i64, scratch_operands = 1 : i64, tpu.core_type = #tpu.core_type<tc>, window_params = [{transform_indices = @transform_0, window_bounds = array<i64: 16, 256>}, {transform_indices = @transform_1, window_bounds = array<i64: 256, 256>}, {transform_indices = @transform_2, window_bounds = array<i64: 1, 256>}, {transform_indices = @transform_3, window_bounds = array<i64: 16, 256>}]} {
    %c0_i32 = arith.constant 0 : i32
    %0 = arith.cmpi eq, %arg2, %c0_i32 : i32
    %1 = arith.extui %0 : i1 to i32
    %c0_i32_0 = arith.constant 0 : i32
    %2 = arith.cmpi ne, %1, %c0_i32_0 : i32
    scf.if %2 {
      %cst_9 = arith.constant 0.000000e+00 : f32
      %12 = vector.broadcast %cst_9 : f32 to vector<16x256xf32>
      %c0_10 = arith.constant 0 : index
      %c0_11 = arith.constant 0 : index
      %13 = vector.load %arg7[%c0_10, %c0_11] : memref<16x256xf32, #tpu.memory_space<vmem>>, vector<16x256xf32>
      tpu.vector_store %arg7[%c0_10, %c0_11], %12 {strides = array<i32>} : memref<16x256xf32, #tpu.memory_space<vmem>>, vector<16x256xf32>,
    } else {
    }
    %c0 = arith.constant 0 : index
    %c0_1 = arith.constant 0 : index
    %3 = vector.load %arg7[%c0, %c0_1] : memref<16x256xf32, #tpu.memory_space<vmem>>, vector<16x256xf32>
    %c0_2 = arith.constant 0 : index
    %c0_3 = arith.constant 0 : index
    %4 = vector.load %arg3[%c0_2, %c0_3] : memref<16x256xbf16, #tpu.memory_space<vmem>>, vector<16x256xbf16>
    %c0_4 = arith.constant 0 : index
    %c0_5 = arith.constant 0 : index
    %5 = vector.load %arg4[%c0_4, %c0_5] : memref<256x256xbf16, #tpu.memory_space<vmem>>, vector<256x256xbf16>
    %cst = arith.constant dense<0.000000e+00> : vector<16x256xf32>
    %6 = tpu.matmul %4, %5, %cst {dimension_numbers = #tpu.dot_dimension_numbers<[1], [0], [0], [1], [0, 0, 1, 1], [], []>} : vector<16x256xbf16>, vector<256x256xbf16>, vector<16x256xf32> -> vector<16x256xf32>
    %7 = arith.addf %3, %6 : vector<16x256xf32>
    %c0_6 = arith.constant 0 : index
    %c0_7 = arith.constant 0 : index
    %8 = vector.load %arg7[%c0_6, %c0_7] : memref<16x256xf32, #tpu.memory_space<vmem>>, vector<16x256xf32>
    tpu.vector_store %arg7[%c0_6, %c0_7], %7 {strides = array<i32>} : memref<16x256xf32, #tpu.memory_space<vmem>>, vector<16x256xf32>,
    %c4_i32 = arith.constant 4 : i32
    %9 = arith.cmpi eq, %arg2, %c4_i32 : i32
    %10 = arith.extui %9 : i1 to i32
    %c0_i32_8 = arith.constant 0 : i32
    %11 = arith.cmpi ne, %10, %c0_i32_8 : i32
    scf.if %11 {
      %c0_9 = arith.constant 0 : index
      %c0_10 = arith.constant 0 : index
      %12 = vector.load %arg7[%c0_9, %c0_10] : memref<16x256xf32, #tpu.memory_space<vmem>>, vector<16x256xf32>
      %c0_11 = arith.constant 0 : index
      %c0_12 = arith.constant 0 : index
      %13 = vector.load %arg5[%c0_11, %c0_12] : memref<1x256xf32, #tpu.memory_space<vmem>>, vector<1x256xf32>
      %14 = vector.broadcast %13 : vector<1x256xf32> to vector<16x256xf32>
      %15 = arith.addf %12, %14 : vector<16x256xf32>
      %c0_13 = arith.constant 0 : index
      %c0_14 = arith.constant 0 : index
      %16 = vector.load %arg6[%c0_13, %c0_14] : memref<16x256xf32, #tpu.memory_space<vmem>>, vector<16x256xf32>
      tpu.vector_store %arg6[%c0_13, %c0_14], %15 {strides = array<i32>} : memref<16x256xf32, #tpu.memory_space<vmem>>, vector<16x256xf32>,
    } else {
    }
    return
  }
  func.func @transform_0(%arg0: i32, %arg1: i32, %arg2: i32) -> (i32, i32) {
    %c0_i32 = arith.constant 0 : i32
    return %arg0, %arg2 : i32, i32
  }
  func.func @transform_1(%arg0: i32, %arg1: i32, %arg2: i32) -> (i32, i32) {
    %c0_i32 = arith.constant 0 : i32
    return %arg2, %arg1 : i32, i32
  }
  func.func @transform_2(%arg0: i32, %arg1: i32, %arg2: i32) -> (i32, i32) {
    %c0_i32 = arith.constant 0 : i32
    %c0_i32_0 = arith.constant 0 : i32
    return %c0_i32, %arg1 : i32, i32
  }
  func.func @transform_3(%arg0: i32, %arg1: i32, %arg2: i32) -> (i32, i32) {
    %c0_i32 = arith.constant 0 : i32
    return %arg0, %arg1 : i32, i32
  }
}

module attributes {stable_mosaic.version = 11 : i64} {
  func.func @_bn_act_kernel(%arg0: i32, %arg1: memref<8x256xf32, #tpu.memory_space<vmem>>, %arg2: memref<1x256xf32, #tpu.memory_space<vmem>>, %arg3: memref<1x256xf32, #tpu.memory_space<vmem>>, %arg4: memref<8x256xf32, #tpu.memory_space<vmem>>) attributes {dimension_semantics = [#tpu.dimension_semantics<parallel>], iteration_bounds = array<i64: 1>, scalar_prefetch = 0 : i64, scratch_operands = 0 : i64, tpu.core_type = #tpu.core_type<tc>, window_params = [{transform_indices = @transform_0, window_bounds = array<i64: 8, 256>}, {pipeline_mode = #tpu.pipeline_mode<synchronous>, transform_indices = @transform_1, window_bounds = array<i64: 1, 256>}, {pipeline_mode = #tpu.pipeline_mode<synchronous>, transform_indices = @transform_2, window_bounds = array<i64: 1, 256>}, {transform_indices = @transform_3, window_bounds = array<i64: 8, 256>}]} {
    %c0 = arith.constant 0 : index
    %c0_0 = arith.constant 0 : index
    %0 = vector.load %arg1[%c0, %c0_0] : memref<8x256xf32, #tpu.memory_space<vmem>>, vector<8x256xf32>
    %c0_1 = arith.constant 0 : index
    %c0_2 = arith.constant 0 : index
    %1 = vector.load %arg2[%c0_1, %c0_2] : memref<1x256xf32, #tpu.memory_space<vmem>>, vector<1x256xf32>
    %2 = vector.broadcast %1 : vector<1x256xf32> to vector<8x256xf32>
    %3 = arith.mulf %0, %2 : vector<8x256xf32>
    %c0_3 = arith.constant 0 : index
    %c0_4 = arith.constant 0 : index
    %4 = vector.load %arg3[%c0_3, %c0_4] : memref<1x256xf32, #tpu.memory_space<vmem>>, vector<1x256xf32>
    %5 = vector.broadcast %4 : vector<1x256xf32> to vector<8x256xf32>
    %6 = arith.addf %3, %5 : vector<8x256xf32>
    %cst = arith.constant 0.000000e+00 : f32
    %7 = vector.broadcast %cst : f32 to vector<8x256xf32>
    %8 = arith.maximumf %6, %7 : vector<8x256xf32>
    %c0_5 = arith.constant 0 : index
    %c0_6 = arith.constant 0 : index
    %9 = vector.load %arg4[%c0_5, %c0_6] : memref<8x256xf32, #tpu.memory_space<vmem>>, vector<8x256xf32>
    tpu.vector_store %arg4[%c0_5, %c0_6], %8 {strides = array<i32>} : memref<8x256xf32, #tpu.memory_space<vmem>>, vector<8x256xf32>,
    return
  }
  func.func @transform_0(%arg0: i32) -> (i32, i32) {
    %c0_i32 = arith.constant 0 : i32
    %c0_i32_0 = arith.constant 0 : i32
    return %arg0, %c0_i32 : i32, i32
  }
  func.func @transform_1(%arg0: i32) -> (i32, i32) {
    %c0_i32 = arith.constant 0 : i32
    %c0_i32_0 = arith.constant 0 : i32
    %c0_i32_1 = arith.constant 0 : i32
    return %c0_i32, %c0_i32_0 : i32, i32
  }
  func.func @transform_2(%arg0: i32) -> (i32, i32) {
    %c0_i32 = arith.constant 0 : i32
    %c0_i32_0 = arith.constant 0 : i32
    %c0_i32_1 = arith.constant 0 : i32
    return %c0_i32, %c0_i32_0 : i32, i32
  }
  func.func @transform_3(%arg0: i32) -> (i32, i32) {
    %c0_i32 = arith.constant 0 : i32
    %c0_i32_0 = arith.constant 0 : i32
    return %arg0, %c0_i32 : i32, i32
  }
}

module attributes {stable_mosaic.version = 11 : i64} {
  func.func @_matmul_bias_kernel(%arg0: i32, %arg1: i32, %arg2: i32, %arg3: memref<16x256xbf16, #tpu.memory_space<vmem>>, %arg4: memref<256x256xbf16, #tpu.memory_space<vmem>>, %arg5: memref<1x256xf32, #tpu.memory_space<vmem>>, %arg6: memref<16x256xf32, #tpu.memory_space<vmem>>, %arg7: memref<16x256xf32, #tpu.memory_space<vmem>>) attributes {dimension_semantics = [#tpu.dimension_semantics<parallel>, #tpu.dimension_semantics<parallel>, #tpu.dimension_semantics<arbitrary>], iteration_bounds = array<i64: 1, 1, 9>, scalar_prefetch = 0 : i64, scratch_operands = 1 : i64, tpu.core_type = #tpu.core_type<tc>, window_params = [{transform_indices = @transform_0, window_bounds = array<i64: 16, 256>}, {transform_indices = @transform_1, window_bounds = array<i64: 256, 256>}, {transform_indices = @transform_2, window_bounds = array<i64: 1, 256>}, {transform_indices = @transform_3, window_bounds = array<i64: 16, 256>}]} {
    %c0_i32 = arith.constant 0 : i32
    %0 = arith.cmpi eq, %arg2, %c0_i32 : i32
    %1 = arith.extui %0 : i1 to i32
    %c0_i32_0 = arith.constant 0 : i32
    %2 = arith.cmpi ne, %1, %c0_i32_0 : i32
    scf.if %2 {
      %cst_9 = arith.constant 0.000000e+00 : f32
      %12 = vector.broadcast %cst_9 : f32 to vector<16x256xf32>
      %c0_10 = arith.constant 0 : index
      %c0_11 = arith.constant 0 : index
      %13 = vector.load %arg7[%c0_10, %c0_11] : memref<16x256xf32, #tpu.memory_space<vmem>>, vector<16x256xf32>
      tpu.vector_store %arg7[%c0_10, %c0_11], %12 {strides = array<i32>} : memref<16x256xf32, #tpu.memory_space<vmem>>, vector<16x256xf32>,
    } else {
    }
    %c0 = arith.constant 0 : index
    %c0_1 = arith.constant 0 : index
    %3 = vector.load %arg7[%c0, %c0_1] : memref<16x256xf32, #tpu.memory_space<vmem>>, vector<16x256xf32>
    %c0_2 = arith.constant 0 : index
    %c0_3 = arith.constant 0 : index
    %4 = vector.load %arg3[%c0_2, %c0_3] : memref<16x256xbf16, #tpu.memory_space<vmem>>, vector<16x256xbf16>
    %c0_4 = arith.constant 0 : index
    %c0_5 = arith.constant 0 : index
    %5 = vector.load %arg4[%c0_4, %c0_5] : memref<256x256xbf16, #tpu.memory_space<vmem>>, vector<256x256xbf16>
    %cst = arith.constant dense<0.000000e+00> : vector<16x256xf32>
    %6 = tpu.matmul %4, %5, %cst {dimension_numbers = #tpu.dot_dimension_numbers<[1], [0], [0], [1], [0, 0, 1, 1], [], []>} : vector<16x256xbf16>, vector<256x256xbf16>, vector<16x256xf32> -> vector<16x256xf32>
    %7 = arith.addf %3, %6 : vector<16x256xf32>
    %c0_6 = arith.constant 0 : index
    %c0_7 = arith.constant 0 : index
    %8 = vector.load %arg7[%c0_6, %c0_7] : memref<16x256xf32, #tpu.memory_space<vmem>>, vector<16x256xf32>
    tpu.vector_store %arg7[%c0_6, %c0_7], %7 {strides = array<i32>} : memref<16x256xf32, #tpu.memory_space<vmem>>, vector<16x256xf32>,
    %c8_i32 = arith.constant 8 : i32
    %9 = arith.cmpi eq, %arg2, %c8_i32 : i32
    %10 = arith.extui %9 : i1 to i32
    %c0_i32_8 = arith.constant 0 : i32
    %11 = arith.cmpi ne, %10, %c0_i32_8 : i32
    scf.if %11 {
      %c0_9 = arith.constant 0 : index
      %c0_10 = arith.constant 0 : index
      %12 = vector.load %arg7[%c0_9, %c0_10] : memref<16x256xf32, #tpu.memory_space<vmem>>, vector<16x256xf32>
      %c0_11 = arith.constant 0 : index
      %c0_12 = arith.constant 0 : index
      %13 = vector.load %arg5[%c0_11, %c0_12] : memref<1x256xf32, #tpu.memory_space<vmem>>, vector<1x256xf32>
      %14 = vector.broadcast %13 : vector<1x256xf32> to vector<16x256xf32>
      %15 = arith.addf %12, %14 : vector<16x256xf32>
      %c0_13 = arith.constant 0 : index
      %c0_14 = arith.constant 0 : index
      %16 = vector.load %arg6[%c0_13, %c0_14] : memref<16x256xf32, #tpu.memory_space<vmem>>, vector<16x256xf32>
      tpu.vector_store %arg6[%c0_13, %c0_14], %15 {strides = array<i32>} : memref<16x256xf32, #tpu.memory_space<vmem>>, vector<16x256xf32>,
    } else {
    }
    return
  }
  func.func @transform_0(%arg0: i32, %arg1: i32, %arg2: i32) -> (i32, i32) {
    %c0_i32 = arith.constant 0 : i32
    return %arg0, %arg2 : i32, i32
  }
  func.func @transform_1(%arg0: i32, %arg1: i32, %arg2: i32) -> (i32, i32) {
    %c0_i32 = arith.constant 0 : i32
    return %arg2, %arg1 : i32, i32
  }
  func.func @transform_2(%arg0: i32, %arg1: i32, %arg2: i32) -> (i32, i32) {
    %c0_i32 = arith.constant 0 : i32
    %c0_i32_0 = arith.constant 0 : i32
    return %c0_i32, %arg1 : i32, i32
  }
  func.func @transform_3(%arg0: i32, %arg1: i32, %arg2: i32) -> (i32, i32) {
    %c0_i32 = arith.constant 0 : i32
    return %arg0, %arg1 : i32, i32
  }
}

module attributes {stable_mosaic.version = 11 : i64} {
  func.func @_bn_add_relu_kernel(%arg0: i32, %arg1: memref<8x256xf32, #tpu.memory_space<vmem>>, %arg2: memref<1x256xf32, #tpu.memory_space<vmem>>, %arg3: memref<1x256xf32, #tpu.memory_space<vmem>>, %arg4: memref<8x256xf32, #tpu.memory_space<vmem>>, %arg5: memref<8x256xf32, #tpu.memory_space<vmem>>) attributes {dimension_semantics = [#tpu.dimension_semantics<parallel>], iteration_bounds = array<i64: 1>, scalar_prefetch = 0 : i64, scratch_operands = 0 : i64, tpu.core_type = #tpu.core_type<tc>, window_params = [{transform_indices = @transform_0, window_bounds = array<i64: 8, 256>}, {pipeline_mode = #tpu.pipeline_mode<synchronous>, transform_indices = @transform_1, window_bounds = array<i64: 1, 256>}, {pipeline_mode = #tpu.pipeline_mode<synchronous>, transform_indices = @transform_2, window_bounds = array<i64: 1, 256>}, {transform_indices = @transform_3, window_bounds = array<i64: 8, 256>}, {transform_indices = @transform_4, window_bounds = array<i64: 8, 256>}]} {
    %c0 = arith.constant 0 : index
    %c0_0 = arith.constant 0 : index
    %0 = vector.load %arg1[%c0, %c0_0] : memref<8x256xf32, #tpu.memory_space<vmem>>, vector<8x256xf32>
    %c0_1 = arith.constant 0 : index
    %c0_2 = arith.constant 0 : index
    %1 = vector.load %arg2[%c0_1, %c0_2] : memref<1x256xf32, #tpu.memory_space<vmem>>, vector<1x256xf32>
    %2 = vector.broadcast %1 : vector<1x256xf32> to vector<8x256xf32>
    %3 = arith.mulf %0, %2 : vector<8x256xf32>
    %c0_3 = arith.constant 0 : index
    %c0_4 = arith.constant 0 : index
    %4 = vector.load %arg3[%c0_3, %c0_4] : memref<1x256xf32, #tpu.memory_space<vmem>>, vector<1x256xf32>
    %5 = vector.broadcast %4 : vector<1x256xf32> to vector<8x256xf32>
    %6 = arith.addf %3, %5 : vector<8x256xf32>
    %c0_5 = arith.constant 0 : index
    %c0_6 = arith.constant 0 : index
    %7 = vector.load %arg4[%c0_5, %c0_6] : memref<8x256xf32, #tpu.memory_space<vmem>>, vector<8x256xf32>
    %8 = arith.addf %6, %7 : vector<8x256xf32>
    %cst = arith.constant 0.000000e+00 : f32
    %9 = vector.broadcast %cst : f32 to vector<8x256xf32>
    %10 = arith.maximumf %8, %9 : vector<8x256xf32>
    %c0_7 = arith.constant 0 : index
    %c0_8 = arith.constant 0 : index
    %11 = vector.load %arg5[%c0_7, %c0_8] : memref<8x256xf32, #tpu.memory_space<vmem>>, vector<8x256xf32>
    tpu.vector_store %arg5[%c0_7, %c0_8], %10 {strides = array<i32>} : memref<8x256xf32, #tpu.memory_space<vmem>>, vector<8x256xf32>,
    return
  }
  func.func @transform_0(%arg0: i32) -> (i32, i32) {
    %c0_i32 = arith.constant 0 : i32
    %c0_i32_0 = arith.constant 0 : i32
    return %arg0, %c0_i32 : i32, i32
  }
  func.func @transform_1(%arg0: i32) -> (i32, i32) {
    %c0_i32 = arith.constant 0 : i32
    %c0_i32_0 = arith.constant 0 : i32
    %c0_i32_1 = arith.constant 0 : i32
    return %c0_i32, %c0_i32_0 : i32, i32
  }
  func.func @transform_2(%arg0: i32) -> (i32, i32) {
    %c0_i32 = arith.constant 0 : i32
    %c0_i32_0 = arith.constant 0 : i32
    %c0_i32_1 = arith.constant 0 : i32
    return %c0_i32, %c0_i32_0 : i32, i32
  }
  func.func @transform_3(%arg0: i32) -> (i32, i32) {
    %c0_i32 = arith.constant 0 : i32
    %c0_i32_0 = arith.constant 0 : i32
    return %arg0, %c0_i32 : i32, i32
  }
  func.func @transform_4(%arg0: i32) -> (i32, i32) {
    %c0_i32 = arith.constant 0 : i32
    %c0_i32_0 = arith.constant 0 : i32
    return %arg0, %c0_i32 : i32, i32
  }
}

module attributes {stable_mosaic.version = 11 : i64} {
  func.func @_matmul_bias_kernel(%arg0: i32, %arg1: i32, %arg2: i32, %arg3: memref<16x256xbf16, #tpu.memory_space<vmem>>, %arg4: memref<256x256xbf16, #tpu.memory_space<vmem>>, %arg5: memref<1x256xf32, #tpu.memory_space<vmem>>, %arg6: memref<16x256xf32, #tpu.memory_space<vmem>>, %arg7: memref<16x256xf32, #tpu.memory_space<vmem>>) attributes {dimension_semantics = [#tpu.dimension_semantics<parallel>, #tpu.dimension_semantics<parallel>, #tpu.dimension_semantics<arbitrary>], iteration_bounds = array<i64: 1, 2, 9>, scalar_prefetch = 0 : i64, scratch_operands = 1 : i64, tpu.core_type = #tpu.core_type<tc>, window_params = [{transform_indices = @transform_0, window_bounds = array<i64: 16, 256>}, {transform_indices = @transform_1, window_bounds = array<i64: 256, 256>}, {transform_indices = @transform_2, window_bounds = array<i64: 1, 256>}, {transform_indices = @transform_3, window_bounds = array<i64: 16, 256>}]} {
    %c0_i32 = arith.constant 0 : i32
    %0 = arith.cmpi eq, %arg2, %c0_i32 : i32
    %1 = arith.extui %0 : i1 to i32
    %c0_i32_0 = arith.constant 0 : i32
    %2 = arith.cmpi ne, %1, %c0_i32_0 : i32
    scf.if %2 {
      %cst_9 = arith.constant 0.000000e+00 : f32
      %12 = vector.broadcast %cst_9 : f32 to vector<16x256xf32>
      %c0_10 = arith.constant 0 : index
      %c0_11 = arith.constant 0 : index
      %13 = vector.load %arg7[%c0_10, %c0_11] : memref<16x256xf32, #tpu.memory_space<vmem>>, vector<16x256xf32>
      tpu.vector_store %arg7[%c0_10, %c0_11], %12 {strides = array<i32>} : memref<16x256xf32, #tpu.memory_space<vmem>>, vector<16x256xf32>,
    } else {
    }
    %c0 = arith.constant 0 : index
    %c0_1 = arith.constant 0 : index
    %3 = vector.load %arg7[%c0, %c0_1] : memref<16x256xf32, #tpu.memory_space<vmem>>, vector<16x256xf32>
    %c0_2 = arith.constant 0 : index
    %c0_3 = arith.constant 0 : index
    %4 = vector.load %arg3[%c0_2, %c0_3] : memref<16x256xbf16, #tpu.memory_space<vmem>>, vector<16x256xbf16>
    %c0_4 = arith.constant 0 : index
    %c0_5 = arith.constant 0 : index
    %5 = vector.load %arg4[%c0_4, %c0_5] : memref<256x256xbf16, #tpu.memory_space<vmem>>, vector<256x256xbf16>
    %cst = arith.constant dense<0.000000e+00> : vector<16x256xf32>
    %6 = tpu.matmul %4, %5, %cst {dimension_numbers = #tpu.dot_dimension_numbers<[1], [0], [0], [1], [0, 0, 1, 1], [], []>} : vector<16x256xbf16>, vector<256x256xbf16>, vector<16x256xf32> -> vector<16x256xf32>
    %7 = arith.addf %3, %6 : vector<16x256xf32>
    %c0_6 = arith.constant 0 : index
    %c0_7 = arith.constant 0 : index
    %8 = vector.load %arg7[%c0_6, %c0_7] : memref<16x256xf32, #tpu.memory_space<vmem>>, vector<16x256xf32>
    tpu.vector_store %arg7[%c0_6, %c0_7], %7 {strides = array<i32>} : memref<16x256xf32, #tpu.memory_space<vmem>>, vector<16x256xf32>,
    %c8_i32 = arith.constant 8 : i32
    %9 = arith.cmpi eq, %arg2, %c8_i32 : i32
    %10 = arith.extui %9 : i1 to i32
    %c0_i32_8 = arith.constant 0 : i32
    %11 = arith.cmpi ne, %10, %c0_i32_8 : i32
    scf.if %11 {
      %c0_9 = arith.constant 0 : index
      %c0_10 = arith.constant 0 : index
      %12 = vector.load %arg7[%c0_9, %c0_10] : memref<16x256xf32, #tpu.memory_space<vmem>>, vector<16x256xf32>
      %c0_11 = arith.constant 0 : index
      %c0_12 = arith.constant 0 : index
      %13 = vector.load %arg5[%c0_11, %c0_12] : memref<1x256xf32, #tpu.memory_space<vmem>>, vector<1x256xf32>
      %14 = vector.broadcast %13 : vector<1x256xf32> to vector<16x256xf32>
      %15 = arith.addf %12, %14 : vector<16x256xf32>
      %c0_13 = arith.constant 0 : index
      %c0_14 = arith.constant 0 : index
      %16 = vector.load %arg6[%c0_13, %c0_14] : memref<16x256xf32, #tpu.memory_space<vmem>>, vector<16x256xf32>
      tpu.vector_store %arg6[%c0_13, %c0_14], %15 {strides = array<i32>} : memref<16x256xf32, #tpu.memory_space<vmem>>, vector<16x256xf32>,
    } else {
    }
    return
  }
  func.func @transform_0(%arg0: i32, %arg1: i32, %arg2: i32) -> (i32, i32) {
    %c0_i32 = arith.constant 0 : i32
    return %arg0, %arg2 : i32, i32
  }
  func.func @transform_1(%arg0: i32, %arg1: i32, %arg2: i32) -> (i32, i32) {
    %c0_i32 = arith.constant 0 : i32
    return %arg2, %arg1 : i32, i32
  }
  func.func @transform_2(%arg0: i32, %arg1: i32, %arg2: i32) -> (i32, i32) {
    %c0_i32 = arith.constant 0 : i32
    %c0_i32_0 = arith.constant 0 : i32
    return %c0_i32, %arg1 : i32, i32
  }
  func.func @transform_3(%arg0: i32, %arg1: i32, %arg2: i32) -> (i32, i32) {
    %c0_i32 = arith.constant 0 : i32
    return %arg0, %arg1 : i32, i32
  }
}

module attributes {stable_mosaic.version = 11 : i64} {
  func.func @_matmul_bias_kernel(%arg0: i32, %arg1: i32, %arg2: i32, %arg3: memref<16x256xbf16, #tpu.memory_space<vmem>>, %arg4: memref<256x256xbf16, #tpu.memory_space<vmem>>, %arg5: memref<1x256xf32, #tpu.memory_space<vmem>>, %arg6: memref<16x256xf32, #tpu.memory_space<vmem>>, %arg7: memref<16x256xf32, #tpu.memory_space<vmem>>) attributes {dimension_semantics = [#tpu.dimension_semantics<parallel>, #tpu.dimension_semantics<parallel>, #tpu.dimension_semantics<arbitrary>], iteration_bounds = array<i64: 1, 2, 1>, scalar_prefetch = 0 : i64, scratch_operands = 1 : i64, tpu.core_type = #tpu.core_type<tc>, window_params = [{transform_indices = @transform_0, window_bounds = array<i64: 16, 256>}, {transform_indices = @transform_1, window_bounds = array<i64: 256, 256>}, {transform_indices = @transform_2, window_bounds = array<i64: 1, 256>}, {transform_indices = @transform_3, window_bounds = array<i64: 16, 256>}]} {
    %c0_i32 = arith.constant 0 : i32
    %0 = arith.cmpi eq, %arg2, %c0_i32 : i32
    %1 = arith.extui %0 : i1 to i32
    %c0_i32_0 = arith.constant 0 : i32
    %2 = arith.cmpi ne, %1, %c0_i32_0 : i32
    scf.if %2 {
      %cst_10 = arith.constant 0.000000e+00 : f32
      %12 = vector.broadcast %cst_10 : f32 to vector<16x256xf32>
      %c0_11 = arith.constant 0 : index
      %c0_12 = arith.constant 0 : index
      %13 = vector.load %arg7[%c0_11, %c0_12] : memref<16x256xf32, #tpu.memory_space<vmem>>, vector<16x256xf32>
      tpu.vector_store %arg7[%c0_11, %c0_12], %12 {strides = array<i32>} : memref<16x256xf32, #tpu.memory_space<vmem>>, vector<16x256xf32>,
    } else {
    }
    %c0 = arith.constant 0 : index
    %c0_1 = arith.constant 0 : index
    %3 = vector.load %arg7[%c0, %c0_1] : memref<16x256xf32, #tpu.memory_space<vmem>>, vector<16x256xf32>
    %c0_2 = arith.constant 0 : index
    %c0_3 = arith.constant 0 : index
    %4 = vector.load %arg3[%c0_2, %c0_3] : memref<16x256xbf16, #tpu.memory_space<vmem>>, vector<16x256xbf16>
    %c0_4 = arith.constant 0 : index
    %c0_5 = arith.constant 0 : index
    %5 = vector.load %arg4[%c0_4, %c0_5] : memref<256x256xbf16, #tpu.memory_space<vmem>>, vector<256x256xbf16>
    %cst = arith.constant dense<0.000000e+00> : vector<16x256xf32>
    %6 = tpu.matmul %4, %5, %cst {dimension_numbers = #tpu.dot_dimension_numbers<[1], [0], [0], [1], [0, 0, 1, 1], [], []>} : vector<16x256xbf16>, vector<256x256xbf16>, vector<16x256xf32> -> vector<16x256xf32>
    %7 = arith.addf %3, %6 : vector<16x256xf32>
    %c0_6 = arith.constant 0 : index
    %c0_7 = arith.constant 0 : index
    %8 = vector.load %arg7[%c0_6, %c0_7] : memref<16x256xf32, #tpu.memory_space<vmem>>, vector<16x256xf32>
    tpu.vector_store %arg7[%c0_6, %c0_7], %7 {strides = array<i32>} : memref<16x256xf32, #tpu.memory_space<vmem>>, vector<16x256xf32>,
    %c0_i32_8 = arith.constant 0 : i32
    %9 = arith.cmpi eq, %arg2, %c0_i32_8 : i32
    %10 = arith.extui %9 : i1 to i32
    %c0_i32_9 = arith.constant 0 : i32
    %11 = arith.cmpi ne, %10, %c0_i32_9 : i32
    scf.if %11 {
      %c0_10 = arith.constant 0 : index
      %c0_11 = arith.constant 0 : index
      %12 = vector.load %arg7[%c0_10, %c0_11] : memref<16x256xf32, #tpu.memory_space<vmem>>, vector<16x256xf32>
      %c0_12 = arith.constant 0 : index
      %c0_13 = arith.constant 0 : index
      %13 = vector.load %arg5[%c0_12, %c0_13] : memref<1x256xf32, #tpu.memory_space<vmem>>, vector<1x256xf32>
      %14 = vector.broadcast %13 : vector<1x256xf32> to vector<16x256xf32>
      %15 = arith.addf %12, %14 : vector<16x256xf32>
      %c0_14 = arith.constant 0 : index
      %c0_15 = arith.constant 0 : index
      %16 = vector.load %arg6[%c0_14, %c0_15] : memref<16x256xf32, #tpu.memory_space<vmem>>, vector<16x256xf32>
      tpu.vector_store %arg6[%c0_14, %c0_15], %15 {strides = array<i32>} : memref<16x256xf32, #tpu.memory_space<vmem>>, vector<16x256xf32>,
    } else {
    }
    return
  }
  func.func @transform_0(%arg0: i32, %arg1: i32, %arg2: i32) -> (i32, i32) {
    %c0_i32 = arith.constant 0 : i32
    return %arg0, %arg2 : i32, i32
  }
  func.func @transform_1(%arg0: i32, %arg1: i32, %arg2: i32) -> (i32, i32) {
    %c0_i32 = arith.constant 0 : i32
    return %arg2, %arg1 : i32, i32
  }
  func.func @transform_2(%arg0: i32, %arg1: i32, %arg2: i32) -> (i32, i32) {
    %c0_i32 = arith.constant 0 : i32
    %c0_i32_0 = arith.constant 0 : i32
    return %c0_i32, %arg1 : i32, i32
  }
  func.func @transform_3(%arg0: i32, %arg1: i32, %arg2: i32) -> (i32, i32) {
    %c0_i32 = arith.constant 0 : i32
    return %arg0, %arg1 : i32, i32
  }
}

module attributes {stable_mosaic.version = 11 : i64} {
  func.func @_bn_stats_kernel(%arg0: i32, %arg1: memref<8x512xf32, #tpu.memory_space<vmem>>, %arg2: memref<1x512xf32, #tpu.memory_space<vmem>>, %arg3: memref<1x512xf32, #tpu.memory_space<vmem>>) attributes {dimension_semantics = [#tpu.dimension_semantics<arbitrary>], iteration_bounds = array<i64: 1>, scalar_prefetch = 0 : i64, scratch_operands = 0 : i64, tpu.core_type = #tpu.core_type<tc>, window_params = [{transform_indices = @transform_0, window_bounds = array<i64: 8, 512>}, {pipeline_mode = #tpu.pipeline_mode<synchronous>, transform_indices = @transform_1, window_bounds = array<i64: 1, 512>}, {pipeline_mode = #tpu.pipeline_mode<synchronous>, transform_indices = @transform_2, window_bounds = array<i64: 1, 512>}]} {
    %c0_i32 = arith.constant 0 : i32
    %0 = arith.cmpi eq, %arg0, %c0_i32 : i32
    %1 = arith.extui %0 : i1 to i32
    %c0_i32_0 = arith.constant 0 : i32
    %2 = arith.cmpi ne, %1, %c0_i32_0 : i32
    scf.if %2 {
      %cst_11 = arith.constant 0.000000e+00 : f32
      %15 = vector.broadcast %cst_11 : f32 to vector<1x512xf32>
      %c0_12 = arith.constant 0 : index
      %c0_13 = arith.constant 0 : index
      %16 = vector.load %arg2[%c0_12, %c0_13] : memref<1x512xf32, #tpu.memory_space<vmem>>, vector<1x512xf32>
      tpu.vector_store %arg2[%c0_12, %c0_13], %15 {strides = array<i32>} : memref<1x512xf32, #tpu.memory_space<vmem>>, vector<1x512xf32>,
      %cst_14 = arith.constant 0.000000e+00 : f32
      %17 = vector.broadcast %cst_14 : f32 to vector<1x512xf32>
      %c0_15 = arith.constant 0 : index
      %c0_16 = arith.constant 0 : index
      %18 = vector.load %arg3[%c0_15, %c0_16] : memref<1x512xf32, #tpu.memory_space<vmem>>, vector<1x512xf32>
      tpu.vector_store %arg3[%c0_15, %c0_16], %17 {strides = array<i32>} : memref<1x512xf32, #tpu.memory_space<vmem>>, vector<1x512xf32>,
    } else {
    }
    %c0 = arith.constant 0 : index
    %c0_1 = arith.constant 0 : index
    %3 = vector.load %arg1[%c0, %c0_1] : memref<8x512xf32, #tpu.memory_space<vmem>>, vector<8x512xf32>
    %c0_2 = arith.constant 0 : index
    %c0_3 = arith.constant 0 : index
    %4 = vector.load %arg2[%c0_2, %c0_3] : memref<1x512xf32, #tpu.memory_space<vmem>>, vector<1x512xf32>
    %cst = arith.constant dense<0.000000e+00> : vector<512xf32>
    %5 = vector.multi_reduction <add>, %3, %cst [0] : vector<8x512xf32> to vector<512xf32>
    %6 = vector.shape_cast %5 : vector<512xf32> to vector<1x512xf32>
    %7 = arith.addf %4, %6 : vector<1x512xf32>
    %c0_4 = arith.constant 0 : index
    %c0_5 = arith.constant 0 : index
    %8 = vector.load %arg2[%c0_4, %c0_5] : memref<1x512xf32, #tpu.memory_space<vmem>>, vector<1x512xf32>
    tpu.vector_store %arg2[%c0_4, %c0_5], %7 {strides = array<i32>} : memref<1x512xf32, #tpu.memory_space<vmem>>, vector<1x512xf32>,
    %c0_6 = arith.constant 0 : index
    %c0_7 = arith.constant 0 : index
    %9 = vector.load %arg3[%c0_6, %c0_7] : memref<1x512xf32, #tpu.memory_space<vmem>>, vector<1x512xf32>
    %10 = arith.mulf %3, %3 : vector<8x512xf32>
    %cst_8 = arith.constant dense<0.000000e+00> : vector<512xf32>
    %11 = vector.multi_reduction <add>, %10, %cst_8 [0] : vector<8x512xf32> to vector<512xf32>
    %12 = vector.shape_cast %11 : vector<512xf32> to vector<1x512xf32>
    %13 = arith.addf %9, %12 : vector<1x512xf32>
    %c0_9 = arith.constant 0 : index
    %c0_10 = arith.constant 0 : index
    %14 = vector.load %arg3[%c0_9, %c0_10] : memref<1x512xf32, #tpu.memory_space<vmem>>, vector<1x512xf32>
    tpu.vector_store %arg3[%c0_9, %c0_10], %13 {strides = array<i32>} : memref<1x512xf32, #tpu.memory_space<vmem>>, vector<1x512xf32>,
    return
  }
  func.func @transform_0(%arg0: i32) -> (i32, i32) {
    %c0_i32 = arith.constant 0 : i32
    %c0_i32_0 = arith.constant 0 : i32
    return %arg0, %c0_i32 : i32, i32
  }
  func.func @transform_1(%arg0: i32) -> (i32, i32) {
    %c0_i32 = arith.constant 0 : i32
    %c0_i32_0 = arith.constant 0 : i32
    %c0_i32_1 = arith.constant 0 : i32
    return %c0_i32, %c0_i32_0 : i32, i32
  }
  func.func @transform_2(%arg0: i32) -> (i32, i32) {
    %c0_i32 = arith.constant 0 : i32
    %c0_i32_0 = arith.constant 0 : i32
    %c0_i32_1 = arith.constant 0 : i32
    return %c0_i32, %c0_i32_0 : i32, i32
  }
}

module attributes {stable_mosaic.version = 11 : i64} {
  func.func @_bn_act_kernel(%arg0: i32, %arg1: memref<8x512xf32, #tpu.memory_space<vmem>>, %arg2: memref<1x512xf32, #tpu.memory_space<vmem>>, %arg3: memref<1x512xf32, #tpu.memory_space<vmem>>, %arg4: memref<8x512xf32, #tpu.memory_space<vmem>>) attributes {dimension_semantics = [#tpu.dimension_semantics<parallel>], iteration_bounds = array<i64: 1>, scalar_prefetch = 0 : i64, scratch_operands = 0 : i64, tpu.core_type = #tpu.core_type<tc>, window_params = [{transform_indices = @transform_0, window_bounds = array<i64: 8, 512>}, {pipeline_mode = #tpu.pipeline_mode<synchronous>, transform_indices = @transform_1, window_bounds = array<i64: 1, 512>}, {pipeline_mode = #tpu.pipeline_mode<synchronous>, transform_indices = @transform_2, window_bounds = array<i64: 1, 512>}, {transform_indices = @transform_3, window_bounds = array<i64: 8, 512>}]} {
    %c0 = arith.constant 0 : index
    %c0_0 = arith.constant 0 : index
    %0 = vector.load %arg1[%c0, %c0_0] : memref<8x512xf32, #tpu.memory_space<vmem>>, vector<8x512xf32>
    %c0_1 = arith.constant 0 : index
    %c0_2 = arith.constant 0 : index
    %1 = vector.load %arg2[%c0_1, %c0_2] : memref<1x512xf32, #tpu.memory_space<vmem>>, vector<1x512xf32>
    %2 = vector.broadcast %1 : vector<1x512xf32> to vector<8x512xf32>
    %3 = arith.mulf %0, %2 : vector<8x512xf32>
    %c0_3 = arith.constant 0 : index
    %c0_4 = arith.constant 0 : index
    %4 = vector.load %arg3[%c0_3, %c0_4] : memref<1x512xf32, #tpu.memory_space<vmem>>, vector<1x512xf32>
    %5 = vector.broadcast %4 : vector<1x512xf32> to vector<8x512xf32>
    %6 = arith.addf %3, %5 : vector<8x512xf32>
    %c0_5 = arith.constant 0 : index
    %c0_6 = arith.constant 0 : index
    %7 = vector.load %arg4[%c0_5, %c0_6] : memref<8x512xf32, #tpu.memory_space<vmem>>, vector<8x512xf32>
    tpu.vector_store %arg4[%c0_5, %c0_6], %6 {strides = array<i32>} : memref<8x512xf32, #tpu.memory_space<vmem>>, vector<8x512xf32>,
    return
  }
  func.func @transform_0(%arg0: i32) -> (i32, i32) {
    %c0_i32 = arith.constant 0 : i32
    %c0_i32_0 = arith.constant 0 : i32
    return %arg0, %c0_i32 : i32, i32
  }
  func.func @transform_1(%arg0: i32) -> (i32, i32) {
    %c0_i32 = arith.constant 0 : i32
    %c0_i32_0 = arith.constant 0 : i32
    %c0_i32_1 = arith.constant 0 : i32
    return %c0_i32, %c0_i32_0 : i32, i32
  }
  func.func @transform_2(%arg0: i32) -> (i32, i32) {
    %c0_i32 = arith.constant 0 : i32
    %c0_i32_0 = arith.constant 0 : i32
    %c0_i32_1 = arith.constant 0 : i32
    return %c0_i32, %c0_i32_0 : i32, i32
  }
  func.func @transform_3(%arg0: i32) -> (i32, i32) {
    %c0_i32 = arith.constant 0 : i32
    %c0_i32_0 = arith.constant 0 : i32
    return %arg0, %c0_i32 : i32, i32
  }
}

module attributes {stable_mosaic.version = 11 : i64} {
  func.func @_bn_act_kernel(%arg0: i32, %arg1: memref<8x512xf32, #tpu.memory_space<vmem>>, %arg2: memref<1x512xf32, #tpu.memory_space<vmem>>, %arg3: memref<1x512xf32, #tpu.memory_space<vmem>>, %arg4: memref<8x512xf32, #tpu.memory_space<vmem>>) attributes {dimension_semantics = [#tpu.dimension_semantics<parallel>], iteration_bounds = array<i64: 1>, scalar_prefetch = 0 : i64, scratch_operands = 0 : i64, tpu.core_type = #tpu.core_type<tc>, window_params = [{transform_indices = @transform_0, window_bounds = array<i64: 8, 512>}, {pipeline_mode = #tpu.pipeline_mode<synchronous>, transform_indices = @transform_1, window_bounds = array<i64: 1, 512>}, {pipeline_mode = #tpu.pipeline_mode<synchronous>, transform_indices = @transform_2, window_bounds = array<i64: 1, 512>}, {transform_indices = @transform_3, window_bounds = array<i64: 8, 512>}]} {
    %c0 = arith.constant 0 : index
    %c0_0 = arith.constant 0 : index
    %0 = vector.load %arg1[%c0, %c0_0] : memref<8x512xf32, #tpu.memory_space<vmem>>, vector<8x512xf32>
    %c0_1 = arith.constant 0 : index
    %c0_2 = arith.constant 0 : index
    %1 = vector.load %arg2[%c0_1, %c0_2] : memref<1x512xf32, #tpu.memory_space<vmem>>, vector<1x512xf32>
    %2 = vector.broadcast %1 : vector<1x512xf32> to vector<8x512xf32>
    %3 = arith.mulf %0, %2 : vector<8x512xf32>
    %c0_3 = arith.constant 0 : index
    %c0_4 = arith.constant 0 : index
    %4 = vector.load %arg3[%c0_3, %c0_4] : memref<1x512xf32, #tpu.memory_space<vmem>>, vector<1x512xf32>
    %5 = vector.broadcast %4 : vector<1x512xf32> to vector<8x512xf32>
    %6 = arith.addf %3, %5 : vector<8x512xf32>
    %cst = arith.constant 0.000000e+00 : f32
    %7 = vector.broadcast %cst : f32 to vector<8x512xf32>
    %8 = arith.maximumf %6, %7 : vector<8x512xf32>
    %c0_5 = arith.constant 0 : index
    %c0_6 = arith.constant 0 : index
    %9 = vector.load %arg4[%c0_5, %c0_6] : memref<8x512xf32, #tpu.memory_space<vmem>>, vector<8x512xf32>
    tpu.vector_store %arg4[%c0_5, %c0_6], %8 {strides = array<i32>} : memref<8x512xf32, #tpu.memory_space<vmem>>, vector<8x512xf32>,
    return
  }
  func.func @transform_0(%arg0: i32) -> (i32, i32) {
    %c0_i32 = arith.constant 0 : i32
    %c0_i32_0 = arith.constant 0 : i32
    return %arg0, %c0_i32 : i32, i32
  }
  func.func @transform_1(%arg0: i32) -> (i32, i32) {
    %c0_i32 = arith.constant 0 : i32
    %c0_i32_0 = arith.constant 0 : i32
    %c0_i32_1 = arith.constant 0 : i32
    return %c0_i32, %c0_i32_0 : i32, i32
  }
  func.func @transform_2(%arg0: i32) -> (i32, i32) {
    %c0_i32 = arith.constant 0 : i32
    %c0_i32_0 = arith.constant 0 : i32
    %c0_i32_1 = arith.constant 0 : i32
    return %c0_i32, %c0_i32_0 : i32, i32
  }
  func.func @transform_3(%arg0: i32) -> (i32, i32) {
    %c0_i32 = arith.constant 0 : i32
    %c0_i32_0 = arith.constant 0 : i32
    return %arg0, %c0_i32 : i32, i32
  }
}

module attributes {stable_mosaic.version = 11 : i64} {
  func.func @_bn_add_relu_kernel(%arg0: i32, %arg1: memref<8x512xf32, #tpu.memory_space<vmem>>, %arg2: memref<1x512xf32, #tpu.memory_space<vmem>>, %arg3: memref<1x512xf32, #tpu.memory_space<vmem>>, %arg4: memref<8x512xf32, #tpu.memory_space<vmem>>, %arg5: memref<8x512xf32, #tpu.memory_space<vmem>>) attributes {dimension_semantics = [#tpu.dimension_semantics<parallel>], iteration_bounds = array<i64: 1>, scalar_prefetch = 0 : i64, scratch_operands = 0 : i64, tpu.core_type = #tpu.core_type<tc>, window_params = [{transform_indices = @transform_0, window_bounds = array<i64: 8, 512>}, {pipeline_mode = #tpu.pipeline_mode<synchronous>, transform_indices = @transform_1, window_bounds = array<i64: 1, 512>}, {pipeline_mode = #tpu.pipeline_mode<synchronous>, transform_indices = @transform_2, window_bounds = array<i64: 1, 512>}, {transform_indices = @transform_3, window_bounds = array<i64: 8, 512>}, {transform_indices = @transform_4, window_bounds = array<i64: 8, 512>}]} {
    %c0 = arith.constant 0 : index
    %c0_0 = arith.constant 0 : index
    %0 = vector.load %arg1[%c0, %c0_0] : memref<8x512xf32, #tpu.memory_space<vmem>>, vector<8x512xf32>
    %c0_1 = arith.constant 0 : index
    %c0_2 = arith.constant 0 : index
    %1 = vector.load %arg2[%c0_1, %c0_2] : memref<1x512xf32, #tpu.memory_space<vmem>>, vector<1x512xf32>
    %2 = vector.broadcast %1 : vector<1x512xf32> to vector<8x512xf32>
    %3 = arith.mulf %0, %2 : vector<8x512xf32>
    %c0_3 = arith.constant 0 : index
    %c0_4 = arith.constant 0 : index
    %4 = vector.load %arg3[%c0_3, %c0_4] : memref<1x512xf32, #tpu.memory_space<vmem>>, vector<1x512xf32>
    %5 = vector.broadcast %4 : vector<1x512xf32> to vector<8x512xf32>
    %6 = arith.addf %3, %5 : vector<8x512xf32>
    %c0_5 = arith.constant 0 : index
    %c0_6 = arith.constant 0 : index
    %7 = vector.load %arg4[%c0_5, %c0_6] : memref<8x512xf32, #tpu.memory_space<vmem>>, vector<8x512xf32>
    %8 = arith.addf %6, %7 : vector<8x512xf32>
    %cst = arith.constant 0.000000e+00 : f32
    %9 = vector.broadcast %cst : f32 to vector<8x512xf32>
    %10 = arith.maximumf %8, %9 : vector<8x512xf32>
    %c0_7 = arith.constant 0 : index
    %c0_8 = arith.constant 0 : index
    %11 = vector.load %arg5[%c0_7, %c0_8] : memref<8x512xf32, #tpu.memory_space<vmem>>, vector<8x512xf32>
    tpu.vector_store %arg5[%c0_7, %c0_8], %10 {strides = array<i32>} : memref<8x512xf32, #tpu.memory_space<vmem>>, vector<8x512xf32>,
    return
  }
  func.func @transform_0(%arg0: i32) -> (i32, i32) {
    %c0_i32 = arith.constant 0 : i32
    %c0_i32_0 = arith.constant 0 : i32
    return %arg0, %c0_i32 : i32, i32
  }
  func.func @transform_1(%arg0: i32) -> (i32, i32) {
    %c0_i32 = arith.constant 0 : i32
    %c0_i32_0 = arith.constant 0 : i32
    %c0_i32_1 = arith.constant 0 : i32
    return %c0_i32, %c0_i32_0 : i32, i32
  }
  func.func @transform_2(%arg0: i32) -> (i32, i32) {
    %c0_i32 = arith.constant 0 : i32
    %c0_i32_0 = arith.constant 0 : i32
    %c0_i32_1 = arith.constant 0 : i32
    return %c0_i32, %c0_i32_0 : i32, i32
  }
  func.func @transform_3(%arg0: i32) -> (i32, i32) {
    %c0_i32 = arith.constant 0 : i32
    %c0_i32_0 = arith.constant 0 : i32
    return %arg0, %c0_i32 : i32, i32
  }
  func.func @transform_4(%arg0: i32) -> (i32, i32) {
    %c0_i32 = arith.constant 0 : i32
    %c0_i32_0 = arith.constant 0 : i32
    return %arg0, %c0_i32 : i32, i32
  }
}

module attributes {stable_mosaic.version = 11 : i64} {
  func.func @_matmul_bias_kernel(%arg0: i32, %arg1: i32, %arg2: i32, %arg3: memref<16x256xbf16, #tpu.memory_space<vmem>>, %arg4: memref<256x256xbf16, #tpu.memory_space<vmem>>, %arg5: memref<1x256xf32, #tpu.memory_space<vmem>>, %arg6: memref<16x256xf32, #tpu.memory_space<vmem>>, %arg7: memref<16x256xf32, #tpu.memory_space<vmem>>) attributes {dimension_semantics = [#tpu.dimension_semantics<parallel>, #tpu.dimension_semantics<parallel>, #tpu.dimension_semantics<arbitrary>], iteration_bounds = array<i64: 1, 2, 18>, scalar_prefetch = 0 : i64, scratch_operands = 1 : i64, tpu.core_type = #tpu.core_type<tc>, window_params = [{transform_indices = @transform_0, window_bounds = array<i64: 16, 256>}, {transform_indices = @transform_1, window_bounds = array<i64: 256, 256>}, {transform_indices = @transform_2, window_bounds = array<i64: 1, 256>}, {transform_indices = @transform_3, window_bounds = array<i64: 16, 256>}]} {
    %c0_i32 = arith.constant 0 : i32
    %0 = arith.cmpi eq, %arg2, %c0_i32 : i32
    %1 = arith.extui %0 : i1 to i32
    %c0_i32_0 = arith.constant 0 : i32
    %2 = arith.cmpi ne, %1, %c0_i32_0 : i32
    scf.if %2 {
      %cst_9 = arith.constant 0.000000e+00 : f32
      %12 = vector.broadcast %cst_9 : f32 to vector<16x256xf32>
      %c0_10 = arith.constant 0 : index
      %c0_11 = arith.constant 0 : index
      %13 = vector.load %arg7[%c0_10, %c0_11] : memref<16x256xf32, #tpu.memory_space<vmem>>, vector<16x256xf32>
      tpu.vector_store %arg7[%c0_10, %c0_11], %12 {strides = array<i32>} : memref<16x256xf32, #tpu.memory_space<vmem>>, vector<16x256xf32>,
    } else {
    }
    %c0 = arith.constant 0 : index
    %c0_1 = arith.constant 0 : index
    %3 = vector.load %arg7[%c0, %c0_1] : memref<16x256xf32, #tpu.memory_space<vmem>>, vector<16x256xf32>
    %c0_2 = arith.constant 0 : index
    %c0_3 = arith.constant 0 : index
    %4 = vector.load %arg3[%c0_2, %c0_3] : memref<16x256xbf16, #tpu.memory_space<vmem>>, vector<16x256xbf16>
    %c0_4 = arith.constant 0 : index
    %c0_5 = arith.constant 0 : index
    %5 = vector.load %arg4[%c0_4, %c0_5] : memref<256x256xbf16, #tpu.memory_space<vmem>>, vector<256x256xbf16>
    %cst = arith.constant dense<0.000000e+00> : vector<16x256xf32>
    %6 = tpu.matmul %4, %5, %cst {dimension_numbers = #tpu.dot_dimension_numbers<[1], [0], [0], [1], [0, 0, 1, 1], [], []>} : vector<16x256xbf16>, vector<256x256xbf16>, vector<16x256xf32> -> vector<16x256xf32>
    %7 = arith.addf %3, %6 : vector<16x256xf32>
    %c0_6 = arith.constant 0 : index
    %c0_7 = arith.constant 0 : index
    %8 = vector.load %arg7[%c0_6, %c0_7] : memref<16x256xf32, #tpu.memory_space<vmem>>, vector<16x256xf32>
    tpu.vector_store %arg7[%c0_6, %c0_7], %7 {strides = array<i32>} : memref<16x256xf32, #tpu.memory_space<vmem>>, vector<16x256xf32>,
    %c17_i32 = arith.constant 17 : i32
    %9 = arith.cmpi eq, %arg2, %c17_i32 : i32
    %10 = arith.extui %9 : i1 to i32
    %c0_i32_8 = arith.constant 0 : i32
    %11 = arith.cmpi ne, %10, %c0_i32_8 : i32
    scf.if %11 {
      %c0_9 = arith.constant 0 : index
      %c0_10 = arith.constant 0 : index
      %12 = vector.load %arg7[%c0_9, %c0_10] : memref<16x256xf32, #tpu.memory_space<vmem>>, vector<16x256xf32>
      %c0_11 = arith.constant 0 : index
      %c0_12 = arith.constant 0 : index
      %13 = vector.load %arg5[%c0_11, %c0_12] : memref<1x256xf32, #tpu.memory_space<vmem>>, vector<1x256xf32>
      %14 = vector.broadcast %13 : vector<1x256xf32> to vector<16x256xf32>
      %15 = arith.addf %12, %14 : vector<16x256xf32>
      %c0_13 = arith.constant 0 : index
      %c0_14 = arith.constant 0 : index
      %16 = vector.load %arg6[%c0_13, %c0_14] : memref<16x256xf32, #tpu.memory_space<vmem>>, vector<16x256xf32>
      tpu.vector_store %arg6[%c0_13, %c0_14], %15 {strides = array<i32>} : memref<16x256xf32, #tpu.memory_space<vmem>>, vector<16x256xf32>,
    } else {
    }
    return
  }
  func.func @transform_0(%arg0: i32, %arg1: i32, %arg2: i32) -> (i32, i32) {
    %c0_i32 = arith.constant 0 : i32
    return %arg0, %arg2 : i32, i32
  }
  func.func @transform_1(%arg0: i32, %arg1: i32, %arg2: i32) -> (i32, i32) {
    %c0_i32 = arith.constant 0 : i32
    return %arg2, %arg1 : i32, i32
  }
  func.func @transform_2(%arg0: i32, %arg1: i32, %arg2: i32) -> (i32, i32) {
    %c0_i32 = arith.constant 0 : i32
    %c0_i32_0 = arith.constant 0 : i32
    return %c0_i32, %arg1 : i32, i32
  }
  func.func @transform_3(%arg0: i32, %arg1: i32, %arg2: i32) -> (i32, i32) {
    %c0_i32 = arith.constant 0 : i32
    return %arg0, %arg1 : i32, i32
  }
}

module attributes {stable_mosaic.version = 11 : i64} {
  func.func @_mean_hw_kernel(%arg0: memref<2x1x512xf32, #tpu.memory_space<vmem>>, %arg1: memref<2x512xf32, #tpu.memory_space<vmem>>) attributes {dimension_semantics = [], scalar_prefetch = 0 : i64, scratch_operands = 0 : i64, tpu.core_type = #tpu.core_type<tc>} {
    %c0 = arith.constant 0 : index
    %c0_0 = arith.constant 0 : index
    %c0_1 = arith.constant 0 : index
    %0 = vector.load %arg0[%c0, %c0_0, %c0_1] : memref<2x1x512xf32, #tpu.memory_space<vmem>>, vector<2x1x512xf32>
    %cst = arith.constant dense<0.000000e+00> : vector<2x512xf32>
    %1 = vector.multi_reduction <add>, %0, %cst [1] : vector<2x1x512xf32> to vector<2x512xf32>
    %cst_2 = arith.constant 1.000000e+00 : f32
    %2 = vector.broadcast %cst_2 : f32 to vector<2x512xf32>
    %3 = arith.divf %1, %2 : vector<2x512xf32>
    %c0_3 = arith.constant 0 : index
    %c0_4 = arith.constant 0 : index
    %4 = vector.load %arg1[%c0_3, %c0_4] : memref<2x512xf32, #tpu.memory_space<vmem>>, vector<2x512xf32>
    tpu.vector_store %arg1[%c0_3, %c0_4], %3 {strides = array<i32>} : memref<2x512xf32, #tpu.memory_space<vmem>>, vector<2x512xf32>,
    return
  }
}

module attributes {stable_mosaic.version = 11 : i64} {
  func.func @_matmul_bias_kernel(%arg0: i32, %arg1: i32, %arg2: i32, %arg3: memref<16x256xbf16, #tpu.memory_space<vmem>>, %arg4: memref<256x128xbf16, #tpu.memory_space<vmem>>, %arg5: memref<1x128xf32, #tpu.memory_space<vmem>>, %arg6: memref<16x128xf32, #tpu.memory_space<vmem>>, %arg7: memref<16x128xf32, #tpu.memory_space<vmem>>) attributes {dimension_semantics = [#tpu.dimension_semantics<parallel>, #tpu.dimension_semantics<parallel>, #tpu.dimension_semantics<arbitrary>], iteration_bounds = array<i64: 1, 1, 2>, scalar_prefetch = 0 : i64, scratch_operands = 1 : i64, tpu.core_type = #tpu.core_type<tc>, window_params = [{transform_indices = @transform_0, window_bounds = array<i64: 16, 256>}, {transform_indices = @transform_1, window_bounds = array<i64: 256, 128>}, {transform_indices = @transform_2, window_bounds = array<i64: 1, 128>}, {transform_indices = @transform_3, window_bounds = array<i64: 16, 128>}]} {
    %c0_i32 = arith.constant 0 : i32
    %0 = arith.cmpi eq, %arg2, %c0_i32 : i32
    %1 = arith.extui %0 : i1 to i32
    %c0_i32_0 = arith.constant 0 : i32
    %2 = arith.cmpi ne, %1, %c0_i32_0 : i32
    scf.if %2 {
      %cst_9 = arith.constant 0.000000e+00 : f32
      %12 = vector.broadcast %cst_9 : f32 to vector<16x128xf32>
      %c0_10 = arith.constant 0 : index
      %c0_11 = arith.constant 0 : index
      %13 = vector.load %arg7[%c0_10, %c0_11] : memref<16x128xf32, #tpu.memory_space<vmem>>, vector<16x128xf32>
      tpu.vector_store %arg7[%c0_10, %c0_11], %12 {strides = array<i32>} : memref<16x128xf32, #tpu.memory_space<vmem>>, vector<16x128xf32>,
    } else {
    }
    %c0 = arith.constant 0 : index
    %c0_1 = arith.constant 0 : index
    %3 = vector.load %arg7[%c0, %c0_1] : memref<16x128xf32, #tpu.memory_space<vmem>>, vector<16x128xf32>
    %c0_2 = arith.constant 0 : index
    %c0_3 = arith.constant 0 : index
    %4 = vector.load %arg3[%c0_2, %c0_3] : memref<16x256xbf16, #tpu.memory_space<vmem>>, vector<16x256xbf16>
    %c0_4 = arith.constant 0 : index
    %c0_5 = arith.constant 0 : index
    %5 = vector.load %arg4[%c0_4, %c0_5] : memref<256x128xbf16, #tpu.memory_space<vmem>>, vector<256x128xbf16>
    %cst = arith.constant dense<0.000000e+00> : vector<16x128xf32>
    %6 = tpu.matmul %4, %5, %cst {dimension_numbers = #tpu.dot_dimension_numbers<[1], [0], [0], [1], [0, 0, 1, 1], [], []>} : vector<16x256xbf16>, vector<256x128xbf16>, vector<16x128xf32> -> vector<16x128xf32>
    %7 = arith.addf %3, %6 : vector<16x128xf32>
    %c0_6 = arith.constant 0 : index
    %c0_7 = arith.constant 0 : index
    %8 = vector.load %arg7[%c0_6, %c0_7] : memref<16x128xf32, #tpu.memory_space<vmem>>, vector<16x128xf32>
    tpu.vector_store %arg7[%c0_6, %c0_7], %7 {strides = array<i32>} : memref<16x128xf32, #tpu.memory_space<vmem>>, vector<16x128xf32>,
    %c1_i32 = arith.constant 1 : i32
    %9 = arith.cmpi eq, %arg2, %c1_i32 : i32
    %10 = arith.extui %9 : i1 to i32
    %c0_i32_8 = arith.constant 0 : i32
    %11 = arith.cmpi ne, %10, %c0_i32_8 : i32
    scf.if %11 {
      %c0_9 = arith.constant 0 : index
      %c0_10 = arith.constant 0 : index
      %12 = vector.load %arg7[%c0_9, %c0_10] : memref<16x128xf32, #tpu.memory_space<vmem>>, vector<16x128xf32>
      %c0_11 = arith.constant 0 : index
      %c0_12 = arith.constant 0 : index
      %13 = vector.load %arg5[%c0_11, %c0_12] : memref<1x128xf32, #tpu.memory_space<vmem>>, vector<1x128xf32>
      %14 = vector.broadcast %13 : vector<1x128xf32> to vector<16x128xf32>
      %15 = arith.addf %12, %14 : vector<16x128xf32>
      %c0_13 = arith.constant 0 : index
      %c0_14 = arith.constant 0 : index
      %16 = vector.load %arg6[%c0_13, %c0_14] : memref<16x128xf32, #tpu.memory_space<vmem>>, vector<16x128xf32>
      tpu.vector_store %arg6[%c0_13, %c0_14], %15 {strides = array<i32>} : memref<16x128xf32, #tpu.memory_space<vmem>>, vector<16x128xf32>,
    } else {
    }
    return
  }
  func.func @transform_0(%arg0: i32, %arg1: i32, %arg2: i32) -> (i32, i32) {
    %c0_i32 = arith.constant 0 : i32
    return %arg0, %arg2 : i32, i32
  }
  func.func @transform_1(%arg0: i32, %arg1: i32, %arg2: i32) -> (i32, i32) {
    %c0_i32 = arith.constant 0 : i32
    return %arg2, %arg1 : i32, i32
  }
  func.func @transform_2(%arg0: i32, %arg1: i32, %arg2: i32) -> (i32, i32) {
    %c0_i32 = arith.constant 0 : i32
    %c0_i32_0 = arith.constant 0 : i32
    return %c0_i32, %arg1 : i32, i32
  }
  func.func @transform_3(%arg0: i32, %arg1: i32, %arg2: i32) -> (i32, i32) {
    %c0_i32 = arith.constant 0 : i32
    return %arg0, %arg1 : i32, i32
  }
}

</mosaic_0001>

<bundles_post_ra>
// kernel: resnet_forward.39
= control target key start
LH: loop header
LB: loop body
LE: loop exit
PB: predicated region body
PF: predicated region fallthrough
CT: control target
= control target key end

     0   :  { %vm14_vm0 = vcmask 516096   ;;  %vm82_vm1 = vcmask 523264   ;;  %v428_v0 = vmov 0.0   ;;  %s786_s0 = inlined_call_operand.vmem [shape: f32[512,64], index: 0, kind: input, shape index: {}]   ;;  %s787_s1 = inlined_call_operand.vmem [shape: f32[1,64], index: 1, kind: output, shape index: {0}]   ;;  %s788_s2 = inlined_call_operand.vmem [shape: f32[1,64], index: 2, kind: output, shape index: {1}]  }
   0x1   :  { %15 = vst.msk [vmem:[%s787_s1] sm:$0x1] %vm14_vm0, %v428_v0  ;;  %v17_v1 = vld [vmem:[%s786_s0] sm:$0xff]  ;;  %v18_v2 = vld [vmem:[%s786_s0 + $0x8] sm:$0xff]  ;;  %v19_v3 = vld [vmem:[%s786_s0 + $0x10] sm:$0xff] }
   0x2   :  { %16 = vst.msk [vmem:[%s788_s2] sm:$0x1] %vm14_vm0, %v428_v0  ;;  %v83_v4 = vsel %vm82_vm1, %v17_v1, 0.0  ;;  %v84_v5 = vsel %vm82_vm1, %v18_v2, 0.0  ;;  %v86_v6 = vsel %vm82_vm1, %v19_v3, 0.0  ;;  %v20_v7 = vld [vmem:[%s786_s0 + $0x18] sm:$0xff]  ;;  %v220_v19 = vmul.f32 %v17_v1, %v17_v1 }
   0x3   :  { %v85_v8 = vadd.f32 %v84_v5, %v83_v4  ;;  %v88_v9 = vsel %vm82_vm1, %v20_v7, 0.0  ;;  %v21_v10 = vld [vmem:[%s786_s0 + $0x20] sm:$0xff]  ;;  %v22_v13 = vld [vmem:[%s786_s0 + $0x28] sm:$0xff]  ;;  %v23_v16 = vld [vmem:[%s786_s0 + $0x30] sm:$0xff]  ;;  %v221_v20 = vmul.f32 %v18_v2, %v18_v2  ;;  %v222_v24 = vmul.f32 %v19_v3, %v19_v3 }
   0x4   :  { %v90_v12 = vsel %vm82_vm1, %v21_v10, 0.0  ;;  %v92_v15 = vsel %vm82_vm1, %v22_v13, 0.0  ;;  %v94_v18 = vsel %vm82_vm1, %v23_v16, 0.0  ;;  %v24_v21 = vld [vmem:[%s786_s0 + $0x38] sm:$0xff]  ;;  %v223_v25 = vmul.f32 %v20_v7, %v20_v7  ;;  %v25_v26 = vld [vmem:[%s786_s0 + $0x40] sm:$0xff]  ;;  %v26_v32 = vld [vmem:[%s786_s0 + $0x48] sm:$0xff] }
   0x5   :  { %v87_v11 = vadd.f32 %v86_v6, %v85_v8  ;;  %v96_v23 = vsel %vm82_vm1, %v24_v21, 0.0  ;;  %v98_v28 = vsel %vm82_vm1, %v25_v26, 0.0  ;;  %v224_v29 = vmul.f32 %v21_v10, %v21_v10  ;;  %v27_v39 = vld [vmem:[%s786_s0 + $0x50] sm:$0xff]  ;;  %v28_v45 = vld [vmem:[%s786_s0 + $0x58] sm:$0xff]  ;;  %v29_v51 = vld [vmem:[%s786_s0 + $0x60] sm:$0xff] }
   0x6   :  { %v284_v30 = vsel %vm82_vm1, %v220_v19, 0.0  ;;  %v285_v31 = vsel %vm82_vm1, %v221_v20, 0.0  ;;  %v100_v35 = vsel %vm82_vm1, %v26_v32, 0.0  ;;  %v225_v36 = vmul.f32 %v22_v13, %v22_v13  ;;  %v30_v57 = vld [vmem:[%s786_s0 + $0x68] sm:$0xff]  ;;  %v31_v63 = vld [vmem:[%s786_s0 + $0x70] sm:$0xff]  ;;  %v32_v5 = vld [vmem:[%s786_s0 + $0x78] sm:$0xff] }
   0x7   :  { %v89_v14 = vadd.f32 %v88_v9, %v87_v11  ;;  %v286_v34 = vadd.f32 %v285_v31, %v284_v30  ;;  %v287_v37 = vsel %vm82_vm1, %v222_v24, 0.0  ;;  %v289_v38 = vsel %vm82_vm1, %v223_v25, 0.0  ;;  %v33_v11 = vld [vmem:[%s786_s0 + $0x80] sm:$0xff] }
   0x8   :  { %v102_v42 = vsel %vm82_vm1, %v27_v39, 0.0  ;;  %v226_v43 = vmul.f32 %v23_v16, %v23_v16  ;;  %v291_v44 = vsel %vm82_vm1, %v224_v29, 0.0  ;;  %v104_v48 = vsel %vm82_vm1, %v28_v45, 0.0  ;;  %v36_v29 = vld [vmem:[%s786_s0 + $0x98] sm:$0xff] }
   0x9   :  { %v91_v17 = vadd.f32 %v90_v12, %v89_v14  ;;  %v288_v41 = vadd.f32 %v287_v37, %v286_v34  ;;  %v227_v49 = vmul.f32 %v24_v21, %v24_v21  ;;  %v293_v50 = vsel %vm82_vm1, %v225_v36, 0.0 }
   0xa   :  { %v106_v54 = vsel %vm82_vm1, %v29_v51, 0.0  ;;  %v228_v55 = vmul.f32 %v25_v26, %v25_v26  ;;  %v295_v56 = vsel %vm82_vm1, %v226_v43, 0.0  ;;  %v108_v60 = vsel %vm82_vm1, %v30_v57, 0.0 }
   0xb   :  { %v93_v22 = vadd.f32 %v92_v15, %v91_v17  ;;  %v290_v47 = vadd.f32 %v289_v38, %v288_v41  ;;  %v229_v61 = vmul.f32 %v26_v32, %v26_v32  ;;  %v297_v62 = vsel %vm82_vm1, %v227_v49, 0.0  ;;  %v34_v17 = vld [vmem:[%s786_s0 + $0x88] sm:$0xff] }
   0xc   :  { %v110_v2 = vsel %vm82_vm1, %v31_v63, 0.0  ;;  %v230_v3 = vmul.f32 %v27_v39, %v27_v39  ;;  %v299_v4 = vsel %vm82_vm1, %v228_v55, 0.0  ;;  %v112_v8 = vsel %vm82_vm1, %v32_v5, 0.0  ;;  %v38_v41 = vld [vmem:[%s786_s0 + $0xa8] sm:$0xff] }
   0xd   :  { %v95_v27 = vadd.f32 %v94_v18, %v93_v22  ;;  %v292_v53 = vadd.f32 %v291_v44, %v290_v47  ;;  %v231_v9 = vmul.f32 %v28_v45, %v28_v45  ;;  %v301_v10 = vsel %vm82_vm1, %v229_v61, 0.0  ;;  %v39_v47 = vld [vmem:[%s786_s0 + $0xb0] sm:$0xff] }
   0xe   :  { %v114_v14 = vsel %vm82_vm1, %v33_v11, 0.0  ;;  %v232_v15 = vmul.f32 %v29_v51, %v29_v51  ;;  %v303_v16 = vsel %vm82_vm1, %v230_v3, 0.0  ;;  %v116_v20 = vsel %vm82_vm1, %v34_v17, 0.0 }
   0xf   :  { %v97_v33 = vadd.f32 %v96_v23, %v95_v27  ;;  %v294_v59 = vadd.f32 %v293_v50, %v292_v53  ;;  %v233_v21 = vmul.f32 %v30_v57, %v30_v57  ;;  %v305_v22 = vsel %vm82_vm1, %v231_v9, 0.0  ;;  %v35_v23 = vld [vmem:[%s786_s0 + $0x90] sm:$0xff]  ;;  %v40_v53 = vld [vmem:[%s786_s0 + $0xb8] sm:$0xff] }
  0x10   :  { %v118_v26 = vsel %vm82_vm1, %v35_v23, 0.0  ;;  %v234_v27 = vmul.f32 %v31_v63, %v31_v63  ;;  %v120_v32 = vsel %vm82_vm1, %v36_v29, 0.0  ;;  %v236_v39 = vmul.f32 %v33_v11, %v33_v11 }
  0x11   :  { %v99_v40 = vadd.f32 %v98_v28, %v97_v33  ;;  %v296_v1 = vadd.f32 %v295_v56, %v294_v59  ;;  %v307_v28 = vsel %vm82_vm1, %v232_v15, 0.0  ;;  %v235_v33 = vmul.f32 %v32_v5, %v32_v5  ;;  %v41_v59 = vld [vmem:[%s786_s0 + $0xc0] sm:$0xff] }
  0x12   :  { %v309_v34 = vsel %vm82_vm1, %v233_v21, 0.0  ;;  %v124_v44 = vsel %vm82_vm1, %v38_v41, 0.0  ;;  %v237_v45 = vmul.f32 %v34_v17, %v34_v17  ;;  %v126_v50 = vsel %vm82_vm1, %v39_v47, 0.0 }
  0x13   :  { %v101_v46 = vadd.f32 %v100_v35, %v99_v40  ;;  %v298_v7 = vadd.f32 %v297_v62, %v296_v1  ;;  %v37_v35 = vld [vmem:[%s786_s0 + $0xa0] sm:$0xff]  ;;  %v311_v40 = vsel %vm82_vm1, %v234_v27, 0.0  ;;  %v238_v51 = vmul.f32 %v35_v23, %v35_v23  ;;  %v42_v1 = vld [vmem:[%s786_s0 + $0xc8] sm:$0xff] }
  0x14   :  { %v122_v38 = vsel %vm82_vm1, %v37_v35, 0.0  ;;  %v128_v56 = vsel %vm82_vm1, %v40_v53, 0.0  ;;  %v239_v57 = vmul.f32 %v36_v29, %v36_v29  ;;  %v130_v62 = vsel %vm82_vm1, %v41_v59, 0.0 }
  0x15   :  { %v103_v52 = vadd.f32 %v102_v42, %v101_v46  ;;  %v300_v13 = vadd.f32 %v299_v4, %v298_v7  ;;  %v313_v46 = vsel %vm82_vm1, %v235_v33, 0.0  ;;  %v240_v63 = vmul.f32 %v37_v35, %v37_v35  ;;  %v43_v7 = vld [vmem:[%s786_s0 + $0xd0] sm:$0xff] }
  0x16   :  { %v132_v4 = vsel %vm82_vm1, %v42_v1, 0.0  ;;  %v241_v5 = vmul.f32 %v38_v41, %v38_v41  ;;  %v242_v11 = vmul.f32 %v39_v47, %v39_v47  ;;  %v243_v17 = vmul.f32 %v40_v53, %v40_v53 }
  0x17   :  { %v105_v58 = vadd.f32 %v104_v48, %v103_v52  ;;  %v302_v19 = vadd.f32 %v301_v10, %v300_v13  ;;  %v315_v52 = vsel %vm82_vm1, %v236_v39, 0.0  ;;  %v134_v10 = vsel %vm82_vm1, %v43_v7, 0.0  ;;  %v44_v13 = vld [vmem:[%s786_s0 + $0xd8] sm:$0xff] }
  0x18   :  { %v244_v23 = vmul.f32 %v41_v59, %v41_v59  ;;  %v245_v29 = vmul.f32 %v42_v1, %v42_v1  ;;  %v246_v35 = vmul.f32 %v43_v7, %v43_v7  ;;  %v247_v41 = vmul.f32 %v44_v13, %v44_v13 }
  0x19   :  { %v107_v0 = vadd.f32 %v106_v54, %v105_v58  ;;  %v304_v25 = vadd.f32 %v303_v16, %v302_v19  ;;  %v317_v58 = vsel %vm82_vm1, %v237_v45, 0.0  ;;  %v136_v16 = vsel %vm82_vm1, %v44_v13, 0.0  ;;  %v45_v19 = vld [vmem:[%s786_s0 + $0xe0] sm:$0xff] }
  0x1a   :  { %v248_v47 = vmul.f32 %v45_v19, %v45_v19 }
  0x1b   :  { %v109_v6 = vadd.f32 %v108_v60, %v107_v0  ;;  %v306_v31 = vadd.f32 %v305_v22, %v304_v25  ;;  %v319_v0 = vsel %vm82_vm1, %v238_v51, 0.0  ;;  %v138_v22 = vsel %vm82_vm1, %v45_v19, 0.0  ;;  %v46_v25 = vld [vmem:[%s786_s0 + $0xe8] sm:$0xff] }
  0x1c   :  { %v249_v53 = vmul.f32 %v46_v25, %v46_v25 }
  0x1d   :  { %v111_v12 = vadd.f32 %v110_v2, %v109_v6  ;;  %v308_v37 = vadd.f32 %v307_v28, %v306_v31  ;;  %v321_v6 = vsel %vm82_vm1, %v239_v57, 0.0  ;;  %v140_v28 = vsel %vm82_vm1, %v46_v25, 0.0  ;;  %v47_v31 = vld [vmem:[%s786_s0 + $0xf0] sm:$0xff] }
  0x1e   :  { %v250_v59 = vmul.f32 %v47_v31, %v47_v31 }
  0x1f   :  { %v113_v18 = vadd.f32 %v112_v8, %v111_v12  ;;  %v310_v43 = vadd.f32 %v309_v34, %v308_v37  ;;  %v323_v12 = vsel %vm82_vm1, %v240_v63, 0.0  ;;  %v142_v34 = vsel %vm82_vm1, %v47_v31, 0.0  ;;  %v48_v37 = vld [vmem:[%s786_s0 + $0xf8] sm:$0xff] }
  0x20   :  { %v251_v1 = vmul.f32 %v48_v37, %v48_v37 }
  0x21   :  { %v115_v24 = vadd.f32 %v114_v14, %v113_v18  ;;  %v312_v49 = vadd.f32 %v311_v40, %v310_v43  ;;  %v325_v18 = vsel %vm82_vm1, %v241_v5, 0.0  ;;  %v144_v40 = vsel %vm82_vm1, %v48_v37, 0.0  ;;  %v49_v43 = vld [vmem:[%s786_s0 + $0x100] sm:$0xff] }
  0x22   :  { %v252_v7 = vmul.f32 %v49_v43, %v49_v43 }
  0x23   :  { %v117_v30 = vadd.f32 %v116_v20, %v115_v24  ;;  %v314_v55 = vadd.f32 %v313_v46, %v312_v49  ;;  %v327_v24 = vsel %vm82_vm1, %v242_v11, 0.0  ;;  %v146_v46 = vsel %vm82_vm1, %v49_v43, 0.0  ;;  %v50_v49 = vld [vmem:[%s786_s0 + $0x108] sm:$0xff] }
  0x24   :  { %v253_v13 = vmul.f32 %v50_v49, %v50_v49 }
  0x25   :  { %v119_v36 = vadd.f32 %v118_v26, %v117_v30  ;;  %v316_v61 = vadd.f32 %v315_v52, %v314_v55  ;;  %v329_v30 = vsel %vm82_vm1, %v243_v17, 0.0  ;;  %v148_v52 = vsel %vm82_vm1, %v50_v49, 0.0  ;;  %v51_v55 = vld [vmem:[%s786_s0 + $0x110] sm:$0xff] }
  0x26   :  { %v254_v19 = vmul.f32 %v51_v55, %v51_v55 }
  0x27   :  { %v121_v42 = vadd.f32 %v120_v32, %v119_v36  ;;  %v318_v3 = vadd.f32 %v317_v58, %v316_v61  ;;  %v331_v36 = vsel %vm82_vm1, %v244_v23, 0.0  ;;  %v150_v58 = vsel %vm82_vm1, %v51_v55, 0.0  ;;  %v52_v61 = vld [vmem:[%s786_s0 + $0x118] sm:$0xff] }
  0x28   :  { %v255_v25 = vmul.f32 %v52_v61, %v52_v61 }
  0x29   :  { %v123_v48 = vadd.f32 %v122_v38, %v121_v42  ;;  %v320_v9 = vadd.f32 %v319_v0, %v318_v3  ;;  %v333_v42 = vsel %vm82_vm1, %v245_v29, 0.0  ;;  %v152_v0 = vsel %vm82_vm1, %v52_v61, 0.0  ;;  %v53_v3 = vld [vmem:[%s786_s0 + $0x120] sm:$0xff] }
  0x2a   :  { %v256_v31 = vmul.f32 %v53_v3, %v53_v3 }
  0x2b   :  { %v125_v54 = vadd.f32 %v124_v44, %v123_v48  ;;  %v322_v15 = vadd.f32 %v321_v6, %v320_v9  ;;  %v335_v48 = vsel %vm82_vm1, %v246_v35, 0.0  ;;  %v154_v6 = vsel %vm82_vm1, %v53_v3, 0.0  ;;  %v54_v9 = vld [vmem:[%s786_s0 + $0x128] sm:$0xff] }
  0x2c   :  { %v257_v37 = vmul.f32 %v54_v9, %v54_v9 }
  0x2d   :  { %v127_v60 = vadd.f32 %v126_v50, %v125_v54  ;;  %v324_v21 = vadd.f32 %v323_v12, %v322_v15  ;;  %v337_v54 = vsel %vm82_vm1, %v247_v41, 0.0  ;;  %v156_v12 = vsel %vm82_vm1, %v54_v9, 0.0  ;;  %v55_v15 = vld [vmem:[%s786_s0 + $0x130] sm:$0xff] }
  0x2e   :  { %v258_v43 = vmul.f32 %v55_v15, %v55_v15 }
  0x2f   :  { %v129_v2 = vadd.f32 %v128_v56, %v127_v60  ;;  %v326_v27 = vadd.f32 %v325_v18, %v324_v21  ;;  %v339_v60 = vsel %vm82_vm1, %v248_v47, 0.0  ;;  %v158_v18 = vsel %vm82_vm1, %v55_v15, 0.0  ;;  %v56_v21 = vld [vmem:[%s786_s0 + $0x138] sm:$0xff] }
  0x30   :  { %v259_v49 = vmul.f32 %v56_v21, %v56_v21 }
  0x31   :  { %v131_v8 = vadd.f32 %v130_v62, %v129_v2  ;;  %v328_v33 = vadd.f32 %v327_v24, %v326_v27  ;;  %v341_v2 = vsel %vm82_vm1, %v249_v53, 0.0  ;;  %v160_v24 = vsel %vm82_vm1, %v56_v21, 0.0  ;;  %v57_v27 = vld [vmem:[%s786_s0 + $0x140] sm:$0xff] }
  0x32   :  { %v260_v55 = vmul.f32 %v57_v27, %v57_v27 }
  0x33   :  { %v133_v14 = vadd.f32 %v132_v4, %v131_v8  ;;  %v330_v39 = vadd.f32 %v329_v30, %v328_v33  ;;  %v343_v8 = vsel %vm82_vm1, %v250_v59, 0.0  ;;  %v162_v30 = vsel %vm82_vm1, %v57_v27, 0.0  ;;  %v58_v33 = vld [vmem:[%s786_s0 + $0x148] sm:$0xff] }
  0x34   :  { %v261_v61 = vmul.f32 %v58_v33, %v58_v33 }
  0x35   :  { %v135_v20 = vadd.f32 %v134_v10, %v133_v14  ;;  %v332_v45 = vadd.f32 %v331_v36, %v330_v39  ;;  %v345_v14 = vsel %vm82_vm1, %v251_v1, 0.0  ;;  %v164_v36 = vsel %vm82_vm1, %v58_v33, 0.0  ;;  %v59_v39 = vld [vmem:[%s786_s0 + $0x150] sm:$0xff] }
  0x36   :  { %v262_v3 = vmul.f32 %v59_v39, %v59_v39 }
  0x37   :  { %v137_v26 = vadd.f32 %v136_v16, %v135_v20  ;;  %v334_v51 = vadd.f32 %v333_v42, %v332_v45  ;;  %v347_v20 = vsel %vm82_vm1, %v252_v7, 0.0  ;;  %v166_v42 = vsel %vm82_vm1, %v59_v39, 0.0  ;;  %v60_v45 = vld [vmem:[%s786_s0 + $0x158] sm:$0xff] }
  0x38   :  { %v263_v9 = vmul.f32 %v60_v45, %v60_v45 }
  0x39   :  { %v139_v32 = vadd.f32 %v138_v22, %v137_v26  ;;  %v336_v57 = vadd.f32 %v335_v48, %v334_v51  ;;  %v349_v26 = vsel %vm82_vm1, %v253_v13, 0.0  ;;  %v168_v48 = vsel %vm82_vm1, %v60_v45, 0.0  ;;  %v61_v51 = vld [vmem:[%s786_s0 + $0x160] sm:$0xff] }
  0x3a   :  { %v264_v15 = vmul.f32 %v61_v51, %v61_v51 }
  0x3b   :  { %v141_v38 = vadd.f32 %v140_v28, %v139_v32  ;;  %v338_v63 = vadd.f32 %v337_v54, %v336_v57  ;;  %v351_v32 = vsel %vm82_vm1, %v254_v19, 0.0  ;;  %v170_v54 = vsel %vm82_vm1, %v61_v51, 0.0  ;;  %v62_v57 = vld [vmem:[%s786_s0 + $0x168] sm:$0xff] }
  0x3c   :  { %v265_v21 = vmul.f32 %v62_v57, %v62_v57 }
  0x3d   :  { %v143_v44 = vadd.f32 %v142_v34, %v141_v38  ;;  %v340_v5 = vadd.f32 %v339_v60, %v338_v63  ;;  %v353_v38 = vsel %vm82_vm1, %v255_v25, 0.0  ;;  %v172_v60 = vsel %vm82_vm1, %v62_v57, 0.0  ;;  %v63_v63 = vld [vmem:[%s786_s0 + $0x170] sm:$0xff] }
  0x3e   :  { %v266_v27 = vmul.f32 %v63_v63, %v63_v63 }
  0x3f   :  { %v145_v50 = vadd.f32 %v144_v40, %v143_v44  ;;  %v342_v11 = vadd.f32 %v341_v2, %v340_v5  ;;  %v355_v44 = vsel %vm82_vm1, %v256_v31, 0.0  ;;  %v174_v2 = vsel %vm82_vm1, %v63_v63, 0.0  ;;  %v64_v5 = vld [vmem:[%s786_s0 + $0x178] sm:$0xff] }
  0x40   :  { %v267_v33 = vmul.f32 %v64_v5, %v64_v5 }
  0x41   :  { %v147_v56 = vadd.f32 %v146_v46, %v145_v50  ;;  %v344_v17 = vadd.f32 %v343_v8, %v342_v11  ;;  %v357_v50 = vsel %vm82_vm1, %v257_v37, 0.0  ;;  %v176_v8 = vsel %vm82_vm1, %v64_v5, 0.0  ;;  %v65_v11 = vld [vmem:[%s786_s0 + $0x180] sm:$0xff] }
  0x42   :  { %v268_v39 = vmul.f32 %v65_v11, %v65_v11 }
  0x43   :  { %v149_v62 = vadd.f32 %v148_v52, %v147_v56  ;;  %v346_v23 = vadd.f32 %v345_v14, %v344_v17  ;;  %v359_v56 = vsel %vm82_vm1, %v258_v43, 0.0  ;;  %v178_v14 = vsel %vm82_vm1, %v65_v11, 0.0  ;;  %v66_v17 = vld [vmem:[%s786_s0 + $0x188] sm:$0xff] }
  0x44   :  { %v269_v45 = vmul.f32 %v66_v17, %v66_v17 }
  0x45   :  { %v151_v4 = vadd.f32 %v150_v58, %v149_v62  ;;  %v348_v29 = vadd.f32 %v347_v20, %v346_v23  ;;  %v361_v62 = vsel %vm82_vm1, %v259_v49, 0.0  ;;  %v180_v20 = vsel %vm82_vm1, %v66_v17, 0.0  ;;  %v67_v23 = vld [vmem:[%s786_s0 + $0x190] sm:$0xff] }
  0x46   :  { %v270_v51 = vmul.f32 %v67_v23, %v67_v23 }
  0x47   :  { %v153_v10 = vadd.f32 %v152_v0, %v151_v4  ;;  %v350_v35 = vadd.f32 %v349_v26, %v348_v29  ;;  %v363_v4 = vsel %vm82_vm1, %v260_v55, 0.0  ;;  %v182_v26 = vsel %vm82_vm1, %v67_v23, 0.0  ;;  %v68_v29 = vld [vmem:[%s786_s0 + $0x198] sm:$0xff] }
  0x48   :  { %v271_v57 = vmul.f32 %v68_v29, %v68_v29 }
  0x49   :  { %v155_v16 = vadd.f32 %v154_v6, %v153_v10  ;;  %v352_v41 = vadd.f32 %v351_v32, %v350_v35  ;;  %v365_v10 = vsel %vm82_vm1, %v261_v61, 0.0  ;;  %v184_v32 = vsel %vm82_vm1, %v68_v29, 0.0  ;;  %v69_v35 = vld [vmem:[%s786_s0 + $0x1a0] sm:$0xff] }
  0x4a   :  { %v272_v63 = vmul.f32 %v69_v35, %v69_v35 }
  0x4b   :  { %v157_v22 = vadd.f32 %v156_v12, %v155_v16  ;;  %v354_v47 = vadd.f32 %v353_v38, %v352_v41  ;;  %v367_v16 = vsel %vm82_vm1, %v262_v3, 0.0  ;;  %v186_v38 = vsel %vm82_vm1, %v69_v35, 0.0  ;;  %v70_v41 = vld [vmem:[%s786_s0 + $0x1a8] sm:$0xff] }
  0x4c   :  { %v273_v5 = vmul.f32 %v70_v41, %v70_v41 }
  0x4d   :  { %v159_v28 = vadd.f32 %v158_v18, %v157_v22  ;;  %v356_v53 = vadd.f32 %v355_v44, %v354_v47  ;;  %v369_v22 = vsel %vm82_vm1, %v263_v9, 0.0  ;;  %v188_v44 = vsel %vm82_vm1, %v70_v41, 0.0  ;;  %v71_v47 = vld [vmem:[%s786_s0 + $0x1b0] sm:$0xff] }
  0x4e   :  { %v274_v11 = vmul.f32 %v71_v47, %v71_v47 }
  0x4f   :  { %v161_v34 = vadd.f32 %v160_v24, %v159_v28  ;;  %v358_v59 = vadd.f32 %v357_v50, %v356_v53  ;;  %v371_v28 = vsel %vm82_vm1, %v264_v15, 0.0  ;;  %v190_v50 = vsel %vm82_vm1, %v71_v47, 0.0  ;;  %v72_v53 = vld [vmem:[%s786_s0 + $0x1b8] sm:$0xff] }
  0x50   :  { %v275_v17 = vmul.f32 %v72_v53, %v72_v53 }
  0x51   :  { %v163_v40 = vadd.f32 %v162_v30, %v161_v34  ;;  %v360_v1 = vadd.f32 %v359_v56, %v358_v59  ;;  %v373_v34 = vsel %vm82_vm1, %v265_v21, 0.0  ;;  %v192_v56 = vsel %vm82_vm1, %v72_v53, 0.0  ;;  %v73_v59 = vld [vmem:[%s786_s0 + $0x1c0] sm:$0xff] }
  0x52   :  { %v276_v23 = vmul.f32 %v73_v59, %v73_v59 }
  0x53   :  { %v165_v46 = vadd.f32 %v164_v36, %v163_v40  ;;  %v362_v7 = vadd.f32 %v361_v62, %v360_v1  ;;  %v375_v40 = vsel %vm82_vm1, %v266_v27, 0.0  ;;  %v194_v62 = vsel %vm82_vm1, %v73_v59, 0.0  ;;  %v74_v1 = vld [vmem:[%s786_s0 + $0x1c8] sm:$0xff] }
  0x54   :  { %v277_v29 = vmul.f32 %v74_v1, %v74_v1 }
  0x55   :  { %v167_v52 = vadd.f32 %v166_v42, %v165_v46  ;;  %v364_v13 = vadd.f32 %v363_v4, %v362_v7  ;;  %v377_v46 = vsel %vm82_vm1, %v267_v33, 0.0  ;;  %v196_v4 = vsel %vm82_vm1, %v74_v1, 0.0  ;;  %v75_v7 = vld [vmem:[%s786_s0 + $0x1d0] sm:$0xff] }
  0x56   :  { %v278_v35 = vmul.f32 %v75_v7, %v75_v7 }
  0x57   :  { %v169_v58 = vadd.f32 %v168_v48, %v167_v52  ;;  %v366_v19 = vadd.f32 %v365_v10, %v364_v13  ;;  %v379_v52 = vsel %vm82_vm1, %v268_v39, 0.0  ;;  %v198_v10 = vsel %vm82_vm1, %v75_v7, 0.0  ;;  %v76_v13 = vld [vmem:[%s786_s0 + $0x1d8] sm:$0xff] }
  0x58   :  { %v279_v41 = vmul.f32 %v76_v13, %v76_v13 }
  0x59   :  { %v171_v0 = vadd.f32 %v170_v54, %v169_v58  ;;  %v368_v25 = vadd.f32 %v367_v16, %v366_v19  ;;  %v381_v58 = vsel %vm82_vm1, %v269_v45, 0.0  ;;  %v200_v16 = vsel %vm82_vm1, %v76_v13, 0.0  ;;  %v77_v19 = vld [vmem:[%s786_s0 + $0x1e0] sm:$0xff] }
  0x5a   :  { %v280_v45 = vmul.f32 %v77_v19, %v77_v19 }
  0x5b   :  { %v173_v6 = vadd.f32 %v172_v60, %v171_v0  ;;  %v370_v31 = vadd.f32 %v369_v22, %v368_v25  ;;  %v383_v0 = vsel %vm82_vm1, %v270_v51, 0.0  ;;  %v202_v22 = vsel %vm82_vm1, %v77_v19, 0.0  ;;  %v78_v25 = vld [vmem:[%s786_s0 + $0x1e8] sm:$0xff] }
  0x5d   :  { %v175_v12 = vadd.f32 %v174_v2, %v173_v6  ;;  %v372_v37 = vadd.f32 %v371_v28, %v370_v31  ;;  %v385_v6 = vsel %vm82_vm1, %v271_v57, 0.0  ;;  %v204_v28 = vsel %vm82_vm1, %v78_v25, 0.0  ;;  %v79_v31 = vld [vmem:[%s786_s0 + $0x1f0] sm:$0xff] }
  0x5e   :  { %v282_v53 = vmul.f32 %v79_v31, %v79_v31 }
  0x5f   :  { %v177_v18 = vadd.f32 %v176_v8, %v175_v12  ;;  %v374_v43 = vadd.f32 %v373_v34, %v372_v37  ;;  %v387_v12 = vsel %vm82_vm1, %v272_v63, 0.0  ;;  %v206_v34 = vsel %vm82_vm1, %v79_v31, 0.0  ;;  %v80_v37 = vld [vmem:[%s786_s0 + $0x1f8] sm:$0xff] }
  0x60   :  { %v283_v57 = vmul.f32 %v80_v37, %v80_v37 }
  0x61   :  { %v179_v24 = vadd.f32 %v178_v14, %v177_v18  ;;  %v376_v49 = vadd.f32 %v375_v40, %v374_v43  ;;  %v389_v18 = vsel %vm82_vm1, %v273_v5, 0.0  ;;  %v208_v40 = vsel %vm82_vm1, %v80_v37, 0.0 }
  0x63   :  { %v181_v30 = vadd.f32 %v180_v20, %v179_v24  ;;  %v378_v55 = vadd.f32 %v377_v46, %v376_v49  ;;  %v391_v24 = vsel %vm82_vm1, %v274_v11, 0.0  ;;  %v399_v46 = vsel %vm82_vm1, %v278_v35, 0.0 }
  0x64   :  { %v281_v49 = vmul.f32 %v78_v25, %v78_v25 }
  0x65   :  { %v183_v36 = vadd.f32 %v182_v26, %v181_v30  ;;  %v380_v61 = vadd.f32 %v379_v52, %v378_v55  ;;  %v393_v30 = vsel %vm82_vm1, %v275_v17, 0.0 }
  0x67   :  { %v185_v42 = vadd.f32 %v184_v32, %v183_v36  ;;  %v382_v3 = vadd.f32 %v381_v58, %v380_v61  ;;  %v395_v36 = vsel %vm82_vm1, %v276_v23, 0.0  ;;  %v405_v58 = vsel %vm82_vm1, %v281_v49, 0.0 }
  0x68   :  { %v407_v61 = vsel %vm82_vm1, %v282_v53, 0.0 }
  0x69   :  { %v187_v48 = vadd.f32 %v186_v38, %v185_v42  ;;  %v384_v9 = vadd.f32 %v383_v0, %v382_v3  ;;  %v397_v42 = vsel %vm82_vm1, %v277_v29, 0.0  ;;  %v409_v0 = vsel %vm82_vm1, %v283_v57, 0.0  ;;  %v81_v3 = vld [vmem:[%s787_s1] sm:$0x1] }
  0x6b   :  { %v189_v54 = vadd.f32 %v188_v44, %v187_v48  ;;  %v386_v15 = vadd.f32 %v385_v6, %v384_v9 }
  0x6d   :  { %v191_v60 = vadd.f32 %v190_v50, %v189_v54  ;;  %v388_v21 = vadd.f32 %v387_v12, %v386_v15  ;;  %v401_v50 = vsel %vm82_vm1, %v279_v41, 0.0  ;;  %v403_v54 = vsel %vm82_vm1, %v280_v45, 0.0  ;;  %v219_v12 = vld [vmem:[%s788_s2] sm:$0x1] }
  0x6f   :  { %v193_v2 = vadd.f32 %v192_v56, %v191_v60  ;;  %v390_v27 = vadd.f32 %v389_v18, %v388_v21 }
  0x71   :  { %v195_v8 = vadd.f32 %v194_v62, %v193_v2  ;;  %v392_v33 = vadd.f32 %v391_v24, %v390_v27 }
  0x73   :  { %v197_v14 = vadd.f32 %v196_v4, %v195_v8  ;;  %v394_v39 = vadd.f32 %v393_v30, %v392_v33 }
  0x75   :  { %v199_v20 = vadd.f32 %v198_v10, %v197_v14  ;;  %v396_v44 = vadd.f32 %v395_v36, %v394_v39 }
  0x77   :  { %v201_v26 = vadd.f32 %v200_v16, %v199_v20  ;;  %v398_v48 = vadd.f32 %v397_v42, %v396_v44 }
  0x79   :  { %v203_v32 = vadd.f32 %v202_v22, %v201_v26  ;;  %v400_v52 = vadd.f32 %v399_v46, %v398_v48 }
  0x7b   :  { %v205_v38 = vadd.f32 %v204_v28, %v203_v32  ;;  %v402_v56 = vadd.f32 %v401_v50, %v400_v52 }
  0x7d   :  { %v207_v43 = vadd.f32 %v206_v34, %v205_v38  ;;  %v404_v60 = vadd.f32 %v403_v54, %v402_v56 }
  0x7f   :  { %v209_v47 = vadd.f32 %v208_v40, %v207_v43  ;;  %v406_v63 = vadd.f32 %v405_v58, %v404_v60 }
  0x81   :  { %v210_v51 = vrot.slane %v209_v47, 4  ;;  %v408_v2 = vadd.f32 %v407_v61, %v406_v63 }
  0x83   :  { %v211_v55 = vadd.f32 %v210_v51, %v209_v47  ;;  %v410_v5 = vadd.f32 %v409_v0, %v408_v2 }
  0x85   :  { %v212_v59 = vrot.slane %v211_v55, 2  ;;  %v411_v7 = vrot.slane %v410_v5, 4 }
  0x87   :  { %v213_v62 = vadd.f32 %v212_v59, %v211_v55  ;;  %v412_v8 = vadd.f32 %v411_v7, %v410_v5 }
  0x89   :  { %v214_v1 = vrot.slane %v213_v62, 1  ;;  %v413_v9 = vrot.slane %v412_v8, 2 }
  0x8b   :  { %v215_v4 = vadd.f32 %v214_v1, %v213_v62  ;;  %v414_v10 = vadd.f32 %v413_v9, %v412_v8 }
  0x8d   :  { %v216_v6 = vadd.f32 %v215_v4, %v81_v3  ;;  %v415_v11 = vrot.slane %v414_v10, 1 }
  0x8f   :  { %218 = vst.msk [vmem:[%s787_s1] sm:$0x1] %vm14_vm0, %v216_v6  ;;  %v416_v13 = vadd.f32 %v415_v11, %v414_v10 }
  0x91   :  { %v417_v14 = vadd.f32 %v416_v13, %v219_v12 }
  0x93   :  { %418 = vst.msk [vmem:[%s788_s2] sm:$0x1] %vm14_vm0, %v417_v14 }

// kernel: resnet_forward.40
= control target key start
LH: loop header
LB: loop body
LE: loop exit
PB: predicated region body
PF: predicated region fallthrough
CT: control target
= control target key end

     0   :  { %vm278_vm0 = vcmask 523264   ;;  %s958_s0 = inlined_call_operand.vmem [shape: f32[512,64], index: 0, kind: input, shape index: {}]   ;;  %s959_s1 = inlined_call_operand.vmem [shape: f32[1,64], index: 1, kind: input, shape index: {}]   ;;  %s960_s2 = inlined_call_operand.vmem [shape: f32[1,64], index: 2, kind: input, shape index: {}]   ;;  %s961_s3 = inlined_call_operand.vmem [shape: f32[512,64], index: 3, kind: output, shape index: {}]  }
   0x1   :  { %v14_v0 = vld [vmem:[%s958_s0] sm:$0xff]  ;;  %v15_v3 = vld [vmem:[%s958_s0 + $0x8] sm:$0xff]  ;;  %v16_v6 = vld [vmem:[%s958_s0 + $0x10] sm:$0xff] }
   0x2   :  { %v375_v1 = vld [vmem:[%s959_s1] ss:$0 sm:$0xff]  ;;  %v17_v7 = vld [vmem:[%s958_s0 + $0x18] sm:$0xff]  ;;  %v19_v12 = vld [vmem:[%s958_s0 + $0x28] sm:$0xff] }
   0x3   :  { %v380_v2 = vld [vmem:[%s960_s2] ss:$0 sm:$0xff]  ;;  %v82_v4 = vmul.f32 %v375_v1, %v14_v0  ;;  %v83_v5 = vmul.f32 %v375_v1, %v15_v3  ;;  %v84_v9 = vmul.f32 %v375_v1, %v16_v6  ;;  %v85_v10 = vmul.f32 %v375_v1, %v17_v7  ;;  %v20_v13 = vld [vmem:[%s958_s0 + $0x30] sm:$0xff]  ;;  %v21_v14 = vld [vmem:[%s958_s0 + $0x38] sm:$0xff] }
   0x4   :  { %v18_v8 = vld [vmem:[%s958_s0 + $0x20] sm:$0xff]  ;;  %v87_v17 = vmul.f32 %v375_v1, %v19_v12  ;;  %v88_v18 = vmul.f32 %v375_v1, %v20_v13  ;;  %v89_v22 = vmul.f32 %v375_v1, %v21_v14  ;;  %v23_v24 = vld [vmem:[%s958_s0 + $0x48] sm:$0xff]  ;;  %v24_v29 = vld [vmem:[%s958_s0 + $0x50] sm:$0xff] }
   0x5   :  { %v86_v11 = vmul.f32 %v375_v1, %v18_v8  ;;  %v150_v15 = vadd.f32 %v380_v2, %v82_v4  ;;  %v151_v16 = vadd.f32 %v380_v2, %v83_v5  ;;  %v152_v19 = vadd.f32 %v380_v2, %v84_v9  ;;  %v22_v23 = vld [vmem:[%s958_s0 + $0x40] sm:$0xff]  ;;  %v25_v30 = vld [vmem:[%s958_s0 + $0x58] sm:$0xff]  ;;  %v27_v35 = vld [vmem:[%s958_s0 + $0x68] sm:$0xff] }
   0x6   :  { %v153_v20 = vadd.f32 %v380_v2, %v85_v10  ;;  %v155_v27 = vadd.f32 %v380_v2, %v87_v17  ;;  %v156_v28 = vadd.f32 %v380_v2, %v88_v18  ;;  %v26_v31 = vld [vmem:[%s958_s0 + $0x60] sm:$0xff]  ;;  %v157_v34 = vadd.f32 %v380_v2, %v89_v22  ;;  %v28_v36 = vld [vmem:[%s958_s0 + $0x70] sm:$0xff]  ;;  %v29_v41 = vld [vmem:[%s958_s0 + $0x78] sm:$0xff] }
   0x7   :  { %v154_v21 = vadd.f32 %v380_v2, %v86_v11  ;;  %v214_v25 = vmax.f32 %v150_v15, 0.0  ;;  %v215_v26 = vmax.f32 %v151_v16, 0.0  ;;  %v216_v32 = vmax.f32 %v152_v19, 0.0  ;;  %v30_v54 = vld [vmem:[%s958_s0 + $0x80] sm:$0xff]  ;;  %v31_v55 = vld [vmem:[%s958_s0 + $0x88] sm:$0xff]  ;;  %v32_v58 = vld [vmem:[%s958_s0 + $0x90] sm:$0xff] }
   0x8   :  { %v217_v33 = vmax.f32 %v153_v20, 0.0  ;;  %v219_v38 = vmax.f32 %v155_v27, 0.0  ;;  %v90_v39 = vmul.f32 %v375_v1, %v22_v23  ;;  %v91_v40 = vmul.f32 %v375_v1, %v23_v24  ;;  %v33_v59 = vld [vmem:[%s958_s0 + $0x98] sm:$0xff]  ;;  %v34_v62 = vld [vmem:[%s958_s0 + $0xa0] sm:$0xff]  ;;  %v35_v5 = vld [vmem:[%s958_s0 + $0xa8] sm:$0xff] }
   0x9   :  { %279 = vst.msk [vmem:[%s961_s3] sm:$0xff] %vm278_vm0, %v214_v25  ;;  %v218_v37 = vmax.f32 %v154_v21, 0.0  ;;  %v220_v42 = vmax.f32 %v156_v28, 0.0  ;;  %v92_v43 = vmul.f32 %v375_v1, %v24_v29  ;;  %v93_v44 = vmul.f32 %v375_v1, %v25_v30  ;;  %v36_v10 = vld [vmem:[%s958_s0 + $0xb0] sm:$0xff]  ;;  %v37_v14 = vld [vmem:[%s958_s0 + $0xb8] sm:$0xff]  ;;  %v38_v18 = vld [vmem:[%s958_s0 + $0xc0] sm:$0xff] }
   0xa   :  { %280 = vst.msk [vmem:[%s961_s3 + $0x8] sm:$0xff] %vm278_vm0, %v215_v26  ;;  %v94_v45 = vmul.f32 %v375_v1, %v26_v31  ;;  %v158_v46 = vadd.f32 %v380_v2, %v90_v39  ;;  %v159_v47 = vadd.f32 %v380_v2, %v91_v40  ;;  %v95_v48 = vmul.f32 %v375_v1, %v27_v35  ;;  %v39_v22 = vld [vmem:[%s958_s0 + $0xc8] sm:$0xff]  ;;  %v40_v26 = vld [vmem:[%s958_s0 + $0xd0] sm:$0xff]  ;;  %v41_v30 = vld [vmem:[%s958_s0 + $0xd8] sm:$0xff] }
   0xb   :  { %281 = vst.msk [vmem:[%s961_s3 + $0x10] sm:$0xff] %vm278_vm0, %v216_v32  ;;  %v96_v49 = vmul.f32 %v375_v1, %v28_v36  ;;  %v221_v50 = vmax.f32 %v157_v34, 0.0  ;;  %v160_v51 = vadd.f32 %v380_v2, %v92_v43  ;;  %v161_v52 = vadd.f32 %v380_v2, %v93_v44  ;;  %v42_v34 = vld [vmem:[%s958_s0 + $0xe0] sm:$0xff] }
   0xc   :  { %282 = vst.msk [vmem:[%s961_s3 + $0x18] sm:$0xff] %vm278_vm0, %v217_v33  ;;  %v97_v53 = vmul.f32 %v375_v1, %v29_v41  ;;  %v222_v56 = vmax.f32 %v158_v46, 0.0  ;;  %v162_v57 = vadd.f32 %v380_v2, %v94_v45  ;;  %v223_v60 = vmax.f32 %v159_v47, 0.0  ;;  %v45_v46 = vld [vmem:[%s958_s0 + $0xf8] sm:$0xff] }
   0xd   :  { %283 = vst.msk [vmem:[%s961_s3 + $0x20] sm:$0xff] %vm278_vm0, %v218_v37  ;;  %v163_v61 = vadd.f32 %v380_v2, %v95_v48  ;;  %v224_v63 = vmax.f32 %v160_v51, 0.0  ;;  %v164_v0 = vadd.f32 %v380_v2, %v96_v49  ;;  %v98_v3 = vmul.f32 %v375_v1, %v30_v54  ;;  %v47_v54 = vld [vmem:[%s958_s0 + $0x108] sm:$0xff] }
   0xe   :  { %284 = vst.msk [vmem:[%s961_s3 + $0x28] sm:$0xff] %vm278_vm0, %v219_v38  ;;  %v99_v4 = vmul.f32 %v375_v1, %v31_v55  ;;  %v225_v6 = vmax.f32 %v161_v52, 0.0  ;;  %v165_v7 = vadd.f32 %v380_v2, %v97_v53  ;;  %v100_v8 = vmul.f32 %v375_v1, %v32_v58  ;;  %v43_v38 = vld [vmem:[%s958_s0 + $0xe8] sm:$0xff]  ;;  %v48_v58 = vld [vmem:[%s958_s0 + $0x110] sm:$0xff] }
   0xf   :  { %285 = vst.msk [vmem:[%s961_s3 + $0x30] sm:$0xff] %vm278_vm0, %v220_v42  ;;  %v101_v9 = vmul.f32 %v375_v1, %v33_v59  ;;  %v226_v11 = vmax.f32 %v162_v57, 0.0  ;;  %v166_v12 = vadd.f32 %v380_v2, %v98_v3  ;;  %v102_v13 = vmul.f32 %v375_v1, %v34_v62  ;;  %v44_v42 = vld [vmem:[%s958_s0 + $0xf0] sm:$0xff]  ;;  %v49_v62 = vld [vmem:[%s958_s0 + $0x118] sm:$0xff] }
  0x10   :  { %286 = vst.msk [vmem:[%s961_s3 + $0x38] sm:$0xff] %vm278_vm0, %v221_v50  ;;  %v227_v15 = vmax.f32 %v163_v61, 0.0  ;;  %v167_v16 = vadd.f32 %v380_v2, %v99_v4  ;;  %v103_v17 = vmul.f32 %v375_v1, %v35_v5  ;;  %v228_v19 = vmax.f32 %v164_v0, 0.0  ;;  %v46_v50 = vld [vmem:[%s958_s0 + $0x100] sm:$0xff] }
  0x11   :  { %287 = vst.msk [vmem:[%s961_s3 + $0x40] sm:$0xff] %vm278_vm0, %v222_v56  ;;  %v168_v20 = vadd.f32 %v380_v2, %v100_v8  ;;  %v104_v21 = vmul.f32 %v375_v1, %v36_v10  ;;  %v229_v23 = vmax.f32 %v165_v7, 0.0  ;;  %v169_v24 = vadd.f32 %v380_v2, %v101_v9  ;;  %v50_v4 = vld [vmem:[%s958_s0 + $0x120] sm:$0xff]  ;;  %v51_v8 = vld [vmem:[%s958_s0 + $0x128] sm:$0xff] }
  0x12   :  { %288 = vst.msk [vmem:[%s961_s3 + $0x48] sm:$0xff] %vm278_vm0, %v223_v60  ;;  %v105_v25 = vmul.f32 %v375_v1, %v37_v14  ;;  %v230_v27 = vmax.f32 %v166_v12, 0.0  ;;  %v170_v28 = vadd.f32 %v380_v2, %v102_v13  ;;  %v106_v29 = vmul.f32 %v375_v1, %v38_v18  ;;  %v52_v12 = vld [vmem:[%s958_s0 + $0x130] sm:$0xff] }
  0x13   :  { %289 = vst.msk [vmem:[%s961_s3 + $0x50] sm:$0xff] %vm278_vm0, %v224_v63  ;;  %v231_v31 = vmax.f32 %v167_v16, 0.0  ;;  %v171_v32 = vadd.f32 %v380_v2, %v103_v17  ;;  %v107_v33 = vmul.f32 %v375_v1, %v39_v22  ;;  %v232_v35 = vmax.f32 %v168_v20, 0.0  ;;  %v53_v16 = vld [vmem:[%s958_s0 + $0x138] sm:$0xff]  ;;  %v54_v20 = vld [vmem:[%s958_s0 + $0x140] sm:$0xff] }
  0x14   :  { %290 = vst.msk [vmem:[%s961_s3 + $0x58] sm:$0xff] %vm278_vm0, %v225_v6  ;;  %v172_v36 = vadd.f32 %v380_v2, %v104_v21  ;;  %v108_v37 = vmul.f32 %v375_v1, %v40_v26  ;;  %v233_v39 = vmax.f32 %v169_v24, 0.0  ;;  %v173_v40 = vadd.f32 %v380_v2, %v105_v25  ;;  %v55_v24 = vld [vmem:[%s958_s0 + $0x148] sm:$0xff] }
  0x15   :  { %291 = vst.msk [vmem:[%s961_s3 + $0x60] sm:$0xff] %vm278_vm0, %v226_v11  ;;  %v109_v41 = vmul.f32 %v375_v1, %v41_v30  ;;  %v234_v43 = vmax.f32 %v170_v28, 0.0  ;;  %v174_v44 = vadd.f32 %v380_v2, %v106_v29  ;;  %v110_v45 = vmul.f32 %v375_v1, %v42_v34  ;;  %v56_v28 = vld [vmem:[%s958_s0 + $0x150] sm:$0xff] }
  0x16   :  { %292 = vst.msk [vmem:[%s961_s3 + $0x68] sm:$0xff] %vm278_vm0, %v227_v15  ;;  %v235_v47 = vmax.f32 %v171_v32, 0.0  ;;  %v175_v48 = vadd.f32 %v380_v2, %v107_v33  ;;  %v111_v49 = vmul.f32 %v375_v1, %v43_v38  ;;  %v236_v51 = vmax.f32 %v172_v36, 0.0  ;;  %v57_v32 = vld [vmem:[%s958_s0 + $0x158] sm:$0xff]  ;;  %v58_v36 = vld [vmem:[%s958_s0 + $0x160] sm:$0xff] }
  0x17   :  { %293 = vst.msk [vmem:[%s961_s3 + $0x70] sm:$0xff] %vm278_vm0, %v228_v19  ;;  %v176_v52 = vadd.f32 %v380_v2, %v108_v37  ;;  %v112_v53 = vmul.f32 %v375_v1, %v44_v42  ;;  %v237_v55 = vmax.f32 %v173_v40, 0.0  ;;  %v177_v56 = vadd.f32 %v380_v2, %v109_v41  ;;  %v59_v40 = vld [vmem:[%s958_s0 + $0x168] sm:$0xff] }
  0x18   :  { %294 = vst.msk [vmem:[%s961_s3 + $0x78] sm:$0xff] %vm278_vm0, %v229_v23  ;;  %v113_v57 = vmul.f32 %v375_v1, %v45_v46  ;;  %v238_v59 = vmax.f32 %v174_v44, 0.0  ;;  %v178_v60 = vadd.f32 %v380_v2, %v110_v45  ;;  %v114_v61 = vmul.f32 %v375_v1, %v46_v50  ;;  %v60_v44 = vld [vmem:[%s958_s0 + $0x170] sm:$0xff] }
  0x19   :  { %295 = vst.msk [vmem:[%s961_s3 + $0x80] sm:$0xff] %vm278_vm0, %v230_v27  ;;  %v239_v63 = vmax.f32 %v175_v48, 0.0  ;;  %v179_v0 = vadd.f32 %v380_v2, %v111_v49  ;;  %v115_v3 = vmul.f32 %v375_v1, %v47_v54  ;;  %v240_v5 = vmax.f32 %v176_v52, 0.0  ;;  %v61_v48 = vld [vmem:[%s958_s0 + $0x178] sm:$0xff]  ;;  %v62_v52 = vld [vmem:[%s958_s0 + $0x180] sm:$0xff] }
  0x1a   :  { %296 = vst.msk [vmem:[%s961_s3 + $0x88] sm:$0xff] %vm278_vm0, %v231_v31  ;;  %v180_v6 = vadd.f32 %v380_v2, %v112_v53  ;;  %v116_v7 = vmul.f32 %v375_v1, %v48_v58  ;;  %v241_v9 = vmax.f32 %v177_v56, 0.0  ;;  %v181_v10 = vadd.f32 %v380_v2, %v113_v57  ;;  %v63_v56 = vld [vmem:[%s958_s0 + $0x188] sm:$0xff] }
  0x1b   :  { %297 = vst.msk [vmem:[%s961_s3 + $0x90] sm:$0xff] %vm278_vm0, %v232_v35  ;;  %v117_v11 = vmul.f32 %v375_v1, %v49_v62  ;;  %v242_v13 = vmax.f32 %v178_v60, 0.0  ;;  %v182_v14 = vadd.f32 %v380_v2, %v114_v61  ;;  %v118_v15 = vmul.f32 %v375_v1, %v50_v4  ;;  %v64_v60 = vld [vmem:[%s958_s0 + $0x190] sm:$0xff] }
  0x1c   :  { %298 = vst.msk [vmem:[%s961_s3 + $0x98] sm:$0xff] %vm278_vm0, %v233_v39  ;;  %v243_v17 = vmax.f32 %v179_v0, 0.0  ;;  %v183_v18 = vadd.f32 %v380_v2, %v115_v3  ;;  %v119_v19 = vmul.f32 %v375_v1, %v51_v8  ;;  %v244_v21 = vmax.f32 %v180_v6, 0.0  ;;  %v65_v0 = vld [vmem:[%s958_s0 + $0x198] sm:$0xff] }
  0x1d   :  { %299 = vst.msk [vmem:[%s961_s3 + $0xa0] sm:$0xff] %vm278_vm0, %v234_v43  ;;  %v184_v22 = vadd.f32 %v380_v2, %v116_v7  ;;  %v120_v23 = vmul.f32 %v375_v1, %v52_v12  ;;  %v245_v25 = vmax.f32 %v181_v10, 0.0  ;;  %v185_v26 = vadd.f32 %v380_v2, %v117_v11  ;;  %v77_v3 = vld [vmem:[%s958_s0 + $0x1f8] sm:$0xff]  ;;  %v66_v7 = vld [vmem:[%s958_s0 + $0x1a0] sm:$0xff]  ;;  %v67_v11 = vld [vmem:[%s958_s0 + $0x1a8] sm:$0xff] }
  0x1e   :  { %300 = vst.msk [vmem:[%s961_s3 + $0xa8] sm:$0xff] %vm278_vm0, %v235_v47  ;;  %v121_v27 = vmul.f32 %v375_v1, %v53_v16  ;;  %v246_v29 = vmax.f32 %v182_v14, 0.0  ;;  %v186_v30 = vadd.f32 %v380_v2, %v118_v15  ;;  %v122_v31 = vmul.f32 %v375_v1, %v54_v20  ;;  %v68_v15 = vld [vmem:[%s958_s0 + $0x1b0] sm:$0xff]  ;;  %v69_v20 = vld [vmem:[%s958_s0 + $0x1b8] sm:$0xff] }
  0x1f   :  { %301 = vst.msk [vmem:[%s961_s3 + $0xb0] sm:$0xff] %vm278_vm0, %v236_v51  ;;  %v247_v33 = vmax.f32 %v183_v18, 0.0  ;;  %v187_v34 = vadd.f32 %v380_v2, %v119_v19  ;;  %v123_v35 = vmul.f32 %v375_v1, %v55_v24  ;;  %v248_v37 = vmax.f32 %v184_v22, 0.0  ;;  %v70_v24 = vld [vmem:[%s958_s0 + $0x1c0] sm:$0xff] }
  0x20   :  { %302 = vst.msk [vmem:[%s961_s3 + $0xb8] sm:$0xff] %vm278_vm0, %v237_v55  ;;  %v188_v38 = vadd.f32 %v380_v2, %v120_v23  ;;  %v124_v39 = vmul.f32 %v375_v1, %v56_v28  ;;  %v249_v41 = vmax.f32 %v185_v26, 0.0  ;;  %v189_v42 = vadd.f32 %v380_v2, %v121_v27 }
  0x21   :  { %303 = vst.msk [vmem:[%s961_s3 + $0xc0] sm:$0xff] %vm278_vm0, %v238_v59  ;;  %v125_v43 = vmul.f32 %v375_v1, %v57_v32  ;;  %v250_v45 = vmax.f32 %v186_v30, 0.0  ;;  %v190_v46 = vadd.f32 %v380_v2, %v122_v31  ;;  %v126_v47 = vmul.f32 %v375_v1, %v58_v36 }
  0x22   :  { %304 = vst.msk [vmem:[%s961_s3 + $0xc8] sm:$0xff] %vm278_vm0, %v239_v63  ;;  %v251_v49 = vmax.f32 %v187_v34, 0.0  ;;  %v191_v50 = vadd.f32 %v380_v2, %v123_v35  ;;  %v127_v51 = vmul.f32 %v375_v1, %v59_v40  ;;  %v252_v53 = vmax.f32 %v188_v38, 0.0 }
  0x23   :  { %305 = vst.msk [vmem:[%s961_s3 + $0xd0] sm:$0xff] %vm278_vm0, %v240_v5  ;;  %v192_v54 = vadd.f32 %v380_v2, %v124_v39  ;;  %v128_v55 = vmul.f32 %v375_v1, %v60_v44  ;;  %v253_v57 = vmax.f32 %v189_v42, 0.0  ;;  %v193_v58 = vadd.f32 %v380_v2, %v125_v43 }
  0x24   :  { %306 = vst.msk [vmem:[%s961_s3 + $0xd8] sm:$0xff] %vm278_vm0, %v241_v9  ;;  %v129_v59 = vmul.f32 %v375_v1, %v61_v48  ;;  %v254_v61 = vmax.f32 %v190_v46, 0.0  ;;  %v194_v62 = vadd.f32 %v380_v2, %v126_v47  ;;  %v130_v63 = vmul.f32 %v375_v1, %v62_v52 }
  0x25   :  { %307 = vst.msk [vmem:[%s961_s3 + $0xe0] sm:$0xff] %vm278_vm0, %v242_v13  ;;  %v255_v4 = vmax.f32 %v191_v50, 0.0  ;;  %v195_v5 = vadd.f32 %v380_v2, %v127_v51  ;;  %v131_v6 = vmul.f32 %v375_v1, %v63_v56  ;;  %v256_v8 = vmax.f32 %v192_v54, 0.0 }
  0x26   :  { %308 = vst.msk [vmem:[%s961_s3 + $0xe8] sm:$0xff] %vm278_vm0, %v243_v17  ;;  %v196_v9 = vadd.f32 %v380_v2, %v128_v55  ;;  %v132_v10 = vmul.f32 %v375_v1, %v64_v60  ;;  %v257_v12 = vmax.f32 %v193_v58, 0.0  ;;  %v197_v13 = vadd.f32 %v380_v2, %v129_v59 }
  0x27   :  { %309 = vst.msk [vmem:[%s961_s3 + $0xf0] sm:$0xff] %vm278_vm0, %v244_v21  ;;  %v133_v14 = vmul.f32 %v375_v1, %v65_v0  ;;  %v145_v16 = vmul.f32 %v375_v1, %v77_v3  ;;  %v258_v17 = vmax.f32 %v194_v62, 0.0  ;;  %v198_v18 = vadd.f32 %v380_v2, %v130_v63 }
  0x28   :  { %310 = vst.msk [vmem:[%s961_s3 + $0xf8] sm:$0xff] %vm278_vm0, %v245_v25  ;;  %v134_v19 = vmul.f32 %v375_v1, %v66_v7  ;;  %v259_v21 = vmax.f32 %v195_v5, 0.0  ;;  %v199_v22 = vadd.f32 %v380_v2, %v131_v6  ;;  %v135_v23 = vmul.f32 %v375_v1, %v67_v11 }
  0x29   :  { %311 = vst.msk [vmem:[%s961_s3 + $0x100] sm:$0xff] %vm278_vm0, %v246_v29  ;;  %v827_v25 = vadd.f32 %v380_v2, %v145_v16  ;;  %v260_v26 = vmax.f32 %v196_v9, 0.0  ;;  %v200_v27 = vadd.f32 %v380_v2, %v132_v10  ;;  %v136_v28 = vmul.f32 %v375_v1, %v68_v15  ;;  %v71_v29 = vld [vmem:[%s958_s0 + $0x1c8] sm:$0xff] }
  0x2a   :  { %312 = vst.msk [vmem:[%s961_s3 + $0x108] sm:$0xff] %vm278_vm0, %v247_v33  ;;  %v261_v30 = vmax.f32 %v197_v13, 0.0  ;;  %v201_v31 = vadd.f32 %v380_v2, %v133_v14  ;;  %v137_v32 = vmul.f32 %v375_v1, %v69_v20  ;;  %v72_v33 = vld [vmem:[%s958_s0 + $0x1d0] sm:$0xff]  ;;  %v262_v34 = vmax.f32 %v198_v18, 0.0 }
  0x2b   :  { %313 = vst.msk [vmem:[%s961_s3 + $0x110] sm:$0xff] %vm278_vm0, %v248_v37  ;;  %v202_v35 = vadd.f32 %v380_v2, %v134_v19  ;;  %v138_v36 = vmul.f32 %v375_v1, %v70_v24  ;;  %v73_v37 = vld [vmem:[%s958_s0 + $0x1d8] sm:$0xff]  ;;  %v263_v38 = vmax.f32 %v199_v22, 0.0  ;;  %v203_v39 = vadd.f32 %v380_v2, %v135_v23 }
  0x2c   :  { %314 = vst.msk [vmem:[%s961_s3 + $0x118] sm:$0xff] %vm278_vm0, %v249_v41  ;;  %v139_v40 = vmul.f32 %v375_v1, %v71_v29  ;;  %v74_v41 = vld [vmem:[%s958_s0 + $0x1e0] sm:$0xff]  ;;  %v264_v42 = vmax.f32 %v200_v27, 0.0  ;;  %v204_v43 = vadd.f32 %v380_v2, %v136_v28  ;;  %v140_v44 = vmul.f32 %v375_v1, %v72_v33 }
  0x2d   :  { %315 = vst.msk [vmem:[%s961_s3 + $0x120] sm:$0xff] %vm278_vm0, %v250_v45  ;;  %v75_v45 = vld [vmem:[%s958_s0 + $0x1e8] sm:$0xff]  ;;  %v265_v46 = vmax.f32 %v201_v31, 0.0  ;;  %v205_v47 = vadd.f32 %v380_v2, %v137_v32  ;;  %v141_v48 = vmul.f32 %v375_v1, %v73_v37  ;;  %v266_v50 = vmax.f32 %v202_v35, 0.0 }
  0x2e   :  { %316 = vst.msk [vmem:[%s961_s3 + $0x128] sm:$0xff] %vm278_vm0, %v251_v49  ;;  %v76_v49 = vld [vmem:[%s958_s0 + $0x1f0] sm:$0xff]  ;;  %v206_v51 = vadd.f32 %v380_v2, %v138_v36  ;;  %v142_v52 = vmul.f32 %v375_v1, %v74_v41  ;;  %v207_v54 = vadd.f32 %v380_v2, %v139_v40  ;;  %v143_v55 = vmul.f32 %v375_v1, %v75_v45 }
  0x2f   :  { %317 = vst.msk [vmem:[%s961_s3 + $0x130] sm:$0xff] %vm278_vm0, %v252_v53  ;;  %v267_v53 = vmax.f32 %v203_v39, 0.0  ;;  %v268_v56 = vmax.f32 %v204_v43, 0.0  ;;  %v144_v58 = vmul.f32 %v375_v1, %v76_v49  ;;  %v269_v59 = vmax.f32 %v205_v47, 0.0 }
  0x30   :  { %318 = vst.msk [vmem:[%s961_s3 + $0x138] sm:$0xff] %vm278_vm0, %v253_v57  ;;  %v208_v57 = vadd.f32 %v380_v2, %v140_v44  ;;  %v209_v60 = vadd.f32 %v380_v2, %v141_v48  ;;  %v210_v62 = vadd.f32 %v380_v2, %v142_v52  ;;  %v271_v1 = vmax.f32 %v207_v54, 0.0 }
  0x31   :  { %319 = vst.msk [vmem:[%s961_s3 + $0x140] sm:$0xff] %vm278_vm0, %v254_v61  ;;  %v270_v61 = vmax.f32 %v206_v51, 0.0  ;;  %v211_v63 = vadd.f32 %v380_v2, %v143_v55  ;;  %v212_v3 = vadd.f32 %v380_v2, %v144_v58  ;;  %v277_v7 = vmax.f32 %v827_v25, 0.0 }
  0x32   :  { %320 = vst.msk [vmem:[%s961_s3 + $0x148] sm:$0xff] %vm278_vm0, %v255_v4  ;;  %v272_v0 = vmax.f32 %v208_v57, 0.0  ;;  %v273_v4 = vmax.f32 %v209_v60, 0.0  ;;  %v274_v5 = vmax.f32 %v210_v62, 0.0 }
  0x33   :  { %321 = vst.msk [vmem:[%s961_s3 + $0x150] sm:$0xff] %vm278_vm0, %v256_v8  ;;  %v275_v6 = vmax.f32 %v211_v63, 0.0  ;;  %v276_v2 = vmax.f32 %v212_v3, 0.0 }
  0x34   :  { %322 = vst.msk [vmem:[%s961_s3 + $0x158] sm:$0xff] %vm278_vm0, %v257_v12 }
  0x35   :  { %323 = vst.msk [vmem:[%s961_s3 + $0x160] sm:$0xff] %vm278_vm0, %v258_v17 }
  0x36   :  { %324 = vst.msk [vmem:[%s961_s3 + $0x168] sm:$0xff] %vm278_vm0, %v259_v21 }
  0x37   :  { %325 = vst.msk [vmem:[%s961_s3 + $0x170] sm:$0xff] %vm278_vm0, %v260_v26 }
  0x38   :  { %326 = vst.msk [vmem:[%s961_s3 + $0x178] sm:$0xff] %vm278_vm0, %v261_v30 }
  0x39   :  { %327 = vst.msk [vmem:[%s961_s3 + $0x180] sm:$0xff] %vm278_vm0, %v262_v34 }
  0x3a   :  { %328 = vst.msk [vmem:[%s961_s3 + $0x188] sm:$0xff] %vm278_vm0, %v263_v38 }
  0x3b   :  { %329 = vst.msk [vmem:[%s961_s3 + $0x190] sm:$0xff] %vm278_vm0, %v264_v42 }
  0x3c   :  { %330 = vst.msk [vmem:[%s961_s3 + $0x198] sm:$0xff] %vm278_vm0, %v265_v46 }
  0x3d   :  { %331 = vst.msk [vmem:[%s961_s3 + $0x1a0] sm:$0xff] %vm278_vm0, %v266_v50 }
  0x3e   :  { %332 = vst.msk [vmem:[%s961_s3 + $0x1a8] sm:$0xff] %vm278_vm0, %v267_v53 }
  0x3f   :  { %333 = vst.msk [vmem:[%s961_s3 + $0x1b0] sm:$0xff] %vm278_vm0, %v268_v56 }
  0x40   :  { %334 = vst.msk [vmem:[%s961_s3 + $0x1b8] sm:$0xff] %vm278_vm0, %v269_v59 }
  0x41   :  { %335 = vst.msk [vmem:[%s961_s3 + $0x1c0] sm:$0xff] %vm278_vm0, %v270_v61 }
  0x42   :  { %336 = vst.msk [vmem:[%s961_s3 + $0x1c8] sm:$0xff] %vm278_vm0, %v271_v1 }
  0x43   :  { %337 = vst.msk [vmem:[%s961_s3 + $0x1d0] sm:$0xff] %vm278_vm0, %v272_v0 }
  0x44   :  { %338 = vst.msk [vmem:[%s961_s3 + $0x1d8] sm:$0xff] %vm278_vm0, %v273_v4 }
  0x45   :  { %339 = vst.msk [vmem:[%s961_s3 + $0x1e0] sm:$0xff] %vm278_vm0, %v274_v5 }
  0x46   :  { %340 = vst.msk [vmem:[%s961_s3 + $0x1e8] sm:$0xff] %vm278_vm0, %v275_v6 }
  0x47   :  { %341 = vst.msk [vmem:[%s961_s3 + $0x1f0] sm:$0xff] %vm278_vm0, %v276_v2 }
  0x48   :  { %342 = vst.msk [vmem:[%s961_s3 + $0x1f8] sm:$0xff] %vm278_vm0, %v277_v7 }

// kernel: resnet_forward.38
= control target key start
LH: loop header
LB: loop body
LE: loop exit
PB: predicated region body
PF: predicated region fallthrough
CT: control target
= control target key end

     0   :  { %s1454_s12 = smov 0   ;;  %s1456_s13 = smov 0   ;;  %s1682_s0 = inlined_call_operand.vmem [shape: bf16[512,256], index: 0, kind: input, shape index: {}]   ;;  %s1683_s1 = inlined_call_operand.vmem [shape: bf16[256,128], index: 1, kind: input, shape index: {}]   ;;  %s1684_s2 = inlined_call_operand.vmem [shape: f32[1,128], index: 2, kind: input, shape index: {}]   ;;  %s1685_s3 = inlined_call_operand.vmem [shape: f32[512,128], index: 3, kind: output, shape index: {}]  }
   0x1   :  { %s1458_s14 = smov 0  }
   0x2 LB: > { %s32_s15 = sadd.s32 1, %s1428_s13  ;;  %p1120_p0 = scmp.ge.s32.totalorder %s1432_s14, 1  ;;  %s1432_s14 = sphi %s1458_s14, %s13_s14   ;;  %s1428_s13 = sphi %s1456_s13, %s1687_s13   ;;  %s1424_s12 = sphi %s1454_s12, %s1686_s12  }
   0x3   : > { %p34_p1 = scmp.ge.s32.totalorder %s32_s15, 2  ;;  %p191_p2 = scmp.lt.s32.totalorder %s1432_s14, 3 }
   0x5   : > { %s1689_s15 = smov (%p34_p1, %s32_s15), 0  ;;  %p192_p3 = pnand %p1120_p0, %p191_p2 }
   0x6   : > { %s1121_s28 = sshll.u32 (!%p192_p3), %s1424_s12, 5 }
   0x7   : > { %195 = sbr.rel (%p192_p3) target bundleno = 302 (0x12e), region = 32  ;;  %p236_p4 = scmp.lt.s32.totalorder (!%p192_p3), %s1121_s28, 63 }
   0xc   : > { %v1360_v0 = vld [vmem:[%s1683_s1 + $0x38] sm:$0xff]  ;;  %v1359_v2 = vld [vmem:[%s1683_s1 + $0x30] sm:$0xff]  ;;  %v1358_v4 = vld [vmem:[%s1683_s1 + $0x28] sm:$0xff]  ;;  %s1691_s28 = smov (!%p236_p4, %s1121_s28), 63 }
   0xd   : > { %v1368_v1 = vld [vmem:[%s1683_s1 + $0x78] sm:$0xff]  ;;  %655 = vmatpush.bf16.msra.mxu0 %v1360_v0  ;;  %1369 = vmatpush.bf16.msra.mxu2 %v1360_v0  ;;  %v1367_v3 = vld [vmem:[%s1683_s1 + $0x70] sm:$0xff]  ;;  %v1366_v5 = vld [vmem:[%s1683_s1 + $0x68] sm:$0xff]  ;;  %s1320_s17 = sshll.u32 %s1691_s28, 3 }
   0xe   : > { %744 = vmatpush.bf16.msra.mxu1 %v1368_v1  ;;  %1377 = vmatpush.bf16.msra.mxu3 %v1368_v1  ;;  %v1357_v6 = vld [vmem:[%s1683_s1 + $0x20] sm:$0xff]  ;;  %v1356_v8 = vld [vmem:[%s1683_s1 + $0x18] sm:$0xff]  ;;  %v1355_v10 = vld [vmem:[%s1683_s1 + $0x10] sm:$0xff]  ;;  %s1522_s22 = scalar_lea.vmem %s1682_s0, %s1320_s17  ;;  %s1607_s7 = scalar_lea.vmem %s1685_s3, %s1320_s17 }
   0xf   : > { %v1365_v7 = vld [vmem:[%s1683_s1 + $0x60] sm:$0xff]  ;;  %v1364_v9 = vld [vmem:[%s1683_s1 + $0x58] sm:$0xff]  ;;  %v1363_v11 = vld [vmem:[%s1683_s1 + $0x50] sm:$0xff] }
  0x10   : > { %v1354_v12 = vld [vmem:[%s1683_s1 + $0x8] sm:$0xff]  ;;  %v1353_v14 = vld [vmem:[%s1683_s1] sm:$0xff]  ;;  %v1136_v28 = vld [vmem:[%s1522_s22 + $0x10] sm:$0xf] }
  0x11   : > { %656 = vmatpush.bf16.msra.mxu0 %v1359_v2  ;;  %1370 = vmatpush.bf16.msra.mxu2 %v1359_v2  ;;  %v1362_v13 = vld [vmem:[%s1683_s1 + $0x48] sm:$0xff]  ;;  %v1361_v15 = vld [vmem:[%s1683_s1 + $0x40] sm:$0xff]  ;;  %v1324_v29 = vld [vmem:[%s1522_s22 + $0x14] sm:$0xf0] }
  0x12   : > { %745 = vmatpush.bf16.msra.mxu1 %v1367_v3  ;;  %1378 = vmatpush.bf16.msra.mxu3 %v1367_v3  ;;  %v1128_v16 = vld [vmem:[%s1522_s22] sm:$0xf]  ;;  %v1322_v17 = vld [vmem:[%s1522_s22 + $0x4] sm:$0xf0]  ;;  %v1321_v20 = vld [vmem:[%s1522_s22 + $0x4] sm:$0xf]  ;;  %v1137_v36 = vor.u32 %v1324_v29, %v1136_v28 }
  0x13   : > { %v1192_v18 = vld [vmem:[%s1522_s22 + $0x80] sm:$0xf]  ;;  %v1338_v19 = vld [vmem:[%s1522_s22 + $0x84] sm:$0xf0]  ;;  %v1130_v21 = vld [vmem:[%s1522_s22 + $0x8] sm:$0xf0]  ;;  %v1129_v24 = vor.u32 %v1322_v17, %v1128_v16 }
  0x14   : > { %v1337_v22 = vld [vmem:[%s1522_s22 + $0x84] sm:$0xf]  ;;  %v1194_v23 = vld [vmem:[%s1522_s22 + $0x88] sm:$0xf0]  ;;  %v1193_v25 = vor.u32 %v1338_v19, %v1192_v18  ;;  %v1133_v26 = vor.u32 %v1321_v20, %v1130_v21  ;;  %v1200_v30 = vld [vmem:[%s1522_s22 + $0x90] sm:$0xf] }
  0x15   : > { %657 = vmatpush.bf16.msra.mxu0 %v1358_v4  ;;  %1371 = vmatpush.bf16.msra.mxu2 %v1358_v4  ;;  %v1197_v27 = vor.u32 %v1337_v22, %v1194_v23  ;;  %v1340_v31 = vld [vmem:[%s1522_s22 + $0x94] sm:$0xf0]  ;;  %v1323_v32 = vld [vmem:[%s1522_s22 + $0x14] sm:$0xf]  ;;  %v1138_v33 = vld [vmem:[%s1522_s22 + $0x18] sm:$0xf0] }
  0x16   : > { %746 = vmatpush.bf16.msra.mxu1 %v1366_v5  ;;  %1379 = vmatpush.bf16.msra.mxu3 %v1366_v5  ;;  %v1339_v34 = vld [vmem:[%s1522_s22 + $0x94] sm:$0xf]  ;;  %v1202_v35 = vld [vmem:[%s1522_s22 + $0x98] sm:$0xf0]  ;;  %v1201_v37 = vor.u32 %v1340_v31, %v1200_v30  ;;  %v1141_v38 = vor.u32 %v1323_v32, %v1138_v33  ;;  %v1144_v40 = vld [vmem:[%s1522_s22 + $0x20] sm:$0xf] }
  0x17   : > { %v1205_v39 = vor.u32 %v1339_v34, %v1202_v35  ;;  %v1326_v41 = vld [vmem:[%s1522_s22 + $0x24] sm:$0xf0]  ;;  %v1208_v42 = vld [vmem:[%s1522_s22 + $0xa0] sm:$0xf]  ;;  %v1325_v44 = vld [vmem:[%s1522_s22 + $0x24] sm:$0xf] }
  0x18   : > { %v1342_v43 = vld [vmem:[%s1522_s22 + $0xa4] sm:$0xf0]  ;;  %v1146_v45 = vld [vmem:[%s1522_s22 + $0x28] sm:$0xf0]  ;;  %v1341_v46 = vld [vmem:[%s1522_s22 + $0xa4] sm:$0xf]  ;;  %v1145_v48 = vor.u32 %v1326_v41, %v1144_v40 }
  0x19   : > { %658 = vmatpush.bf16.msra.mxu0 %v1357_v6  ;;  %1372 = vmatpush.bf16.msra.mxu2 %v1357_v6  ;;  %v1210_v47 = vld [vmem:[%s1522_s22 + $0xa8] sm:$0xf0]  ;;  %v1209_v49 = vor.u32 %v1342_v43, %v1208_v42  ;;  %v1149_v50 = vor.u32 %v1325_v44, %v1146_v45  ;;  %v1152_v52 = vld [vmem:[%s1522_s22 + $0x30] sm:$0xf]  ;;  %v1328_v53 = vld [vmem:[%s1522_s22 + $0x34] sm:$0xf0] }
  0x1a   : > { %747 = vmatpush.bf16.msra.mxu1 %v1365_v7  ;;  %1380 = vmatpush.bf16.msra.mxu3 %v1365_v7  ;;  %v1213_v51 = vor.u32 %v1341_v46, %v1210_v47  ;;  %v1216_v54 = vld [vmem:[%s1522_s22 + $0xb0] sm:$0xf]  ;;  %v1344_v55 = vld [vmem:[%s1522_s22 + $0xb4] sm:$0xf0]  ;;  %v1327_v56 = vld [vmem:[%s1522_s22 + $0x34] sm:$0xf]  ;;  %v1153_v60 = vor.u32 %v1328_v53, %v1152_v52 }
  0x1b   : > { %v1154_v57 = vld [vmem:[%s1522_s22 + $0x38] sm:$0xf0]  ;;  %v1343_v58 = vld [vmem:[%s1522_s22 + $0xb4] sm:$0xf]  ;;  %v1217_v61 = vor.u32 %v1344_v55, %v1216_v54  ;;  %v1160_v0 = vld [vmem:[%s1522_s22 + $0x40] sm:$0xf] }
  0x1c   : > { %v1218_v59 = vld [vmem:[%s1522_s22 + $0xb8] sm:$0xf0]  ;;  %v1157_v62 = vor.u32 %v1327_v56, %v1154_v57  ;;  %v1330_v1 = vld [vmem:[%s1522_s22 + $0x44] sm:$0xf0]  ;;  %v1224_v2 = vld [vmem:[%s1522_s22 + $0xc0] sm:$0xf] }
  0x1d   : > { %659 = vmatpush.bf16.msra.mxu0 %v1356_v8  ;;  %1373 = vmatpush.bf16.msra.mxu2 %v1356_v8  ;;  %v1221_v63 = vor.u32 %v1343_v58, %v1218_v59  ;;  %v1346_v3 = vld [vmem:[%s1522_s22 + $0xc4] sm:$0xf0]  ;;  %v1329_v4 = vld [vmem:[%s1522_s22 + $0x44] sm:$0xf]  ;;  %v1162_v5 = vld [vmem:[%s1522_s22 + $0x48] sm:$0xf0]  ;;  %v1161_v8 = vor.u32 %v1330_v1, %v1160_v0 }
  0x1e   : > { %748 = vmatpush.bf16.msra.mxu1 %v1364_v9  ;;  %1381 = vmatpush.bf16.msra.mxu3 %v1364_v9  ;;  %v1345_v6 = vld [vmem:[%s1522_s22 + $0xc4] sm:$0xf]  ;;  %v1226_v7 = vld [vmem:[%s1522_s22 + $0xc8] sm:$0xf0]  ;;  %v1225_v9 = vor.u32 %v1346_v3, %v1224_v2  ;;  %v1331_v16 = vld [vmem:[%s1522_s22 + $0x54] sm:$0xf] }
  0x1f   : > { %v1170_v17 = vld [vmem:[%s1522_s22 + $0x58] sm:$0xf0]  ;;  %v1347_v18 = vld [vmem:[%s1522_s22 + $0xd4] sm:$0xf]  ;;  %v1333_v28 = vld [vmem:[%s1522_s22 + $0x64] sm:$0xf] }
  0x20   : > { %v1234_v19 = vld [vmem:[%s1522_s22 + $0xd8] sm:$0xf0]  ;;  %v1173_v22 = vor.u32 %v1331_v16, %v1170_v17  ;;  %v1178_v29 = vld [vmem:[%s1522_s22 + $0x68] sm:$0xf0]  ;;  %v1349_v30 = vld [vmem:[%s1522_s22 + $0xe4] sm:$0xf] }
  0x21   : > { %660 = vmatpush.bf16.msra.mxu0 %v1355_v10  ;;  %1374 = vmatpush.bf16.msra.mxu2 %v1355_v10  ;;  %v1165_v10 = vor.u32 %v1329_v4, %v1162_v5  ;;  %v1237_v23 = vor.u32 %v1347_v18, %v1234_v19  ;;  %v1242_v31 = vld [vmem:[%s1522_s22 + $0xe8] sm:$0xf0]  ;;  %v1181_v34 = vor.u32 %v1333_v28, %v1178_v29  ;;  %v1335_v40 = vld [vmem:[%s1522_s22 + $0x74] sm:$0xf]  ;;  %v1186_v41 = vld [vmem:[%s1522_s22 + $0x78] sm:$0xf0] }
  0x22   : > { %749 = vmatpush.bf16.msra.mxu1 %v1363_v11  ;;  %1382 = vmatpush.bf16.msra.mxu3 %v1363_v11  ;;  %v1229_v11 = vor.u32 %v1345_v6, %v1226_v7  ;;  %v1245_v35 = vor.u32 %v1349_v30, %v1242_v31  ;;  %v1351_v42 = vld [vmem:[%s1522_s22 + $0xf4] sm:$0xf]  ;;  %v1250_v43 = vld [vmem:[%s1522_s22 + $0xf8] sm:$0xf0]  ;;  %v1189_v46 = vor.u32 %v1335_v40, %v1186_v41 }
  0x23   : > { %v1253_v47 = vor.u32 %v1351_v42, %v1250_v43 }
  0x25   : > { %661 = vmatpush.bf16.msra.mxu0 %v1354_v12  ;;  %1375 = vmatpush.bf16.msra.mxu2 %v1354_v12  ;;  %v1168_v12 = vld [vmem:[%s1522_s22 + $0x50] sm:$0xf] }
  0x26   : > { %750 = vmatpush.bf16.msra.mxu1 %v1362_v13  ;;  %1383 = vmatpush.bf16.msra.mxu3 %v1362_v13  ;;  %v1332_v13 = vld [vmem:[%s1522_s22 + $0x54] sm:$0xf0] }
  0x27   : > { %v1169_v20 = vor.u32 %v1332_v13, %v1168_v12 }
  0x29   : > { %662 = vmatpush.bf16.msra.mxu0 %v1353_v14  ;;  %1376 = vmatpush.bf16.msra.mxu2 %v1353_v14  ;;  %v1232_v14 = vld [vmem:[%s1522_s22 + $0xd0] sm:$0xf] }
  0x2a   : > { %751 = vmatpush.bf16.msra.mxu1 %v1361_v15  ;;  %1384 = vmatpush.bf16.msra.mxu3 %v1361_v15  ;;  %v1348_v15 = vld [vmem:[%s1522_s22 + $0xd4] sm:$0xf0] }
  0x2b   : > { %v1233_v21 = vor.u32 %v1348_v15, %v1232_v14 }
  0x2c   : > { %663 = vmatmul.bf16.vlgmr.msra.gmra.mxu0 %v1129_v24  ;;  %703 = vmatmul.bf16.vlgmr.msra.gmra.mxu2 %v1193_v25  ;;  %v1176_v24 = vld [vmem:[%s1522_s22 + $0x60] sm:$0xf]  ;;  %v1334_v25 = vld [vmem:[%s1522_s22 + $0x64] sm:$0xf0] }
  0x2d   : > { %752 = vmatmul.bf16.vlgmr.msra.gmra.mxu1 %v1133_v26  ;;  %792 = vmatmul.bf16.vlgmr.msra.gmra.mxu3 %v1197_v27  ;;  %v1240_v26 = vld [vmem:[%s1522_s22 + $0xe0] sm:$0xf]  ;;  %v1350_v27 = vld [vmem:[%s1522_s22 + $0xe4] sm:$0xf0]  ;;  %v1177_v32 = vor.u32 %v1334_v25, %v1176_v24 }
  0x2e   : > { %v1241_v33 = vor.u32 %v1350_v27, %v1240_v26 }
  0x3c   : > { %668 = vmatmul.bf16.gmra.mxu0 %v1137_v36  ;;  %708 = vmatmul.bf16.gmra.mxu2 %v1201_v37  ;;  %v1184_v36 = vld [vmem:[%s1522_s22 + $0x70] sm:$0xf]  ;;  %v1336_v37 = vld [vmem:[%s1522_s22 + $0x74] sm:$0xf0] }
  0x3d   : > { %757 = vmatmul.bf16.gmra.mxu1 %v1141_v38  ;;  %797 = vmatmul.bf16.gmra.mxu3 %v1205_v39  ;;  %v1248_v38 = vld [vmem:[%s1522_s22 + $0xf0] sm:$0xf]  ;;  %v1352_v39 = vld [vmem:[%s1522_s22 + $0xf4] sm:$0xf0]  ;;  %v1185_v44 = vor.u32 %v1336_v37, %v1184_v36 }
  0x3e   : > { %v1249_v45 = vor.u32 %v1352_v39, %v1248_v38 }
  0x4c   : > { %673 = vmatmul.bf16.gmra.mxu0 %v1145_v48  ;;  %713 = vmatmul.bf16.gmra.mxu2 %v1209_v49  ;;  %v1600_v49 = vld [vmem:[%s1684_s2] ss:$0 sm:$0xff] }
  0x4d   : > { %762 = vmatmul.bf16.gmra.mxu1 %v1149_v50  ;;  %802 = vmatmul.bf16.gmra.mxu3 %v1213_v51 }
  0x5c   : > { %678 = vmatmul.bf16.gmra.mxu0 %v1153_v60  ;;  %718 = vmatmul.bf16.gmra.mxu2 %v1217_v61 }
  0x5d   : > { %767 = vmatmul.bf16.gmra.mxu1 %v1157_v62  ;;  %807 = vmatmul.bf16.gmra.mxu3 %v1221_v63 }
  0x6c   : > { %683 = vmatmul.bf16.gmra.mxu0 %v1161_v8  ;;  %723 = vmatmul.bf16.gmra.mxu2 %v1225_v9 }
  0x6d   : > { %772 = vmatmul.bf16.gmra.mxu1 %v1165_v10  ;;  %812 = vmatmul.bf16.gmra.mxu3 %v1229_v11 }
  0x7c   : > { %688 = vmatmul.bf16.gmra.mxu0 %v1169_v20  ;;  %728 = vmatmul.bf16.gmra.mxu2 %v1233_v21 }
  0x7d   : > { %777 = vmatmul.bf16.gmra.mxu1 %v1173_v22  ;;  %817 = vmatmul.bf16.gmra.mxu3 %v1237_v23 }
  0x8c   : > { %693 = vmatmul.bf16.gmra.mxu0 %v1177_v32  ;;  %733 = vmatmul.bf16.gmra.mxu2 %v1241_v33 }
  0x8d   : > { %782 = vmatmul.bf16.gmra.mxu1 %v1181_v34  ;;  %822 = vmatmul.bf16.gmra.mxu3 %v1245_v35 }
  0x9c   : > { %698 = vmatmul.bf16.gmra.mxu0 %v1185_v44  ;;  %738 = vmatmul.bf16.gmra.mxu2 %v1249_v45 }
  0x9d   : > { %787 = vmatmul.bf16.gmra.mxu1 %v1189_v46  ;;  %827 = vmatmul.bf16.gmra.mxu3 %v1253_v47 }
  0xa9   : > { %v664_v48 = vpop.f32.mrf.mxu0 }
  0xaa   : > { %v753_v50 = vpop.f32.mrf.mxu1 }
  0xab   : > { %v754_v51 = vadd.f32 %v753_v50, %v664_v48 }
  0xad   : > { %v936_v52 = vadd.f32 %v1600_v49, %v754_v51 }
  0xaf   : > { %968 = vst [vmem:[%s1607_s7] sm:$0xff] %v936_v52  ;;  %v704_v53 = vpop.f32.mrf.mxu2 }
  0xb0   : > { %v793_v54 = vpop.f32.mrf.mxu3 }
  0xb1   : > { %v794_v55 = vadd.f32 %v793_v54, %v704_v53  ;;  %v666_v56 = vpop.f32.mrf.mxu0 }
  0xb2   : > { %v755_v57 = vpop.f32.mrf.mxu1 }
  0xb3   : > { %v952_v58 = vadd.f32 %v1600_v49, %v794_v55  ;;  %v756_v59 = vadd.f32 %v755_v57, %v666_v56 }
  0xb5   : > { %984 = vst [vmem:[%s1607_s7 + $0x80] sm:$0xff] %v952_v58  ;;  %v937_v60 = vadd.f32 %v1600_v49, %v756_v59 }
  0xb7   : > { %969 = vst [vmem:[%s1607_s7 + $0x8] sm:$0xff] %v937_v60  ;;  %v706_v61 = vpop.f32.mrf.mxu2 }
  0xb8   : > { %v795_v62 = vpop.f32.mrf.mxu3 }
  0xb9   : > { %v796_v63 = vadd.f32 %v795_v62, %v706_v61  ;;  %v669_v0 = vpop.f32.mrf.mxu0 }
  0xba   : > { %v758_v1 = vpop.f32.mrf.mxu1 }
  0xbb   : > { %v953_v2 = vadd.f32 %v1600_v49, %v796_v63  ;;  %v759_v3 = vadd.f32 %v758_v1, %v669_v0 }
  0xbd   : > { %985 = vst [vmem:[%s1607_s7 + $0x88] sm:$0xff] %v953_v2  ;;  %v938_v4 = vadd.f32 %v1600_v49, %v759_v3 }
  0xbf   : > { %970 = vst [vmem:[%s1607_s7 + $0x10] sm:$0xff] %v938_v4  ;;  %v709_v5 = vpop.f32.mrf.mxu2 }
  0xc0   : > { %v798_v6 = vpop.f32.mrf.mxu3 }
  0xc1   : > { %v799_v7 = vadd.f32 %v798_v6, %v709_v5  ;;  %v671_v8 = vpop.f32.mrf.mxu0 }
  0xc2   : > { %v760_v9 = vpop.f32.mrf.mxu1 }
  0xc3   : > { %v954_v10 = vadd.f32 %v1600_v49, %v799_v7  ;;  %v761_v11 = vadd.f32 %v760_v9, %v671_v8 }
  0xc5   : > { %986 = vst [vmem:[%s1607_s7 + $0x90] sm:$0xff] %v954_v10  ;;  %v939_v12 = vadd.f32 %v1600_v49, %v761_v11 }
  0xc7   : > { %971 = vst [vmem:[%s1607_s7 + $0x18] sm:$0xff] %v939_v12  ;;  %v711_v13 = vpop.f32.mrf.mxu2 }
  0xc8   : > { %v800_v14 = vpop.f32.mrf.mxu3 }
  0xc9   : > { %v801_v15 = vadd.f32 %v800_v14, %v711_v13  ;;  %v674_v16 = vpop.f32.mrf.mxu0 }
  0xca   : > { %v763_v17 = vpop.f32.mrf.mxu1 }
  0xcb   : > { %v955_v18 = vadd.f32 %v1600_v49, %v801_v15  ;;  %v764_v19 = vadd.f32 %v763_v17, %v674_v16 }
  0xcd   : > { %987 = vst [vmem:[%s1607_s7 + $0x98] sm:$0xff] %v955_v18  ;;  %v940_v20 = vadd.f32 %v1600_v49, %v764_v19 }
  0xcf   : > { %972 = vst [vmem:[%s1607_s7 + $0x20] sm:$0xff] %v940_v20  ;;  %v714_v21 = vpop.f32.mrf.mxu2 }
  0xd0   : > { %v803_v22 = vpop.f32.mrf.mxu3 }
  0xd1   : > { %v804_v23 = vadd.f32 %v803_v22, %v714_v21  ;;  %v676_v24 = vpop.f32.mrf.mxu0 }
  0xd2   : > { %v765_v25 = vpop.f32.mrf.mxu1 }
  0xd3   : > { %v956_v26 = vadd.f32 %v1600_v49, %v804_v23  ;;  %v766_v27 = vadd.f32 %v765_v25, %v676_v24 }
  0xd5   : > { %988 = vst [vmem:[%s1607_s7 + $0xa0] sm:$0xff] %v956_v26  ;;  %v941_v28 = vadd.f32 %v1600_v49, %v766_v27 }
  0xd7   : > { %973 = vst [vmem:[%s1607_s7 + $0x28] sm:$0xff] %v941_v28  ;;  %v716_v29 = vpop.f32.mrf.mxu2 }
  0xd8   : > { %v805_v30 = vpop.f32.mrf.mxu3 }
  0xd9   : > { %v806_v31 = vadd.f32 %v805_v30, %v716_v29  ;;  %v679_v32 = vpop.f32.mrf.mxu0 }
  0xda   : > { %v768_v33 = vpop.f32.mrf.mxu1 }
  0xdb   : > { %v957_v34 = vadd.f32 %v1600_v49, %v806_v31  ;;  %v769_v35 = vadd.f32 %v768_v33, %v679_v32 }
  0xdd   : > { %989 = vst [vmem:[%s1607_s7 + $0xa8] sm:$0xff] %v957_v34  ;;  %v942_v36 = vadd.f32 %v1600_v49, %v769_v35 }
  0xdf   : > { %974 = vst [vmem:[%s1607_s7 + $0x30] sm:$0xff] %v942_v36  ;;  %v719_v37 = vpop.f32.mrf.mxu2 }
  0xe0   : > { %v808_v38 = vpop.f32.mrf.mxu3 }
  0xe1   : > { %v809_v39 = vadd.f32 %v808_v38, %v719_v37  ;;  %v681_v40 = vpop.f32.mrf.mxu0 }
  0xe2   : > { %v770_v41 = vpop.f32.mrf.mxu1 }
  0xe3   : > { %v958_v42 = vadd.f32 %v1600_v49, %v809_v39  ;;  %v771_v43 = vadd.f32 %v770_v41, %v681_v40 }
  0xe5   : > { %990 = vst [vmem:[%s1607_s7 + $0xb0] sm:$0xff] %v958_v42  ;;  %v943_v44 = vadd.f32 %v1600_v49, %v771_v43 }
  0xe7   : > { %975 = vst [vmem:[%s1607_s7 + $0x38] sm:$0xff] %v943_v44  ;;  %v721_v45 = vpop.f32.mrf.mxu2 }
  0xe8   : > { %v810_v46 = vpop.f32.mrf.mxu3 }
  0xe9   : > { %v811_v47 = vadd.f32 %v810_v46, %v721_v45  ;;  %v684_v48 = vpop.f32.mrf.mxu0 }
  0xea   : > { %v773_v50 = vpop.f32.mrf.mxu1 }
  0xeb   : > { %v959_v51 = vadd.f32 %v1600_v49, %v811_v47  ;;  %v774_v52 = vadd.f32 %v773_v50, %v684_v48 }
  0xed   : > { %991 = vst [vmem:[%s1607_s7 + $0xb8] sm:$0xff] %v959_v51  ;;  %v944_v53 = vadd.f32 %v1600_v49, %v774_v52 }
  0xef   : > { %976 = vst [vmem:[%s1607_s7 + $0x40] sm:$0xff] %v944_v53  ;;  %v724_v54 = vpop.f32.mrf.mxu2 }
  0xf0   : > { %v813_v55 = vpop.f32.mrf.mxu3 }
  0xf1   : > { %v814_v56 = vadd.f32 %v813_v55, %v724_v54  ;;  %v686_v57 = vpop.f32.mrf.mxu0 }
  0xf2   : > { %v775_v58 = vpop.f32.mrf.mxu1 }
  0xf3   : > { %v960_v59 = vadd.f32 %v1600_v49, %v814_v56  ;;  %v776_v60 = vadd.f32 %v775_v58, %v686_v57 }
  0xf5   : > { %992 = vst [vmem:[%s1607_s7 + $0xc0] sm:$0xff] %v960_v59  ;;  %v945_v61 = vadd.f32 %v1600_v49, %v776_v60 }
  0xf7   : > { %977 = vst [vmem:[%s1607_s7 + $0x48] sm:$0xff] %v945_v61  ;;  %v726_v62 = vpop.f32.mrf.mxu2 }
  0xf8   : > { %v815_v63 = vpop.f32.mrf.mxu3 }
  0xf9   : > { %v816_v0 = vadd.f32 %v815_v63, %v726_v62  ;;  %v689_v1 = vpop.f32.mrf.mxu0 }
  0xfa   : > { %v778_v2 = vpop.f32.mrf.mxu1 }
  0xfb   : > { %v961_v3 = vadd.f32 %v1600_v49, %v816_v0  ;;  %v779_v4 = vadd.f32 %v778_v2, %v689_v1 }
  0xfd   : > { %993 = vst [vmem:[%s1607_s7 + $0xc8] sm:$0xff] %v961_v3  ;;  %v946_v5 = vadd.f32 %v1600_v49, %v779_v4 }
  0xff   : > { %978 = vst [vmem:[%s1607_s7 + $0x50] sm:$0xff] %v946_v5  ;;  %v729_v6 = vpop.f32.mrf.mxu2 }
 0x100   : > { %v818_v7 = vpop.f32.mrf.mxu3 }
 0x101   : > { %v819_v8 = vadd.f32 %v818_v7, %v729_v6  ;;  %v691_v9 = vpop.f32.mrf.mxu0 }
 0x102   : > { %v780_v10 = vpop.f32.mrf.mxu1 }
 0x103   : > { %v962_v11 = vadd.f32 %v1600_v49, %v819_v8  ;;  %v781_v12 = vadd.f32 %v780_v10, %v691_v9 }
 0x105   : > { %994 = vst [vmem:[%s1607_s7 + $0xd0] sm:$0xff] %v962_v11  ;;  %v947_v13 = vadd.f32 %v1600_v49, %v781_v12 }
 0x107   : > { %979 = vst [vmem:[%s1607_s7 + $0x58] sm:$0xff] %v947_v13  ;;  %v731_v14 = vpop.f32.mrf.mxu2 }
 0x108   : > { %v820_v15 = vpop.f32.mrf.mxu3 }
 0x109   : > { %v821_v16 = vadd.f32 %v820_v15, %v731_v14  ;;  %v694_v17 = vpop.f32.mrf.mxu0 }
 0x10a   : > { %v783_v18 = vpop.f32.mrf.mxu1 }
 0x10b   : > { %v963_v19 = vadd.f32 %v1600_v49, %v821_v16  ;;  %v784_v20 = vadd.f32 %v783_v18, %v694_v17 }
 0x10d   : > { %995 = vst [vmem:[%s1607_s7 + $0xd8] sm:$0xff] %v963_v19  ;;  %v948_v21 = vadd.f32 %v1600_v49, %v784_v20 }
 0x10f   : > { %980 = vst [vmem:[%s1607_s7 + $0x60] sm:$0xff] %v948_v21  ;;  %v734_v22 = vpop.f32.mrf.mxu2 }
 0x110   : > { %v823_v23 = vpop.f32.mrf.mxu3 }
 0x111   : > { %v824_v24 = vadd.f32 %v823_v23, %v734_v22  ;;  %v696_v25 = vpop.f32.mrf.mxu0 }
 0x112   : > { %v785_v26 = vpop.f32.mrf.mxu1 }
 0x113   : > { %v964_v27 = vadd.f32 %v1600_v49, %v824_v24  ;;  %v786_v28 = vadd.f32 %v785_v26, %v696_v25 }
 0x115   : > { %996 = vst [vmem:[%s1607_s7 + $0xe0] sm:$0xff] %v964_v27  ;;  %v949_v29 = vadd.f32 %v1600_v49, %v786_v28 }
 0x117   : > { %981 = vst [vmem:[%s1607_s7 + $0x68] sm:$0xff] %v949_v29  ;;  %v736_v30 = vpop.f32.mrf.mxu2 }
 0x118   : > { %v825_v31 = vpop.f32.mrf.mxu3 }
 0x119   : > { %v826_v32 = vadd.f32 %v825_v31, %v736_v30  ;;  %v699_v33 = vpop.f32.mrf.mxu0 }
 0x11a   : > { %v788_v34 = vpop.f32.mrf.mxu1 }
 0x11b   : > { %v965_v35 = vadd.f32 %v1600_v49, %v826_v32  ;;  %v789_v36 = vadd.f32 %v788_v34, %v699_v33 }
 0x11d   : > { %997 = vst [vmem:[%s1607_s7 + $0xe8] sm:$0xff] %v965_v35  ;;  %v950_v37 = vadd.f32 %v1600_v49, %v789_v36 }
 0x11f   : > { %982 = vst [vmem:[%s1607_s7 + $0x70] sm:$0xff] %v950_v37  ;;  %v739_v38 = vpop.f32.mrf.mxu2 }
 0x120   : > { %v828_v39 = vpop.f32.mrf.mxu3 }
 0x121   : > { %v829_v40 = vadd.f32 %v828_v39, %v739_v38  ;;  %v701_v41 = vpop.f32.mrf.mxu0 }
 0x122   : > { %v790_v42 = vpop.f32.mrf.mxu1 }
 0x123   : > { %v966_v43 = vadd.f32 %v1600_v49, %v829_v40  ;;  %v791_v44 = vadd.f32 %v790_v42, %v701_v41 }
 0x125   : > { %998 = vst [vmem:[%s1607_s7 + $0xf0] sm:$0xff] %v966_v43  ;;  %v951_v45 = vadd.f32 %v1600_v49, %v791_v44 }
 0x127   : > { %983 = vst [vmem:[%s1607_s7 + $0x78] sm:$0xff] %v951_v45  ;;  %v741_v46 = vpop.f32.mrf.mxu2 }
 0x128   : > { %v830_v47 = vpop.f32.mrf.mxu3 }
 0x129   : > { %v831_v48 = vadd.f32 %v830_v47, %v741_v46 }
 0x12b   : > { %v967_v50 = vadd.f32 %v1600_v49, %v831_v48 }
 0x12d   : > { %999 = vst [vmem:[%s1607_s7 + $0xf8] sm:$0xff] %v967_v50 }
 0x12e PF: > { %s13_s14 = sadd.s32 1, %s1432_s14   ;;  %s1686_s12 = smov %s1428_s13 }
 0x12f   : > { %p10_p5 = scmp.ge.s32.totalorder %s13_s14, 4   ;;  %s1687_s13 = smov %s1689_s15 }
 0x131   :  { %12 = sbr.rel (!%p10_p5) target bundleno = 2 (0x2), region = 76 }

// kernel: resnet_forward.43
= control target key start
LH: loop header
LB: loop body
LE: loop exit
PB: predicated region body
PF: predicated region fallthrough
CT: control target
= control target key end

     0   :  { %vm86_vm0 = vcmask 523264   ;;  %s265_s0 = inlined_call_operand.vmem [shape: f32[128,64], index: 0, kind: input, shape index: {}]   ;;  %s266_s1 = inlined_call_operand.vmem [shape: f32[1,64], index: 1, kind: input, shape index: {}]   ;;  %s267_s2 = inlined_call_operand.vmem [shape: f32[1,64], index: 2, kind: input, shape index: {}]   ;;  %s268_s3 = inlined_call_operand.vmem [shape: f32[128,64], index: 3, kind: output, shape index: {}]  }
   0x1   :  { %v14_v0 = vld [vmem:[%s265_s0] sm:$0xff]  ;;  %v15_v3 = vld [vmem:[%s265_s0 + $0x8] sm:$0xff]  ;;  %v16_v6 = vld [vmem:[%s265_s0 + $0x10] sm:$0xff] }
   0x2   :  { %v107_v1 = vld [vmem:[%s266_s1] ss:$0 sm:$0xff]  ;;  %v17_v7 = vld [vmem:[%s265_s0 + $0x18] sm:$0xff]  ;;  %v19_v12 = vld [vmem:[%s265_s0 + $0x28] sm:$0xff] }
   0x3   :  { %v138_v2 = vld [vmem:[%s267_s2] ss:$0 sm:$0xff]  ;;  %v34_v4 = vmul.f32 %v107_v1, %v14_v0  ;;  %v35_v5 = vmul.f32 %v107_v1, %v15_v3  ;;  %v36_v9 = vmul.f32 %v107_v1, %v16_v6  ;;  %v37_v10 = vmul.f32 %v107_v1, %v17_v7  ;;  %v20_v13 = vld [vmem:[%s265_s0 + $0x30] sm:$0xff]  ;;  %v21_v14 = vld [vmem:[%s265_s0 + $0x38] sm:$0xff] }
   0x4   :  { %v18_v8 = vld [vmem:[%s265_s0 + $0x20] sm:$0xff]  ;;  %v39_v17 = vmul.f32 %v107_v1, %v19_v12  ;;  %v40_v18 = vmul.f32 %v107_v1, %v20_v13  ;;  %v41_v22 = vmul.f32 %v107_v1, %v21_v14  ;;  %v23_v24 = vld [vmem:[%s265_s0 + $0x48] sm:$0xff]  ;;  %v24_v29 = vld [vmem:[%s265_s0 + $0x50] sm:$0xff] }
   0x5   :  { %v38_v11 = vmul.f32 %v107_v1, %v18_v8  ;;  %v54_v15 = vadd.f32 %v138_v2, %v34_v4  ;;  %v55_v16 = vadd.f32 %v138_v2, %v35_v5  ;;  %v56_v19 = vadd.f32 %v138_v2, %v36_v9  ;;  %v22_v23 = vld [vmem:[%s265_s0 + $0x40] sm:$0xff]  ;;  %v25_v30 = vld [vmem:[%s265_s0 + $0x58] sm:$0xff]  ;;  %v27_v35 = vld [vmem:[%s265_s0 + $0x68] sm:$0xff] }
   0x6   :  { %v57_v20 = vadd.f32 %v138_v2, %v37_v10  ;;  %v59_v27 = vadd.f32 %v138_v2, %v39_v17  ;;  %v60_v28 = vadd.f32 %v138_v2, %v40_v18  ;;  %v26_v31 = vld [vmem:[%s265_s0 + $0x60] sm:$0xff]  ;;  %v61_v34 = vadd.f32 %v138_v2, %v41_v22  ;;  %v28_v36 = vld [vmem:[%s265_s0 + $0x70] sm:$0xff]  ;;  %v29_v41 = vld [vmem:[%s265_s0 + $0x78] sm:$0xff] }
   0x7   :  { %v58_v21 = vadd.f32 %v138_v2, %v38_v11  ;;  %v70_v25 = vmax.f32 %v54_v15, 0.0  ;;  %v71_v26 = vmax.f32 %v55_v16, 0.0  ;;  %v72_v32 = vmax.f32 %v56_v19, 0.0 }
   0x8   :  { %v73_v33 = vmax.f32 %v57_v20, 0.0  ;;  %v75_v38 = vmax.f32 %v59_v27, 0.0  ;;  %v42_v39 = vmul.f32 %v107_v1, %v22_v23  ;;  %v43_v40 = vmul.f32 %v107_v1, %v23_v24 }
   0x9   :  { %87 = vst.msk [vmem:[%s268_s3] sm:$0xff] %vm86_vm0, %v70_v25  ;;  %v74_v37 = vmax.f32 %v58_v21, 0.0  ;;  %v76_v42 = vmax.f32 %v60_v28, 0.0  ;;  %v44_v43 = vmul.f32 %v107_v1, %v24_v29  ;;  %v45_v44 = vmul.f32 %v107_v1, %v25_v30 }
   0xa   :  { %88 = vst.msk [vmem:[%s268_s3 + $0x8] sm:$0xff] %vm86_vm0, %v71_v26  ;;  %v46_v45 = vmul.f32 %v107_v1, %v26_v31  ;;  %v62_v46 = vadd.f32 %v138_v2, %v42_v39  ;;  %v63_v47 = vadd.f32 %v138_v2, %v43_v40  ;;  %v47_v48 = vmul.f32 %v107_v1, %v27_v35 }
   0xb   :  { %89 = vst.msk [vmem:[%s268_s3 + $0x10] sm:$0xff] %vm86_vm0, %v72_v32  ;;  %v48_v49 = vmul.f32 %v107_v1, %v28_v36  ;;  %v77_v50 = vmax.f32 %v61_v34, 0.0  ;;  %v64_v51 = vadd.f32 %v138_v2, %v44_v43  ;;  %v65_v52 = vadd.f32 %v138_v2, %v45_v44 }
   0xc   :  { %90 = vst.msk [vmem:[%s268_s3 + $0x18] sm:$0xff] %vm86_vm0, %v73_v33  ;;  %v49_v53 = vmul.f32 %v107_v1, %v29_v41  ;;  %v78_v54 = vmax.f32 %v62_v46, 0.0  ;;  %v66_v55 = vadd.f32 %v138_v2, %v46_v45  ;;  %v79_v56 = vmax.f32 %v63_v47, 0.0 }
   0xd   :  { %91 = vst.msk [vmem:[%s268_s3 + $0x20] sm:$0xff] %vm86_vm0, %v74_v37  ;;  %v67_v57 = vadd.f32 %v138_v2, %v47_v48  ;;  %v80_v58 = vmax.f32 %v64_v51, 0.0  ;;  %v68_v59 = vadd.f32 %v138_v2, %v48_v49  ;;  %v81_v60 = vmax.f32 %v65_v52, 0.0 }
   0xe   :  { %92 = vst.msk [vmem:[%s268_s3 + $0x28] sm:$0xff] %vm86_vm0, %v75_v38  ;;  %v69_v61 = vadd.f32 %v138_v2, %v49_v53  ;;  %v82_v62 = vmax.f32 %v66_v55, 0.0 }
   0xf   :  { %93 = vst.msk [vmem:[%s268_s3 + $0x30] sm:$0xff] %vm86_vm0, %v76_v42  ;;  %v83_v63 = vmax.f32 %v67_v57, 0.0  ;;  %v84_v0 = vmax.f32 %v68_v59, 0.0 }
  0x10   :  { %94 = vst.msk [vmem:[%s268_s3 + $0x38] sm:$0xff] %vm86_vm0, %v77_v50  ;;  %v85_v1 = vmax.f32 %v69_v61, 0.0 }
  0x11   :  { %95 = vst.msk [vmem:[%s268_s3 + $0x40] sm:$0xff] %vm86_vm0, %v78_v54 }
  0x12   :  { %96 = vst.msk [vmem:[%s268_s3 + $0x48] sm:$0xff] %vm86_vm0, %v79_v56 }
  0x13   :  { %97 = vst.msk [vmem:[%s268_s3 + $0x50] sm:$0xff] %vm86_vm0, %v80_v58 }
  0x14   :  { %98 = vst.msk [vmem:[%s268_s3 + $0x58] sm:$0xff] %vm86_vm0, %v81_v60 }
  0x15   :  { %99 = vst.msk [vmem:[%s268_s3 + $0x60] sm:$0xff] %vm86_vm0, %v82_v62 }
  0x16   :  { %100 = vst.msk [vmem:[%s268_s3 + $0x68] sm:$0xff] %vm86_vm0, %v83_v63 }
  0x17   :  { %101 = vst.msk [vmem:[%s268_s3 + $0x70] sm:$0xff] %vm86_vm0, %v84_v0 }
  0x18   :  { %102 = vst.msk [vmem:[%s268_s3 + $0x78] sm:$0xff] %vm86_vm0, %v85_v1 }

// kernel: resnet_forward.42
= control target key start
LH: loop header
LB: loop body
LE: loop exit
PB: predicated region body
PF: predicated region fallthrough
CT: control target
= control target key end

     0   :  { %vm14_vm0 = vcmask 516096   ;;  %vm34_vm1 = vcmask 523264   ;;  %v140_v0 = vmov 0.0   ;;  %s258_s0 = inlined_call_operand.vmem [shape: f32[128,64], index: 0, kind: input, shape index: {}]   ;;  %s259_s1 = inlined_call_operand.vmem [shape: f32[1,64], index: 1, kind: output, shape index: {0}]   ;;  %s260_s2 = inlined_call_operand.vmem [shape: f32[1,64], index: 2, kind: output, shape index: {1}]  }
   0x1   :  { %15 = vst.msk [vmem:[%s259_s1] sm:$0x1] %vm14_vm0, %v140_v0  ;;  %v17_v1 = vld [vmem:[%s258_s0] sm:$0xff]  ;;  %v18_v2 = vld [vmem:[%s258_s0 + $0x8] sm:$0xff]  ;;  %v19_v3 = vld [vmem:[%s258_s0 + $0x10] sm:$0xff] }
   0x2   :  { %v35_v4 = vsel %vm34_vm1, %v17_v1, 0.0  ;;  %v36_v5 = vsel %vm34_vm1, %v18_v2, 0.0  ;;  %v38_v6 = vsel %vm34_vm1, %v19_v3, 0.0  ;;  %v20_v7 = vld [vmem:[%s258_s0 + $0x18] sm:$0xff]  ;;  %v21_v10 = vld [vmem:[%s258_s0 + $0x20] sm:$0xff]  ;;  %v22_v13 = vld [vmem:[%s258_s0 + $0x28] sm:$0xff]  ;;  %v76_v15 = vmul.f32 %v17_v1, %v17_v1 }
   0x3   :  { %v37_v8 = vadd.f32 %v36_v5, %v35_v4  ;;  %v40_v9 = vsel %vm34_vm1, %v20_v7, 0.0  ;;  %v42_v12 = vsel %vm34_vm1, %v21_v10, 0.0  ;;  %16 = vst.msk [vmem:[%s260_s2] sm:$0x1] %vm14_vm0, %v140_v0  ;;  %v77_v16 = vmul.f32 %v18_v2, %v18_v2  ;;  %v23_v19 = vld [vmem:[%s258_s0 + $0x30] sm:$0xff]  ;;  %v24_v24 = vld [vmem:[%s258_s0 + $0x38] sm:$0xff] }
   0x4   :  { %v78_v17 = vmul.f32 %v19_v3, %v19_v3  ;;  %v44_v18 = vsel %vm34_vm1, %v22_v13, 0.0  ;;  %v79_v21 = vmul.f32 %v20_v7, %v20_v7  ;;  %v46_v22 = vsel %vm34_vm1, %v23_v19, 0.0  ;;  %v25_v31 = vld [vmem:[%s258_s0 + $0x40] sm:$0xff]  ;;  %v26_v37 = vld [vmem:[%s258_s0 + $0x48] sm:$0xff]  ;;  %v27_v43 = vld [vmem:[%s258_s0 + $0x50] sm:$0xff] }
   0x5   :  { %v39_v11 = vadd.f32 %v38_v6, %v37_v8  ;;  %v80_v23 = vmul.f32 %v21_v10, %v21_v10  ;;  %v92_v26 = vsel %vm34_vm1, %v76_v15, 0.0  ;;  %v93_v27 = vsel %vm34_vm1, %v77_v16, 0.0  ;;  %v28_v49 = vld [vmem:[%s258_s0 + $0x58] sm:$0xff]  ;;  %v29_v55 = vld [vmem:[%s258_s0 + $0x60] sm:$0xff]  ;;  %v30_v61 = vld [vmem:[%s258_s0 + $0x68] sm:$0xff] }
   0x6   :  { %v95_v28 = vsel %vm34_vm1, %v78_v17, 0.0  ;;  %v48_v29 = vsel %vm34_vm1, %v24_v24, 0.0  ;;  %v94_v30 = vadd.f32 %v93_v27, %v92_v26  ;;  %v81_v33 = vmul.f32 %v22_v13, %v22_v13  ;;  %v31_v3 = vld [vmem:[%s258_s0 + $0x70] sm:$0xff] }
   0x7   :  { %v41_v14 = vadd.f32 %v40_v9, %v39_v11  ;;  %v97_v34 = vsel %vm34_vm1, %v79_v21, 0.0  ;;  %v50_v35 = vsel %vm34_vm1, %v25_v31, 0.0  ;;  %v82_v39 = vmul.f32 %v23_v19, %v23_v19  ;;  %v32_v9 = vld [vmem:[%s258_s0 + $0x78] sm:$0xff] }
   0x8   :  { %v96_v36 = vadd.f32 %v95_v28, %v94_v30  ;;  %v99_v40 = vsel %vm34_vm1, %v80_v23, 0.0  ;;  %v52_v41 = vsel %vm34_vm1, %v26_v37, 0.0  ;;  %v83_v45 = vmul.f32 %v24_v24, %v24_v24 }
   0x9   :  { %v43_v20 = vadd.f32 %v42_v12, %v41_v14  ;;  %v101_v46 = vsel %vm34_vm1, %v81_v33, 0.0  ;;  %v54_v47 = vsel %vm34_vm1, %v27_v43, 0.0  ;;  %v84_v51 = vmul.f32 %v25_v31, %v25_v31 }
   0xa   :  { %v98_v42 = vadd.f32 %v97_v34, %v96_v36  ;;  %v103_v52 = vsel %vm34_vm1, %v82_v39, 0.0  ;;  %v56_v53 = vsel %vm34_vm1, %v28_v49, 0.0  ;;  %v85_v57 = vmul.f32 %v26_v37, %v26_v37  ;;  %v33_v36 = vld [vmem:[%s259_s1] sm:$0x1] }
   0xb   :  { %v45_v25 = vadd.f32 %v44_v18, %v43_v20  ;;  %v105_v58 = vsel %vm34_vm1, %v83_v45, 0.0  ;;  %v58_v59 = vsel %vm34_vm1, %v29_v55, 0.0  ;;  %v86_v63 = vmul.f32 %v27_v43, %v27_v43 }
   0xc   :  { %v100_v48 = vadd.f32 %v99_v40, %v98_v42  ;;  %v107_v0 = vsel %vm34_vm1, %v84_v51, 0.0  ;;  %v60_v1 = vsel %vm34_vm1, %v30_v61, 0.0  ;;  %v87_v5 = vmul.f32 %v28_v49, %v28_v49 }
   0xd   :  { %v47_v32 = vadd.f32 %v46_v22, %v45_v25  ;;  %v109_v6 = vsel %vm34_vm1, %v85_v57, 0.0  ;;  %v62_v7 = vsel %vm34_vm1, %v31_v3, 0.0  ;;  %v88_v11 = vmul.f32 %v29_v55, %v29_v55 }
   0xe   :  { %v102_v54 = vadd.f32 %v101_v46, %v100_v48  ;;  %v111_v12 = vsel %vm34_vm1, %v86_v63, 0.0  ;;  %v64_v13 = vsel %vm34_vm1, %v32_v9, 0.0  ;;  %v89_v16 = vmul.f32 %v30_v61, %v30_v61 }
   0xf   :  { %v49_v38 = vadd.f32 %v48_v29, %v47_v32  ;;  %v113_v17 = vsel %vm34_vm1, %v87_v5, 0.0  ;;  %v90_v20 = vmul.f32 %v31_v3, %v31_v3  ;;  %v115_v21 = vsel %vm34_vm1, %v88_v11, 0.0 }
  0x10   :  { %v104_v60 = vadd.f32 %v103_v52, %v102_v54  ;;  %v91_v24 = vmul.f32 %v32_v9, %v32_v9  ;;  %v117_v25 = vsel %vm34_vm1, %v89_v16, 0.0 }
  0x11   :  { %v51_v44 = vadd.f32 %v50_v35, %v49_v38  ;;  %v119_v28 = vsel %vm34_vm1, %v90_v20, 0.0 }
  0x12   :  { %v106_v2 = vadd.f32 %v105_v58, %v104_v60  ;;  %v121_v31 = vsel %vm34_vm1, %v91_v24, 0.0 }
  0x13   :  { %v53_v50 = vadd.f32 %v52_v41, %v51_v44  ;;  %v75_v44 = vld [vmem:[%s260_s2] sm:$0x1] }
  0x14   :  { %v108_v8 = vadd.f32 %v107_v0, %v106_v2 }
  0x15   :  { %v55_v56 = vadd.f32 %v54_v47, %v53_v50 }
  0x16   :  { %v110_v14 = vadd.f32 %v109_v6, %v108_v8 }
  0x17   :  { %v57_v62 = vadd.f32 %v56_v53, %v55_v56 }
  0x18   :  { %v112_v18 = vadd.f32 %v111_v12, %v110_v14 }
  0x19   :  { %v59_v4 = vadd.f32 %v58_v59, %v57_v62 }
  0x1a   :  { %v114_v22 = vadd.f32 %v113_v17, %v112_v18 }
  0x1b   :  { %v61_v10 = vadd.f32 %v60_v1, %v59_v4 }
  0x1c   :  { %v116_v26 = vadd.f32 %v115_v21, %v114_v22 }
  0x1d   :  { %v63_v15 = vadd.f32 %v62_v7, %v61_v10 }
  0x1e   :  { %v118_v29 = vadd.f32 %v117_v25, %v116_v26 }
  0x1f   :  { %v65_v19 = vadd.f32 %v64_v13, %v63_v15 }
  0x20   :  { %v120_v32 = vadd.f32 %v119_v28, %v118_v29 }
  0x21   :  { %v66_v23 = vrot.slane %v65_v19, 4 }
  0x22   :  { %v122_v34 = vadd.f32 %v121_v31, %v120_v32 }
  0x23   :  { %v67_v27 = vadd.f32 %v66_v23, %v65_v19 }
  0x24   :  { %v123_v37 = vrot.slane %v122_v34, 4 }
  0x25   :  { %v68_v30 = vrot.slane %v67_v27, 2 }
  0x26   :  { %v124_v39 = vadd.f32 %v123_v37, %v122_v34 }
  0x27   :  { %v69_v33 = vadd.f32 %v68_v30, %v67_v27 }
  0x28   :  { %v125_v41 = vrot.slane %v124_v39, 2 }
  0x29   :  { %v70_v35 = vrot.slane %v69_v33, 1 }
  0x2a   :  { %v126_v42 = vadd.f32 %v125_v41, %v124_v39 }
  0x2b   :  { %v71_v38 = vadd.f32 %v70_v35, %v69_v33 }
  0x2c   :  { %v127_v43 = vrot.slane %v126_v42, 1 }
  0x2d   :  { %v72_v40 = vadd.f32 %v71_v38, %v33_v36 }
  0x2e   :  { %v128_v45 = vadd.f32 %v127_v43, %v126_v42 }
  0x2f   :  { %74 = vst.msk [vmem:[%s259_s1] sm:$0x1] %vm14_vm0, %v72_v40 }
  0x30   :  { %v129_v46 = vadd.f32 %v128_v45, %v75_v44 }
  0x32   :  { %130 = vst.msk [vmem:[%s260_s2] sm:$0x1] %vm14_vm0, %v129_v46 }

// kernel: resnet_forward.41
= control target key start
LH: loop header
LB: loop body
LE: loop exit
PB: predicated region body
PF: predicated region fallthrough
CT: control target
= control target key end

     0   :  { %s1203_s12 = smov 0   ;;  %s1205_s13 = smov 0   ;;  %s1391_s0 = inlined_call_operand.vmem [shape: bf16[128,768], index: 0, kind: input, shape index: {}]   ;;  %s1392_s1 = inlined_call_operand.vmem [shape: bf16[768,128], index: 1, kind: input, shape index: {}]   ;;  %s1393_s2 = inlined_call_operand.vmem [shape: f32[1,128], index: 2, kind: input, shape index: {}]   ;;  %s1394_s3 = inlined_call_operand.vmem [shape: f32[128,128], index: 3, kind: output, shape index: {}]  }
   0x1   :  { %s1207_s14 = smov 0   ;;  %s1209_s15 = smov 0  }
   0x2   :  { %s1211_s16 = smov 0  }
   0x3 LB: > { %s25_s17 = sadd.s32 1, %s1176_s15  ;;  %p48_p1 = scmp.ne.s32.totalorder %s1168_s13, %s1164_s12  ;;  %s1180_s16 = sphi %s1211_s16, %s13_s16   ;;  %s1176_s15 = sphi %s1209_s15, %s1398_s15   ;;  %s1172_s14 = sphi %s1207_s14, %s1397_s14   ;;  %s1168_s13 = sphi %s1205_s13, %s1396_s13   ;;  %s1164_s12 = sphi %s1203_s12, %s1395_s12  }
   0x4   : > { %p26_p0 = scmp.ge.s32.totalorder %s25_s17, 3  ;;  %p49_p2 = scmp.eq.s32.totalorder %s1180_s16, 0 }
   0x5   : > { %s41_s19 = sadd.s32 1, %s1168_s13  ;;  %p909_p5 = scmp.ge.s32.totalorder %s1180_s16, 3 }
   0x6   : > { %s1400_s17 = smov (%p26_p0, %s25_s17), 0  ;;  %p50_p3 = por %p49_p2, %p48_p1 }
   0x7   : > { %s37_s18 = ssub.s32 %s1176_s15, %s1400_s17  ;;  %162 = sbr.rel (%p909_p5) target bundleno = 32 (0x20), region = 20 }
   0x8   : > { %p39_p4 = scmp.eq.s32.totalorder %s37_s18, 0 }
   0xa   : > { %s1238_s20 = scalar_select %p39_p4, %s1168_s13, %s41_s19  }
   0xc   : > { %165 = sbr.rel (!%p50_p3) target bundleno = 32 (0x20), region = 24  ;;  %s167_s21 = sand.u32 (%p50_p3), 1, %s1168_s13  }
   0xd   : > { %s1051_s22 = sshll.u32 (%p50_p3), %s1176_s15, 3  ;;  %s910_s23 = sshll.u32 (%p50_p3), %s167_s21, 7 }
   0xe   : > { %s1246_s26 = scalar_lea.vmem (%p50_p3), %s1391_s0, %s1051_s22  ;;  %s169_s27 = scalar_lea.vmem (%p50_p3), [#allocation3], %s910_s23 }
   0xf   : > { %v234_v0 = vld [vmem:[%s1246_s26] sm:$0xff] (%p50_p3)  ;;  %v236_v1 = vld [vmem:[%s1246_s26 + $0x18] sm:$0xff] (%p50_p3)  ;;  %v238_v2 = vld [vmem:[%s1246_s26 + $0x30] sm:$0xff] (%p50_p3) }
  0x10   : > { %235 = vst [vmem:[%s169_s27] sm:$0xff] (%p50_p3), %v234_v0  ;;  %v240_v3 = vld [vmem:[%s1246_s26 + $0x48] sm:$0xff] (%p50_p3)  ;;  %v242_v4 = vld [vmem:[%s1246_s26 + $0x60] sm:$0xff] (%p50_p3)  ;;  %v244_v5 = vld [vmem:[%s1246_s26 + $0x78] sm:$0xff] (%p50_p3) }
  0x11   : > { %237 = vst [vmem:[%s169_s27 + $0x8] sm:$0xff] %v236_v1  ;;  %v246_v6 = vld [vmem:[%s1246_s26 + $0x90] sm:$0xff]  ;;  %v248_v7 = vld [vmem:[%s1246_s26 + $0xa8] sm:$0xff]  ;;  %v250_v8 = vld [vmem:[%s1246_s26 + $0xc0] sm:$0xff] }
  0x12   : > { %239 = vst [vmem:[%s169_s27 + $0x10] sm:$0xff] %v238_v2  ;;  %v252_v9 = vld [vmem:[%s1246_s26 + $0xd8] sm:$0xff]  ;;  %v254_v10 = vld [vmem:[%s1246_s26 + $0xf0] sm:$0xff]  ;;  %v256_v11 = vld [vmem:[%s1246_s26 + $0x108] sm:$0xff] }
  0x13   : > { %241 = vst [vmem:[%s169_s27 + $0x18] sm:$0xff] %v240_v3  ;;  %v258_v12 = vld [vmem:[%s1246_s26 + $0x120] sm:$0xff]  ;;  %v260_v13 = vld [vmem:[%s1246_s26 + $0x138] sm:$0xff]  ;;  %v262_v14 = vld [vmem:[%s1246_s26 + $0x150] sm:$0xff] }
  0x14   : > { %243 = vst [vmem:[%s169_s27 + $0x20] sm:$0xff] %v242_v4  ;;  %v264_v15 = vld [vmem:[%s1246_s26 + $0x168] sm:$0xff] }
  0x15   : > { %245 = vst [vmem:[%s169_s27 + $0x28] sm:$0xff] %v244_v5 }
  0x16   : > { %247 = vst [vmem:[%s169_s27 + $0x30] sm:$0xff] %v246_v6 }
  0x17   : > { %249 = vst [vmem:[%s169_s27 + $0x38] sm:$0xff] %v248_v7 }
  0x18   : > { %251 = vst [vmem:[%s169_s27 + $0x40] sm:$0xff] %v250_v8 }
  0x19   : > { %253 = vst [vmem:[%s169_s27 + $0x48] sm:$0xff] %v252_v9 }
  0x1a   : > { %255 = vst [vmem:[%s169_s27 + $0x50] sm:$0xff] %v254_v10 }
  0x1b   : > { %257 = vst [vmem:[%s169_s27 + $0x58] sm:$0xff] %v256_v11 }
  0x1c   : > { %259 = vst [vmem:[%s169_s27 + $0x60] sm:$0xff] %v258_v12 }
  0x1d   : > { %261 = vst [vmem:[%s169_s27 + $0x68] sm:$0xff] %v260_v13 }
  0x1e   : > { %263 = vst [vmem:[%s169_s27 + $0x70] sm:$0xff] %v262_v14 }
  0x1f   : > { %265 = vst [vmem:[%s169_s27 + $0x78] sm:$0xff] %v264_v15 }
  0x20 PF: > { %p913_p6 = scmp.ge.s32.totalorder %s1180_s16, 1  ;;  %p282_p7 = scmp.lt.s32.totalorder %s1180_s16, 4 }
  0x22   : > { %p283_p8 = pnand %p913_p6, %p282_p7 }
  0x23   : > { %s289_s28 = sand.u32 (!%p283_p8), 1, %s1164_s12   ;;  %s915_s29 = sshll.u32 (!%p283_p8), %s1172_s14, 5 }
  0x24   : > { %286 = sbr.rel (%p283_p8) target bundleno = 308 (0x134), region = 66  ;;  %s914_s30 = sshll.u32 (!%p283_p8), %s289_s28, 7 }
  0x25   : > { %p329_p9 = scmp.lt.s32.totalorder (!%p283_p8), %s915_s29, 95  ;;  %s1273_s8 = scalar_lea.vmem (!%p283_p8), [#allocation3], %s914_s30 }
  0x26   : > { %p917_p10 = scmp.ne.s32.totalorder (!%p283_p8), %s1172_s14, 0 }
  0x29   : > { %s1402_s29 = smov (!%p329_p9, %s915_s29), 95  ;;  %352 = sbr.rel (%p917_p10) target bundleno = 63 (0x3f), region = 74 }
  0x2a   : > { %s916_s4 = sshll.u32 %s1402_s29, 2 }
  0x2b   : > { %s1271_s7 = scalar_lea.vmem %s1392_s1, %s916_s4 }
  0x2e   : > { %v1182_v16 = vmov 0.0  }
  0x2f   : > { %353 = vst [vmem:[#allocation2 + $0x30] sm:$0xff] %v1182_v16 }
  0x30   : > { %354 = vst [vmem:[#allocation2] sm:$0xff] %v1182_v16 }
  0x31   : > { %355 = vst [vmem:[#allocation2 + $0x58] sm:$0xff] %v1182_v16 }
  0x32   : > { %356 = vst [vmem:[#allocation2 + $0x18] sm:$0xff] %v1182_v16 }
  0x33   : > { %357 = vst [vmem:[#allocation2 + $0x50] sm:$0xff] %v1182_v16 }
  0x34   : > { %358 = vst [vmem:[#allocation2 + $0x68] sm:$0xff] %v1182_v16 }
  0x35   : > { %359 = vst [vmem:[#allocation2 + $0x8] sm:$0xff] %v1182_v16 }
  0x36   : > { %360 = vst [vmem:[#allocation2 + $0x48] sm:$0xff] %v1182_v16 }
  0x37   : > { %361 = vst [vmem:[#allocation2 + $0x40] sm:$0xff] %v1182_v16 }
  0x38   : > { %362 = vst [vmem:[#allocation2 + $0x20] sm:$0xff] %v1182_v16 }
  0x39   : > { %363 = vst [vmem:[#allocation2 + $0x10] sm:$0xff] %v1182_v16 }
  0x3a   : > { %364 = vst [vmem:[#allocation2 + $0x38] sm:$0xff] %v1182_v16 }
  0x3b   : > { %365 = vst [vmem:[#allocation2 + $0x60] sm:$0xff] %v1182_v16 }
  0x3c   : > { %366 = vst [vmem:[#allocation2 + $0x70] sm:$0xff] %v1182_v16 }
  0x3d   : > { %367 = vst [vmem:[#allocation2 + $0x78] sm:$0xff] %v1182_v16 }
  0x3e   : > { %368 = vst [vmem:[#allocation2 + $0x28] sm:$0xff] %v1182_v16 }
  0x3f PF: > { %v1075_v17 = vld [vmem:[%s1271_s7 + $0x38] sm:$0xff]  ;;  %v1074_v19 = vld [vmem:[%s1271_s7 + $0x30] sm:$0xff]  ;;  %v1073_v21 = vld [vmem:[%s1271_s7 + $0x28] sm:$0xff]  ;;  %p1046_p11 = scmp.ne.s32.totalorder %s1172_s14, 2 }
  0x40   : > { %v1083_v18 = vld [vmem:[%s1271_s7 + $0x78] sm:$0xff]  ;;  %609 = vmatpush.bf16.msra.mxu0 %v1075_v17  ;;  %1084 = vmatpush.bf16.msra.mxu2 %v1075_v17  ;;  %v1082_v20 = vld [vmem:[%s1271_s7 + $0x70] sm:$0xff]  ;;  %v1081_v22 = vld [vmem:[%s1271_s7 + $0x68] sm:$0xff] }
  0x41   : > { %658 = vmatpush.bf16.msra.mxu1 %v1083_v18  ;;  %1092 = vmatpush.bf16.msra.mxu3 %v1083_v18  ;;  %v1072_v23 = vld [vmem:[%s1271_s7 + $0x20] sm:$0xff]  ;;  %v1071_v25 = vld [vmem:[%s1271_s7 + $0x18] sm:$0xff]  ;;  %v1070_v27 = vld [vmem:[%s1271_s7 + $0x10] sm:$0xff] }
  0x42   : > { %v1080_v24 = vld [vmem:[%s1271_s7 + $0x60] sm:$0xff]  ;;  %v1079_v26 = vld [vmem:[%s1271_s7 + $0x58] sm:$0xff]  ;;  %v1078_v28 = vld [vmem:[%s1271_s7 + $0x50] sm:$0xff] }
  0x43   : > { %v1069_v29 = vld [vmem:[%s1271_s7 + $0x8] sm:$0xff]  ;;  %v1068_v31 = vld [vmem:[%s1271_s7] sm:$0xff]  ;;  %v928_v45 = vld [vmem:[%s1273_s8 + $0x10] sm:$0xf] }
  0x44   : > { %610 = vmatpush.bf16.msra.mxu0 %v1074_v19  ;;  %1085 = vmatpush.bf16.msra.mxu2 %v1074_v19  ;;  %v1077_v30 = vld [vmem:[%s1271_s7 + $0x48] sm:$0xff]  ;;  %v1076_v32 = vld [vmem:[%s1271_s7 + $0x40] sm:$0xff]  ;;  %v1055_v46 = vld [vmem:[%s1273_s8 + $0x14] sm:$0xf0] }
  0x45   : > { %659 = vmatpush.bf16.msra.mxu1 %v1082_v20  ;;  %1093 = vmatpush.bf16.msra.mxu3 %v1082_v20  ;;  %v920_v33 = vld [vmem:[%s1273_s8] sm:$0xf]  ;;  %v1053_v34 = vld [vmem:[%s1273_s8 + $0x4] sm:$0xf0]  ;;  %v1052_v37 = vld [vmem:[%s1273_s8 + $0x4] sm:$0xf]  ;;  %v929_v53 = vor.u32 %v1055_v46, %v928_v45 }
  0x46   : > { %v952_v35 = vld [vmem:[%s1273_s8 + $0x40] sm:$0xf]  ;;  %v1061_v36 = vld [vmem:[%s1273_s8 + $0x44] sm:$0xf0]  ;;  %v922_v38 = vld [vmem:[%s1273_s8 + $0x8] sm:$0xf0]  ;;  %v921_v41 = vor.u32 %v1053_v34, %v920_v33 }
  0x47   : > { %v1060_v39 = vld [vmem:[%s1273_s8 + $0x44] sm:$0xf]  ;;  %v954_v40 = vld [vmem:[%s1273_s8 + $0x48] sm:$0xf0]  ;;  %v953_v42 = vor.u32 %v1061_v36, %v952_v35  ;;  %v925_v43 = vor.u32 %v1052_v37, %v922_v38  ;;  %v960_v47 = vld [vmem:[%s1273_s8 + $0x50] sm:$0xf] }
  0x48   : > { %611 = vmatpush.bf16.msra.mxu0 %v1073_v21  ;;  %1086 = vmatpush.bf16.msra.mxu2 %v1073_v21  ;;  %v957_v44 = vor.u32 %v1060_v39, %v954_v40  ;;  %v1063_v48 = vld [vmem:[%s1273_s8 + $0x54] sm:$0xf0]  ;;  %v1054_v49 = vld [vmem:[%s1273_s8 + $0x14] sm:$0xf]  ;;  %v930_v50 = vld [vmem:[%s1273_s8 + $0x18] sm:$0xf0] }
  0x49   : > { %660 = vmatpush.bf16.msra.mxu1 %v1081_v22  ;;  %1094 = vmatpush.bf16.msra.mxu3 %v1081_v22  ;;  %v1062_v51 = vld [vmem:[%s1273_s8 + $0x54] sm:$0xf]  ;;  %v962_v52 = vld [vmem:[%s1273_s8 + $0x58] sm:$0xf0]  ;;  %v961_v54 = vor.u32 %v1063_v48, %v960_v47  ;;  %v933_v55 = vor.u32 %v1054_v49, %v930_v50  ;;  %v936_v57 = vld [vmem:[%s1273_s8 + $0x20] sm:$0xf] }
  0x4a   : > { %v965_v56 = vor.u32 %v1062_v51, %v962_v52  ;;  %v1057_v58 = vld [vmem:[%s1273_s8 + $0x24] sm:$0xf0]  ;;  %v968_v59 = vld [vmem:[%s1273_s8 + $0x60] sm:$0xf]  ;;  %v1056_v61 = vld [vmem:[%s1273_s8 + $0x24] sm:$0xf] }
  0x4b   : > { %v1065_v60 = vld [vmem:[%s1273_s8 + $0x64] sm:$0xf0]  ;;  %v938_v62 = vld [vmem:[%s1273_s8 + $0x28] sm:$0xf0]  ;;  %v1064_v63 = vld [vmem:[%s1273_s8 + $0x64] sm:$0xf]  ;;  %v937_v1 = vor.u32 %v1057_v58, %v936_v57 }
  0x4c   : > { %612 = vmatpush.bf16.msra.mxu0 %v1072_v23  ;;  %1087 = vmatpush.bf16.msra.mxu2 %v1072_v23  ;;  %v970_v0 = vld [vmem:[%s1273_s8 + $0x68] sm:$0xf0]  ;;  %v969_v2 = vor.u32 %v1065_v60, %v968_v59  ;;  %v941_v3 = vor.u32 %v1056_v61, %v938_v62  ;;  %v944_v5 = vld [vmem:[%s1273_s8 + $0x30] sm:$0xf]  ;;  %v1059_v6 = vld [vmem:[%s1273_s8 + $0x34] sm:$0xf0] }
  0x4d   : > { %661 = vmatpush.bf16.msra.mxu1 %v1080_v24  ;;  %1095 = vmatpush.bf16.msra.mxu3 %v1080_v24  ;;  %v973_v4 = vor.u32 %v1064_v63, %v970_v0  ;;  %v976_v7 = vld [vmem:[%s1273_s8 + $0x70] sm:$0xf]  ;;  %v1067_v8 = vld [vmem:[%s1273_s8 + $0x74] sm:$0xf0]  ;;  %v1058_v9 = vld [vmem:[%s1273_s8 + $0x34] sm:$0xf]  ;;  %v945_v13 = vor.u32 %v1059_v6, %v944_v5 }
  0x4e   : > { %v946_v10 = vld [vmem:[%s1273_s8 + $0x38] sm:$0xf0]  ;;  %v1066_v11 = vld [vmem:[%s1273_s8 + $0x74] sm:$0xf]  ;;  %v977_v14 = vor.u32 %v1067_v8, %v976_v7  ;;  %v377_v23 = vld [vmem:[#allocation2 + $0x40] sm:$0xff] }
  0x4f   : > { %v978_v12 = vld [vmem:[%s1273_s8 + $0x78] sm:$0xf0]  ;;  %v949_v15 = vor.u32 %v1058_v9, %v946_v10  ;;  %v369_v18 = vld [vmem:[#allocation2 + $0x30] sm:$0xff]  ;;  %v378_v33 = vld [vmem:[#allocation2 + $0x20] sm:$0xff] }
  0x50   : > { %613 = vmatpush.bf16.msra.mxu0 %v1071_v25  ;;  %1088 = vmatpush.bf16.msra.mxu2 %v1071_v25  ;;  %v981_v16 = vor.u32 %v1066_v11, %v978_v12  ;;  %v371_v37 = vld [vmem:[#allocation2 + $0x58] sm:$0xff]  ;;  %v373_v57 = vld [vmem:[#allocation2 + $0x50] sm:$0xff]  ;;  %v381_v63 = vld [vmem:[#allocation2 + $0x60] sm:$0xff] }
  0x51   : > { %662 = vmatpush.bf16.msra.mxu1 %v1079_v26  ;;  %1096 = vmatpush.bf16.msra.mxu3 %v1079_v26  ;;  %v372_v47 = vld [vmem:[#allocation2 + $0x18] sm:$0xff]  ;;  %v382_v9 = vld [vmem:[#allocation2 + $0x70] sm:$0xff] }
  0x54   : > { %614 = vmatpush.bf16.msra.mxu0 %v1070_v27  ;;  %1089 = vmatpush.bf16.msra.mxu2 %v1070_v27  ;;  %v370_v27 = vld [vmem:[#allocation2] sm:$0xff] }
  0x55   : > { %663 = vmatpush.bf16.msra.mxu1 %v1078_v28  ;;  %1097 = vmatpush.bf16.msra.mxu3 %v1078_v28 }
  0x58   : > { %615 = vmatpush.bf16.msra.mxu0 %v1069_v29  ;;  %1090 = vmatpush.bf16.msra.mxu2 %v1069_v29 }
  0x59   : > { %664 = vmatpush.bf16.msra.mxu1 %v1077_v30  ;;  %1098 = vmatpush.bf16.msra.mxu3 %v1077_v30 }
  0x5c   : > { %616 = vmatpush.bf16.msra.mxu0 %v1068_v31  ;;  %1091 = vmatpush.bf16.msra.mxu2 %v1068_v31 }
  0x5d   : > { %665 = vmatpush.bf16.msra.mxu1 %v1076_v32  ;;  %1099 = vmatpush.bf16.msra.mxu3 %v1076_v32 }
  0x5f   : > { %617 = vmatmul.bf16.vlgmr.msra.gmra.mxu0 %v921_v41  ;;  %637 = vmatmul.bf16.vlgmr.msra.gmra.mxu2 %v953_v42 }
  0x60   : > { %666 = vmatmul.bf16.vlgmr.msra.gmra.mxu1 %v925_v43  ;;  %686 = vmatmul.bf16.vlgmr.msra.gmra.mxu3 %v957_v44  ;;  %v379_v43 = vld [vmem:[#allocation2 + $0x10] sm:$0xff] }
  0x6f   : > { %622 = vmatmul.bf16.gmra.mxu0 %v929_v53  ;;  %642 = vmatmul.bf16.gmra.mxu2 %v961_v54  ;;  %v380_v53 = vld [vmem:[#allocation2 + $0x38] sm:$0xff] }
  0x70   : > { %671 = vmatmul.bf16.gmra.mxu1 %v933_v55  ;;  %691 = vmatmul.bf16.gmra.mxu3 %v965_v56 }
  0x7f   : > { %627 = vmatmul.bf16.gmra.mxu0 %v937_v1  ;;  %647 = vmatmul.bf16.gmra.mxu2 %v969_v2 }
  0x80   : > { %676 = vmatmul.bf16.gmra.mxu1 %v941_v3  ;;  %696 = vmatmul.bf16.gmra.mxu3 %v973_v4  ;;  %v374_v3 = vld [vmem:[#allocation2 + $0x68] sm:$0xff] }
  0x8f   : > { %632 = vmatmul.bf16.gmra.mxu0 %v945_v13  ;;  %652 = vmatmul.bf16.gmra.mxu2 %v977_v14  ;;  %v375_v13 = vld [vmem:[#allocation2 + $0x8] sm:$0xff] }
  0x90   : > { %681 = vmatmul.bf16.gmra.mxu1 %v949_v15  ;;  %701 = vmatmul.bf16.gmra.mxu3 %v981_v16 }
  0xdc   : > { %v618_v17 = vpop.f32.mrf.mxu0 }
  0xdd   : > { %v667_v19 = vpop.f32.mrf.mxu1 }
  0xde   : > { %v668_v20 = vadd.f32 %v667_v19, %v618_v17  ;;  %v383_v19 = vld [vmem:[#allocation2 + $0x78] sm:$0xff] }
  0xe0   : > { %v707_v21 = vadd.f32 %v668_v20, %v369_v18 }
  0xe2   : > { %723 = vst [vmem:[#allocation2 + $0x30] sm:$0xff] %v707_v21  ;;  %v638_v22 = vpop.f32.mrf.mxu2 }
  0xe3   : > { %v687_v24 = vpop.f32.mrf.mxu3 }
  0xe4   : > { %v688_v25 = vadd.f32 %v687_v24, %v638_v22  ;;  %v620_v26 = vpop.f32.mrf.mxu0 }
  0xe5   : > { %v669_v28 = vpop.f32.mrf.mxu1 }
  0xe6   : > { %v715_v29 = vadd.f32 %v688_v25, %v377_v23  ;;  %v670_v30 = vadd.f32 %v669_v28, %v620_v26  ;;  %v376_v23 = vld [vmem:[#allocation2 + $0x48] sm:$0xff] }
  0xe8   : > { %731 = vst [vmem:[#allocation2 + $0x40] sm:$0xff] %v715_v29  ;;  %v708_v31 = vadd.f32 %v670_v30, %v370_v27  ;;  %v384_v29 = vld [vmem:[#allocation2 + $0x28] sm:$0xff] }
  0xea   : > { %724 = vst [vmem:[#allocation2] sm:$0xff] %v708_v31  ;;  %v640_v32 = vpop.f32.mrf.mxu2 }
  0xeb   : > { %v689_v34 = vpop.f32.mrf.mxu3 }
  0xec   : > { %v690_v35 = vadd.f32 %v689_v34, %v640_v32  ;;  %v623_v36 = vpop.f32.mrf.mxu0 }
  0xed   : > { %v672_v38 = vpop.f32.mrf.mxu1 }
  0xee   : > { %v716_v39 = vadd.f32 %v690_v35, %v378_v33  ;;  %v673_v40 = vadd.f32 %v672_v38, %v623_v36 }
  0xf0   : > { %732 = vst [vmem:[#allocation2 + $0x20] sm:$0xff] %v716_v39  ;;  %v709_v41 = vadd.f32 %v673_v40, %v371_v37 }
  0xf2   : > { %725 = vst [vmem:[#allocation2 + $0x58] sm:$0xff] %v709_v41  ;;  %v643_v42 = vpop.f32.mrf.mxu2 }
  0xf3   : > { %v692_v44 = vpop.f32.mrf.mxu3 }
  0xf4   : > { %v693_v45 = vadd.f32 %v692_v44, %v643_v42  ;;  %v625_v46 = vpop.f32.mrf.mxu0 }
  0xf5   : > { %v674_v48 = vpop.f32.mrf.mxu1 }
  0xf6   : > { %v717_v49 = vadd.f32 %v693_v45, %v379_v43  ;;  %v675_v50 = vadd.f32 %v674_v48, %v625_v46 }
  0xf8   : > { %733 = vst [vmem:[#allocation2 + $0x10] sm:$0xff] %v717_v49  ;;  %v710_v51 = vadd.f32 %v675_v50, %v372_v47 }
  0xfa   : > { %726 = vst [vmem:[#allocation2 + $0x18] sm:$0xff] %v710_v51  ;;  %v645_v52 = vpop.f32.mrf.mxu2 }
  0xfb   : > { %v694_v54 = vpop.f32.mrf.mxu3 }
  0xfc   : > { %v695_v55 = vadd.f32 %v694_v54, %v645_v52  ;;  %v628_v56 = vpop.f32.mrf.mxu0 }
  0xfd   : > { %v677_v58 = vpop.f32.mrf.mxu1 }
  0xfe   : > { %v718_v59 = vadd.f32 %v695_v55, %v380_v53  ;;  %v678_v60 = vadd.f32 %v677_v58, %v628_v56 }
 0x100   : > { %734 = vst [vmem:[#allocation2 + $0x38] sm:$0xff] %v718_v59  ;;  %v711_v61 = vadd.f32 %v678_v60, %v373_v57 }
 0x102   : > { %727 = vst [vmem:[#allocation2 + $0x50] sm:$0xff] %v711_v61  ;;  %v648_v62 = vpop.f32.mrf.mxu2 }
 0x103   : > { %v697_v0 = vpop.f32.mrf.mxu3 }
 0x104   : > { %v698_v1 = vadd.f32 %v697_v0, %v648_v62  ;;  %v630_v2 = vpop.f32.mrf.mxu0 }
 0x105   : > { %v679_v4 = vpop.f32.mrf.mxu1 }
 0x106   : > { %v719_v5 = vadd.f32 %v698_v1, %v381_v63  ;;  %v680_v6 = vadd.f32 %v679_v4, %v630_v2 }
 0x108   : > { %735 = vst [vmem:[#allocation2 + $0x60] sm:$0xff] %v719_v5  ;;  %v712_v7 = vadd.f32 %v680_v6, %v374_v3 }
 0x10a   : > { %728 = vst [vmem:[#allocation2 + $0x68] sm:$0xff] %v712_v7  ;;  %v650_v8 = vpop.f32.mrf.mxu2 }
 0x10b   : > { %v699_v10 = vpop.f32.mrf.mxu3 }
 0x10c   : > { %v700_v11 = vadd.f32 %v699_v10, %v650_v8  ;;  %v633_v12 = vpop.f32.mrf.mxu0 }
 0x10d   : > { %v682_v14 = vpop.f32.mrf.mxu1 }
 0x10e   : > { %v720_v15 = vadd.f32 %v700_v11, %v382_v9  ;;  %v683_v16 = vadd.f32 %v682_v14, %v633_v12 }
 0x110   : > { %736 = vst [vmem:[#allocation2 + $0x70] sm:$0xff] %v720_v15  ;;  %v713_v17 = vadd.f32 %v683_v16, %v375_v13 }
 0x112   : > { %729 = vst [vmem:[#allocation2 + $0x8] sm:$0xff] %v713_v17  ;;  %v653_v18 = vpop.f32.mrf.mxu2 }
 0x113   : > { %v702_v20 = vpop.f32.mrf.mxu3 }
 0x114   : > { %v703_v21 = vadd.f32 %v702_v20, %v653_v18  ;;  %v635_v22 = vpop.f32.mrf.mxu0 }
 0x115   : > { %v684_v24 = vpop.f32.mrf.mxu1 }
 0x116   : > { %v721_v25 = vadd.f32 %v703_v21, %v383_v19  ;;  %v685_v26 = vadd.f32 %v684_v24, %v635_v22 }
 0x118   : > { %737 = vst [vmem:[#allocation2 + $0x78] sm:$0xff] %v721_v25  ;;  %v714_v27 = vadd.f32 %v685_v26, %v376_v23 }
 0x11a   : > { %730 = vst [vmem:[#allocation2 + $0x48] sm:$0xff] %v714_v27  ;;  %v655_v28 = vpop.f32.mrf.mxu2 }
 0x11b   : > { %v704_v30 = vpop.f32.mrf.mxu3 }
 0x11c   : > { %v705_v31 = vadd.f32 %v704_v30, %v655_v28  ;;  %742 = sbr.rel (%p1046_p11) target bundleno = 308 (0x134), region = 78 }
 0x11e   : > { %v722_v32 = vadd.f32 %v705_v31, %v384_v29 }
 0x120   : > { %738 = vst [vmem:[#allocation2 + $0x28] sm:$0xff] %v722_v32 }
 0x121   : > { %v743_v33 = vld [vmem:[#allocation2 + $0x30] sm:$0xff]  ;;  %v1141_v34 = vld [vmem:[%s1393_s2] ss:$0 sm:$0xff]  ;;  %v745_v36 = vld [vmem:[#allocation2 + $0x58] sm:$0xff] }
 0x122   : > { %v744_v35 = vld [vmem:[#allocation2] sm:$0xff]  ;;  %v746_v37 = vld [vmem:[#allocation2 + $0x18] sm:$0xff]  ;;  %v763_v38 = vadd.f32 %v1141_v34, %v743_v33  ;;  %v765_v40 = vadd.f32 %v1141_v34, %v745_v36  ;;  %v747_v41 = vld [vmem:[#allocation2 + $0x50] sm:$0xff] }
 0x123   : > { %v764_v39 = vadd.f32 %v1141_v34, %v744_v35  ;;  %v748_v42 = vld [vmem:[#allocation2 + $0x68] sm:$0xff]  ;;  %v766_v43 = vadd.f32 %v1141_v34, %v746_v37  ;;  %v767_v45 = vadd.f32 %v1141_v34, %v747_v41  ;;  %v751_v48 = vld [vmem:[#allocation2 + $0x40] sm:$0xff]  ;;  %v753_v52 = vld [vmem:[#allocation2 + $0x10] sm:$0xff] }
 0x124   : > { %v749_v44 = vld [vmem:[#allocation2 + $0x8] sm:$0xff]  ;;  %779 = vst [vmem:[%s1394_s3] sm:$0xff] %v763_v38  ;;  %v768_v47 = vadd.f32 %v1141_v34, %v748_v42  ;;  %v752_v50 = vld [vmem:[#allocation2 + $0x20] sm:$0xff]  ;;  %v771_v53 = vadd.f32 %v1141_v34, %v751_v48  ;;  %v754_v54 = vld [vmem:[#allocation2 + $0x38] sm:$0xff]  ;;  %v773_v57 = vadd.f32 %v1141_v34, %v753_v52 }
 0x125   : > { %v750_v46 = vld [vmem:[#allocation2 + $0x48] sm:$0xff]  ;;  %780 = vst [vmem:[%s1394_s3 + $0x8] sm:$0xff] %v764_v39  ;;  %v769_v49 = vadd.f32 %v1141_v34, %v749_v44  ;;  %v772_v55 = vadd.f32 %v1141_v34, %v752_v50  ;;  %v755_v56 = vld [vmem:[#allocation2 + $0x60] sm:$0xff]  ;;  %v756_v58 = vld [vmem:[#allocation2 + $0x70] sm:$0xff]  ;;  %v774_v59 = vadd.f32 %v1141_v34, %v754_v54 }
 0x126   : > { %781 = vst [vmem:[%s1394_s3 + $0x10] sm:$0xff] %v765_v40  ;;  %v770_v51 = vadd.f32 %v1141_v34, %v750_v46  ;;  %v757_v60 = vld [vmem:[#allocation2 + $0x78] sm:$0xff]  ;;  %v775_v61 = vadd.f32 %v1141_v34, %v755_v56  ;;  %v776_v63 = vadd.f32 %v1141_v34, %v756_v58 }
 0x127   : > { %782 = vst [vmem:[%s1394_s3 + $0x18] sm:$0xff] %v766_v43  ;;  %v758_v62 = vld [vmem:[#allocation2 + $0x28] sm:$0xff]  ;;  %v777_v0 = vadd.f32 %v1141_v34, %v757_v60 }
 0x128   : > { %783 = vst [vmem:[%s1394_s3 + $0x20] sm:$0xff] %v767_v45  ;;  %v778_v1 = vadd.f32 %v1141_v34, %v758_v62 }
 0x129   : > { %784 = vst [vmem:[%s1394_s3 + $0x28] sm:$0xff] %v768_v47 }
 0x12a   : > { %785 = vst [vmem:[%s1394_s3 + $0x30] sm:$0xff] %v769_v49 }
 0x12b   : > { %786 = vst [vmem:[%s1394_s3 + $0x38] sm:$0xff] %v770_v51 }
 0x12c   : > { %787 = vst [vmem:[%s1394_s3 + $0x40] sm:$0xff] %v771_v53 }
 0x12d   : > { %788 = vst [vmem:[%s1394_s3 + $0x48] sm:$0xff] %v772_v55 }
 0x12e   : > { %789 = vst [vmem:[%s1394_s3 + $0x50] sm:$0xff] %v773_v57 }
 0x12f   : > { %790 = vst [vmem:[%s1394_s3 + $0x58] sm:$0xff] %v774_v59 }
 0x130   : > { %791 = vst [vmem:[%s1394_s3 + $0x60] sm:$0xff] %v775_v61 }
 0x131   : > { %792 = vst [vmem:[%s1394_s3 + $0x68] sm:$0xff] %v776_v63 }
 0x132   : > { %793 = vst [vmem:[%s1394_s3 + $0x70] sm:$0xff] %v777_v0 }
 0x133   : > { %794 = vst [vmem:[%s1394_s3 + $0x78] sm:$0xff] %v778_v1 }
 0x134 PF: > { %s13_s16 = sadd.s32 1, %s1180_s16   ;;  %s1395_s12 = smov %s1168_s13 }
 0x135   : > { %p10_p12 = scmp.ge.s32.totalorder %s13_s16, 5   ;;  %s1396_s13 = smov %s1238_s20 }
 0x136   : > { %s1397_s14 = smov %s1176_s15  ;;  %s1398_s15 = smov %s1400_s17 }
 0x137   :  { %12 = sbr.rel (!%p10_p12) target bundleno = 3 (0x3), region = 119 }

// kernel: resnet_forward.46
= control target key start
LH: loop header
LB: loop body
LE: loop exit
PB: predicated region body
PF: predicated region fallthrough
CT: control target
= control target key end

     0   :  { %vm121_vm0 = vcmask 523264   ;;  %s371_s0 = inlined_call_operand.vmem [shape: f32[128,64], index: 0, kind: input, shape index: {}]   ;;  %s372_s1 = inlined_call_operand.vmem [shape: f32[1,64], index: 1, kind: input, shape index: {}]   ;;  %s373_s2 = inlined_call_operand.vmem [shape: f32[1,64], index: 2, kind: input, shape index: {}]   ;;  %s374_s3 = inlined_call_operand.vmem [shape: f32[128,64], index: 3, kind: input, shape index: {}]   ;;  %s375_s4 = inlined_call_operand.vmem [shape: f32[128,64], index: 4, kind: output, shape index: {}]  }
   0x1   :  { %v17_v0 = vld [vmem:[%s371_s0] sm:$0xff]  ;;  %v18_v4 = vld [vmem:[%s371_s0 + $0x8] sm:$0xff]  ;;  %v19_v5 = vld [vmem:[%s371_s0 + $0x10] sm:$0xff] }
   0x2   :  { %v175_v1 = vld [vmem:[%s372_s1] ss:$0 sm:$0xff]  ;;  %v74_v8 = vld [vmem:[%s374_s3 + $0x8] sm:$0xff]  ;;  %v20_v10 = vld [vmem:[%s371_s0 + $0x18] sm:$0xff] }
   0x3   :  { %v180_v2 = vld [vmem:[%s373_s2] ss:$0 sm:$0xff]  ;;  %v37_v3 = vmul.f32 %v175_v1, %v17_v0  ;;  %v38_v7 = vmul.f32 %v175_v1, %v18_v4  ;;  %v39_v9 = vmul.f32 %v175_v1, %v19_v5  ;;  %v75_v12 = vld [vmem:[%s374_s3 + $0x10] sm:$0xff]  ;;  %v40_v13 = vmul.f32 %v175_v1, %v20_v10  ;;  %v22_v15 = vld [vmem:[%s371_s0 + $0x28] sm:$0xff] }
   0x4   :  { %v73_v6 = vld [vmem:[%s374_s3] sm:$0xff]  ;;  %v76_v18 = vld [vmem:[%s374_s3 + $0x18] sm:$0xff]  ;;  %v42_v20 = vmul.f32 %v175_v1, %v22_v15  ;;  %v23_v21 = vld [vmem:[%s371_s0 + $0x30] sm:$0xff] }
   0x5   :  { %v57_v11 = vadd.f32 %v180_v2, %v37_v3  ;;  %v21_v14 = vld [vmem:[%s371_s0 + $0x20] sm:$0xff]  ;;  %v58_v16 = vadd.f32 %v180_v2, %v38_v7  ;;  %v59_v17 = vadd.f32 %v180_v2, %v39_v9  ;;  %v60_v23 = vadd.f32 %v180_v2, %v40_v13  ;;  %v78_v25 = vld [vmem:[%s374_s3 + $0x28] sm:$0xff]  ;;  %v24_v27 = vld [vmem:[%s371_s0 + $0x38] sm:$0xff] }
   0x6   :  { %v41_v19 = vmul.f32 %v175_v1, %v21_v14  ;;  %v77_v24 = vld [vmem:[%s374_s3 + $0x20] sm:$0xff]  ;;  %v43_v26 = vmul.f32 %v175_v1, %v23_v21  ;;  %v62_v31 = vadd.f32 %v180_v2, %v42_v20  ;;  %v79_v32 = vld [vmem:[%s374_s3 + $0x30] sm:$0xff]  ;;  %v44_v37 = vmul.f32 %v175_v1, %v24_v27  ;;  %v26_v38 = vld [vmem:[%s371_s0 + $0x48] sm:$0xff] }
   0x7   :  { %v89_v22 = vadd.f32 %v73_v6, %v57_v11  ;;  %v90_v28 = vadd.f32 %v74_v8, %v58_v16  ;;  %v91_v29 = vadd.f32 %v75_v12, %v59_v17  ;;  %v25_v33 = vld [vmem:[%s371_s0 + $0x40] sm:$0xff]  ;;  %v92_v35 = vadd.f32 %v76_v18, %v60_v23  ;;  %v27_v39 = vld [vmem:[%s371_s0 + $0x50] sm:$0xff]  ;;  %v80_v44 = vld [vmem:[%s374_s3 + $0x38] sm:$0xff] }
   0x8   :  { %v61_v30 = vadd.f32 %v180_v2, %v41_v19  ;;  %v63_v36 = vadd.f32 %v180_v2, %v43_v26  ;;  %v94_v43 = vadd.f32 %v78_v25, %v62_v31  ;;  %v28_v45 = vld [vmem:[%s371_s0 + $0x58] sm:$0xff]  ;;  %v64_v48 = vadd.f32 %v180_v2, %v44_v37  ;;  %v29_v50 = vld [vmem:[%s371_s0 + $0x60] sm:$0xff]  ;;  %v30_v51 = vld [vmem:[%s371_s0 + $0x68] sm:$0xff] }
   0x9   :  { %v105_v34 = vmax.f32 %v89_v22, 0.0  ;;  %v106_v40 = vmax.f32 %v90_v28, 0.0  ;;  %v107_v41 = vmax.f32 %v91_v29, 0.0  ;;  %v108_v46 = vmax.f32 %v92_v35, 0.0  ;;  %v81_v54 = vld [vmem:[%s374_s3 + $0x40] sm:$0xff]  ;;  %v31_v57 = vld [vmem:[%s371_s0 + $0x70] sm:$0xff] }
   0xa   :  { %v93_v42 = vadd.f32 %v77_v24, %v61_v30  ;;  %v95_v47 = vadd.f32 %v79_v32, %v63_v36  ;;  %v45_v49 = vmul.f32 %v175_v1, %v25_v33  ;;  %v110_v53 = vmax.f32 %v94_v43, 0.0  ;;  %v82_v61 = vld [vmem:[%s374_s3 + $0x48] sm:$0xff]  ;;  %v83_v62 = vld [vmem:[%s374_s3 + $0x50] sm:$0xff]  ;;  %v84_v4 = vld [vmem:[%s374_s3 + $0x58] sm:$0xff] }
   0xb   :  { %122 = vst.msk [vmem:[%s375_s4] sm:$0xff] %vm121_vm0, %v105_v34  ;;  %v46_v55 = vmul.f32 %v175_v1, %v26_v38  ;;  %v47_v56 = vmul.f32 %v175_v1, %v27_v39  ;;  %v96_v59 = vadd.f32 %v80_v44, %v64_v48  ;;  %v48_v63 = vmul.f32 %v175_v1, %v28_v45  ;;  %v32_v7 = vld [vmem:[%s371_s0 + $0x78] sm:$0xff]  ;;  %v85_v11 = vld [vmem:[%s374_s3 + $0x60] sm:$0xff]  ;;  %v86_v12 = vld [vmem:[%s374_s3 + $0x68] sm:$0xff] }
   0xc   :  { %123 = vst.msk [vmem:[%s375_s4 + $0x8] sm:$0xff] %vm121_vm0, %v106_v40  ;;  %v109_v52 = vmax.f32 %v93_v42, 0.0  ;;  %v111_v58 = vmax.f32 %v95_v47, 0.0  ;;  %v65_v60 = vadd.f32 %v180_v2, %v45_v49  ;;  %v49_v5 = vmul.f32 %v175_v1, %v29_v50  ;;  %v87_v18 = vld [vmem:[%s374_s3 + $0x70] sm:$0xff]  ;;  %v88_v27 = vld [vmem:[%s374_s3 + $0x78] sm:$0xff] }
   0xd   :  { %124 = vst.msk [vmem:[%s375_s4 + $0x10] sm:$0xff] %vm121_vm0, %v107_v41  ;;  %v66_v0 = vadd.f32 %v180_v2, %v46_v55  ;;  %v67_v3 = vadd.f32 %v180_v2, %v47_v56  ;;  %v50_v6 = vmul.f32 %v175_v1, %v30_v51  ;;  %v112_v8 = vmax.f32 %v96_v59, 0.0 }
   0xe   :  { %125 = vst.msk [vmem:[%s375_s4 + $0x18] sm:$0xff] %vm121_vm0, %v108_v46  ;;  %v97_v9 = vadd.f32 %v81_v54, %v65_v60  ;;  %v68_v10 = vadd.f32 %v180_v2, %v48_v63  ;;  %v51_v13 = vmul.f32 %v175_v1, %v31_v57  ;;  %v69_v16 = vadd.f32 %v180_v2, %v49_v5 }
   0xf   :  { %126 = vst.msk [vmem:[%s375_s4 + $0x20] sm:$0xff] %vm121_vm0, %v109_v52  ;;  %v98_v14 = vadd.f32 %v82_v61, %v66_v0  ;;  %v99_v15 = vadd.f32 %v83_v62, %v67_v3  ;;  %v70_v17 = vadd.f32 %v180_v2, %v50_v6  ;;  %v52_v22 = vmul.f32 %v175_v1, %v32_v7 }
  0x10   :  { %127 = vst.msk [vmem:[%s375_s4 + $0x28] sm:$0xff] %vm121_vm0, %v110_v53  ;;  %v113_v19 = vmax.f32 %v97_v9, 0.0  ;;  %v100_v20 = vadd.f32 %v84_v4, %v68_v10  ;;  %v71_v21 = vadd.f32 %v180_v2, %v51_v13  ;;  %v101_v25 = vadd.f32 %v85_v11, %v69_v16 }
  0x11   :  { %128 = vst.msk [vmem:[%s375_s4 + $0x30] sm:$0xff] %vm121_vm0, %v111_v58  ;;  %v114_v23 = vmax.f32 %v98_v14, 0.0  ;;  %v115_v24 = vmax.f32 %v99_v15, 0.0  ;;  %v102_v26 = vadd.f32 %v86_v12, %v70_v17  ;;  %v72_v29 = vadd.f32 %v180_v2, %v52_v22 }
  0x12   :  { %129 = vst.msk [vmem:[%s375_s4 + $0x38] sm:$0xff] %vm121_vm0, %v112_v8  ;;  %v116_v28 = vmax.f32 %v100_v20, 0.0  ;;  %v103_v1 = vadd.f32 %v87_v18, %v71_v21  ;;  %v117_v30 = vmax.f32 %v101_v25, 0.0 }
  0x13   :  { %130 = vst.msk [vmem:[%s375_s4 + $0x40] sm:$0xff] %vm121_vm0, %v113_v19  ;;  %v118_v31 = vmax.f32 %v102_v26, 0.0  ;;  %v104_v33 = vadd.f32 %v88_v27, %v72_v29 }
  0x14   :  { %131 = vst.msk [vmem:[%s375_s4 + $0x48] sm:$0xff] %vm121_vm0, %v114_v23  ;;  %v119_v32 = vmax.f32 %v103_v1, 0.0 }
  0x15   :  { %132 = vst.msk [vmem:[%s375_s4 + $0x50] sm:$0xff] %vm121_vm0, %v115_v24  ;;  %v120_v2 = vmax.f32 %v104_v33, 0.0 }
  0x16   :  { %133 = vst.msk [vmem:[%s375_s4 + $0x58] sm:$0xff] %vm121_vm0, %v116_v28 }
  0x17   :  { %134 = vst.msk [vmem:[%s375_s4 + $0x60] sm:$0xff] %vm121_vm0, %v117_v30 }
  0x18   :  { %135 = vst.msk [vmem:[%s375_s4 + $0x68] sm:$0xff] %vm121_vm0, %v118_v31 }
  0x19   :  { %136 = vst.msk [vmem:[%s375_s4 + $0x70] sm:$0xff] %vm121_vm0, %v119_v32 }
  0x1a   :  { %137 = vst.msk [vmem:[%s375_s4 + $0x78] sm:$0xff] %vm121_vm0, %v120_v2 }

// kernel: resnet_forward.52
= control target key start
LH: loop header
LB: loop body
LE: loop exit
PB: predicated region body
PF: predicated region fallthrough
CT: control target
= control target key end

     0   :  { %v57_v0 = vmov 0.0   ;;  %s103_s1 = inlined_call_operand.vmem [shape: f32[1,128], index: 1, kind: output, shape index: {0}]   ;;  %s104_s2 = inlined_call_operand.vmem [shape: f32[1,128], index: 2, kind: output, shape index: {1}]   ;;  %s105_s0 = inlined_call_operand.vmem [shape: f32[32,128], index: 0, kind: input, shape index: {}]  }
   0x1   :  { %14 = vst [vmem:[%s103_s1] sm:$0x1] %v57_v0  ;;  %v16_v1 = vld [vmem:[%s105_s0] sm:$0xff]  ;;  %v17_v2 = vld [vmem:[%s105_s0 + $0x8] sm:$0xff]  ;;  %v18_v3 = vld [vmem:[%s105_s0 + $0x10] sm:$0xff] }
   0x2   :  { %15 = vst [vmem:[%s104_s2] sm:$0x1] %v57_v0  ;;  %v19_v4 = vld [vmem:[%s105_s0 + $0x18] sm:$0xff]  ;;  %v21_v5 = vadd.f32 %v17_v2, %v16_v1  ;;  %v33_v6 = vmul.f32 %v16_v1, %v16_v1  ;;  %v34_v7 = vmul.f32 %v17_v2, %v17_v2  ;;  %v35_v8 = vmul.f32 %v18_v3, %v18_v3 }
   0x3   :  { %v36_v10 = vmul.f32 %v19_v4, %v19_v4 }
   0x4   :  { %v22_v9 = vadd.f32 %v21_v5, %v18_v3  ;;  %v37_v11 = vadd.f32 %v34_v7, %v33_v6 }
   0x6   :  { %v23_v12 = vadd.f32 %v22_v9, %v19_v4  ;;  %v38_v13 = vadd.f32 %v37_v11, %v35_v8 }
   0x8   :  { %v24_v14 = vrot.slane %v23_v12, 4  ;;  %v39_v15 = vadd.f32 %v38_v13, %v36_v10  ;;  %v20_v24 = vld [vmem:[%s103_s1] sm:$0x1] }
   0x9   :  { %v32_v27 = vld [vmem:[%s104_s2] sm:$0x1] }
   0xa   :  { %v25_v16 = vadd.f32 %v24_v14, %v23_v12  ;;  %v40_v17 = vrot.slane %v39_v15, 4 }
   0xc   :  { %v26_v18 = vrot.slane %v25_v16, 2  ;;  %v41_v19 = vadd.f32 %v40_v17, %v39_v15 }
   0xe   :  { %v27_v20 = vadd.f32 %v26_v18, %v25_v16  ;;  %v42_v21 = vrot.slane %v41_v19, 2 }
  0x10   :  { %v28_v22 = vrot.slane %v27_v20, 1  ;;  %v43_v23 = vadd.f32 %v42_v21, %v41_v19 }
  0x12   :  { %v29_v25 = vadd.f32 %v28_v22, %v27_v20  ;;  %v44_v26 = vrot.slane %v43_v23, 1 }
  0x14   :  { %v30_v28 = vadd.f32 %v29_v25, %v20_v24  ;;  %v45_v29 = vadd.f32 %v44_v26, %v43_v23 }
  0x16   :  { %31 = vst [vmem:[%s103_s1] sm:$0x1] %v30_v28  ;;  %v46_v30 = vadd.f32 %v45_v29, %v32_v27 }
  0x18   :  { %47 = vst [vmem:[%s104_s2] sm:$0x1] %v46_v30 }

// kernel: resnet_forward.51
= control target key start
LH: loop header
LB: loop body
LE: loop exit
PB: predicated region body
PF: predicated region fallthrough
CT: control target
= control target key end

     0   :  { %s280_s1 = inlined_call_operand.vmem [shape: bf16[128,128], index: 1, kind: input, shape index: {}]   ;;  %s281_s2 = inlined_call_operand.vmem [shape: f32[1,128], index: 2, kind: input, shape index: {}]   ;;  %s282_s0 = inlined_call_operand.vmem [shape: bf16[32,128], index: 0, kind: input, shape index: {}]   ;;  %s283_s3 = inlined_call_operand.vmem [shape: f32[32,128], index: 3, kind: output, shape index: {}]  }
   0x1   :  { %v205_v0 = vld [vmem:[%s280_s1 + $0x38] sm:$0xff]  ;;  %v204_v1 = vld [vmem:[%s280_s1 + $0x30] sm:$0xff]  ;;  %v203_v2 = vld [vmem:[%s280_s1 + $0x28] sm:$0xff] }
   0x2   :  { %106 = vmatpush.bf16.msra.mxu0 %v205_v0  ;;  %206 = vmatpush.bf16.msra.mxu1 %v205_v0  ;;  %v202_v3 = vld [vmem:[%s280_s1 + $0x20] sm:$0xff]  ;;  %v201_v4 = vld [vmem:[%s280_s1 + $0x18] sm:$0xff]  ;;  %v200_v5 = vld [vmem:[%s280_s1 + $0x10] sm:$0xff] }
   0x3   :  { %v199_v6 = vld [vmem:[%s280_s1 + $0x8] sm:$0xff]  ;;  %v198_v7 = vld [vmem:[%s280_s1] sm:$0xff] }
   0x4   :  { %v196_v8 = vld [vmem:[%s282_s0] sm:$0xff]  ;;  %v197_v9 = vld [vmem:[%s282_s0 + $0x8] sm:$0xff] }
   0x5   :  { %v214_v10 = vld [vmem:[%s281_s2] ss:$0 sm:$0xff] }
   0x6   :  { %107 = vmatpush.bf16.msra.mxu0 %v204_v1  ;;  %207 = vmatpush.bf16.msra.mxu1 %v204_v1 }
   0xa   :  { %108 = vmatpush.bf16.msra.mxu0 %v203_v2  ;;  %208 = vmatpush.bf16.msra.mxu1 %v203_v2 }
   0xe   :  { %109 = vmatpush.bf16.msra.mxu0 %v202_v3  ;;  %209 = vmatpush.bf16.msra.mxu1 %v202_v3 }
  0x12   :  { %110 = vmatpush.bf16.msra.mxu0 %v201_v4  ;;  %210 = vmatpush.bf16.msra.mxu1 %v201_v4 }
  0x16   :  { %111 = vmatpush.bf16.msra.mxu0 %v200_v5  ;;  %211 = vmatpush.bf16.msra.mxu1 %v200_v5 }
  0x1a   :  { %112 = vmatpush.bf16.msra.mxu0 %v199_v6  ;;  %212 = vmatpush.bf16.msra.mxu1 %v199_v6 }
  0x1e   :  { %113 = vmatpush.bf16.msra.mxu0 %v198_v7  ;;  %213 = vmatpush.bf16.msra.mxu1 %v198_v7 }
  0x21   :  { %114 = vmatmul.bf16.vlgmr.msra.gmra.mxu0 %v196_v8  ;;  %119 = vmatmul.bf16.vlgmr.msra.gmra.mxu1 %v197_v9 }
  0x9e   :  { %v115_v11 = vpop.f32.mrf.mxu0  ;;  %v120_v12 = vpop.f32.mrf.mxu1 }
  0x9f   :  { %v144_v13 = vadd.f32 %v214_v10, %v115_v11  ;;  %v146_v14 = vadd.f32 %v214_v10, %v120_v12 }
  0xa1   :  { %148 = vst [vmem:[%s283_s3] sm:$0xff] %v144_v13 }
  0xa2   :  { %150 = vst [vmem:[%s283_s3 + $0x10] sm:$0xff] %v146_v14 }
  0xa6   :  { %v117_v15 = vpop.f32.mrf.mxu0  ;;  %v122_v16 = vpop.f32.mrf.mxu1 }
  0xa7   :  { %v145_v17 = vadd.f32 %v214_v10, %v117_v15  ;;  %v147_v18 = vadd.f32 %v214_v10, %v122_v16 }
  0xa9   :  { %149 = vst [vmem:[%s283_s3 + $0x8] sm:$0xff] %v145_v17 }
  0xaa   :  { %151 = vst [vmem:[%s283_s3 + $0x18] sm:$0xff] %v147_v18 }

// kernel: resnet_forward.53
= control target key start
LH: loop header
LB: loop body
LE: loop exit
PB: predicated region body
PF: predicated region fallthrough
CT: control target
= control target key end

     0   :  { %s94_s0 = inlined_call_operand.vmem [shape: f32[32,128], index: 0, kind: input, shape index: {}]   ;;  %s95_s1 = inlined_call_operand.vmem [shape: f32[1,128], index: 1, kind: input, shape index: {}]   ;;  %s96_s2 = inlined_call_operand.vmem [shape: f32[1,128], index: 2, kind: input, shape index: {}]   ;;  %s97_s3 = inlined_call_operand.vmem [shape: f32[32,128], index: 3, kind: output, shape index: {}]  }
   0x1   :  { %v14_v0 = vld [vmem:[%s94_s0] sm:$0xff]  ;;  %v15_v3 = vld [vmem:[%s94_s0 + $0x8] sm:$0xff]  ;;  %v16_v6 = vld [vmem:[%s94_s0 + $0x10] sm:$0xff] }
   0x2   :  { %v42_v1 = vld [vmem:[%s95_s1] ss:$0 sm:$0xff]  ;;  %v17_v7 = vld [vmem:[%s94_s0 + $0x18] sm:$0xff] }
   0x3   :  { %v43_v2 = vld [vmem:[%s96_s2] ss:$0 sm:$0xff]  ;;  %v22_v4 = vmul.f32 %v42_v1, %v14_v0  ;;  %v23_v5 = vmul.f32 %v42_v1, %v15_v3  ;;  %v24_v8 = vmul.f32 %v42_v1, %v16_v6  ;;  %v25_v9 = vmul.f32 %v42_v1, %v17_v7 }
   0x5   :  { %v30_v10 = vadd.f32 %v43_v2, %v22_v4  ;;  %v31_v11 = vadd.f32 %v43_v2, %v23_v5  ;;  %v32_v12 = vadd.f32 %v43_v2, %v24_v8  ;;  %v33_v13 = vadd.f32 %v43_v2, %v25_v9 }
   0x7   :  { %34 = vst [vmem:[%s97_s3] sm:$0xff] %v30_v10 }
   0x8   :  { %35 = vst [vmem:[%s97_s3 + $0x8] sm:$0xff] %v31_v11 }
   0x9   :  { %36 = vst [vmem:[%s97_s3 + $0x10] sm:$0xff] %v32_v12 }
   0xa   :  { %37 = vst [vmem:[%s97_s3 + $0x18] sm:$0xff] %v33_v13 }

// kernel: resnet_forward.49
= control target key start
LH: loop header
LB: loop body
LE: loop exit
PB: predicated region body
PF: predicated region fallthrough
CT: control target
= control target key end

     0   :  { %s98_s0 = inlined_call_operand.vmem [shape: f32[32,128], index: 0, kind: input, shape index: {}]   ;;  %s99_s1 = inlined_call_operand.vmem [shape: f32[1,128], index: 1, kind: input, shape index: {}]   ;;  %s100_s2 = inlined_call_operand.vmem [shape: f32[1,128], index: 2, kind: input, shape index: {}]   ;;  %s101_s3 = inlined_call_operand.vmem [shape: f32[32,128], index: 3, kind: output, shape index: {}]  }
   0x1   :  { %v14_v0 = vld [vmem:[%s98_s0] sm:$0xff]  ;;  %v15_v3 = vld [vmem:[%s98_s0 + $0x8] sm:$0xff]  ;;  %v16_v6 = vld [vmem:[%s98_s0 + $0x10] sm:$0xff] }
   0x2   :  { %v46_v1 = vld [vmem:[%s99_s1] ss:$0 sm:$0xff]  ;;  %v17_v7 = vld [vmem:[%s98_s0 + $0x18] sm:$0xff] }
   0x3   :  { %v47_v2 = vld [vmem:[%s100_s2] ss:$0 sm:$0xff]  ;;  %v22_v4 = vmul.f32 %v46_v1, %v14_v0  ;;  %v23_v5 = vmul.f32 %v46_v1, %v15_v3  ;;  %v24_v8 = vmul.f32 %v46_v1, %v16_v6  ;;  %v25_v9 = vmul.f32 %v46_v1, %v17_v7 }
   0x5   :  { %v30_v10 = vadd.f32 %v47_v2, %v22_v4  ;;  %v31_v11 = vadd.f32 %v47_v2, %v23_v5  ;;  %v32_v12 = vadd.f32 %v47_v2, %v24_v8  ;;  %v33_v13 = vadd.f32 %v47_v2, %v25_v9 }
   0x7   :  { %v34_v14 = vmax.f32 %v30_v10, 0.0  ;;  %v35_v15 = vmax.f32 %v31_v11, 0.0  ;;  %v36_v16 = vmax.f32 %v32_v12, 0.0  ;;  %v37_v17 = vmax.f32 %v33_v13, 0.0 }
   0x9   :  { %38 = vst [vmem:[%s101_s3] sm:$0xff] %v34_v14 }
   0xa   :  { %39 = vst [vmem:[%s101_s3 + $0x8] sm:$0xff] %v35_v15 }
   0xb   :  { %40 = vst [vmem:[%s101_s3 + $0x10] sm:$0xff] %v36_v16 }
   0xc   :  { %41 = vst [vmem:[%s101_s3 + $0x18] sm:$0xff] %v37_v17 }

// kernel: resnet_forward.47
= control target key start
LH: loop header
LB: loop body
LE: loop exit
PB: predicated region body
PF: predicated region fallthrough
CT: control target
= control target key end

     0   :  { %s879_s12 = smov 0   ;;  %s881_s13 = smov 0   ;;  %s989_s0 = inlined_call_operand.vmem [shape: bf16[32,768], index: 0, kind: input, shape index: {}]   ;;  %s990_s1 = inlined_call_operand.vmem [shape: bf16[768,128], index: 1, kind: input, shape index: {}]   ;;  %s991_s2 = inlined_call_operand.vmem [shape: f32[1,128], index: 2, kind: input, shape index: {}]   ;;  %s992_s3 = inlined_call_operand.vmem [shape: f32[32,128], index: 3, kind: output, shape index: {}]  }
   0x1   :  { %s883_s14 = smov 0   ;;  %s885_s15 = smov 0  }
   0x2   :  { %s887_s16 = smov 0  }
   0x3 LB: > { %s25_s17 = sadd.s32 1, %s852_s15  ;;  %p48_p1 = scmp.ne.s32.totalorder %s844_s13, %s840_s12  ;;  %s856_s16 = sphi %s887_s16, %s13_s16   ;;  %s852_s15 = sphi %s885_s15, %s996_s15   ;;  %s848_s14 = sphi %s883_s14, %s995_s14   ;;  %s844_s13 = sphi %s881_s13, %s994_s13   ;;  %s840_s12 = sphi %s879_s12, %s993_s12  }
   0x4   : > { %p26_p0 = scmp.ge.s32.totalorder %s25_s17, 3  ;;  %p49_p2 = scmp.eq.s32.totalorder %s856_s16, 0 }
   0x5   : > { %s41_s19 = sadd.s32 1, %s844_s13  ;;  %p645_p5 = scmp.ge.s32.totalorder %s856_s16, 3 }
   0x6   : > { %s998_s17 = smov (%p26_p0, %s25_s17), 0  ;;  %p50_p3 = por %p49_p2, %p48_p1 }
   0x7   : > { %s37_s18 = ssub.s32 %s852_s15, %s998_s17  ;;  %162 = sbr.rel (%p645_p5) target bundleno = 20 (0x14), region = 20 }
   0x8   : > { %p39_p4 = scmp.eq.s32.totalorder %s37_s18, 0 }
   0xa   : > { %s914_s20 = scalar_select %p39_p4, %s844_s13, %s41_s19  }
   0xc   : > { %165 = sbr.rel (!%p50_p3) target bundleno = 20 (0x14), region = 24  ;;  %s167_s21 = sand.u32 (%p50_p3), 1, %s844_s13  }
   0xd   : > { %s739_s22 = sshll.u32 (%p50_p3), %s852_s15, 3  ;;  %s646_s23 = sshll.u32 (%p50_p3), %s167_s21, 5 }
   0xe   : > { %s175_s26 = scalar_lea.vmem (%p50_p3), %s989_s0, %s739_s22  ;;  %s169_s27 = scalar_lea.vmem (%p50_p3), [#allocation3], %s646_s23 }
   0xf   : > { %v210_v0 = vld [vmem:[%s175_s26] sm:$0xff] (%p50_p3)  ;;  %v212_v1 = vld [vmem:[%s175_s26 + $0x18] sm:$0xff] (%p50_p3)  ;;  %v214_v2 = vld [vmem:[%s175_s26 + $0x30] sm:$0xff] (%p50_p3) }
  0x10   : > { %211 = vst [vmem:[%s169_s27] sm:$0xff] (%p50_p3), %v210_v0  ;;  %v216_v3 = vld [vmem:[%s175_s26 + $0x48] sm:$0xff] (%p50_p3) }
  0x11   : > { %213 = vst [vmem:[%s169_s27 + $0x8] sm:$0xff] %v212_v1 }
  0x12   : > { %215 = vst [vmem:[%s169_s27 + $0x10] sm:$0xff] %v214_v2 }
  0x13   : > { %217 = vst [vmem:[%s169_s27 + $0x18] sm:$0xff] %v216_v3 }
  0x14 PF: > { %p649_p6 = scmp.ge.s32.totalorder %s856_s16, 1  ;;  %p234_p7 = scmp.lt.s32.totalorder %s856_s16, 4 }
  0x16   : > { %p235_p8 = pnand %p649_p6, %p234_p7 }
  0x17   : > { %s241_s28 = sand.u32 (!%p235_p8), 1, %s840_s12   ;;  %s651_s29 = sshll.u32 (!%p235_p8), %s848_s14, 5 }
  0x18   : > { %238 = sbr.rel (%p235_p8) target bundleno = 227 (0xe3), region = 66  ;;  %s650_s30 = sshll.u32 (!%p235_p8), %s241_s28, 5 }
  0x19   : > { %p281_p9 = scmp.lt.s32.totalorder (!%p235_p8), %s651_s29, 95  ;;  %s931_s8 = scalar_lea.vmem (!%p235_p8), [#allocation3], %s650_s30 }
  0x1a   : > { %p653_p10 = scmp.ne.s32.totalorder (!%p235_p8), %s848_s14, 0 }
  0x1d   : > { %s1000_s29 = smov (!%p281_p9, %s651_s29), 95  ;;  %304 = sbr.rel (%p653_p10) target bundleno = 39 (0x27), region = 74 }
  0x1e   : > { %s652_s4 = sshll.u32 %s1000_s29, 2 }
  0x1f   : > { %s929_s7 = scalar_lea.vmem %s990_s1, %s652_s4 }
  0x22   : > { %v858_v4 = vmov 0.0  }
  0x23   : > { %305 = vst [vmem:[#allocation2 + $0x10] sm:$0xff] %v858_v4 }
  0x24   : > { %306 = vst [vmem:[#allocation2] sm:$0xff] %v858_v4 }
  0x25   : > { %307 = vst [vmem:[#allocation2 + $0x18] sm:$0xff] %v858_v4 }
  0x26   : > { %308 = vst [vmem:[#allocation2 + $0x8] sm:$0xff] %v858_v4 }
  0x27 PF: > { %v751_v5 = vld [vmem:[%s929_s7 + $0x38] sm:$0xff]  ;;  %v750_v7 = vld [vmem:[%s929_s7 + $0x30] sm:$0xff]  ;;  %v749_v9 = vld [vmem:[%s929_s7 + $0x28] sm:$0xff]  ;;  %p734_p11 = scmp.ne.s32.totalorder %s848_s14, 2 }
  0x28   : > { %v759_v6 = vld [vmem:[%s929_s7 + $0x78] sm:$0xff]  ;;  %465 = vmatpush.bf16.msra.mxu0 %v751_v5  ;;  %760 = vmatpush.bf16.msra.mxu2 %v751_v5  ;;  %v758_v8 = vld [vmem:[%s929_s7 + $0x70] sm:$0xff]  ;;  %v757_v10 = vld [vmem:[%s929_s7 + $0x68] sm:$0xff] }
  0x29   : > { %484 = vmatpush.bf16.msra.mxu1 %v759_v6  ;;  %768 = vmatpush.bf16.msra.mxu3 %v759_v6  ;;  %v748_v11 = vld [vmem:[%s929_s7 + $0x20] sm:$0xff]  ;;  %v747_v13 = vld [vmem:[%s929_s7 + $0x18] sm:$0xff]  ;;  %v746_v15 = vld [vmem:[%s929_s7 + $0x10] sm:$0xff] }
  0x2a   : > { %v756_v12 = vld [vmem:[%s929_s7 + $0x60] sm:$0xff]  ;;  %v755_v14 = vld [vmem:[%s929_s7 + $0x58] sm:$0xff]  ;;  %v754_v16 = vld [vmem:[%s929_s7 + $0x50] sm:$0xff] }
  0x2b   : > { %v745_v17 = vld [vmem:[%s929_s7 + $0x8] sm:$0xff]  ;;  %v744_v19 = vld [vmem:[%s929_s7] sm:$0xff]  ;;  %v664_v23 = vld [vmem:[%s931_s8 + $0x10] sm:$0xf] }
  0x2c   : > { %466 = vmatpush.bf16.msra.mxu0 %v750_v7  ;;  %761 = vmatpush.bf16.msra.mxu2 %v750_v7  ;;  %v753_v18 = vld [vmem:[%s929_s7 + $0x48] sm:$0xff]  ;;  %v752_v20 = vld [vmem:[%s929_s7 + $0x40] sm:$0xff]  ;;  %v743_v24 = vld [vmem:[%s931_s8 + $0x14] sm:$0xf0] }
  0x2d   : > { %485 = vmatpush.bf16.msra.mxu1 %v758_v8  ;;  %769 = vmatpush.bf16.msra.mxu3 %v758_v8  ;;  %v656_v21 = vld [vmem:[%s931_s8] sm:$0xf]  ;;  %v741_v22 = vld [vmem:[%s931_s8 + $0x4] sm:$0xf0]  ;;  %v740_v25 = vld [vmem:[%s931_s8 + $0x4] sm:$0xf]  ;;  %v665_v30 = vor.u32 %v743_v24, %v664_v23 }
  0x2e   : > { %v658_v26 = vld [vmem:[%s931_s8 + $0x8] sm:$0xf0]  ;;  %v742_v27 = vld [vmem:[%s931_s8 + $0x14] sm:$0xf]  ;;  %v666_v28 = vld [vmem:[%s931_s8 + $0x18] sm:$0xf0]  ;;  %v657_v29 = vor.u32 %v741_v22, %v656_v21 }
  0x2f   : > { %v661_v31 = vor.u32 %v740_v25, %v658_v26  ;;  %v669_v32 = vor.u32 %v742_v27, %v666_v28  ;;  %v309_v34 = vld [vmem:[#allocation2 + $0x10] sm:$0xff]  ;;  %v311_v39 = vld [vmem:[#allocation2 + $0x18] sm:$0xff]  ;;  %v310_v43 = vld [vmem:[#allocation2] sm:$0xff] }
  0x30   : > { %467 = vmatpush.bf16.msra.mxu0 %v749_v9  ;;  %762 = vmatpush.bf16.msra.mxu2 %v749_v9  ;;  %v312_v49 = vld [vmem:[#allocation2 + $0x8] sm:$0xff] }
  0x31   : > { %486 = vmatpush.bf16.msra.mxu1 %v757_v10  ;;  %770 = vmatpush.bf16.msra.mxu3 %v757_v10 }
  0x34   : > { %468 = vmatpush.bf16.msra.mxu0 %v748_v11  ;;  %763 = vmatpush.bf16.msra.mxu2 %v748_v11 }
  0x35   : > { %487 = vmatpush.bf16.msra.mxu1 %v756_v12  ;;  %771 = vmatpush.bf16.msra.mxu3 %v756_v12 }
  0x38   : > { %469 = vmatpush.bf16.msra.mxu0 %v747_v13  ;;  %764 = vmatpush.bf16.msra.mxu2 %v747_v13 }
  0x39   : > { %488 = vmatpush.bf16.msra.mxu1 %v755_v14  ;;  %772 = vmatpush.bf16.msra.mxu3 %v755_v14 }
  0x3c   : > { %470 = vmatpush.bf16.msra.mxu0 %v746_v15  ;;  %765 = vmatpush.bf16.msra.mxu2 %v746_v15 }
  0x3d   : > { %489 = vmatpush.bf16.msra.mxu1 %v754_v16  ;;  %773 = vmatpush.bf16.msra.mxu3 %v754_v16 }
  0x40   : > { %471 = vmatpush.bf16.msra.mxu0 %v745_v17  ;;  %766 = vmatpush.bf16.msra.mxu2 %v745_v17 }
  0x41   : > { %490 = vmatpush.bf16.msra.mxu1 %v753_v18  ;;  %774 = vmatpush.bf16.msra.mxu3 %v753_v18 }
  0x44   : > { %472 = vmatpush.bf16.msra.mxu0 %v744_v19  ;;  %767 = vmatpush.bf16.msra.mxu2 %v744_v19 }
  0x45   : > { %491 = vmatpush.bf16.msra.mxu1 %v752_v20  ;;  %775 = vmatpush.bf16.msra.mxu3 %v752_v20 }
  0x47   : > { %473 = vmatmul.bf16.vlgmr.msra.gmra.mxu0 %v657_v29  ;;  %478 = vmatmul.bf16.vlgmr.msra.gmra.mxu2 %v665_v30 }
  0x48   : > { %492 = vmatmul.bf16.vlgmr.msra.gmra.mxu1 %v661_v31  ;;  %497 = vmatmul.bf16.vlgmr.msra.gmra.mxu3 %v669_v32 }
  0xc4   : > { %v474_v33 = vpop.f32.mrf.mxu0 }
  0xc5   : > { %v493_v35 = vpop.f32.mrf.mxu1 }
  0xc6   : > { %v494_v36 = vadd.f32 %v493_v35, %v474_v33 }
  0xc8   : > { %v503_v37 = vadd.f32 %v494_v36, %v309_v34 }
  0xca   : > { %507 = vst [vmem:[#allocation2 + $0x10] sm:$0xff] %v503_v37  ;;  %v479_v38 = vpop.f32.mrf.mxu2 }
  0xcb   : > { %v498_v40 = vpop.f32.mrf.mxu3 }
  0xcc   : > { %v499_v41 = vadd.f32 %v498_v40, %v479_v38  ;;  %v476_v42 = vpop.f32.mrf.mxu0 }
  0xcd   : > { %v495_v44 = vpop.f32.mrf.mxu1 }
  0xce   : > { %v505_v45 = vadd.f32 %v499_v41, %v311_v39  ;;  %v496_v46 = vadd.f32 %v495_v44, %v476_v42 }
  0xd0   : > { %509 = vst [vmem:[#allocation2 + $0x18] sm:$0xff] %v505_v45  ;;  %v504_v47 = vadd.f32 %v496_v46, %v310_v43 }
  0xd2   : > { %508 = vst [vmem:[#allocation2] sm:$0xff] %v504_v47  ;;  %v481_v48 = vpop.f32.mrf.mxu2 }
  0xd3   : > { %v500_v50 = vpop.f32.mrf.mxu3 }
  0xd4   : > { %v501_v51 = vadd.f32 %v500_v50, %v481_v48  ;;  %514 = sbr.rel (%p734_p11) target bundleno = 227 (0xe3), region = 78 }
  0xd6   : > { %v506_v52 = vadd.f32 %v501_v51, %v312_v49 }
  0xd8   : > { %510 = vst [vmem:[#allocation2 + $0x8] sm:$0xff] %v506_v52 }
  0xd9   : > { %v515_v53 = vld [vmem:[#allocation2 + $0x10] sm:$0xff]  ;;  %v817_v54 = vld [vmem:[%s991_s2] ss:$0 sm:$0xff]  ;;  %v517_v56 = vld [vmem:[#allocation2 + $0x18] sm:$0xff] }
  0xda   : > { %v516_v55 = vld [vmem:[#allocation2] sm:$0xff]  ;;  %v523_v58 = vadd.f32 %v817_v54, %v515_v53  ;;  %v525_v60 = vadd.f32 %v817_v54, %v517_v56 }
  0xdb   : > { %v524_v59 = vadd.f32 %v817_v54, %v516_v55 }
  0xdc   : > { %527 = vst [vmem:[%s992_s3] sm:$0xff] %v523_v58 }
  0xdd   : > { %528 = vst [vmem:[%s992_s3 + $0x8] sm:$0xff] %v524_v59 }
  0xde   : > { %529 = vst [vmem:[%s992_s3 + $0x10] sm:$0xff] %v525_v60 }
  0xdf   : > { %v518_v57 = vld [vmem:[#allocation2 + $0x8] sm:$0xff] }
  0xe0   : > { %v526_v61 = vadd.f32 %v817_v54, %v518_v57 }
  0xe2   : > { %530 = vst [vmem:[%s992_s3 + $0x18] sm:$0xff] %v526_v61 }
  0xe3 PF: > { %s13_s16 = sadd.s32 1, %s856_s16   ;;  %s993_s12 = smov %s844_s13 }
  0xe4   : > { %p10_p12 = scmp.ge.s32.totalorder %s13_s16, 5   ;;  %s994_s13 = smov %s914_s20 }
  0xe5   : > { %s995_s14 = smov %s852_s15  ;;  %s996_s15 = smov %s998_s17 }
  0xe6   :  { %12 = sbr.rel (!%p10_p12) target bundleno = 3 (0x3), region = 119 }

// kernel: resnet_forward.55
= control target key start
LH: loop header
LB: loop body
LE: loop exit
PB: predicated region body
PF: predicated region fallthrough
CT: control target
= control target key end

     0   :  { %s126_s0 = inlined_call_operand.vmem [shape: f32[32,128], index: 0, kind: input, shape index: {}]   ;;  %s127_s1 = inlined_call_operand.vmem [shape: f32[1,128], index: 1, kind: input, shape index: {}]   ;;  %s128_s2 = inlined_call_operand.vmem [shape: f32[1,128], index: 2, kind: input, shape index: {}]   ;;  %s129_s3 = inlined_call_operand.vmem [shape: f32[32,128], index: 3, kind: input, shape index: {}]   ;;  %s130_s4 = inlined_call_operand.vmem [shape: f32[32,128], index: 4, kind: output, shape index: {}]  }
   0x1   :  { %v17_v0 = vld [vmem:[%s126_s0] sm:$0xff]  ;;  %v18_v4 = vld [vmem:[%s126_s0 + $0x8] sm:$0xff]  ;;  %v19_v5 = vld [vmem:[%s126_s0 + $0x10] sm:$0xff] }
   0x2   :  { %v57_v1 = vld [vmem:[%s127_s1] ss:$0 sm:$0xff]  ;;  %v20_v9 = vld [vmem:[%s126_s0 + $0x18] sm:$0xff]  ;;  %v38_v11 = vld [vmem:[%s129_s3 + $0x8] sm:$0xff] }
   0x3   :  { %v58_v2 = vld [vmem:[%s128_s2] ss:$0 sm:$0xff]  ;;  %v25_v3 = vmul.f32 %v57_v1, %v17_v0  ;;  %v26_v7 = vmul.f32 %v57_v1, %v18_v4  ;;  %v27_v8 = vmul.f32 %v57_v1, %v19_v5  ;;  %v39_v12 = vld [vmem:[%s129_s3 + $0x10] sm:$0xff]  ;;  %v28_v13 = vmul.f32 %v57_v1, %v20_v9  ;;  %v40_v16 = vld [vmem:[%s129_s3 + $0x18] sm:$0xff] }
   0x4   :  { %v37_v6 = vld [vmem:[%s129_s3] sm:$0xff] }
   0x5   :  { %v33_v10 = vadd.f32 %v58_v2, %v25_v3  ;;  %v34_v14 = vadd.f32 %v58_v2, %v26_v7  ;;  %v35_v15 = vadd.f32 %v58_v2, %v27_v8  ;;  %v36_v18 = vadd.f32 %v58_v2, %v28_v13 }
   0x7   :  { %v41_v17 = vadd.f32 %v37_v6, %v33_v10  ;;  %v42_v19 = vadd.f32 %v38_v11, %v34_v14  ;;  %v43_v20 = vadd.f32 %v39_v12, %v35_v15  ;;  %v44_v22 = vadd.f32 %v40_v16, %v36_v18 }
   0x9   :  { %v45_v21 = vmax.f32 %v41_v17, 0.0  ;;  %v46_v23 = vmax.f32 %v42_v19, 0.0  ;;  %v47_v24 = vmax.f32 %v43_v20, 0.0  ;;  %v48_v25 = vmax.f32 %v44_v22, 0.0 }
   0xb   :  { %49 = vst [vmem:[%s130_s4] sm:$0xff] %v45_v21 }
   0xc   :  { %50 = vst [vmem:[%s130_s4 + $0x8] sm:$0xff] %v46_v23 }
   0xd   :  { %51 = vst [vmem:[%s130_s4 + $0x10] sm:$0xff] %v47_v24 }
   0xe   :  { %52 = vst [vmem:[%s130_s4 + $0x18] sm:$0xff] %v48_v25 }

// kernel: resnet_forward.50
= control target key start
LH: loop header
LB: loop body
LE: loop exit
PB: predicated region body
PF: predicated region fallthrough
CT: control target
= control target key end

     0   :  { %s879_s12 = smov 0   ;;  %s881_s13 = smov 0   ;;  %s989_s0 = inlined_call_operand.vmem [shape: bf16[32,1280], index: 0, kind: input, shape index: {}]   ;;  %s990_s1 = inlined_call_operand.vmem [shape: bf16[1280,128], index: 1, kind: input, shape index: {}]   ;;  %s991_s2 = inlined_call_operand.vmem [shape: f32[1,128], index: 2, kind: input, shape index: {}]   ;;  %s992_s3 = inlined_call_operand.vmem [shape: f32[32,128], index: 3, kind: output, shape index: {}]  }
   0x1   :  { %s883_s14 = smov 0   ;;  %s885_s15 = smov 0  }
   0x2   :  { %s887_s16 = smov 0  }
   0x3 LB: > { %s25_s17 = sadd.s32 1, %s852_s15  ;;  %p48_p1 = scmp.ne.s32.totalorder %s844_s13, %s840_s12  ;;  %s856_s16 = sphi %s887_s16, %s13_s16   ;;  %s852_s15 = sphi %s885_s15, %s996_s15   ;;  %s848_s14 = sphi %s883_s14, %s995_s14   ;;  %s844_s13 = sphi %s881_s13, %s994_s13   ;;  %s840_s12 = sphi %s879_s12, %s993_s12  }
   0x4   : > { %p26_p0 = scmp.ge.s32.totalorder %s25_s17, 5  ;;  %p49_p2 = scmp.eq.s32.totalorder %s856_s16, 0 }
   0x5   : > { %s41_s19 = sadd.s32 1, %s844_s13  ;;  %p645_p5 = scmp.ge.s32.totalorder %s856_s16, 5 }
   0x6   : > { %s998_s17 = smov (%p26_p0, %s25_s17), 0  ;;  %p50_p3 = por %p49_p2, %p48_p1 }
   0x7   : > { %s37_s18 = ssub.s32 %s852_s15, %s998_s17  ;;  %162 = sbr.rel (%p645_p5) target bundleno = 20 (0x14), region = 20 }
   0x8   : > { %p39_p4 = scmp.eq.s32.totalorder %s37_s18, 0 }
   0xa   : > { %s914_s20 = scalar_select %p39_p4, %s844_s13, %s41_s19  }
   0xc   : > { %165 = sbr.rel (!%p50_p3) target bundleno = 20 (0x14), region = 24  ;;  %s167_s21 = sand.u32 (%p50_p3), 1, %s844_s13  }
   0xd   : > { %s739_s22 = sshll.u32 (%p50_p3), %s852_s15, 3  ;;  %s646_s23 = sshll.u32 (%p50_p3), %s167_s21, 5 }
   0xe   : > { %s175_s26 = scalar_lea.vmem (%p50_p3), %s989_s0, %s739_s22  ;;  %s169_s27 = scalar_lea.vmem (%p50_p3), [#allocation3], %s646_s23 }
   0xf   : > { %v210_v0 = vld [vmem:[%s175_s26] sm:$0xff] (%p50_p3)  ;;  %v212_v1 = vld [vmem:[%s175_s26 + $0x28] sm:$0xff] (%p50_p3)  ;;  %v214_v2 = vld [vmem:[%s175_s26 + $0x50] sm:$0xff] (%p50_p3) }
  0x10   : > { %211 = vst [vmem:[%s169_s27] sm:$0xff] (%p50_p3), %v210_v0  ;;  %v216_v3 = vld [vmem:[%s175_s26 + $0x78] sm:$0xff] (%p50_p3) }
  0x11   : > { %213 = vst [vmem:[%s169_s27 + $0x8] sm:$0xff] %v212_v1 }
  0x12   : > { %215 = vst [vmem:[%s169_s27 + $0x10] sm:$0xff] %v214_v2 }
  0x13   : > { %217 = vst [vmem:[%s169_s27 + $0x18] sm:$0xff] %v216_v3 }
  0x14 PF: > { %p649_p6 = scmp.ge.s32.totalorder %s856_s16, 1  ;;  %p234_p7 = scmp.lt.s32.totalorder %s856_s16, 6 }
  0x16   : > { %p235_p8 = pnand %p649_p6, %p234_p7 }
  0x17   : > { %s241_s28 = sand.u32 (!%p235_p8), 1, %s840_s12   ;;  %s651_s29 = sshll.u32 (!%p235_p8), %s848_s14, 5 }
  0x18   : > { %238 = sbr.rel (%p235_p8) target bundleno = 227 (0xe3), region = 66  ;;  %s650_s30 = sshll.u32 (!%p235_p8), %s241_s28, 5 }
  0x19   : > { %p281_p9 = scmp.lt.s32.totalorder (!%p235_p8), %s651_s29, 159  ;;  %s931_s8 = scalar_lea.vmem (!%p235_p8), [#allocation3], %s650_s30 }
  0x1a   : > { %p653_p10 = scmp.ne.s32.totalorder (!%p235_p8), %s848_s14, 0 }
  0x1d   : > { %s1000_s29 = smov (!%p281_p9, %s651_s29), 159  ;;  %304 = sbr.rel (%p653_p10) target bundleno = 39 (0x27), region = 74 }
  0x1e   : > { %s652_s4 = sshll.u32 %s1000_s29, 2 }
  0x1f   : > { %s929_s7 = scalar_lea.vmem %s990_s1, %s652_s4 }
  0x22   : > { %v858_v4 = vmov 0.0  }
  0x23   : > { %305 = vst [vmem:[#allocation2 + $0x10] sm:$0xff] %v858_v4 }
  0x24   : > { %306 = vst [vmem:[#allocation2] sm:$0xff] %v858_v4 }
  0x25   : > { %307 = vst [vmem:[#allocation2 + $0x18] sm:$0xff] %v858_v4 }
  0x26   : > { %308 = vst [vmem:[#allocation2 + $0x8] sm:$0xff] %v858_v4 }
  0x27 PF: > { %v751_v5 = vld [vmem:[%s929_s7 + $0x38] sm:$0xff]  ;;  %v750_v7 = vld [vmem:[%s929_s7 + $0x30] sm:$0xff]  ;;  %v749_v9 = vld [vmem:[%s929_s7 + $0x28] sm:$0xff]  ;;  %p734_p11 = scmp.ne.s32.totalorder %s848_s14, 4 }
  0x28   : > { %v759_v6 = vld [vmem:[%s929_s7 + $0x78] sm:$0xff]  ;;  %465 = vmatpush.bf16.msra.mxu0 %v751_v5  ;;  %760 = vmatpush.bf16.msra.mxu2 %v751_v5  ;;  %v758_v8 = vld [vmem:[%s929_s7 + $0x70] sm:$0xff]  ;;  %v757_v10 = vld [vmem:[%s929_s7 + $0x68] sm:$0xff] }
  0x29   : > { %484 = vmatpush.bf16.msra.mxu1 %v759_v6  ;;  %768 = vmatpush.bf16.msra.mxu3 %v759_v6  ;;  %v748_v11 = vld [vmem:[%s929_s7 + $0x20] sm:$0xff]  ;;  %v747_v13 = vld [vmem:[%s929_s7 + $0x18] sm:$0xff]  ;;  %v746_v15 = vld [vmem:[%s929_s7 + $0x10] sm:$0xff] }
  0x2a   : > { %v756_v12 = vld [vmem:[%s929_s7 + $0x60] sm:$0xff]  ;;  %v755_v14 = vld [vmem:[%s929_s7 + $0x58] sm:$0xff]  ;;  %v754_v16 = vld [vmem:[%s929_s7 + $0x50] sm:$0xff] }
  0x2b   : > { %v745_v17 = vld [vmem:[%s929_s7 + $0x8] sm:$0xff]  ;;  %v744_v19 = vld [vmem:[%s929_s7] sm:$0xff]  ;;  %v664_v23 = vld [vmem:[%s931_s8 + $0x10] sm:$0xf] }
  0x2c   : > { %466 = vmatpush.bf16.msra.mxu0 %v750_v7  ;;  %761 = vmatpush.bf16.msra.mxu2 %v750_v7  ;;  %v753_v18 = vld [vmem:[%s929_s7 + $0x48] sm:$0xff]  ;;  %v752_v20 = vld [vmem:[%s929_s7 + $0x40] sm:$0xff]  ;;  %v743_v24 = vld [vmem:[%s931_s8 + $0x14] sm:$0xf0] }
  0x2d   : > { %485 = vmatpush.bf16.msra.mxu1 %v758_v8  ;;  %769 = vmatpush.bf16.msra.mxu3 %v758_v8  ;;  %v656_v21 = vld [vmem:[%s931_s8] sm:$0xf]  ;;  %v741_v22 = vld [vmem:[%s931_s8 + $0x4] sm:$0xf0]  ;;  %v740_v25 = vld [vmem:[%s931_s8 + $0x4] sm:$0xf]  ;;  %v665_v30 = vor.u32 %v743_v24, %v664_v23 }
  0x2e   : > { %v658_v26 = vld [vmem:[%s931_s8 + $0x8] sm:$0xf0]  ;;  %v742_v27 = vld [vmem:[%s931_s8 + $0x14] sm:$0xf]  ;;  %v666_v28 = vld [vmem:[%s931_s8 + $0x18] sm:$0xf0]  ;;  %v657_v29 = vor.u32 %v741_v22, %v656_v21 }
  0x2f   : > { %v661_v31 = vor.u32 %v740_v25, %v658_v26  ;;  %v669_v32 = vor.u32 %v742_v27, %v666_v28  ;;  %v309_v34 = vld [vmem:[#allocation2 + $0x10] sm:$0xff]  ;;  %v311_v39 = vld [vmem:[#allocation2 + $0x18] sm:$0xff]  ;;  %v310_v43 = vld [vmem:[#allocation2] sm:$0xff] }
  0x30   : > { %467 = vmatpush.bf16.msra.mxu0 %v749_v9  ;;  %762 = vmatpush.bf16.msra.mxu2 %v749_v9  ;;  %v312_v49 = vld [vmem:[#allocation2 + $0x8] sm:$0xff] }
  0x31   : > { %486 = vmatpush.bf16.msra.mxu1 %v757_v10  ;;  %770 = vmatpush.bf16.msra.mxu3 %v757_v10 }
  0x34   : > { %468 = vmatpush.bf16.msra.mxu0 %v748_v11  ;;  %763 = vmatpush.bf16.msra.mxu2 %v748_v11 }
  0x35   : > { %487 = vmatpush.bf16.msra.mxu1 %v756_v12  ;;  %771 = vmatpush.bf16.msra.mxu3 %v756_v12 }
  0x38   : > { %469 = vmatpush.bf16.msra.mxu0 %v747_v13  ;;  %764 = vmatpush.bf16.msra.mxu2 %v747_v13 }
  0x39   : > { %488 = vmatpush.bf16.msra.mxu1 %v755_v14  ;;  %772 = vmatpush.bf16.msra.mxu3 %v755_v14 }
  0x3c   : > { %470 = vmatpush.bf16.msra.mxu0 %v746_v15  ;;  %765 = vmatpush.bf16.msra.mxu2 %v746_v15 }
  0x3d   : > { %489 = vmatpush.bf16.msra.mxu1 %v754_v16  ;;  %773 = vmatpush.bf16.msra.mxu3 %v754_v16 }
  0x40   : > { %471 = vmatpush.bf16.msra.mxu0 %v745_v17  ;;  %766 = vmatpush.bf16.msra.mxu2 %v745_v17 }
  0x41   : > { %490 = vmatpush.bf16.msra.mxu1 %v753_v18  ;;  %774 = vmatpush.bf16.msra.mxu3 %v753_v18 }
  0x44   : > { %472 = vmatpush.bf16.msra.mxu0 %v744_v19  ;;  %767 = vmatpush.bf16.msra.mxu2 %v744_v19 }
  0x45   : > { %491 = vmatpush.bf16.msra.mxu1 %v752_v20  ;;  %775 = vmatpush.bf16.msra.mxu3 %v752_v20 }
  0x47   : > { %473 = vmatmul.bf16.vlgmr.msra.gmra.mxu0 %v657_v29  ;;  %478 = vmatmul.bf16.vlgmr.msra.gmra.mxu2 %v665_v30 }
  0x48   : > { %492 = vmatmul.bf16.vlgmr.msra.gmra.mxu1 %v661_v31  ;;  %497 = vmatmul.bf16.vlgmr.msra.gmra.mxu3 %v669_v32 }
  0xc4   : > { %v474_v33 = vpop.f32.mrf.mxu0 }
  0xc5   : > { %v493_v35 = vpop.f32.mrf.mxu1 }
  0xc6   : > { %v494_v36 = vadd.f32 %v493_v35, %v474_v33 }
  0xc8   : > { %v503_v37 = vadd.f32 %v494_v36, %v309_v34 }
  0xca   : > { %507 = vst [vmem:[#allocation2 + $0x10] sm:$0xff] %v503_v37  ;;  %v479_v38 = vpop.f32.mrf.mxu2 }
  0xcb   : > { %v498_v40 = vpop.f32.mrf.mxu3 }
  0xcc   : > { %v499_v41 = vadd.f32 %v498_v40, %v479_v38  ;;  %v476_v42 = vpop.f32.mrf.mxu0 }
  0xcd   : > { %v495_v44 = vpop.f32.mrf.mxu1 }
  0xce   : > { %v505_v45 = vadd.f32 %v499_v41, %v311_v39  ;;  %v496_v46 = vadd.f32 %v495_v44, %v476_v42 }
  0xd0   : > { %509 = vst [vmem:[#allocation2 + $0x18] sm:$0xff] %v505_v45  ;;  %v504_v47 = vadd.f32 %v496_v46, %v310_v43 }
  0xd2   : > { %508 = vst [vmem:[#allocation2] sm:$0xff] %v504_v47  ;;  %v481_v48 = vpop.f32.mrf.mxu2 }
  0xd3   : > { %v500_v50 = vpop.f32.mrf.mxu3 }
  0xd4   : > { %v501_v51 = vadd.f32 %v500_v50, %v481_v48  ;;  %514 = sbr.rel (%p734_p11) target bundleno = 227 (0xe3), region = 78 }
  0xd6   : > { %v506_v52 = vadd.f32 %v501_v51, %v312_v49 }
  0xd8   : > { %510 = vst [vmem:[#allocation2 + $0x8] sm:$0xff] %v506_v52 }
  0xd9   : > { %v515_v53 = vld [vmem:[#allocation2 + $0x10] sm:$0xff]  ;;  %v817_v54 = vld [vmem:[%s991_s2] ss:$0 sm:$0xff]  ;;  %v517_v56 = vld [vmem:[#allocation2 + $0x18] sm:$0xff] }
  0xda   : > { %v516_v55 = vld [vmem:[#allocation2] sm:$0xff]  ;;  %v523_v58 = vadd.f32 %v817_v54, %v515_v53  ;;  %v525_v60 = vadd.f32 %v817_v54, %v517_v56 }
  0xdb   : > { %v524_v59 = vadd.f32 %v817_v54, %v516_v55 }
  0xdc   : > { %527 = vst [vmem:[%s992_s3] sm:$0xff] %v523_v58 }
  0xdd   : > { %528 = vst [vmem:[%s992_s3 + $0x8] sm:$0xff] %v524_v59 }
  0xde   : > { %529 = vst [vmem:[%s992_s3 + $0x10] sm:$0xff] %v525_v60 }
  0xdf   : > { %v518_v57 = vld [vmem:[#allocation2 + $0x8] sm:$0xff] }
  0xe0   : > { %v526_v61 = vadd.f32 %v817_v54, %v518_v57 }
  0xe2   : > { %530 = vst [vmem:[%s992_s3 + $0x18] sm:$0xff] %v526_v61 }
  0xe3 PF: > { %s13_s16 = sadd.s32 1, %s856_s16   ;;  %s993_s12 = smov %s844_s13 }
  0xe4   : > { %p10_p12 = scmp.ge.s32.totalorder %s13_s16, 7   ;;  %s994_s13 = smov %s914_s20 }
  0xe5   : > { %s995_s14 = smov %s852_s15  ;;  %s996_s15 = smov %s998_s17 }
  0xe6   :  { %12 = sbr.rel (!%p10_p12) target bundleno = 3 (0x3), region = 119 }

// kernel: resnet_forward.61
= control target key start
LH: loop header
LB: loop body
LE: loop exit
PB: predicated region body
PF: predicated region fallthrough
CT: control target
= control target key end

     0   :  { %v14_v0 = vlaneseq  ;;  %v78_v7 = vmov 0.0   ;;  %vm38_vm1 = vcmask 1040384   ;;  %s130_s0 = inlined_call_operand.vmem [shape: f32[8,256], index: 0, kind: input, shape index: {}]   ;;  %s131_s1 = inlined_call_operand.vmem [shape: f32[1,256], index: 1, kind: output, shape index: {0}]   ;;  %s132_s2 = inlined_call_operand.vmem [shape: f32[1,256], index: 2, kind: output, shape index: {1}]  }
   0x1   :  { %v20_v1 = vld [vmem:[%s130_s0] sm:$0xff]  ;;  %v21_v2 = vld [vmem:[%s130_s0 + $0x8] sm:$0xff] }
   0x2   :  { %vm100_vm0 = vcmp.lt.s32.totalorder %v14_v0, 256  ;;  %v23_v4 = vrot.slane %v20_v1, 4  ;;  %v29_v5 = vrot.slane %v21_v2, 4  ;;  %v48_v6 = vmul.f32 %v20_v1, %v20_v1 }
   0x3   :  { %18 = vst.msk [vmem:[%s131_s1] sm:$0x3] %vm100_vm0, %v78_v7  ;;  %v49_v8 = vmul.f32 %v21_v2, %v21_v2 }
   0x4   :  { %v24_v9 = vadd.f32 %v23_v4, %v20_v1  ;;  %v30_v10 = vadd.f32 %v29_v5, %v21_v2  ;;  %19 = vst.msk [vmem:[%s132_s2] sm:$0x3] %vm100_vm0, %v78_v7  ;;  %v50_v11 = vrot.slane %v48_v6, 4 }
   0x5   :  { %v56_v12 = vrot.slane %v49_v8, 4 }
   0x6   :  { %v25_v13 = vrot.slane %v24_v9, 2  ;;  %v31_v14 = vrot.slane %v30_v10, 2  ;;  %v51_v15 = vadd.f32 %v50_v11, %v48_v6 }
   0x7   :  { %v57_v16 = vadd.f32 %v56_v12, %v49_v8 }
   0x8   :  { %v26_v17 = vadd.f32 %v25_v13, %v24_v9  ;;  %v32_v18 = vadd.f32 %v31_v14, %v30_v10  ;;  %v52_v19 = vrot.slane %v51_v15, 2 }
   0x9   :  { %v58_v20 = vrot.slane %v57_v16, 2 }
   0xa   :  { %v27_v21 = vrot.slane %v26_v17, 1  ;;  %v33_v22 = vrot.slane %v32_v18, 1  ;;  %v53_v23 = vadd.f32 %v52_v19, %v51_v15  ;;  %v22_v29 = vld [vmem:[%s131_s1] sm:$0x3] }
   0xb   :  { %v59_v24 = vadd.f32 %v58_v20, %v57_v16  ;;  %v47_v35 = vld [vmem:[%s132_s2] sm:$0x3] }
   0xc   :  { %v28_v25 = vadd.f32 %v27_v21, %v26_v17  ;;  %v34_v26 = vadd.f32 %v33_v22, %v32_v18  ;;  %v54_v27 = vrot.slane %v53_v23, 1 }
   0xd   :  { %v60_v28 = vrot.slane %v59_v24, 1 }
   0xe   :  { %v37_v30 = vrot.slane %v34_v26, 7  ;;  %v55_v31 = vadd.f32 %v54_v27, %v53_v23 }
   0xf   :  { %v61_v32 = vadd.f32 %v60_v28, %v59_v24 }
  0x10   :  { %v39_v33 = vsel %vm38_vm1, %v28_v25, %v37_v30 }
  0x11   :  { %v41_v34 = vadd.f32 %v39_v33, %v22_v29  ;;  %v64_v36 = vrot.slane %v61_v32, 7 }
  0x13   :  { %46 = vst.msk [vmem:[%s131_s1] sm:$0x3] %vm100_vm0, %v41_v34  ;;  %v65_v37 = vsel %vm38_vm1, %v55_v31, %v64_v36 }
  0x14   :  { %v67_v38 = vadd.f32 %v65_v37, %v47_v35 }
  0x16   :  { %68 = vst.msk [vmem:[%s132_s2] sm:$0x3] %vm100_vm0, %v67_v38 }

// kernel: resnet_forward.60
= control target key start
LH: loop header
LB: loop body
LE: loop exit
PB: predicated region body
PF: predicated region fallthrough
CT: control target
= control target key end

     0   :  { %s410_s1 = inlined_call_operand.vmem [shape: bf16[128,256], index: 1, kind: input, shape index: {}]   ;;  %s411_s0 = inlined_call_operand.vmem [shape: bf16[16,128], index: 0, kind: input, shape index: {}]   ;;  %s412_s2 = inlined_call_operand.vmem [shape: f32[1,256], index: 2, kind: input, shape index: {}]   ;;  %s413_s3 = inlined_call_operand.vmem [shape: f32[16,256], index: 3, kind: output, shape index: {}]  }
   0x1   :  { %v253_v0 = vld [vmem:[%s410_s1 + $0x70] sm:$0xf]  ;;  %v275_v1 = vld [vmem:[%s410_s1 + $0x74] sm:$0xf0]  ;;  %v274_v2 = vld [vmem:[%s410_s1 + $0x74] sm:$0xf] }
   0x2   :  { %v254_v3 = vor.u32 %v275_v1, %v253_v0  ;;  %v255_v4 = vld [vmem:[%s410_s1 + $0x78] sm:$0xf0]  ;;  %v245_v5 = vld [vmem:[%s410_s1 + $0x60] sm:$0xf]  ;;  %v273_v6 = vld [vmem:[%s410_s1 + $0x64] sm:$0xf0] }
   0x3   :  { %v258_v7 = vor.u32 %v274_v2, %v255_v4  ;;  %v272_v8 = vld [vmem:[%s410_s1 + $0x64] sm:$0xf]  ;;  %v247_v9 = vld [vmem:[%s410_s1 + $0x68] sm:$0xf0]  ;;  %v246_v10 = vor.u32 %v273_v6, %v245_v5  ;;  %v237_v12 = vld [vmem:[%s410_s1 + $0x50] sm:$0xf] }
   0x4   :  { %130 = vmatpush.bf16.msra.mxu0 %v254_v3  ;;  %v250_v11 = vor.u32 %v272_v8, %v247_v9  ;;  %v271_v13 = vld [vmem:[%s410_s1 + $0x54] sm:$0xf0]  ;;  %v270_v14 = vld [vmem:[%s410_s1 + $0x54] sm:$0xf]  ;;  %v239_v15 = vld [vmem:[%s410_s1 + $0x58] sm:$0xf0] }
   0x5   :  { %144 = vmatpush.bf16.msra.mxu1 %v258_v7  ;;  %v238_v16 = vor.u32 %v271_v13, %v237_v12  ;;  %v242_v17 = vor.u32 %v270_v14, %v239_v15  ;;  %v229_v18 = vld [vmem:[%s410_s1 + $0x40] sm:$0xf]  ;;  %v269_v19 = vld [vmem:[%s410_s1 + $0x44] sm:$0xf0]  ;;  %v268_v20 = vld [vmem:[%s410_s1 + $0x44] sm:$0xf] }
   0x6   :  { %v231_v21 = vld [vmem:[%s410_s1 + $0x48] sm:$0xf0]  ;;  %v230_v22 = vor.u32 %v269_v19, %v229_v18  ;;  %v221_v24 = vld [vmem:[%s410_s1 + $0x30] sm:$0xf]  ;;  %v267_v25 = vld [vmem:[%s410_s1 + $0x34] sm:$0xf0] }
   0x7   :  { %v234_v23 = vor.u32 %v268_v20, %v231_v21  ;;  %v266_v26 = vld [vmem:[%s410_s1 + $0x34] sm:$0xf]  ;;  %v223_v27 = vld [vmem:[%s410_s1 + $0x38] sm:$0xf0]  ;;  %v222_v28 = vor.u32 %v267_v25, %v221_v24  ;;  %v213_v30 = vld [vmem:[%s410_s1 + $0x20] sm:$0xf] }
   0x8   :  { %131 = vmatpush.bf16.msra.mxu0 %v246_v10  ;;  %v226_v29 = vor.u32 %v266_v26, %v223_v27  ;;  %v265_v31 = vld [vmem:[%s410_s1 + $0x24] sm:$0xf0]  ;;  %v264_v32 = vld [vmem:[%s410_s1 + $0x24] sm:$0xf]  ;;  %v215_v33 = vld [vmem:[%s410_s1 + $0x28] sm:$0xf0] }
   0x9   :  { %145 = vmatpush.bf16.msra.mxu1 %v250_v11  ;;  %v214_v34 = vor.u32 %v265_v31, %v213_v30  ;;  %v218_v35 = vor.u32 %v264_v32, %v215_v33  ;;  %v205_v36 = vld [vmem:[%s410_s1 + $0x10] sm:$0xf]  ;;  %v263_v37 = vld [vmem:[%s410_s1 + $0x14] sm:$0xf0]  ;;  %v262_v38 = vld [vmem:[%s410_s1 + $0x14] sm:$0xf] }
   0xa   :  { %v207_v39 = vld [vmem:[%s410_s1 + $0x18] sm:$0xf0]  ;;  %v206_v40 = vor.u32 %v263_v37, %v205_v36  ;;  %v197_v42 = vld [vmem:[%s410_s1] sm:$0xf]  ;;  %v261_v43 = vld [vmem:[%s410_s1 + $0x4] sm:$0xf0] }
   0xb   :  { %v210_v41 = vor.u32 %v262_v38, %v207_v39  ;;  %v260_v44 = vld [vmem:[%s410_s1 + $0x4] sm:$0xf]  ;;  %v199_v45 = vld [vmem:[%s410_s1 + $0x8] sm:$0xf0]  ;;  %v198_v46 = vor.u32 %v261_v43, %v197_v42  ;;  %v173_v49 = vld [vmem:[%s412_s2] sm:$0x3] }
   0xc   :  { %132 = vmatpush.bf16.msra.mxu0 %v238_v16  ;;  %v202_v47 = vor.u32 %v260_v44, %v199_v45  ;;  %v259_v48 = vld [vmem:[%s411_s0] sm:$0xff]  ;;  %v175_v50 = vperm.slane %v173_v49, 0  ;;  %v176_v51 = vperm.slane %v173_v49, 1 }
   0xd   :  { %146 = vmatpush.bf16.msra.mxu1 %v242_v17 }
  0x10   :  { %133 = vmatpush.bf16.msra.mxu0 %v230_v22 }
  0x11   :  { %147 = vmatpush.bf16.msra.mxu1 %v234_v23 }
  0x14   :  { %134 = vmatpush.bf16.msra.mxu0 %v222_v28 }
  0x15   :  { %148 = vmatpush.bf16.msra.mxu1 %v226_v29 }
  0x18   :  { %135 = vmatpush.bf16.msra.mxu0 %v214_v34 }
  0x19   :  { %149 = vmatpush.bf16.msra.mxu1 %v218_v35 }
  0x1c   :  { %136 = vmatpush.bf16.msra.mxu0 %v206_v40 }
  0x1d   :  { %150 = vmatpush.bf16.msra.mxu1 %v210_v41 }
  0x20   :  { %137 = vmatpush.bf16.msra.mxu0 %v198_v46 }
  0x21   :  { %151 = vmatpush.bf16.msra.mxu1 %v202_v47 }
  0x23   :  { %138 = vmatmul.bf16.vlgmr.msra.gmra.mxu0 %v259_v48 }
  0x24   :  { %152 = vmatmul.bf16.vlgmr.msra.gmra.mxu1 %v259_v48 }
  0xa0   :  { %v139_v52 = vpop.f32.mrf.mxu0 }
  0xa1   :  { %v179_v53 = vadd.f32 %v175_v50, %v139_v52  ;;  %v153_v54 = vpop.f32.mrf.mxu1 }
  0xa2   :  { %v180_v55 = vadd.f32 %v176_v51, %v153_v54 }
  0xa3   :  { %183 = vst [vmem:[%s413_s3] sm:$0xff] %v179_v53 }
  0xa4   :  { %184 = vst [vmem:[%s413_s3 + $0x8] sm:$0xff] %v180_v55 }
  0xa8   :  { %v141_v56 = vpop.f32.mrf.mxu0 }
  0xa9   :  { %v181_v57 = vadd.f32 %v175_v50, %v141_v56  ;;  %v155_v58 = vpop.f32.mrf.mxu1 }
  0xaa   :  { %v182_v59 = vadd.f32 %v176_v51, %v155_v58 }
  0xab   :  { %185 = vst [vmem:[%s413_s3 + $0x10] sm:$0xff] %v181_v57 }
  0xac   :  { %186 = vst [vmem:[%s413_s3 + $0x18] sm:$0xff] %v182_v59 }

// kernel: resnet_forward.62
= control target key start
LH: loop header
LB: loop body
LE: loop exit
PB: predicated region body
PF: predicated region fallthrough
CT: control target
= control target key end

     0   :  { %s76_s0 = inlined_call_operand.vmem [shape: f32[8,256], index: 0, kind: input, shape index: {}]   ;;  %s77_s1 = inlined_call_operand.vmem [shape: f32[1,256], index: 1, kind: input, shape index: {}]   ;;  %s78_s2 = inlined_call_operand.vmem [shape: f32[1,256], index: 2, kind: input, shape index: {}]   ;;  %s79_s3 = inlined_call_operand.vmem [shape: f32[8,256], index: 3, kind: output, shape index: {}]  }
   0x1   :  { %v14_v0 = vld [vmem:[%s76_s0] sm:$0xff]  ;;  %v15_v5 = vld [vmem:[%s76_s0 + $0x8] sm:$0xff] }
   0x2   :  { %v16_v1 = vld [vmem:[%s77_s1] sm:$0x3] }
   0x3   :  { %v24_v2 = vld [vmem:[%s78_s2] sm:$0x3]  ;;  %v18_v3 = vperm.slane %v16_v1, 0  ;;  %v19_v6 = vperm.slane %v16_v1, 1 }
   0x4   :  { %v26_v4 = vperm.slane %v24_v2, 0  ;;  %v27_v7 = vperm.slane %v24_v2, 1 }
   0x5   :  { %v22_v8 = vmul.f32 %v18_v3, %v14_v0  ;;  %v23_v9 = vmul.f32 %v19_v6, %v15_v5 }
   0x7   :  { %v30_v10 = vadd.f32 %v26_v4, %v22_v8  ;;  %v31_v11 = vadd.f32 %v27_v7, %v23_v9 }
   0x9   :  { %32 = vst [vmem:[%s79_s3] sm:$0xff] %v30_v10 }
   0xa   :  { %33 = vst [vmem:[%s79_s3 + $0x8] sm:$0xff] %v31_v11 }

// kernel: resnet_forward.58
= control target key start
LH: loop header
LB: loop body
LE: loop exit
PB: predicated region body
PF: predicated region fallthrough
CT: control target
= control target key end

     0   :  { %s78_s0 = inlined_call_operand.vmem [shape: f32[8,256], index: 0, kind: input, shape index: {}]   ;;  %s79_s1 = inlined_call_operand.vmem [shape: f32[1,256], index: 1, kind: input, shape index: {}]   ;;  %s80_s2 = inlined_call_operand.vmem [shape: f32[1,256], index: 2, kind: input, shape index: {}]   ;;  %s81_s3 = inlined_call_operand.vmem [shape: f32[8,256], index: 3, kind: output, shape index: {}]  }
   0x1   :  { %v14_v0 = vld [vmem:[%s78_s0] sm:$0xff]  ;;  %v15_v5 = vld [vmem:[%s78_s0 + $0x8] sm:$0xff] }
   0x2   :  { %v16_v1 = vld [vmem:[%s79_s1] sm:$0x3] }
   0x3   :  { %v24_v2 = vld [vmem:[%s80_s2] sm:$0x3]  ;;  %v18_v3 = vperm.slane %v16_v1, 0  ;;  %v19_v6 = vperm.slane %v16_v1, 1 }
   0x4   :  { %v26_v4 = vperm.slane %v24_v2, 0  ;;  %v27_v7 = vperm.slane %v24_v2, 1 }
   0x5   :  { %v22_v8 = vmul.f32 %v18_v3, %v14_v0  ;;  %v23_v9 = vmul.f32 %v19_v6, %v15_v5 }
   0x7   :  { %v30_v10 = vadd.f32 %v26_v4, %v22_v8  ;;  %v31_v11 = vadd.f32 %v27_v7, %v23_v9 }
   0x9   :  { %v32_v12 = vmax.f32 %v30_v10, 0.0  ;;  %v33_v13 = vmax.f32 %v31_v11, 0.0 }
   0xb   :  { %34 = vst [vmem:[%s81_s3] sm:$0xff] %v32_v12 }
   0xc   :  { %35 = vst [vmem:[%s81_s3 + $0x8] sm:$0xff] %v33_v13 }

// kernel: resnet_forward.56
= control target key start
LH: loop header
LB: loop body
LE: loop exit
PB: predicated region body
PF: predicated region fallthrough
CT: control target
= control target key end

     0   :  { %s1028_s12 = smov 0   ;;  %s1030_s13 = smov 0   ;;  %s1182_s0 = inlined_call_operand.vmem [shape: bf16[16,1280], index: 0, kind: input, shape index: {}]   ;;  %s1183_s1 = inlined_call_operand.vmem [shape: bf16[1280,256], index: 1, kind: input, shape index: {}]   ;;  %s1184_s2 = inlined_call_operand.vmem [shape: f32[1,256], index: 2, kind: input, shape index: {}]   ;;  %s1185_s3 = inlined_call_operand.vmem [shape: f32[16,256], index: 3, kind: output, shape index: {}]  }
   0x1   :  { %s1032_s14 = smov 0   ;;  %s1034_s15 = smov 0  }
   0x2   :  { %s1036_s16 = smov 0  }
   0x3 LB: > { %s25_s17 = sadd.s32 1, %s1001_s15  ;;  %p48_p1 = scmp.ne.s32.totalorder %s993_s13, %s989_s12  ;;  %s1005_s16 = sphi %s1036_s16, %s13_s16   ;;  %s1001_s15 = sphi %s1034_s15, %s1189_s15   ;;  %s997_s14 = sphi %s1032_s14, %s1188_s14   ;;  %s993_s13 = sphi %s1030_s13, %s1187_s13   ;;  %s989_s12 = sphi %s1028_s12, %s1186_s12  }
   0x4   : > { %p26_p0 = scmp.ge.s32.totalorder %s25_s17, 5  ;;  %p49_p2 = scmp.eq.s32.totalorder %s1005_s16, 0 }
   0x5   : > { %s41_s19 = sadd.s32 1, %s993_s13  ;;  %p739_p5 = scmp.ge.s32.totalorder %s1005_s16, 5 }
   0x6   : > { %s1191_s17 = smov (%p26_p0, %s25_s17), 0  ;;  %p50_p3 = por %p49_p2, %p48_p1 }
   0x7   : > { %s37_s18 = ssub.s32 %s1001_s15, %s1191_s17  ;;  %164 = sbr.rel (%p739_p5) target bundleno = 18 (0x12), region = 20 }
   0x8   : > { %p39_p4 = scmp.eq.s32.totalorder %s37_s18, 0 }
   0xa   : > { %s1063_s20 = scalar_select %p39_p4, %s993_s13, %s41_s19  }
   0xc   : > { %167 = sbr.rel (!%p50_p3) target bundleno = 18 (0x12), region = 24  ;;  %s169_s21 = sand.u32 (%p50_p3), 1, %s993_s13  }
   0xd   : > { %s890_s22 = sshll.u32 (%p50_p3), %s1001_s15, 3  ;;  %s740_s23 = sshll.u32 (%p50_p3), %s169_s21, 4 }
   0xe   : > { %s177_s26 = scalar_lea.vmem (%p50_p3), %s1182_s0, %s890_s22  ;;  %s171_s27 = scalar_lea.vmem (%p50_p3), [#allocation3], %s740_s23 }
   0xf   : > { %v208_v0 = vld [vmem:[%s177_s26] sm:$0xff] (%p50_p3)  ;;  %v210_v1 = vld [vmem:[%s177_s26 + $0x28] sm:$0xff] (%p50_p3) }
  0x10   : > { %209 = vst [vmem:[%s171_s27] sm:$0xff] (%p50_p3), %v208_v0 }
  0x11   : > { %211 = vst [vmem:[%s171_s27 + $0x8] sm:$0xff] %v210_v1 }
  0x12 PF: > { %p743_p6 = scmp.ge.s32.totalorder %s1005_s16, 1  ;;  %p231_p7 = scmp.lt.s32.totalorder %s1005_s16, 6 }
  0x14   : > { %p232_p8 = pnand %p743_p6, %p231_p7 }
  0x15   : > { %s238_s28 = sand.u32 (!%p232_p8), 1, %s989_s12   ;;  %s745_s29 = sshll.u32 (!%p232_p8), %s997_s14, 5 }
  0x16   : > { %235 = sbr.rel (%p232_p8) target bundleno = 228 (0xe4), region = 66  ;;  %s744_s30 = sshll.u32 (!%p232_p8), %s238_s28, 4 }
  0x17   : > { %p284_p9 = scmp.lt.s32.totalorder (!%p232_p8), %s745_s29, 159  ;;  %s1080_s8 = scalar_lea.vmem (!%p232_p8), [#allocation3], %s744_s30 }
  0x18   : > { %p748_p10 = scmp.ne.s32.totalorder (!%p232_p8), %s997_s14, 0 }
  0x1b   : > { %s1193_s29 = smov (!%p284_p9, %s745_s29), 159  ;;  %314 = sbr.rel (%p748_p10) target bundleno = 37 (0x25), region = 74 }
  0x1c   : > { %s891_s4 = sshll.u32 %s1193_s29, 3 }
  0x1d   : > { %s1078_s7 = scalar_lea.vmem %s1183_s1, %s891_s4 }
  0x20   : > { %v1007_v2 = vmov 0.0  }
  0x21   : > { %315 = vst [vmem:[#allocation2 + $0x10] sm:$0xff] %v1007_v2 }
  0x22   : > { %316 = vst [vmem:[#allocation2] sm:$0xff] %v1007_v2 }
  0x23   : > { %317 = vst [vmem:[#allocation2 + $0x18] sm:$0xff] %v1007_v2 }
  0x24   : > { %318 = vst [vmem:[#allocation2 + $0x8] sm:$0xff] %v1007_v2 }
  0x25 PF: > { %v815_v3 = vld [vmem:[%s1078_s7 + $0x70] sm:$0xf]  ;;  %v909_v4 = vld [vmem:[%s1078_s7 + $0x74] sm:$0xf0]  ;;  %v908_v8 = vld [vmem:[%s1078_s7 + $0x74] sm:$0xf] }
  0x26   : > { %v879_v5 = vld [vmem:[%s1078_s7 + $0xf0] sm:$0xf]  ;;  %v816_v6 = vor.u32 %v909_v4, %v815_v3  ;;  %v925_v7 = vld [vmem:[%s1078_s7 + $0xf4] sm:$0xf0]  ;;  %v817_v9 = vld [vmem:[%s1078_s7 + $0x78] sm:$0xf0] }
  0x27   : > { %v880_v10 = vor.u32 %v925_v7, %v879_v5  ;;  %v820_v11 = vor.u32 %v908_v8, %v817_v9  ;;  %v924_v12 = vld [vmem:[%s1078_s7 + $0xf4] sm:$0xf]  ;;  %v881_v13 = vld [vmem:[%s1078_s7 + $0xf8] sm:$0xf0]  ;;  %v807_v14 = vld [vmem:[%s1078_s7 + $0x60] sm:$0xf] }
  0x28   : > { %527 = vmatpush.bf16.msra.mxu0 %v816_v6  ;;  %v884_v15 = vor.u32 %v924_v12, %v881_v13  ;;  %v907_v16 = vld [vmem:[%s1078_s7 + $0x64] sm:$0xf0]  ;;  %v871_v17 = vld [vmem:[%s1078_s7 + $0xe0] sm:$0xf]  ;;  %v906_v21 = vld [vmem:[%s1078_s7 + $0x64] sm:$0xf] }
  0x29   : > { %v923_v18 = vld [vmem:[%s1078_s7 + $0xe4] sm:$0xf0]  ;;  %541 = vmatpush.bf16.msra.mxu1 %v880_v10  ;;  %555 = vmatpush.bf16.msra.mxu2 %v820_v11  ;;  %v808_v19 = vor.u32 %v907_v16, %v807_v14  ;;  %v809_v22 = vld [vmem:[%s1078_s7 + $0x68] sm:$0xf0]  ;;  %v922_v23 = vld [vmem:[%s1078_s7 + $0xe4] sm:$0xf] }
  0x2a   : > { %v872_v20 = vor.u32 %v923_v18, %v871_v17  ;;  %569 = vmatpush.bf16.msra.mxu3 %v884_v15  ;;  %v812_v24 = vor.u32 %v906_v21, %v809_v22  ;;  %v873_v25 = vld [vmem:[%s1078_s7 + $0xe8] sm:$0xf0]  ;;  %v799_v26 = vld [vmem:[%s1078_s7 + $0x50] sm:$0xf]  ;;  %v905_v27 = vld [vmem:[%s1078_s7 + $0x54] sm:$0xf0] }
  0x2b   : > { %v876_v28 = vor.u32 %v922_v23, %v873_v25  ;;  %v863_v29 = vld [vmem:[%s1078_s7 + $0xd0] sm:$0xf]  ;;  %v921_v30 = vld [vmem:[%s1078_s7 + $0xd4] sm:$0xf0]  ;;  %v904_v31 = vld [vmem:[%s1078_s7 + $0x54] sm:$0xf]  ;;  %v800_v32 = vor.u32 %v905_v27, %v799_v26 }
  0x2c   : > { %528 = vmatpush.bf16.msra.mxu0 %v808_v19  ;;  %v801_v33 = vld [vmem:[%s1078_s7 + $0x58] sm:$0xf0]  ;;  %v920_v34 = vld [vmem:[%s1078_s7 + $0xd4] sm:$0xf]  ;;  %v864_v36 = vor.u32 %v921_v30, %v863_v29  ;;  %v791_v38 = vld [vmem:[%s1078_s7 + $0x40] sm:$0xf] }
  0x2d   : > { %v865_v35 = vld [vmem:[%s1078_s7 + $0xd8] sm:$0xf0]  ;;  %542 = vmatpush.bf16.msra.mxu1 %v872_v20  ;;  %556 = vmatpush.bf16.msra.mxu2 %v812_v24  ;;  %v804_v37 = vor.u32 %v904_v31, %v801_v33  ;;  %v903_v39 = vld [vmem:[%s1078_s7 + $0x44] sm:$0xf0]  ;;  %v855_v40 = vld [vmem:[%s1078_s7 + $0xc0] sm:$0xf] }
  0x2e   : > { %570 = vmatpush.bf16.msra.mxu3 %v876_v28  ;;  %v868_v41 = vor.u32 %v920_v34, %v865_v35  ;;  %v919_v42 = vld [vmem:[%s1078_s7 + $0xc4] sm:$0xf0]  ;;  %v902_v43 = vld [vmem:[%s1078_s7 + $0x44] sm:$0xf]  ;;  %v793_v44 = vld [vmem:[%s1078_s7 + $0x48] sm:$0xf0]  ;;  %v792_v47 = vor.u32 %v903_v39, %v791_v38 }
  0x2f   : > { %v918_v45 = vld [vmem:[%s1078_s7 + $0xc4] sm:$0xf]  ;;  %v857_v46 = vld [vmem:[%s1078_s7 + $0xc8] sm:$0xf0]  ;;  %v856_v48 = vor.u32 %v919_v42, %v855_v40  ;;  %v796_v49 = vor.u32 %v902_v43, %v793_v44  ;;  %v783_v50 = vld [vmem:[%s1078_s7 + $0x30] sm:$0xf] }
  0x30   : > { %529 = vmatpush.bf16.msra.mxu0 %v800_v32  ;;  %v901_v51 = vld [vmem:[%s1078_s7 + $0x34] sm:$0xf0]  ;;  %v847_v52 = vld [vmem:[%s1078_s7 + $0xb0] sm:$0xf]  ;;  %v860_v53 = vor.u32 %v918_v45, %v857_v46  ;;  %v900_v55 = vld [vmem:[%s1078_s7 + $0x34] sm:$0xf] }
  0x31   : > { %543 = vmatpush.bf16.msra.mxu1 %v864_v36  ;;  %557 = vmatpush.bf16.msra.mxu2 %v804_v37  ;;  %v917_v54 = vld [vmem:[%s1078_s7 + $0xb4] sm:$0xf0]  ;;  %v785_v56 = vld [vmem:[%s1078_s7 + $0x38] sm:$0xf0]  ;;  %v916_v57 = vld [vmem:[%s1078_s7 + $0xb4] sm:$0xf]  ;;  %v784_v59 = vor.u32 %v901_v51, %v783_v50 }
  0x32   : > { %571 = vmatpush.bf16.msra.mxu3 %v868_v41  ;;  %v849_v58 = vld [vmem:[%s1078_s7 + $0xb8] sm:$0xf0]  ;;  %v848_v60 = vor.u32 %v917_v54, %v847_v52  ;;  %v788_v61 = vor.u32 %v900_v55, %v785_v56  ;;  %v775_v62 = vld [vmem:[%s1078_s7 + $0x20] sm:$0xf]  ;;  %v899_v63 = vld [vmem:[%s1078_s7 + $0x24] sm:$0xf0] }
  0x33   : > { %v839_v0 = vld [vmem:[%s1078_s7 + $0xa0] sm:$0xf]  ;;  %v852_v1 = vor.u32 %v916_v57, %v849_v58  ;;  %v915_v2 = vld [vmem:[%s1078_s7 + $0xa4] sm:$0xf0]  ;;  %v898_v3 = vld [vmem:[%s1078_s7 + $0x24] sm:$0xf]  ;;  %v776_v7 = vor.u32 %v899_v63, %v775_v62 }
  0x34   : > { %530 = vmatpush.bf16.msra.mxu0 %v792_v47  ;;  %v777_v4 = vld [vmem:[%s1078_s7 + $0x28] sm:$0xf0]  ;;  %v914_v5 = vld [vmem:[%s1078_s7 + $0xa4] sm:$0xf]  ;;  %v840_v8 = vor.u32 %v915_v2, %v839_v0  ;;  %v767_v10 = vld [vmem:[%s1078_s7 + $0x10] sm:$0xf] }
  0x35   : > { %544 = vmatpush.bf16.msra.mxu1 %v856_v48  ;;  %558 = vmatpush.bf16.msra.mxu2 %v796_v49  ;;  %v841_v6 = vld [vmem:[%s1078_s7 + $0xa8] sm:$0xf0]  ;;  %v780_v9 = vor.u32 %v898_v3, %v777_v4  ;;  %v897_v11 = vld [vmem:[%s1078_s7 + $0x14] sm:$0xf0]  ;;  %v831_v12 = vld [vmem:[%s1078_s7 + $0x90] sm:$0xf] }
  0x36   : > { %572 = vmatpush.bf16.msra.mxu3 %v860_v53  ;;  %v844_v13 = vor.u32 %v914_v5, %v841_v6  ;;  %v913_v14 = vld [vmem:[%s1078_s7 + $0x94] sm:$0xf0]  ;;  %v896_v15 = vld [vmem:[%s1078_s7 + $0x14] sm:$0xf]  ;;  %v769_v16 = vld [vmem:[%s1078_s7 + $0x18] sm:$0xf0]  ;;  %v768_v19 = vor.u32 %v897_v11, %v767_v10 }
  0x37   : > { %v912_v17 = vld [vmem:[%s1078_s7 + $0x94] sm:$0xf]  ;;  %v833_v18 = vld [vmem:[%s1078_s7 + $0x98] sm:$0xf0]  ;;  %v832_v20 = vor.u32 %v913_v14, %v831_v12  ;;  %v772_v21 = vor.u32 %v896_v15, %v769_v16  ;;  %v759_v22 = vld [vmem:[%s1078_s7] sm:$0xf] }
  0x38   : > { %531 = vmatpush.bf16.msra.mxu0 %v784_v59  ;;  %v895_v23 = vld [vmem:[%s1078_s7 + $0x4] sm:$0xf0]  ;;  %v823_v24 = vld [vmem:[%s1078_s7 + $0x80] sm:$0xf]  ;;  %v836_v25 = vor.u32 %v912_v17, %v833_v18  ;;  %v894_v27 = vld [vmem:[%s1078_s7 + $0x4] sm:$0xf] }
  0x39   : > { %545 = vmatpush.bf16.msra.mxu1 %v848_v60  ;;  %559 = vmatpush.bf16.msra.mxu2 %v788_v61  ;;  %v911_v26 = vld [vmem:[%s1078_s7 + $0x84] sm:$0xf0]  ;;  %v761_v28 = vld [vmem:[%s1078_s7 + $0x8] sm:$0xf0]  ;;  %v910_v29 = vld [vmem:[%s1078_s7 + $0x84] sm:$0xf]  ;;  %v760_v31 = vor.u32 %v895_v23, %v759_v22 }
  0x3a   : > { %573 = vmatpush.bf16.msra.mxu3 %v852_v1  ;;  %v825_v30 = vld [vmem:[%s1078_s7 + $0x88] sm:$0xf0]  ;;  %v751_v32 = vld [vmem:[%s1080_s8] sm:$0xf]  ;;  %v893_v33 = vld [vmem:[%s1080_s8 + $0x4] sm:$0xf0]  ;;  %v824_v34 = vor.u32 %v911_v26, %v823_v24  ;;  %v764_v35 = vor.u32 %v894_v27, %v761_v28 }
  0x3b   : > { %v892_v36 = vld [vmem:[%s1080_s8 + $0x4] sm:$0xf]  ;;  %v753_v37 = vld [vmem:[%s1080_s8 + $0x8] sm:$0xf0]  ;;  %v828_v38 = vor.u32 %v910_v29, %v825_v30  ;;  %v752_v39 = vor.u32 %v893_v33, %v751_v32  ;;  %p885_p11 = scmp.ne.s32.totalorder %s997_s14, 4 }
  0x3c   : > { %532 = vmatpush.bf16.msra.mxu0 %v776_v7  ;;  %v756_v40 = vor.u32 %v892_v36, %v753_v37  ;;  %v319_v42 = vld [vmem:[#allocation2 + $0x10] sm:$0xff]  ;;  %v320_v47 = vld [vmem:[#allocation2] sm:$0xff]  ;;  %v321_v51 = vld [vmem:[#allocation2 + $0x18] sm:$0xff] }
  0x3d   : > { %546 = vmatpush.bf16.msra.mxu1 %v840_v8  ;;  %560 = vmatpush.bf16.msra.mxu2 %v780_v9  ;;  %v322_v57 = vld [vmem:[#allocation2 + $0x8] sm:$0xff] }
  0x3e   : > { %574 = vmatpush.bf16.msra.mxu3 %v844_v13 }
  0x40   : > { %533 = vmatpush.bf16.msra.mxu0 %v768_v19 }
  0x41   : > { %547 = vmatpush.bf16.msra.mxu1 %v832_v20  ;;  %561 = vmatpush.bf16.msra.mxu2 %v772_v21 }
  0x42   : > { %575 = vmatpush.bf16.msra.mxu3 %v836_v25 }
  0x44   : > { %534 = vmatpush.bf16.msra.mxu0 %v760_v31 }
  0x45   : > { %548 = vmatpush.bf16.msra.mxu1 %v824_v34  ;;  %562 = vmatpush.bf16.msra.mxu2 %v764_v35 }
  0x46   : > { %576 = vmatpush.bf16.msra.mxu3 %v828_v38 }
  0x47   : > { %535 = vmatmul.bf16.vlgmr.msra.gmra.mxu0 %v752_v39 }
  0x48   : > { %549 = vmatmul.bf16.vlgmr.msra.gmra.mxu1 %v756_v40  ;;  %563 = vmatmul.bf16.vlgmr.msra.gmra.mxu2 %v752_v39 }
  0x49   : > { %577 = vmatmul.bf16.vlgmr.msra.gmra.mxu3 %v756_v40 }
  0xc4   : > { %v536_v41 = vpop.f32.mrf.mxu0 }
  0xc5   : > { %v550_v43 = vpop.f32.mrf.mxu1 }
  0xc6   : > { %v551_v44 = vadd.f32 %v550_v43, %v536_v41 }
  0xc8   : > { %v583_v45 = vadd.f32 %v551_v44, %v319_v42 }
  0xca   : > { %587 = vst [vmem:[#allocation2 + $0x10] sm:$0xff] %v583_v45 }
  0xcb   : > { %v564_v46 = vpop.f32.mrf.mxu2 }
  0xcc   : > { %v578_v48 = vpop.f32.mrf.mxu3  ;;  %v538_v49 = vpop.f32.mrf.mxu0 }
  0xcd   : > { %v579_v50 = vadd.f32 %v578_v48, %v564_v46  ;;  %v552_v52 = vpop.f32.mrf.mxu1 }
  0xce   : > { %v553_v53 = vadd.f32 %v552_v52, %v538_v49 }
  0xcf   : > { %v584_v54 = vadd.f32 %v579_v50, %v320_v47 }
  0xd0   : > { %v585_v55 = vadd.f32 %v553_v53, %v321_v51 }
  0xd1   : > { %588 = vst [vmem:[#allocation2] sm:$0xff] %v584_v54 }
  0xd2   : > { %589 = vst [vmem:[#allocation2 + $0x18] sm:$0xff] %v585_v55 }
  0xd3   : > { %v566_v56 = vpop.f32.mrf.mxu2 }
  0xd4   : > { %v580_v58 = vpop.f32.mrf.mxu3 }
  0xd5   : > { %v581_v59 = vadd.f32 %v580_v58, %v566_v56  ;;  %594 = sbr.rel (%p885_p11) target bundleno = 228 (0xe4), region = 78 }
  0xd7   : > { %v586_v60 = vadd.f32 %v581_v59, %v322_v57 }
  0xd9   : > { %590 = vst [vmem:[#allocation2 + $0x8] sm:$0xff] %v586_v60 }
  0xda   : > { %v595_v61 = vld [vmem:[#allocation2 + $0x10] sm:$0xff]  ;;  %v599_v62 = vld [vmem:[%s1184_s2] sm:$0x3]  ;;  %v597_v2 = vld [vmem:[#allocation2 + $0x18] sm:$0xff] }
  0xdb   : > { %v596_v63 = vld [vmem:[#allocation2] sm:$0xff]  ;;  %v601_v0 = vperm.slane %v599_v62, 0  ;;  %v602_v1 = vperm.slane %v599_v62, 1 }
  0xdd   : > { %v605_v4 = vadd.f32 %v601_v0, %v595_v61  ;;  %v606_v5 = vadd.f32 %v602_v1, %v596_v63  ;;  %v607_v6 = vadd.f32 %v601_v0, %v597_v2 }
  0xdf   : > { %609 = vst [vmem:[%s1185_s3] sm:$0xff] %v605_v4 }
  0xe0   : > { %v598_v3 = vld [vmem:[#allocation2 + $0x8] sm:$0xff]  ;;  %610 = vst [vmem:[%s1185_s3 + $0x8] sm:$0xff] %v606_v5 }
  0xe1   : > { %v608_v7 = vadd.f32 %v602_v1, %v598_v3  ;;  %611 = vst [vmem:[%s1185_s3 + $0x10] sm:$0xff] %v607_v6 }
  0xe3   : > { %612 = vst [vmem:[%s1185_s3 + $0x18] sm:$0xff] %v608_v7 }
  0xe4 PF: > { %s13_s16 = sadd.s32 1, %s1005_s16   ;;  %s1186_s12 = smov %s993_s13 }
  0xe5   : > { %p10_p12 = scmp.ge.s32.totalorder %s13_s16, 7   ;;  %s1187_s13 = smov %s1063_s20 }
  0xe6   : > { %s1188_s14 = smov %s1001_s15  ;;  %s1189_s15 = smov %s1191_s17 }
  0xe7   :  { %12 = sbr.rel (!%p10_p12) target bundleno = 3 (0x3), region = 119 }

// kernel: resnet_forward.59
= control target key start
LH: loop header
LB: loop body
LE: loop exit
PB: predicated region body
PF: predicated region fallthrough
CT: control target
= control target key end

     0   :  { %s1028_s12 = smov 0   ;;  %s1030_s13 = smov 0   ;;  %s1182_s0 = inlined_call_operand.vmem [shape: bf16[16,2304], index: 0, kind: input, shape index: {}]   ;;  %s1183_s1 = inlined_call_operand.vmem [shape: bf16[2304,256], index: 1, kind: input, shape index: {}]   ;;  %s1184_s2 = inlined_call_operand.vmem [shape: f32[1,256], index: 2, kind: input, shape index: {}]   ;;  %s1185_s3 = inlined_call_operand.vmem [shape: f32[16,256], index: 3, kind: output, shape index: {}]  }
   0x1   :  { %s1032_s14 = smov 0   ;;  %s1034_s15 = smov 0  }
   0x2   :  { %s1036_s16 = smov 0  }
   0x3 LB: > { %s25_s17 = sadd.s32 1, %s1001_s15  ;;  %p48_p1 = scmp.ne.s32.totalorder %s993_s13, %s989_s12  ;;  %s1005_s16 = sphi %s1036_s16, %s13_s16   ;;  %s1001_s15 = sphi %s1034_s15, %s1189_s15   ;;  %s997_s14 = sphi %s1032_s14, %s1188_s14   ;;  %s993_s13 = sphi %s1030_s13, %s1187_s13   ;;  %s989_s12 = sphi %s1028_s12, %s1186_s12  }
   0x4   : > { %p26_p0 = scmp.ge.s32.totalorder %s25_s17, 9  ;;  %p49_p2 = scmp.eq.s32.totalorder %s1005_s16, 0 }
   0x5   : > { %s41_s19 = sadd.s32 1, %s993_s13  ;;  %p739_p5 = scmp.ge.s32.totalorder %s1005_s16, 9 }
   0x6   : > { %s1191_s17 = smov (%p26_p0, %s25_s17), 0  ;;  %p50_p3 = por %p49_p2, %p48_p1 }
   0x7   : > { %s37_s18 = ssub.s32 %s1001_s15, %s1191_s17  ;;  %164 = sbr.rel (%p739_p5) target bundleno = 18 (0x12), region = 20 }
   0x8   : > { %p39_p4 = scmp.eq.s32.totalorder %s37_s18, 0 }
   0xa   : > { %s1063_s20 = scalar_select %p39_p4, %s993_s13, %s41_s19  }
   0xc   : > { %167 = sbr.rel (!%p50_p3) target bundleno = 18 (0x12), region = 24  ;;  %s169_s21 = sand.u32 (%p50_p3), 1, %s993_s13  }
   0xd   : > { %s890_s22 = sshll.u32 (%p50_p3), %s1001_s15, 3  ;;  %s740_s23 = sshll.u32 (%p50_p3), %s169_s21, 4 }
   0xe   : > { %s177_s26 = scalar_lea.vmem (%p50_p3), %s1182_s0, %s890_s22  ;;  %s171_s27 = scalar_lea.vmem (%p50_p3), [#allocation3], %s740_s23 }
   0xf   : > { %v208_v0 = vld [vmem:[%s177_s26] sm:$0xff] (%p50_p3)  ;;  %v210_v1 = vld [vmem:[%s177_s26 + $0x48] sm:$0xff] (%p50_p3) }
  0x10   : > { %209 = vst [vmem:[%s171_s27] sm:$0xff] (%p50_p3), %v208_v0 }
  0x11   : > { %211 = vst [vmem:[%s171_s27 + $0x8] sm:$0xff] %v210_v1 }
  0x12 PF: > { %p743_p6 = scmp.ge.s32.totalorder %s1005_s16, 1  ;;  %p231_p7 = scmp.lt.s32.totalorder %s1005_s16, 10 }
  0x14   : > { %p232_p8 = pnand %p743_p6, %p231_p7 }
  0x15   : > { %s238_s28 = sand.u32 (!%p232_p8), 1, %s989_s12   ;;  %s745_s29 = sshll.u32 (!%p232_p8), %s997_s14, 5 }
  0x16   : > { %235 = sbr.rel (%p232_p8) target bundleno = 228 (0xe4), region = 66  ;;  %s744_s30 = sshll.u32 (!%p232_p8), %s238_s28, 4 }
  0x17   : > { %p284_p9 = scmp.lt.s32.totalorder (!%p232_p8), %s745_s29, 287  ;;  %s1080_s8 = scalar_lea.vmem (!%p232_p8), [#allocation3], %s744_s30 }
  0x18   : > { %p748_p10 = scmp.ne.s32.totalorder (!%p232_p8), %s997_s14, 0 }
  0x1b   : > { %s1193_s29 = smov (!%p284_p9, %s745_s29), 287  ;;  %314 = sbr.rel (%p748_p10) target bundleno = 37 (0x25), region = 74 }
  0x1c   : > { %s891_s4 = sshll.u32 %s1193_s29, 3 }
  0x1d   : > { %s1078_s7 = scalar_lea.vmem %s1183_s1, %s891_s4 }
  0x20   : > { %v1007_v2 = vmov 0.0  }
  0x21   : > { %315 = vst [vmem:[#allocation2 + $0x10] sm:$0xff] %v1007_v2 }
  0x22   : > { %316 = vst [vmem:[#allocation2] sm:$0xff] %v1007_v2 }
  0x23   : > { %317 = vst [vmem:[#allocation2 + $0x18] sm:$0xff] %v1007_v2 }
  0x24   : > { %318 = vst [vmem:[#allocation2 + $0x8] sm:$0xff] %v1007_v2 }
  0x25 PF: > { %v815_v3 = vld [vmem:[%s1078_s7 + $0x70] sm:$0xf]  ;;  %v909_v4 = vld [vmem:[%s1078_s7 + $0x74] sm:$0xf0]  ;;  %v908_v8 = vld [vmem:[%s1078_s7 + $0x74] sm:$0xf] }
  0x26   : > { %v879_v5 = vld [vmem:[%s1078_s7 + $0xf0] sm:$0xf]  ;;  %v816_v6 = vor.u32 %v909_v4, %v815_v3  ;;  %v925_v7 = vld [vmem:[%s1078_s7 + $0xf4] sm:$0xf0]  ;;  %v817_v9 = vld [vmem:[%s1078_s7 + $0x78] sm:$0xf0] }
  0x27   : > { %v880_v10 = vor.u32 %v925_v7, %v879_v5  ;;  %v820_v11 = vor.u32 %v908_v8, %v817_v9  ;;  %v924_v12 = vld [vmem:[%s1078_s7 + $0xf4] sm:$0xf]  ;;  %v881_v13 = vld [vmem:[%s1078_s7 + $0xf8] sm:$0xf0]  ;;  %v807_v14 = vld [vmem:[%s1078_s7 + $0x60] sm:$0xf] }
  0x28   : > { %527 = vmatpush.bf16.msra.mxu0 %v816_v6  ;;  %v884_v15 = vor.u32 %v924_v12, %v881_v13  ;;  %v907_v16 = vld [vmem:[%s1078_s7 + $0x64] sm:$0xf0]  ;;  %v871_v17 = vld [vmem:[%s1078_s7 + $0xe0] sm:$0xf]  ;;  %v906_v21 = vld [vmem:[%s1078_s7 + $0x64] sm:$0xf] }
  0x29   : > { %v923_v18 = vld [vmem:[%s1078_s7 + $0xe4] sm:$0xf0]  ;;  %541 = vmatpush.bf16.msra.mxu1 %v880_v10  ;;  %555 = vmatpush.bf16.msra.mxu2 %v820_v11  ;;  %v808_v19 = vor.u32 %v907_v16, %v807_v14  ;;  %v809_v22 = vld [vmem:[%s1078_s7 + $0x68] sm:$0xf0]  ;;  %v922_v23 = vld [vmem:[%s1078_s7 + $0xe4] sm:$0xf] }
  0x2a   : > { %v872_v20 = vor.u32 %v923_v18, %v871_v17  ;;  %569 = vmatpush.bf16.msra.mxu3 %v884_v15  ;;  %v812_v24 = vor.u32 %v906_v21, %v809_v22  ;;  %v873_v25 = vld [vmem:[%s1078_s7 + $0xe8] sm:$0xf0]  ;;  %v799_v26 = vld [vmem:[%s1078_s7 + $0x50] sm:$0xf]  ;;  %v905_v27 = vld [vmem:[%s1078_s7 + $0x54] sm:$0xf0] }
  0x2b   : > { %v876_v28 = vor.u32 %v922_v23, %v873_v25  ;;  %v863_v29 = vld [vmem:[%s1078_s7 + $0xd0] sm:$0xf]  ;;  %v921_v30 = vld [vmem:[%s1078_s7 + $0xd4] sm:$0xf0]  ;;  %v904_v31 = vld [vmem:[%s1078_s7 + $0x54] sm:$0xf]  ;;  %v800_v32 = vor.u32 %v905_v27, %v799_v26 }
  0x2c   : > { %528 = vmatpush.bf16.msra.mxu0 %v808_v19  ;;  %v801_v33 = vld [vmem:[%s1078_s7 + $0x58] sm:$0xf0]  ;;  %v920_v34 = vld [vmem:[%s1078_s7 + $0xd4] sm:$0xf]  ;;  %v864_v36 = vor.u32 %v921_v30, %v863_v29  ;;  %v791_v38 = vld [vmem:[%s1078_s7 + $0x40] sm:$0xf] }
  0x2d   : > { %v865_v35 = vld [vmem:[%s1078_s7 + $0xd8] sm:$0xf0]  ;;  %542 = vmatpush.bf16.msra.mxu1 %v872_v20  ;;  %556 = vmatpush.bf16.msra.mxu2 %v812_v24  ;;  %v804_v37 = vor.u32 %v904_v31, %v801_v33  ;;  %v903_v39 = vld [vmem:[%s1078_s7 + $0x44] sm:$0xf0]  ;;  %v855_v40 = vld [vmem:[%s1078_s7 + $0xc0] sm:$0xf] }
  0x2e   : > { %570 = vmatpush.bf16.msra.mxu3 %v876_v28  ;;  %v868_v41 = vor.u32 %v920_v34, %v865_v35  ;;  %v919_v42 = vld [vmem:[%s1078_s7 + $0xc4] sm:$0xf0]  ;;  %v902_v43 = vld [vmem:[%s1078_s7 + $0x44] sm:$0xf]  ;;  %v793_v44 = vld [vmem:[%s1078_s7 + $0x48] sm:$0xf0]  ;;  %v792_v47 = vor.u32 %v903_v39, %v791_v38 }
  0x2f   : > { %v918_v45 = vld [vmem:[%s1078_s7 + $0xc4] sm:$0xf]  ;;  %v857_v46 = vld [vmem:[%s1078_s7 + $0xc8] sm:$0xf0]  ;;  %v856_v48 = vor.u32 %v919_v42, %v855_v40  ;;  %v796_v49 = vor.u32 %v902_v43, %v793_v44  ;;  %v783_v50 = vld [vmem:[%s1078_s7 + $0x30] sm:$0xf] }
  0x30   : > { %529 = vmatpush.bf16.msra.mxu0 %v800_v32  ;;  %v901_v51 = vld [vmem:[%s1078_s7 + $0x34] sm:$0xf0]  ;;  %v847_v52 = vld [vmem:[%s1078_s7 + $0xb0] sm:$0xf]  ;;  %v860_v53 = vor.u32 %v918_v45, %v857_v46  ;;  %v900_v55 = vld [vmem:[%s1078_s7 + $0x34] sm:$0xf] }
  0x31   : > { %543 = vmatpush.bf16.msra.mxu1 %v864_v36  ;;  %557 = vmatpush.bf16.msra.mxu2 %v804_v37  ;;  %v917_v54 = vld [vmem:[%s1078_s7 + $0xb4] sm:$0xf0]  ;;  %v785_v56 = vld [vmem:[%s1078_s7 + $0x38] sm:$0xf0]  ;;  %v916_v57 = vld [vmem:[%s1078_s7 + $0xb4] sm:$0xf]  ;;  %v784_v59 = vor.u32 %v901_v51, %v783_v50 }
  0x32   : > { %571 = vmatpush.bf16.msra.mxu3 %v868_v41  ;;  %v849_v58 = vld [vmem:[%s1078_s7 + $0xb8] sm:$0xf0]  ;;  %v848_v60 = vor.u32 %v917_v54, %v847_v52  ;;  %v788_v61 = vor.u32 %v900_v55, %v785_v56  ;;  %v775_v62 = vld [vmem:[%s1078_s7 + $0x20] sm:$0xf]  ;;  %v899_v63 = vld [vmem:[%s1078_s7 + $0x24] sm:$0xf0] }
  0x33   : > { %v839_v0 = vld [vmem:[%s1078_s7 + $0xa0] sm:$0xf]  ;;  %v852_v1 = vor.u32 %v916_v57, %v849_v58  ;;  %v915_v2 = vld [vmem:[%s1078_s7 + $0xa4] sm:$0xf0]  ;;  %v898_v3 = vld [vmem:[%s1078_s7 + $0x24] sm:$0xf]  ;;  %v776_v7 = vor.u32 %v899_v63, %v775_v62 }
  0x34   : > { %530 = vmatpush.bf16.msra.mxu0 %v792_v47  ;;  %v777_v4 = vld [vmem:[%s1078_s7 + $0x28] sm:$0xf0]  ;;  %v914_v5 = vld [vmem:[%s1078_s7 + $0xa4] sm:$0xf]  ;;  %v840_v8 = vor.u32 %v915_v2, %v839_v0  ;;  %v767_v10 = vld [vmem:[%s1078_s7 + $0x10] sm:$0xf] }
  0x35   : > { %544 = vmatpush.bf16.msra.mxu1 %v856_v48  ;;  %558 = vmatpush.bf16.msra.mxu2 %v796_v49  ;;  %v841_v6 = vld [vmem:[%s1078_s7 + $0xa8] sm:$0xf0]  ;;  %v780_v9 = vor.u32 %v898_v3, %v777_v4  ;;  %v897_v11 = vld [vmem:[%s1078_s7 + $0x14] sm:$0xf0]  ;;  %v831_v12 = vld [vmem:[%s1078_s7 + $0x90] sm:$0xf] }
  0x36   : > { %572 = vmatpush.bf16.msra.mxu3 %v860_v53  ;;  %v844_v13 = vor.u32 %v914_v5, %v841_v6  ;;  %v913_v14 = vld [vmem:[%s1078_s7 + $0x94] sm:$0xf0]  ;;  %v896_v15 = vld [vmem:[%s1078_s7 + $0x14] sm:$0xf]  ;;  %v769_v16 = vld [vmem:[%s1078_s7 + $0x18] sm:$0xf0]  ;;  %v768_v19 = vor.u32 %v897_v11, %v767_v10 }
  0x37   : > { %v912_v17 = vld [vmem:[%s1078_s7 + $0x94] sm:$0xf]  ;;  %v833_v18 = vld [vmem:[%s1078_s7 + $0x98] sm:$0xf0]  ;;  %v832_v20 = vor.u32 %v913_v14, %v831_v12  ;;  %v772_v21 = vor.u32 %v896_v15, %v769_v16  ;;  %v759_v22 = vld [vmem:[%s1078_s7] sm:$0xf] }
  0x38   : > { %531 = vmatpush.bf16.msra.mxu0 %v784_v59  ;;  %v895_v23 = vld [vmem:[%s1078_s7 + $0x4] sm:$0xf0]  ;;  %v823_v24 = vld [vmem:[%s1078_s7 + $0x80] sm:$0xf]  ;;  %v836_v25 = vor.u32 %v912_v17, %v833_v18  ;;  %v894_v27 = vld [vmem:[%s1078_s7 + $0x4] sm:$0xf] }
  0x39   : > { %545 = vmatpush.bf16.msra.mxu1 %v848_v60  ;;  %559 = vmatpush.bf16.msra.mxu2 %v788_v61  ;;  %v911_v26 = vld [vmem:[%s1078_s7 + $0x84] sm:$0xf0]  ;;  %v761_v28 = vld [vmem:[%s1078_s7 + $0x8] sm:$0xf0]  ;;  %v910_v29 = vld [vmem:[%s1078_s7 + $0x84] sm:$0xf]  ;;  %v760_v31 = vor.u32 %v895_v23, %v759_v22 }
  0x3a   : > { %573 = vmatpush.bf16.msra.mxu3 %v852_v1  ;;  %v825_v30 = vld [vmem:[%s1078_s7 + $0x88] sm:$0xf0]  ;;  %v751_v32 = vld [vmem:[%s1080_s8] sm:$0xf]  ;;  %v893_v33 = vld [vmem:[%s1080_s8 + $0x4] sm:$0xf0]  ;;  %v824_v34 = vor.u32 %v911_v26, %v823_v24  ;;  %v764_v35 = vor.u32 %v894_v27, %v761_v28 }
  0x3b   : > { %v892_v36 = vld [vmem:[%s1080_s8 + $0x4] sm:$0xf]  ;;  %v753_v37 = vld [vmem:[%s1080_s8 + $0x8] sm:$0xf0]  ;;  %v828_v38 = vor.u32 %v910_v29, %v825_v30  ;;  %v752_v39 = vor.u32 %v893_v33, %v751_v32  ;;  %p885_p11 = scmp.ne.s32.totalorder %s997_s14, 8 }
  0x3c   : > { %532 = vmatpush.bf16.msra.mxu0 %v776_v7  ;;  %v756_v40 = vor.u32 %v892_v36, %v753_v37  ;;  %v319_v42 = vld [vmem:[#allocation2 + $0x10] sm:$0xff]  ;;  %v320_v47 = vld [vmem:[#allocation2] sm:$0xff]  ;;  %v321_v51 = vld [vmem:[#allocation2 + $0x18] sm:$0xff] }
  0x3d   : > { %546 = vmatpush.bf16.msra.mxu1 %v840_v8  ;;  %560 = vmatpush.bf16.msra.mxu2 %v780_v9  ;;  %v322_v57 = vld [vmem:[#allocation2 + $0x8] sm:$0xff] }
  0x3e   : > { %574 = vmatpush.bf16.msra.mxu3 %v844_v13 }
  0x40   : > { %533 = vmatpush.bf16.msra.mxu0 %v768_v19 }
  0x41   : > { %547 = vmatpush.bf16.msra.mxu1 %v832_v20  ;;  %561 = vmatpush.bf16.msra.mxu2 %v772_v21 }
  0x42   : > { %575 = vmatpush.bf16.msra.mxu3 %v836_v25 }
  0x44   : > { %534 = vmatpush.bf16.msra.mxu0 %v760_v31 }
  0x45   : > { %548 = vmatpush.bf16.msra.mxu1 %v824_v34  ;;  %562 = vmatpush.bf16.msra.mxu2 %v764_v35 }
  0x46   : > { %576 = vmatpush.bf16.msra.mxu3 %v828_v38 }
  0x47   : > { %535 = vmatmul.bf16.vlgmr.msra.gmra.mxu0 %v752_v39 }
  0x48   : > { %549 = vmatmul.bf16.vlgmr.msra.gmra.mxu1 %v756_v40  ;;  %563 = vmatmul.bf16.vlgmr.msra.gmra.mxu2 %v752_v39 }
  0x49   : > { %577 = vmatmul.bf16.vlgmr.msra.gmra.mxu3 %v756_v40 }
  0xc4   : > { %v536_v41 = vpop.f32.mrf.mxu0 }
  0xc5   : > { %v550_v43 = vpop.f32.mrf.mxu1 }
  0xc6   : > { %v551_v44 = vadd.f32 %v550_v43, %v536_v41 }
  0xc8   : > { %v583_v45 = vadd.f32 %v551_v44, %v319_v42 }
  0xca   : > { %587 = vst [vmem:[#allocation2 + $0x10] sm:$0xff] %v583_v45 }
  0xcb   : > { %v564_v46 = vpop.f32.mrf.mxu2 }
  0xcc   : > { %v578_v48 = vpop.f32.mrf.mxu3  ;;  %v538_v49 = vpop.f32.mrf.mxu0 }
  0xcd   : > { %v579_v50 = vadd.f32 %v578_v48, %v564_v46  ;;  %v552_v52 = vpop.f32.mrf.mxu1 }
  0xce   : > { %v553_v53 = vadd.f32 %v552_v52, %v538_v49 }
  0xcf   : > { %v584_v54 = vadd.f32 %v579_v50, %v320_v47 }
  0xd0   : > { %v585_v55 = vadd.f32 %v553_v53, %v321_v51 }
  0xd1   : > { %588 = vst [vmem:[#allocation2] sm:$0xff] %v584_v54 }
  0xd2   : > { %589 = vst [vmem:[#allocation2 + $0x18] sm:$0xff] %v585_v55 }
  0xd3   : > { %v566_v56 = vpop.f32.mrf.mxu2 }
  0xd4   : > { %v580_v58 = vpop.f32.mrf.mxu3 }
  0xd5   : > { %v581_v59 = vadd.f32 %v580_v58, %v566_v56  ;;  %594 = sbr.rel (%p885_p11) target bundleno = 228 (0xe4), region = 78 }
  0xd7   : > { %v586_v60 = vadd.f32 %v581_v59, %v322_v57 }
  0xd9   : > { %590 = vst [vmem:[#allocation2 + $0x8] sm:$0xff] %v586_v60 }
  0xda   : > { %v595_v61 = vld [vmem:[#allocation2 + $0x10] sm:$0xff]  ;;  %v599_v62 = vld [vmem:[%s1184_s2] sm:$0x3]  ;;  %v597_v2 = vld [vmem:[#allocation2 + $0x18] sm:$0xff] }
  0xdb   : > { %v596_v63 = vld [vmem:[#allocation2] sm:$0xff]  ;;  %v601_v0 = vperm.slane %v599_v62, 0  ;;  %v602_v1 = vperm.slane %v599_v62, 1 }
  0xdd   : > { %v605_v4 = vadd.f32 %v601_v0, %v595_v61  ;;  %v606_v5 = vadd.f32 %v602_v1, %v596_v63  ;;  %v607_v6 = vadd.f32 %v601_v0, %v597_v2 }
  0xdf   : > { %609 = vst [vmem:[%s1185_s3] sm:$0xff] %v605_v4 }
  0xe0   : > { %v598_v3 = vld [vmem:[#allocation2 + $0x8] sm:$0xff]  ;;  %610 = vst [vmem:[%s1185_s3 + $0x8] sm:$0xff] %v606_v5 }
  0xe1   : > { %v608_v7 = vadd.f32 %v602_v1, %v598_v3  ;;  %611 = vst [vmem:[%s1185_s3 + $0x10] sm:$0xff] %v607_v6 }
  0xe3   : > { %612 = vst [vmem:[%s1185_s3 + $0x18] sm:$0xff] %v608_v7 }
  0xe4 PF: > { %s13_s16 = sadd.s32 1, %s1005_s16   ;;  %s1186_s12 = smov %s993_s13 }
  0xe5   : > { %p10_p12 = scmp.ge.s32.totalorder %s13_s16, 11   ;;  %s1187_s13 = smov %s1063_s20 }
  0xe6   : > { %s1188_s14 = smov %s1001_s15  ;;  %s1189_s15 = smov %s1191_s17 }
  0xe7   :  { %12 = sbr.rel (!%p10_p12) target bundleno = 3 (0x3), region = 119 }

// kernel: resnet_forward.64
= control target key start
LH: loop header
LB: loop body
LE: loop exit
PB: predicated region body
PF: predicated region fallthrough
CT: control target
= control target key end

     0   :  { %s96_s0 = inlined_call_operand.vmem [shape: f32[8,256], index: 0, kind: input, shape index: {}]   ;;  %s97_s1 = inlined_call_operand.vmem [shape: f32[1,256], index: 1, kind: input, shape index: {}]   ;;  %s98_s2 = inlined_call_operand.vmem [shape: f32[1,256], index: 2, kind: input, shape index: {}]   ;;  %s99_s3 = inlined_call_operand.vmem [shape: f32[8,256], index: 3, kind: input, shape index: {}]   ;;  %s100_s4 = inlined_call_operand.vmem [shape: f32[8,256], index: 4, kind: output, shape index: {}]  }
   0x1   :  { %v17_v0 = vld [vmem:[%s96_s0] sm:$0xff]  ;;  %v18_v5 = vld [vmem:[%s96_s0 + $0x8] sm:$0xff] }
   0x2   :  { %v19_v1 = vld [vmem:[%s97_s1] sm:$0x3]  ;;  %v36_v11 = vld [vmem:[%s99_s3 + $0x8] sm:$0xff] }
   0x3   :  { %v27_v2 = vld [vmem:[%s98_s2] sm:$0x3]  ;;  %v21_v3 = vperm.slane %v19_v1, 0  ;;  %v22_v6 = vperm.slane %v19_v1, 1 }
   0x4   :  { %v29_v4 = vperm.slane %v27_v2, 0  ;;  %v30_v7 = vperm.slane %v27_v2, 1  ;;  %v35_v10 = vld [vmem:[%s99_s3] sm:$0xff] }
   0x5   :  { %v25_v8 = vmul.f32 %v21_v3, %v17_v0  ;;  %v26_v9 = vmul.f32 %v22_v6, %v18_v5 }
   0x7   :  { %v33_v12 = vadd.f32 %v29_v4, %v25_v8  ;;  %v34_v13 = vadd.f32 %v30_v7, %v26_v9 }
   0x9   :  { %v37_v14 = vadd.f32 %v35_v10, %v33_v12  ;;  %v38_v15 = vadd.f32 %v36_v11, %v34_v13 }
   0xb   :  { %v39_v16 = vmax.f32 %v37_v14, 0.0  ;;  %v40_v17 = vmax.f32 %v38_v15, 0.0 }
   0xd   :  { %41 = vst [vmem:[%s100_s4] sm:$0xff] %v39_v16 }
   0xe   :  { %42 = vst [vmem:[%s100_s4 + $0x8] sm:$0xff] %v40_v17 }

// kernel: resnet_forward.65
= control target key start
LH: loop header
LB: loop body
LE: loop exit
PB: predicated region body
PF: predicated region fallthrough
CT: control target
= control target key end

     0   :  { %s1281_s12 = smov 0   ;;  %s1283_s13 = smov 0   ;;  %s1603_s0 = inlined_call_operand.vmem [shape: bf16[16,2304], index: 0, kind: input, shape index: {}]   ;;  %s1604_s1 = inlined_call_operand.vmem [shape: bf16[2304,512], index: 1, kind: input, shape index: {}]   ;;  %s1605_s2 = inlined_call_operand.vmem [shape: f32[1,512], index: 2, kind: input, shape index: {}]   ;;  %s1606_s3 = inlined_call_operand.vmem [shape: f32[16,512], index: 3, kind: output, shape index: {}]  }
   0x1   :  { %s1285_s14 = smov 0   ;;  %s1287_s15 = smov 0  }
   0x2   :  { %s1289_s16 = smov 0   ;;  %s1291_s17 = smov 0  }
   0x3   :  { %s1293_s18 = smov 0   ;;  %s1295_s19 = smov 0  }
   0x4   :  { %s1297_s20 = smov 0   ;;  %s1299_s21 = smov 0  }
   0x5   :  { %s1301_s22 = smov 0  }
   0x6 LB: > { %s886_s23 = sadd.s32 4294967295, %s1258_s22   ;;  %s25_s24 = sadd.s32 1, %s1250_s20  ;;  %s1258_s22 = sphi %s1301_s22, %s13_s22   ;;  %s1254_s21 = sphi %s1299_s21, %s1627_s21   ;;  %s1250_s20 = sphi %s1297_s20, %s1626_s20   ;;  %s1246_s19 = sphi %s1295_s19, %s1625_s19   ;;  %s1242_s18 = sphi %s1293_s18, %s1624_s18   ;;  %s1238_s17 = sphi %s1291_s17, %s1623_s17   ;;  %s1234_s16 = sphi %s1289_s16, %s1622_s16   ;;  %s1230_s15 = sphi %s1287_s15, %s1621_s15   ;;  %s1226_s14 = sphi %s1285_s14, %s1620_s14   ;;  %s1222_s13 = sphi %s1283_s13, %s1619_s13   ;;  %s1218_s12 = sphi %s1281_s12, %s1618_s12  }
   0x7   : > { %p26_p0 = scmp.ge.s32.totalorder %s25_s24, 9  ;;  %s28_s25 = sadd.s32 1, %s1254_s21 }
   0x8   : > { %s41_s26 = sadd.s32 1, %s1238_s17  ;;  %p48_p1 = scmp.ne.s32.totalorder %s1238_s17, %s1234_s16 }
   0x9   : > { %s1629_s24 = smov (%p26_p0, %s25_s24), 0  ;;  %s1631_s25 = smov (!%p26_p0, %s28_s25), %s1254_s21 }
   0xa   : > { %1609 = sst [smem:[#allocation6_spill]] %s1629_s24  ;;  %s37_s27 = ssub.s32 %s1250_s20, %s1629_s24 }
   0xb   : > { %p49_p2 = scmp.eq.s32.totalorder %s1258_s22, 0  ;;  %p30_p3 = scmp.ge.s32.totalorder %s1631_s25, 2 }
   0xc   : > { %p39_p4 = scmp.eq.s32.totalorder %s37_s27, 0  ;;  %s69_s29 = sadd.s32 1, %s1230_s15 }
   0xd   : > { %p1348_p5 = por %p49_p2, %p48_p1  ;;  %s1633_s25 = smov (%p30_p3, %s1631_s25), 0 }
   0xe   : > { %1611 = sst [smem:[#allocation7_spill]] %s1633_s25  ;;  %s65_s4 = ssub.s32 %s1254_s21, %s1633_s25 }
   0xf   : > { %s1356_s30 = scalar_select %p39_p4, %s1238_s17, %s41_s26  }
  0x10   : > { %p76_p6 = scmp.ne.s32.totalorder %s1230_s15, %s1226_s14  ;;  %s66_s5 = sor.u32 %s65_s4, %s37_s27 }
  0x11   : > { %1612 = sst [smem:[#allocation8_spill]] %s1356_s30  ;;  %p121_p7 = scmp.eq.s32.totalorder %s65_s4, 0 }
  0x12   : > { %p67_p8 = scmp.eq.s32.totalorder %s66_s5, 0  ;;  %p1362_p9 = por %p76_p6, %p49_p2 }
  0x13   : > { %s123_s7 = sadd.s32 1, %s1222_s13  ;;  %p133_p10 = scmp.ne.s32.totalorder %s1222_s13, %s1218_s12 }
  0x14   : > { %s1370_s8 = scalar_select %p67_p8, %s1230_s15, %s69_s29  }
  0x15   : > { %s1373_s9 = scalar_select %p121_p7, %s1222_s13, %s123_s7  }
  0x16   : > { %p134_p11 = scmp.eq.s32.totalorder %s886_s23, 17  ;;  %p889_p13 = scmp.ge.s32.totalorder %s1258_s22, 18 }
  0x18   : > { %p1375_p12 = por %p134_p11, %p133_p10  ;;  %156 = sbr.rel (%p889_p13) target bundleno = 74 (0x4a), region = 16 }
  0x1d   : > { %159 = sbr.rel (!%p1348_p5) target bundleno = 35 (0x23), region = 20  ;;  %s161_s11 = sand.u32 (%p1348_p5), 1, %s1238_s17  }
  0x1e   : > { %s1046_s26 = sshll.u32 (%p1348_p5), %s1250_s20, 3  ;;  %s890_s27 = sshll.u32 (%p1348_p5), %s161_s11, 4 }
  0x1f   : > { %s169_s5 = scalar_lea.vmem (%p1348_p5), %s1603_s0, %s1046_s26  ;;  %s163_s23 = scalar_lea.vmem (%p1348_p5), [#allocation3], %s890_s27 }
  0x20   : > { %v200_v0 = vld [vmem:[%s169_s5] sm:$0xff] (%p1348_p5)  ;;  %v202_v1 = vld [vmem:[%s169_s5 + $0x48] sm:$0xff] (%p1348_p5) }
  0x21   : > { %201 = vst [vmem:[%s163_s23] sm:$0xff] (%p1348_p5), %v200_v0 }
  0x22   : > { %203 = vst [vmem:[%s163_s23 + $0x8] sm:$0xff] %v202_v1 }
  0x23 PF: > { %209 = sbr.rel (!%p1362_p9) target bundleno = 74 (0x4a), region = 58  ;;  %s211_s28 = sand.u32 (%p1362_p9), 1, %s1230_s15  }
  0x24   : > { %s895_s7 = sshll.u32 (%p1362_p9), %s1254_s21, 1  ;;  %s893_s25 = sshll.u32 (%p1362_p9), %s211_s28, 8 }
  0x25   : > { %s1047_s11 = sshll.u32 (%p1362_p9), %s1250_s20, 7  ;;  %s1400_s6 = scalar_lea.vmem (%p1362_p9), [#allocation4], %s893_s25 }
  0x26   : > { %s217_s24 = sadd.s32 (%p1362_p9), %s1047_s11, %s895_s7 }
  0x27   : > { %s897_s30 = sshll.u32 (%p1362_p9), %s217_s24, 2 }
  0x28   : > { %s1395_s4 = scalar_lea.vmem %s1604_s1, %s897_s30 }
  0x29   : > { %v310_v2 = vld [vmem:[%s1395_s4] sm:$0xff]  ;;  %v312_v3 = vld [vmem:[%s1395_s4 + $0x10] sm:$0xff] }
  0x2a   : > { %v314_v4 = vld [vmem:[%s1395_s4 + $0x20] sm:$0xff]  ;;  %311 = vst [vmem:[%s1400_s6] sm:$0xff] %v310_v2  ;;  %v316_v5 = vld [vmem:[%s1395_s4 + $0x30] sm:$0xff] }
  0x2b   : > { %313 = vst [vmem:[%s1400_s6 + $0x8] sm:$0xff] %v312_v3  ;;  %v318_v6 = vld [vmem:[%s1395_s4 + $0x40] sm:$0xff]  ;;  %v320_v7 = vld [vmem:[%s1395_s4 + $0x50] sm:$0xff] }
  0x2c   : > { %315 = vst [vmem:[%s1400_s6 + $0x10] sm:$0xff] %v314_v4  ;;  %v322_v8 = vld [vmem:[%s1395_s4 + $0x60] sm:$0xff]  ;;  %v324_v9 = vld [vmem:[%s1395_s4 + $0x70] sm:$0xff] }
  0x2d   : > { %317 = vst [vmem:[%s1400_s6 + $0x18] sm:$0xff] %v316_v5  ;;  %v326_v10 = vld [vmem:[%s1395_s4 + $0x80] sm:$0xff]  ;;  %v328_v11 = vld [vmem:[%s1395_s4 + $0x90] sm:$0xff] }
  0x2e   : > { %319 = vst [vmem:[%s1400_s6 + $0x20] sm:$0xff] %v318_v6  ;;  %v330_v12 = vld [vmem:[%s1395_s4 + $0xa0] sm:$0xff]  ;;  %v332_v13 = vld [vmem:[%s1395_s4 + $0xb0] sm:$0xff] }
  0x2f   : > { %321 = vst [vmem:[%s1400_s6 + $0x28] sm:$0xff] %v320_v7  ;;  %v334_v14 = vld [vmem:[%s1395_s4 + $0xc0] sm:$0xff]  ;;  %v336_v15 = vld [vmem:[%s1395_s4 + $0xd0] sm:$0xff] }
  0x30   : > { %323 = vst [vmem:[%s1400_s6 + $0x30] sm:$0xff] %v322_v8  ;;  %v338_v16 = vld [vmem:[%s1395_s4 + $0xe0] sm:$0xff]  ;;  %v340_v17 = vld [vmem:[%s1395_s4 + $0xf0] sm:$0xff] }
  0x31   : > { %325 = vst [vmem:[%s1400_s6 + $0x38] sm:$0xff] %v324_v9  ;;  %v342_v18 = vld [vmem:[%s1395_s4 + $0x100] sm:$0xff]  ;;  %v344_v19 = vld [vmem:[%s1395_s4 + $0x110] sm:$0xff] }
  0x32   : > { %327 = vst [vmem:[%s1400_s6 + $0x40] sm:$0xff] %v326_v10  ;;  %v346_v20 = vld [vmem:[%s1395_s4 + $0x120] sm:$0xff]  ;;  %v348_v21 = vld [vmem:[%s1395_s4 + $0x130] sm:$0xff] }
  0x33   : > { %329 = vst [vmem:[%s1400_s6 + $0x48] sm:$0xff] %v328_v11  ;;  %v350_v22 = vld [vmem:[%s1395_s4 + $0x140] sm:$0xff]  ;;  %v352_v23 = vld [vmem:[%s1395_s4 + $0x150] sm:$0xff] }
  0x34   : > { %331 = vst [vmem:[%s1400_s6 + $0x50] sm:$0xff] %v330_v12  ;;  %v354_v24 = vld [vmem:[%s1395_s4 + $0x160] sm:$0xff]  ;;  %v356_v25 = vld [vmem:[%s1395_s4 + $0x170] sm:$0xff] }
  0x35   : > { %333 = vst [vmem:[%s1400_s6 + $0x58] sm:$0xff] %v332_v13  ;;  %v358_v26 = vld [vmem:[%s1395_s4 + $0x180] sm:$0xff]  ;;  %v360_v27 = vld [vmem:[%s1395_s4 + $0x190] sm:$0xff] }
  0x36   : > { %335 = vst [vmem:[%s1400_s6 + $0x60] sm:$0xff] %v334_v14  ;;  %v362_v28 = vld [vmem:[%s1395_s4 + $0x1a0] sm:$0xff]  ;;  %v364_v29 = vld [vmem:[%s1395_s4 + $0x1b0] sm:$0xff] }
  0x37   : > { %337 = vst [vmem:[%s1400_s6 + $0x68] sm:$0xff] %v336_v15  ;;  %v366_v30 = vld [vmem:[%s1395_s4 + $0x1c0] sm:$0xff]  ;;  %v368_v31 = vld [vmem:[%s1395_s4 + $0x1d0] sm:$0xff] }
  0x38   : > { %339 = vst [vmem:[%s1400_s6 + $0x70] sm:$0xff] %v338_v16  ;;  %v370_v32 = vld [vmem:[%s1395_s4 + $0x1e0] sm:$0xff]  ;;  %v372_v33 = vld [vmem:[%s1395_s4 + $0x1f0] sm:$0xff] }
  0x39   : > { %341 = vst [vmem:[%s1400_s6 + $0x78] sm:$0xff] %v340_v17 }
  0x3a   : > { %343 = vst [vmem:[%s1400_s6 + $0x80] sm:$0xff] %v342_v18 }
  0x3b   : > { %345 = vst [vmem:[%s1400_s6 + $0x88] sm:$0xff] %v344_v19 }
  0x3c   : > { %347 = vst [vmem:[%s1400_s6 + $0x90] sm:$0xff] %v346_v20 }
  0x3d   : > { %349 = vst [vmem:[%s1400_s6 + $0x98] sm:$0xff] %v348_v21 }
  0x3e   : > { %351 = vst [vmem:[%s1400_s6 + $0xa0] sm:$0xff] %v350_v22 }
  0x3f   : > { %353 = vst [vmem:[%s1400_s6 + $0xa8] sm:$0xff] %v352_v23 }
  0x40   : > { %355 = vst [vmem:[%s1400_s6 + $0xb0] sm:$0xff] %v354_v24 }
  0x41   : > { %357 = vst [vmem:[%s1400_s6 + $0xb8] sm:$0xff] %v356_v25 }
  0x42   : > { %359 = vst [vmem:[%s1400_s6 + $0xc0] sm:$0xff] %v358_v26 }
  0x43   : > { %361 = vst [vmem:[%s1400_s6 + $0xc8] sm:$0xff] %v360_v27 }
  0x44   : > { %363 = vst [vmem:[%s1400_s6 + $0xd0] sm:$0xff] %v362_v28 }
  0x45   : > { %365 = vst [vmem:[%s1400_s6 + $0xd8] sm:$0xff] %v364_v29 }
  0x46   : > { %367 = vst [vmem:[%s1400_s6 + $0xe0] sm:$0xff] %v366_v30 }
  0x47   : > { %369 = vst [vmem:[%s1400_s6 + $0xe8] sm:$0xff] %v368_v31 }
  0x48   : > { %371 = vst [vmem:[%s1400_s6 + $0xf0] sm:$0xff] %v370_v32 }
  0x49   : > { %373 = vst [vmem:[%s1400_s6 + $0xf8] sm:$0xff] %v372_v33 }
  0x4a PF: > { %p898_p0 = scmp.ge.s32.totalorder %s1258_s22, 1  ;;  %p386_p1 = scmp.lt.s32.totalorder %s1258_s22, 19 }
  0x4c   : > { %p387_p2 = pnand %p898_p0, %p386_p1 }
  0x4d   : > { %s393_s24 = sand.u32 (!%p387_p2), 1, %s1234_s16   ;;  %s400_s25 = sand.u32 (!%p387_p2), 1, %s1226_s14  }
  0x4e   : > { %390 = sbr.rel (%p387_p2) target bundleno = 294 (0x126), region = 100  ;;  %s899_s30 = sshll.u32 (!%p387_p2), %s393_s24, 4 }
  0x4f   : > { %s900_s27 = sshll.u32 (!%p387_p2), %s400_s25, 8  ;;  %s427_s5 = sand.u32 (!%p387_p2), 1, %s1218_s12  }
  0x50   : > { %s902_s23 = sshll.u32 (!%p387_p2), %s1246_s19, 1  ;;  %s901_s28 = sshll.u32 (!%p387_p2), %s427_s5, 5 }
  0x51   : > { %p435_p3 = scmp.lt.s32.totalorder (!%p387_p2), %s902_s23, 3  ;;  %s1475_s26 = scalar_lea.vmem (!%p387_p2), [#allocation3], %s899_s30 }
  0x52   : > { %s1477_s4 = scalar_lea.vmem (!%p387_p2), [#allocation4], %s900_s27  ;;  %s1479_s6 = scalar_lea.vmem (!%p387_p2), [#allocation5], %s901_s28 }
  0x53   : > { %s1635_s23 = smov (!%p435_p3, %s902_s23), 3  ;;  %p903_p4 = scmp.ne.s32.totalorder %s1242_s18, 0 }
  0x54   : > { %s437_s29 = scalar_lea.vmem %s1605_s2, %s1635_s23 }
  0x55   : > { %444 = sbr.rel (%p903_p4) target bundleno = 95 (0x5f), region = 112 }
  0x5a   : > { %v1260_v34 = vmov 0.0  }
  0x5b   : > { %445 = vst [vmem:[#allocation2 + $0x10] sm:$0xff] %v1260_v34 }
  0x5c   : > { %446 = vst [vmem:[#allocation2] sm:$0xff] %v1260_v34 }
  0x5d   : > { %447 = vst [vmem:[#allocation2 + $0x18] sm:$0xff] %v1260_v34 }
  0x5e   : > { %448 = vst [vmem:[#allocation2 + $0x8] sm:$0xff] %v1260_v34 }
  0x5f PF: > { %v970_v35 = vld [vmem:[%s1477_s4 + $0x70] sm:$0xf]  ;;  %v1065_v36 = vld [vmem:[%s1477_s4 + $0x74] sm:$0xf0]  ;;  %v1064_v40 = vld [vmem:[%s1477_s4 + $0x74] sm:$0xf] }
  0x60   : > { %v1034_v37 = vld [vmem:[%s1477_s4 + $0xf0] sm:$0xf]  ;;  %v971_v38 = vor.u32 %v1065_v36, %v970_v35  ;;  %v1081_v39 = vld [vmem:[%s1477_s4 + $0xf4] sm:$0xf0]  ;;  %v972_v41 = vld [vmem:[%s1477_s4 + $0x78] sm:$0xf0] }
  0x61   : > { %v1035_v42 = vor.u32 %v1081_v39, %v1034_v37  ;;  %v975_v43 = vor.u32 %v1064_v40, %v972_v41  ;;  %v1080_v44 = vld [vmem:[%s1477_s4 + $0xf4] sm:$0xf]  ;;  %v1036_v45 = vld [vmem:[%s1477_s4 + $0xf8] sm:$0xf0]  ;;  %v962_v46 = vld [vmem:[%s1477_s4 + $0x60] sm:$0xf] }
  0x62   : > { %657 = vmatpush.bf16.msra.mxu0 %v971_v38  ;;  %v1039_v47 = vor.u32 %v1080_v44, %v1036_v45  ;;  %v1063_v48 = vld [vmem:[%s1477_s4 + $0x64] sm:$0xf0]  ;;  %v1026_v49 = vld [vmem:[%s1477_s4 + $0xe0] sm:$0xf]  ;;  %v1062_v53 = vld [vmem:[%s1477_s4 + $0x64] sm:$0xf] }
  0x63   : > { %v1079_v50 = vld [vmem:[%s1477_s4 + $0xe4] sm:$0xf0]  ;;  %671 = vmatpush.bf16.msra.mxu1 %v1035_v42  ;;  %685 = vmatpush.bf16.msra.mxu2 %v975_v43  ;;  %v963_v51 = vor.u32 %v1063_v48, %v962_v46  ;;  %v964_v54 = vld [vmem:[%s1477_s4 + $0x68] sm:$0xf0]  ;;  %v1078_v55 = vld [vmem:[%s1477_s4 + $0xe4] sm:$0xf] }
  0x64   : > { %v1027_v52 = vor.u32 %v1079_v50, %v1026_v49  ;;  %699 = vmatpush.bf16.msra.mxu3 %v1039_v47  ;;  %v967_v56 = vor.u32 %v1062_v53, %v964_v54  ;;  %v1028_v57 = vld [vmem:[%s1477_s4 + $0xe8] sm:$0xf0]  ;;  %v954_v58 = vld [vmem:[%s1477_s4 + $0x50] sm:$0xf]  ;;  %v1061_v59 = vld [vmem:[%s1477_s4 + $0x54] sm:$0xf0] }
  0x65   : > { %v1031_v60 = vor.u32 %v1078_v55, %v1028_v57  ;;  %v1018_v61 = vld [vmem:[%s1477_s4 + $0xd0] sm:$0xf]  ;;  %v1077_v62 = vld [vmem:[%s1477_s4 + $0xd4] sm:$0xf0]  ;;  %v1060_v63 = vld [vmem:[%s1477_s4 + $0x54] sm:$0xf]  ;;  %v955_v0 = vor.u32 %v1061_v59, %v954_v58 }
  0x66   : > { %658 = vmatpush.bf16.msra.mxu0 %v963_v51  ;;  %v956_v1 = vld [vmem:[%s1477_s4 + $0x58] sm:$0xf0]  ;;  %v1076_v2 = vld [vmem:[%s1477_s4 + $0xd4] sm:$0xf]  ;;  %v1019_v4 = vor.u32 %v1077_v62, %v1018_v61  ;;  %v946_v6 = vld [vmem:[%s1477_s4 + $0x40] sm:$0xf] }
  0x67   : > { %v1020_v3 = vld [vmem:[%s1477_s4 + $0xd8] sm:$0xf0]  ;;  %672 = vmatpush.bf16.msra.mxu1 %v1027_v52  ;;  %686 = vmatpush.bf16.msra.mxu2 %v967_v56  ;;  %v959_v5 = vor.u32 %v1060_v63, %v956_v1  ;;  %v1059_v7 = vld [vmem:[%s1477_s4 + $0x44] sm:$0xf0]  ;;  %v1010_v8 = vld [vmem:[%s1477_s4 + $0xc0] sm:$0xf] }
  0x68   : > { %700 = vmatpush.bf16.msra.mxu3 %v1031_v60  ;;  %v1023_v9 = vor.u32 %v1076_v2, %v1020_v3  ;;  %v1075_v10 = vld [vmem:[%s1477_s4 + $0xc4] sm:$0xf0]  ;;  %v1058_v11 = vld [vmem:[%s1477_s4 + $0x44] sm:$0xf]  ;;  %v948_v12 = vld [vmem:[%s1477_s4 + $0x48] sm:$0xf0]  ;;  %v947_v15 = vor.u32 %v1059_v7, %v946_v6 }
  0x69   : > { %v1074_v13 = vld [vmem:[%s1477_s4 + $0xc4] sm:$0xf]  ;;  %v1012_v14 = vld [vmem:[%s1477_s4 + $0xc8] sm:$0xf0]  ;;  %v1011_v16 = vor.u32 %v1075_v10, %v1010_v8  ;;  %v951_v17 = vor.u32 %v1058_v11, %v948_v12  ;;  %v938_v18 = vld [vmem:[%s1477_s4 + $0x30] sm:$0xf] }
  0x6a   : > { %659 = vmatpush.bf16.msra.mxu0 %v955_v0  ;;  %v1057_v19 = vld [vmem:[%s1477_s4 + $0x34] sm:$0xf0]  ;;  %v1002_v20 = vld [vmem:[%s1477_s4 + $0xb0] sm:$0xf]  ;;  %v1015_v21 = vor.u32 %v1074_v13, %v1012_v14  ;;  %v1056_v23 = vld [vmem:[%s1477_s4 + $0x34] sm:$0xf] }
  0x6b   : > { %673 = vmatpush.bf16.msra.mxu1 %v1019_v4  ;;  %687 = vmatpush.bf16.msra.mxu2 %v959_v5  ;;  %v1073_v22 = vld [vmem:[%s1477_s4 + $0xb4] sm:$0xf0]  ;;  %v940_v24 = vld [vmem:[%s1477_s4 + $0x38] sm:$0xf0]  ;;  %v1072_v25 = vld [vmem:[%s1477_s4 + $0xb4] sm:$0xf]  ;;  %v939_v27 = vor.u32 %v1057_v19, %v938_v18 }
  0x6c   : > { %701 = vmatpush.bf16.msra.mxu3 %v1023_v9  ;;  %v1004_v26 = vld [vmem:[%s1477_s4 + $0xb8] sm:$0xf0]  ;;  %v1003_v28 = vor.u32 %v1073_v22, %v1002_v20  ;;  %v943_v29 = vor.u32 %v1056_v23, %v940_v24  ;;  %v930_v30 = vld [vmem:[%s1477_s4 + $0x20] sm:$0xf]  ;;  %v1055_v31 = vld [vmem:[%s1477_s4 + $0x24] sm:$0xf0] }
  0x6d   : > { %v994_v32 = vld [vmem:[%s1477_s4 + $0xa0] sm:$0xf]  ;;  %v1007_v33 = vor.u32 %v1072_v25, %v1004_v26  ;;  %v1071_v34 = vld [vmem:[%s1477_s4 + $0xa4] sm:$0xf0]  ;;  %v1054_v35 = vld [vmem:[%s1477_s4 + $0x24] sm:$0xf]  ;;  %v931_v39 = vor.u32 %v1055_v31, %v930_v30 }
  0x6e   : > { %660 = vmatpush.bf16.msra.mxu0 %v947_v15  ;;  %v932_v36 = vld [vmem:[%s1477_s4 + $0x28] sm:$0xf0]  ;;  %v1070_v37 = vld [vmem:[%s1477_s4 + $0xa4] sm:$0xf]  ;;  %v995_v40 = vor.u32 %v1071_v34, %v994_v32  ;;  %v922_v42 = vld [vmem:[%s1477_s4 + $0x10] sm:$0xf] }
  0x6f   : > { %674 = vmatpush.bf16.msra.mxu1 %v1011_v16  ;;  %688 = vmatpush.bf16.msra.mxu2 %v951_v17  ;;  %v996_v38 = vld [vmem:[%s1477_s4 + $0xa8] sm:$0xf0]  ;;  %v935_v41 = vor.u32 %v1054_v35, %v932_v36  ;;  %v1053_v43 = vld [vmem:[%s1477_s4 + $0x14] sm:$0xf0]  ;;  %v986_v44 = vld [vmem:[%s1477_s4 + $0x90] sm:$0xf] }
  0x70   : > { %702 = vmatpush.bf16.msra.mxu3 %v1015_v21  ;;  %v999_v45 = vor.u32 %v1070_v37, %v996_v38  ;;  %v1069_v46 = vld [vmem:[%s1477_s4 + $0x94] sm:$0xf0]  ;;  %v1052_v47 = vld [vmem:[%s1477_s4 + $0x14] sm:$0xf]  ;;  %v924_v48 = vld [vmem:[%s1477_s4 + $0x18] sm:$0xf0]  ;;  %v923_v51 = vor.u32 %v1053_v43, %v922_v42 }
  0x71   : > { %v1068_v49 = vld [vmem:[%s1477_s4 + $0x94] sm:$0xf]  ;;  %v988_v50 = vld [vmem:[%s1477_s4 + $0x98] sm:$0xf0]  ;;  %v987_v52 = vor.u32 %v1069_v46, %v986_v44  ;;  %v927_v53 = vor.u32 %v1052_v47, %v924_v48  ;;  %v914_v54 = vld [vmem:[%s1477_s4] sm:$0xf] }
  0x72   : > { %661 = vmatpush.bf16.msra.mxu0 %v939_v27  ;;  %v1051_v55 = vld [vmem:[%s1477_s4 + $0x4] sm:$0xf0]  ;;  %v978_v56 = vld [vmem:[%s1477_s4 + $0x80] sm:$0xf]  ;;  %v991_v57 = vor.u32 %v1068_v49, %v988_v50  ;;  %v1050_v59 = vld [vmem:[%s1477_s4 + $0x4] sm:$0xf] }
  0x73   : > { %675 = vmatpush.bf16.msra.mxu1 %v1003_v28  ;;  %689 = vmatpush.bf16.msra.mxu2 %v943_v29  ;;  %v1067_v58 = vld [vmem:[%s1477_s4 + $0x84] sm:$0xf0]  ;;  %v916_v60 = vld [vmem:[%s1477_s4 + $0x8] sm:$0xf0]  ;;  %v1066_v61 = vld [vmem:[%s1477_s4 + $0x84] sm:$0xf]  ;;  %v915_v63 = vor.u32 %v1051_v55, %v914_v54 }
  0x74   : > { %703 = vmatpush.bf16.msra.mxu3 %v1007_v33  ;;  %v980_v62 = vld [vmem:[%s1477_s4 + $0x88] sm:$0xf0]  ;;  %v906_v0 = vld [vmem:[%s1475_s26] sm:$0xf]  ;;  %v1049_v1 = vld [vmem:[%s1475_s26 + $0x4] sm:$0xf0]  ;;  %v979_v2 = vor.u32 %v1067_v58, %v978_v56  ;;  %v919_v3 = vor.u32 %v1050_v59, %v916_v60 }
  0x75   : > { %v1048_v4 = vld [vmem:[%s1475_s26 + $0x4] sm:$0xf]  ;;  %v908_v5 = vld [vmem:[%s1475_s26 + $0x8] sm:$0xf0]  ;;  %v983_v6 = vor.u32 %v1066_v61, %v980_v62  ;;  %v907_v7 = vor.u32 %v1049_v1, %v906_v0  ;;  %p1040_p5 = scmp.ne.s32.totalorder %s1242_s18, 8 }
  0x76   : > { %662 = vmatpush.bf16.msra.mxu0 %v931_v39  ;;  %v911_v8 = vor.u32 %v1048_v4, %v908_v5  ;;  %v449_v10 = vld [vmem:[#allocation2 + $0x10] sm:$0xff]  ;;  %v450_v15 = vld [vmem:[#allocation2] sm:$0xff]  ;;  %v451_v19 = vld [vmem:[#allocation2 + $0x18] sm:$0xff] }
  0x77   : > { %676 = vmatpush.bf16.msra.mxu1 %v995_v40  ;;  %690 = vmatpush.bf16.msra.mxu2 %v935_v41  ;;  %v452_v25 = vld [vmem:[#allocation2 + $0x8] sm:$0xff] }
  0x78   : > { %704 = vmatpush.bf16.msra.mxu3 %v999_v45 }
  0x7a   : > { %663 = vmatpush.bf16.msra.mxu0 %v923_v51 }
  0x7b   : > { %677 = vmatpush.bf16.msra.mxu1 %v987_v52  ;;  %691 = vmatpush.bf16.msra.mxu2 %v927_v53 }
  0x7c   : > { %705 = vmatpush.bf16.msra.mxu3 %v991_v57 }
  0x7e   : > { %664 = vmatpush.bf16.msra.mxu0 %v915_v63 }
  0x7f   : > { %678 = vmatpush.bf16.msra.mxu1 %v979_v2  ;;  %692 = vmatpush.bf16.msra.mxu2 %v919_v3 }
  0x80   : > { %706 = vmatpush.bf16.msra.mxu3 %v983_v6 }
  0x81   : > { %665 = vmatmul.bf16.vlgmr.msra.gmra.mxu0 %v907_v7 }
  0x82   : > { %679 = vmatmul.bf16.vlgmr.msra.gmra.mxu1 %v911_v8  ;;  %693 = vmatmul.bf16.vlgmr.msra.gmra.mxu2 %v907_v7 }
  0x83   : > { %707 = vmatmul.bf16.vlgmr.msra.gmra.mxu3 %v911_v8 }
  0xfe   : > { %v666_v9 = vpop.f32.mrf.mxu0 }
  0xff   : > { %v680_v11 = vpop.f32.mrf.mxu1 }
 0x100   : > { %v681_v12 = vadd.f32 %v680_v11, %v666_v9 }
 0x102   : > { %v713_v13 = vadd.f32 %v681_v12, %v449_v10 }
 0x104   : > { %717 = vst [vmem:[#allocation2 + $0x10] sm:$0xff] %v713_v13 }
 0x105   : > { %v694_v14 = vpop.f32.mrf.mxu2 }
 0x106   : > { %v708_v16 = vpop.f32.mrf.mxu3  ;;  %v668_v17 = vpop.f32.mrf.mxu0 }
 0x107   : > { %v709_v18 = vadd.f32 %v708_v16, %v694_v14  ;;  %v682_v20 = vpop.f32.mrf.mxu1 }
 0x108   : > { %v683_v21 = vadd.f32 %v682_v20, %v668_v17 }
 0x109   : > { %v714_v22 = vadd.f32 %v709_v18, %v450_v15 }
 0x10a   : > { %v715_v23 = vadd.f32 %v683_v21, %v451_v19 }
 0x10b   : > { %718 = vst [vmem:[#allocation2] sm:$0xff] %v714_v22 }
 0x10c   : > { %719 = vst [vmem:[#allocation2 + $0x18] sm:$0xff] %v715_v23 }
 0x10d   : > { %v696_v24 = vpop.f32.mrf.mxu2 }
 0x10e   : > { %v710_v26 = vpop.f32.mrf.mxu3 }
 0x10f   : > { %v711_v27 = vadd.f32 %v710_v26, %v696_v24  ;;  %724 = sbr.rel (%p1040_p5) target bundleno = 286 (0x11e), region = 116 }
 0x111   : > { %v716_v28 = vadd.f32 %v711_v27, %v452_v25 }
 0x113   : > { %720 = vst [vmem:[#allocation2 + $0x8] sm:$0xff] %v716_v28 }
 0x114   : > { %v725_v29 = vld [vmem:[#allocation2 + $0x10] sm:$0xff]  ;;  %v729_v30 = vld [vmem:[%s437_s29] sm:$0x3]  ;;  %v727_v34 = vld [vmem:[#allocation2 + $0x18] sm:$0xff] }
 0x115   : > { %v726_v31 = vld [vmem:[#allocation2] sm:$0xff]  ;;  %v731_v32 = vperm.slane %v729_v30, 0  ;;  %v732_v33 = vperm.slane %v729_v30, 1 }
 0x117   : > { %v735_v36 = vadd.f32 %v731_v32, %v725_v29  ;;  %v736_v37 = vadd.f32 %v732_v33, %v726_v31  ;;  %v737_v38 = vadd.f32 %v731_v32, %v727_v34 }
 0x119   : > { %739 = vst [vmem:[%s1479_s6] sm:$0xff] %v735_v36 }
 0x11a   : > { %v728_v35 = vld [vmem:[#allocation2 + $0x8] sm:$0xff]  ;;  %740 = vst [vmem:[%s1479_s6 + $0x8] sm:$0xff] %v736_v37 }
 0x11b   : > { %v738_v39 = vadd.f32 %v732_v33, %v728_v35  ;;  %741 = vst [vmem:[%s1479_s6 + $0x10] sm:$0xff] %v737_v38 }
 0x11d   : > { %742 = vst [vmem:[%s1479_s6 + $0x18] sm:$0xff] %v738_v39 }
 0x11e PF: > { %749 = sbr.rel (!%p1375_p12) target bundleno = 294 (0x126), region = 120  ;;  %s1082_s16 = sshll.u32 (%p1375_p12), %s1246_s19, 4 }
 0x11f   : > { %s755_s25 = scalar_lea.vmem (%p1375_p12), %s1606_s3, %s1082_s16 }
 0x120   : > { %v768_v40 = vld [vmem:[%s1479_s6] sm:$0xff] (%p1375_p12) }
 0x121   : > { %v770_v41 = vld [vmem:[%s1479_s6 + $0x8] sm:$0xff] (%p1375_p12)  ;;  %769 = vst [vmem:[%s755_s25] sm:$0xff] (%p1375_p12), %v768_v40 }
 0x122   : > { %v772_v42 = vld [vmem:[%s1479_s6 + $0x10] sm:$0xff] (%p1375_p12)  ;;  %771 = vst [vmem:[%s755_s25 + $0x8] sm:$0xff] (%p1375_p12), %v770_v41 }
 0x123   : > { %773 = vst [vmem:[%s755_s25 + $0x20] sm:$0xff] %v772_v42 }
 0x124   : > { %v774_v43 = vld [vmem:[%s1479_s6 + $0x18] sm:$0xff] }
 0x125   : > { %775 = vst [vmem:[%s755_s25 + $0x28] sm:$0xff] %v774_v43 }
 0x126 PF: > { %s13_s22 = sadd.s32 1, %s1258_s22   ;;  %s1615_s19 = sld [smem:[#allocation8_spill]] }
 0x127   : > { %p10_p6 = scmp.ge.s32.totalorder %s13_s22, 20   ;;  %s1616_s10 = sld [smem:[#allocation6_spill]] }
 0x128   : > { %s1617_s30 = sld [smem:[#allocation7_spill]]  ;;  %s1618_s12 = smov %s1222_s13 }
 0x129   : > { %s1619_s13 = smov %s1373_s9  ;;  %s1620_s14 = smov %s1230_s15 }
 0x12a   : > { %s1621_s15 = smov %s1370_s8  ;;  %s1622_s16 = smov %s1238_s17 }
 0x12b   : > { %s1624_s18 = smov %s1250_s20  ;;  %12 = sbr.rel (!%p10_p6) target bundleno = 6 (0x6), region = 185 }
 0x12c   : > { %s1623_s17 = smov %s1615_s19  ;;  %s1625_s19 = smov %s1254_s21 }
 0x12d   : > { %s1626_s20 = smov %s1616_s10 }
 0x12e   : > { %s1627_s21 = smov %s1617_s30 }

// kernel: resnet_forward.69
= control target key start
LH: loop header
LB: loop body
LE: loop exit
PB: predicated region body
PF: predicated region fallthrough
CT: control target
= control target key end

     0   :  { %s1145_s12 = smov 0   ;;  %s1147_s13 = smov 0   ;;  %s1371_s0 = inlined_call_operand.vmem [shape: bf16[16,256], index: 0, kind: input, shape index: {}]   ;;  %s1372_s1 = inlined_call_operand.vmem [shape: bf16[256,512], index: 1, kind: input, shape index: {}]   ;;  %s1373_s2 = inlined_call_operand.vmem [shape: f32[1,512], index: 2, kind: input, shape index: {}]   ;;  %s1374_s3 = inlined_call_operand.vmem [shape: f32[16,512], index: 3, kind: output, shape index: {}]  }
   0x1   :  { %s1149_s14 = smov 0   ;;  %s1151_s15 = smov 0  }
   0x2   :  { %s1153_s16 = smov 0  }
   0x3 LB: > { %s28_s17 = sadd.s32 1, %s1119_s15  ;;  %s856_s18 = sadd.s32 4294967295, %s1123_s16   ;;  %s1123_s16 = sphi %s1153_s16, %s13_s16   ;;  %s1119_s15 = sphi %s1151_s15, %s1379_s15   ;;  %s1115_s14 = sphi %s1149_s14, %s1378_s14   ;;  %s1111_s13 = sphi %s1147_s13, %s1377_s13   ;;  %s1107_s12 = sphi %s1145_s12, %s1376_s12  }
   0x4   : > { %p30_p0 = scmp.ge.s32.totalorder %s28_s17, 2  ;;  %p76_p1 = scmp.ne.s32.totalorder %s1111_s13, %s1107_s12 }
   0x5   : > { %p77_p2 = scmp.eq.s32.totalorder %s1123_s16, 0  ;;  %p134_p4 = scmp.eq.s32.totalorder %s856_s18, 1 }
   0x6   : > { %s1381_s17 = smov (%p30_p0, %s28_s17), 0  ;;  %s69_s20 = sadd.s32 1, %s1111_s13 }
   0x7   : > { %p78_p3 = por %p77_p2, %p76_p1  ;;  %s65_s19 = ssub.s32 %s1119_s15, %s1381_s17 }
   0x8   : > { %p67_p5 = scmp.eq.s32.totalorder %s65_s19, 0  ;;  %p1180_p6 = por %p134_p4, %p76_p1 }
   0x9   : > { %p860_p7 = scmp.ge.s32.totalorder %s1123_s16, 2 }
   0xa   : > { %s1185_s22 = scalar_select %p67_p5, %s1111_s13, %s69_s20  }
   0xb   : > { %171 = sbr.rel (%p860_p7) target bundleno = 52 (0x34), region = 20 }
  0x10   : > { %174 = sbr.rel (!%p78_p3) target bundleno = 52 (0x34), region = 24  ;;  %s176_s23 = sand.u32 (%p78_p3), 1, %s1111_s13  }
  0x11   : > { %s1009_s24 = sshll.u32 (%p78_p3), %s1119_s15, 3  ;;  %s861_s25 = sshll.u32 (%p78_p3), %s176_s23, 8 }
  0x12   : > { %s1193_s28 = scalar_lea.vmem (%p78_p3), %s1372_s1, %s1009_s24  ;;  %s1198_s29 = scalar_lea.vmem (%p78_p3), [#allocation3], %s861_s25 }
  0x13   : > { %v275_v0 = vld [vmem:[%s1193_s28] sm:$0xff] (%p78_p3)  ;;  %v277_v1 = vld [vmem:[%s1193_s28 + $0x10] sm:$0xff] (%p78_p3) }
  0x14   : > { %v279_v2 = vld [vmem:[%s1193_s28 + $0x20] sm:$0xff] (%p78_p3)  ;;  %276 = vst [vmem:[%s1198_s29] sm:$0xff] (%p78_p3), %v275_v0  ;;  %v281_v3 = vld [vmem:[%s1193_s28 + $0x30] sm:$0xff] (%p78_p3) }
  0x15   : > { %278 = vst [vmem:[%s1198_s29 + $0x8] sm:$0xff] %v277_v1  ;;  %v283_v4 = vld [vmem:[%s1193_s28 + $0x40] sm:$0xff]  ;;  %v285_v5 = vld [vmem:[%s1193_s28 + $0x50] sm:$0xff] }
  0x16   : > { %280 = vst [vmem:[%s1198_s29 + $0x10] sm:$0xff] %v279_v2  ;;  %v287_v6 = vld [vmem:[%s1193_s28 + $0x60] sm:$0xff]  ;;  %v289_v7 = vld [vmem:[%s1193_s28 + $0x70] sm:$0xff] }
  0x17   : > { %282 = vst [vmem:[%s1198_s29 + $0x18] sm:$0xff] %v281_v3  ;;  %v291_v8 = vld [vmem:[%s1193_s28 + $0x80] sm:$0xff]  ;;  %v293_v9 = vld [vmem:[%s1193_s28 + $0x90] sm:$0xff] }
  0x18   : > { %284 = vst [vmem:[%s1198_s29 + $0x20] sm:$0xff] %v283_v4  ;;  %v295_v10 = vld [vmem:[%s1193_s28 + $0xa0] sm:$0xff]  ;;  %v297_v11 = vld [vmem:[%s1193_s28 + $0xb0] sm:$0xff] }
  0x19   : > { %286 = vst [vmem:[%s1198_s29 + $0x28] sm:$0xff] %v285_v5  ;;  %v299_v12 = vld [vmem:[%s1193_s28 + $0xc0] sm:$0xff]  ;;  %v301_v13 = vld [vmem:[%s1193_s28 + $0xd0] sm:$0xff] }
  0x1a   : > { %288 = vst [vmem:[%s1198_s29 + $0x30] sm:$0xff] %v287_v6  ;;  %v303_v14 = vld [vmem:[%s1193_s28 + $0xe0] sm:$0xff]  ;;  %v305_v15 = vld [vmem:[%s1193_s28 + $0xf0] sm:$0xff] }
  0x1b   : > { %290 = vst [vmem:[%s1198_s29 + $0x38] sm:$0xff] %v289_v7  ;;  %v307_v16 = vld [vmem:[%s1193_s28 + $0x100] sm:$0xff]  ;;  %v309_v17 = vld [vmem:[%s1193_s28 + $0x110] sm:$0xff] }
  0x1c   : > { %292 = vst [vmem:[%s1198_s29 + $0x40] sm:$0xff] %v291_v8  ;;  %v311_v18 = vld [vmem:[%s1193_s28 + $0x120] sm:$0xff]  ;;  %v313_v19 = vld [vmem:[%s1193_s28 + $0x130] sm:$0xff] }
  0x1d   : > { %294 = vst [vmem:[%s1198_s29 + $0x48] sm:$0xff] %v293_v9  ;;  %v315_v20 = vld [vmem:[%s1193_s28 + $0x140] sm:$0xff]  ;;  %v317_v21 = vld [vmem:[%s1193_s28 + $0x150] sm:$0xff] }
  0x1e   : > { %296 = vst [vmem:[%s1198_s29 + $0x50] sm:$0xff] %v295_v10  ;;  %v319_v22 = vld [vmem:[%s1193_s28 + $0x160] sm:$0xff]  ;;  %v321_v23 = vld [vmem:[%s1193_s28 + $0x170] sm:$0xff] }
  0x1f   : > { %298 = vst [vmem:[%s1198_s29 + $0x58] sm:$0xff] %v297_v11  ;;  %v323_v24 = vld [vmem:[%s1193_s28 + $0x180] sm:$0xff]  ;;  %v325_v25 = vld [vmem:[%s1193_s28 + $0x190] sm:$0xff] }
  0x20   : > { %300 = vst [vmem:[%s1198_s29 + $0x60] sm:$0xff] %v299_v12  ;;  %v327_v26 = vld [vmem:[%s1193_s28 + $0x1a0] sm:$0xff]  ;;  %v329_v27 = vld [vmem:[%s1193_s28 + $0x1b0] sm:$0xff] }
  0x21   : > { %302 = vst [vmem:[%s1198_s29 + $0x68] sm:$0xff] %v301_v13  ;;  %v331_v28 = vld [vmem:[%s1193_s28 + $0x1c0] sm:$0xff]  ;;  %v333_v29 = vld [vmem:[%s1193_s28 + $0x1d0] sm:$0xff] }
  0x22   : > { %304 = vst [vmem:[%s1198_s29 + $0x70] sm:$0xff] %v303_v14  ;;  %v335_v30 = vld [vmem:[%s1193_s28 + $0x1e0] sm:$0xff]  ;;  %v337_v31 = vld [vmem:[%s1193_s28 + $0x1f0] sm:$0xff] }
  0x23   : > { %306 = vst [vmem:[%s1198_s29 + $0x78] sm:$0xff] %v305_v15 }
  0x24   : > { %308 = vst [vmem:[%s1198_s29 + $0x80] sm:$0xff] %v307_v16 }
  0x25   : > { %310 = vst [vmem:[%s1198_s29 + $0x88] sm:$0xff] %v309_v17 }
  0x26   : > { %312 = vst [vmem:[%s1198_s29 + $0x90] sm:$0xff] %v311_v18 }
  0x27   : > { %314 = vst [vmem:[%s1198_s29 + $0x98] sm:$0xff] %v313_v19 }
  0x28   : > { %316 = vst [vmem:[%s1198_s29 + $0xa0] sm:$0xff] %v315_v20 }
  0x29   : > { %318 = vst [vmem:[%s1198_s29 + $0xa8] sm:$0xff] %v317_v21 }
  0x2a   : > { %320 = vst [vmem:[%s1198_s29 + $0xb0] sm:$0xff] %v319_v22 }
  0x2b   : > { %322 = vst [vmem:[%s1198_s29 + $0xb8] sm:$0xff] %v321_v23 }
  0x2c   : > { %324 = vst [vmem:[%s1198_s29 + $0xc0] sm:$0xff] %v323_v24 }
  0x2d   : > { %326 = vst [vmem:[%s1198_s29 + $0xc8] sm:$0xff] %v325_v25 }
  0x2e   : > { %328 = vst [vmem:[%s1198_s29 + $0xd0] sm:$0xff] %v327_v26 }
  0x2f   : > { %330 = vst [vmem:[%s1198_s29 + $0xd8] sm:$0xff] %v329_v27 }
  0x30   : > { %332 = vst [vmem:[%s1198_s29 + $0xe0] sm:$0xff] %v331_v28 }
  0x31   : > { %334 = vst [vmem:[%s1198_s29 + $0xe8] sm:$0xff] %v333_v29 }
  0x32   : > { %336 = vst [vmem:[%s1198_s29 + $0xf0] sm:$0xff] %v335_v30 }
  0x33   : > { %338 = vst [vmem:[%s1198_s29 + $0xf8] sm:$0xff] %v337_v31 }
  0x34 PF: > { %p864_p8 = scmp.ge.s32.totalorder %s1123_s16, 1  ;;  %p351_p9 = scmp.lt.s32.totalorder %s1123_s16, 3 }
  0x36   : > { %p352_p10 = pnand %p864_p8, %p351_p9 }
  0x37   : > { %s358_s30 = sand.u32 (!%p352_p10), 1, %s1107_s12   ;;  %s867_s20 = sshll.u32 (!%p352_p10), %s1115_s14, 1 }
  0x38   : > { %355 = sbr.rel (%p352_p10) target bundleno = 250 (0xfa), region = 66  ;;  %s865_s4 = sshll.u32 (!%p352_p10), %s358_s30, 8 }
  0x39   : > { %s1266_s5 = scalar_lea.vmem (!%p352_p10), [#allocation3], %s865_s4  ;;  %p409_p11 = scmp.lt.s32.totalorder (!%p352_p10), %s867_s20, 3 }
  0x3a   : > { %s866_s26 = sshll.u32 (!%p352_p10), %s358_s30, 5 }
  0x3b   : > { %s393_s27 = scalar_lea.vmem (!%p352_p10), [#allocation4], %s866_s26 }
  0x3d   : > { %v934_v32 = vld [vmem:[%s1266_s5 + $0x70] sm:$0xf]  ;;  %v1027_v33 = vld [vmem:[%s1266_s5 + $0x74] sm:$0xf0]  ;;  %v1026_v37 = vld [vmem:[%s1266_s5 + $0x74] sm:$0xf] }
  0x3e   : > { %v998_v34 = vld [vmem:[%s1266_s5 + $0xf0] sm:$0xf]  ;;  %v935_v35 = vor.u32 %v1027_v33, %v934_v32  ;;  %v1043_v36 = vld [vmem:[%s1266_s5 + $0xf4] sm:$0xf0]  ;;  %v936_v38 = vld [vmem:[%s1266_s5 + $0x78] sm:$0xf0] }
  0x3f   : > { %v999_v39 = vor.u32 %v1043_v36, %v998_v34  ;;  %v939_v40 = vor.u32 %v1026_v37, %v936_v38  ;;  %v1042_v41 = vld [vmem:[%s1266_s5 + $0xf4] sm:$0xf]  ;;  %v1000_v42 = vld [vmem:[%s1266_s5 + $0xf8] sm:$0xf0]  ;;  %v926_v43 = vld [vmem:[%s1266_s5 + $0x60] sm:$0xf] }
  0x40   : > { %631 = vmatpush.bf16.msra.mxu0 %v935_v35  ;;  %v1003_v44 = vor.u32 %v1042_v41, %v1000_v42  ;;  %v1025_v45 = vld [vmem:[%s1266_s5 + $0x64] sm:$0xf0]  ;;  %v990_v46 = vld [vmem:[%s1266_s5 + $0xe0] sm:$0xf]  ;;  %v1024_v50 = vld [vmem:[%s1266_s5 + $0x64] sm:$0xf] }
  0x41   : > { %v1041_v47 = vld [vmem:[%s1266_s5 + $0xe4] sm:$0xf0]  ;;  %645 = vmatpush.bf16.msra.mxu1 %v999_v39  ;;  %659 = vmatpush.bf16.msra.mxu2 %v939_v40  ;;  %v927_v48 = vor.u32 %v1025_v45, %v926_v43  ;;  %v928_v51 = vld [vmem:[%s1266_s5 + $0x68] sm:$0xf0]  ;;  %v1040_v52 = vld [vmem:[%s1266_s5 + $0xe4] sm:$0xf] }
  0x42   : > { %v991_v49 = vor.u32 %v1041_v47, %v990_v46  ;;  %673 = vmatpush.bf16.msra.mxu3 %v1003_v44  ;;  %v931_v53 = vor.u32 %v1024_v50, %v928_v51  ;;  %v992_v54 = vld [vmem:[%s1266_s5 + $0xe8] sm:$0xf0]  ;;  %v918_v55 = vld [vmem:[%s1266_s5 + $0x50] sm:$0xf]  ;;  %v1023_v56 = vld [vmem:[%s1266_s5 + $0x54] sm:$0xf0] }
  0x43   : > { %v995_v57 = vor.u32 %v1040_v52, %v992_v54  ;;  %v982_v58 = vld [vmem:[%s1266_s5 + $0xd0] sm:$0xf]  ;;  %v1039_v59 = vld [vmem:[%s1266_s5 + $0xd4] sm:$0xf0]  ;;  %v1022_v60 = vld [vmem:[%s1266_s5 + $0x54] sm:$0xf]  ;;  %v919_v61 = vor.u32 %v1023_v56, %v918_v55 }
  0x44   : > { %632 = vmatpush.bf16.msra.mxu0 %v927_v48  ;;  %v920_v62 = vld [vmem:[%s1266_s5 + $0x58] sm:$0xf0]  ;;  %v1038_v63 = vld [vmem:[%s1266_s5 + $0xd4] sm:$0xf]  ;;  %v983_v1 = vor.u32 %v1039_v59, %v982_v58  ;;  %v910_v3 = vld [vmem:[%s1266_s5 + $0x40] sm:$0xf] }
  0x45   : > { %v984_v0 = vld [vmem:[%s1266_s5 + $0xd8] sm:$0xf0]  ;;  %646 = vmatpush.bf16.msra.mxu1 %v991_v49  ;;  %660 = vmatpush.bf16.msra.mxu2 %v931_v53  ;;  %v923_v2 = vor.u32 %v1022_v60, %v920_v62  ;;  %v1021_v4 = vld [vmem:[%s1266_s5 + $0x44] sm:$0xf0]  ;;  %v974_v5 = vld [vmem:[%s1266_s5 + $0xc0] sm:$0xf] }
  0x46   : > { %674 = vmatpush.bf16.msra.mxu3 %v995_v57  ;;  %v987_v6 = vor.u32 %v1038_v63, %v984_v0  ;;  %v1037_v7 = vld [vmem:[%s1266_s5 + $0xc4] sm:$0xf0]  ;;  %v1020_v8 = vld [vmem:[%s1266_s5 + $0x44] sm:$0xf]  ;;  %v912_v9 = vld [vmem:[%s1266_s5 + $0x48] sm:$0xf0]  ;;  %v911_v12 = vor.u32 %v1021_v4, %v910_v3 }
  0x47   : > { %v1036_v10 = vld [vmem:[%s1266_s5 + $0xc4] sm:$0xf]  ;;  %v976_v11 = vld [vmem:[%s1266_s5 + $0xc8] sm:$0xf0]  ;;  %v975_v13 = vor.u32 %v1037_v7, %v974_v5  ;;  %v915_v14 = vor.u32 %v1020_v8, %v912_v9  ;;  %v902_v15 = vld [vmem:[%s1266_s5 + $0x30] sm:$0xf] }
  0x48   : > { %633 = vmatpush.bf16.msra.mxu0 %v919_v61  ;;  %v1019_v16 = vld [vmem:[%s1266_s5 + $0x34] sm:$0xf0]  ;;  %v966_v17 = vld [vmem:[%s1266_s5 + $0xb0] sm:$0xf]  ;;  %v979_v18 = vor.u32 %v1036_v10, %v976_v11  ;;  %v1018_v20 = vld [vmem:[%s1266_s5 + $0x34] sm:$0xf] }
  0x49   : > { %647 = vmatpush.bf16.msra.mxu1 %v983_v1  ;;  %661 = vmatpush.bf16.msra.mxu2 %v923_v2  ;;  %v1035_v19 = vld [vmem:[%s1266_s5 + $0xb4] sm:$0xf0]  ;;  %v904_v21 = vld [vmem:[%s1266_s5 + $0x38] sm:$0xf0]  ;;  %v1034_v22 = vld [vmem:[%s1266_s5 + $0xb4] sm:$0xf]  ;;  %v903_v24 = vor.u32 %v1019_v16, %v902_v15 }
  0x4a   : > { %675 = vmatpush.bf16.msra.mxu3 %v987_v6  ;;  %v968_v23 = vld [vmem:[%s1266_s5 + $0xb8] sm:$0xf0]  ;;  %v967_v25 = vor.u32 %v1035_v19, %v966_v17  ;;  %v907_v26 = vor.u32 %v1018_v20, %v904_v21  ;;  %v894_v27 = vld [vmem:[%s1266_s5 + $0x20] sm:$0xf]  ;;  %v1017_v28 = vld [vmem:[%s1266_s5 + $0x24] sm:$0xf0] }
  0x4b   : > { %v958_v29 = vld [vmem:[%s1266_s5 + $0xa0] sm:$0xf]  ;;  %v971_v30 = vor.u32 %v1034_v22, %v968_v23  ;;  %v1033_v31 = vld [vmem:[%s1266_s5 + $0xa4] sm:$0xf0]  ;;  %v1016_v32 = vld [vmem:[%s1266_s5 + $0x24] sm:$0xf]  ;;  %v895_v36 = vor.u32 %v1017_v28, %v894_v27 }
  0x4c   : > { %634 = vmatpush.bf16.msra.mxu0 %v911_v12  ;;  %v896_v33 = vld [vmem:[%s1266_s5 + $0x28] sm:$0xf0]  ;;  %v1032_v34 = vld [vmem:[%s1266_s5 + $0xa4] sm:$0xf]  ;;  %v959_v37 = vor.u32 %v1033_v31, %v958_v29  ;;  %v886_v39 = vld [vmem:[%s1266_s5 + $0x10] sm:$0xf] }
  0x4d   : > { %648 = vmatpush.bf16.msra.mxu1 %v975_v13  ;;  %662 = vmatpush.bf16.msra.mxu2 %v915_v14  ;;  %v960_v35 = vld [vmem:[%s1266_s5 + $0xa8] sm:$0xf0]  ;;  %v899_v38 = vor.u32 %v1016_v32, %v896_v33  ;;  %v1015_v40 = vld [vmem:[%s1266_s5 + $0x14] sm:$0xf0]  ;;  %v950_v41 = vld [vmem:[%s1266_s5 + $0x90] sm:$0xf] }
  0x4e   : > { %676 = vmatpush.bf16.msra.mxu3 %v979_v18  ;;  %v963_v42 = vor.u32 %v1032_v34, %v960_v35  ;;  %v1031_v43 = vld [vmem:[%s1266_s5 + $0x94] sm:$0xf0]  ;;  %v1014_v44 = vld [vmem:[%s1266_s5 + $0x14] sm:$0xf]  ;;  %v888_v45 = vld [vmem:[%s1266_s5 + $0x18] sm:$0xf0]  ;;  %v887_v48 = vor.u32 %v1015_v40, %v886_v39 }
  0x4f   : > { %v1030_v46 = vld [vmem:[%s1266_s5 + $0x94] sm:$0xf]  ;;  %v952_v47 = vld [vmem:[%s1266_s5 + $0x98] sm:$0xf0]  ;;  %v951_v49 = vor.u32 %v1031_v43, %v950_v41  ;;  %v891_v50 = vor.u32 %v1014_v44, %v888_v45  ;;  %v878_v51 = vld [vmem:[%s1266_s5] sm:$0xf] }
  0x50   : > { %635 = vmatpush.bf16.msra.mxu0 %v903_v24  ;;  %v1013_v52 = vld [vmem:[%s1266_s5 + $0x4] sm:$0xf0]  ;;  %v942_v53 = vld [vmem:[%s1266_s5 + $0x80] sm:$0xf]  ;;  %v955_v54 = vor.u32 %v1030_v46, %v952_v47  ;;  %v1012_v56 = vld [vmem:[%s1266_s5 + $0x4] sm:$0xf] }
  0x51   : > { %649 = vmatpush.bf16.msra.mxu1 %v967_v25  ;;  %663 = vmatpush.bf16.msra.mxu2 %v907_v26  ;;  %v1029_v55 = vld [vmem:[%s1266_s5 + $0x84] sm:$0xf0]  ;;  %v880_v57 = vld [vmem:[%s1266_s5 + $0x8] sm:$0xf0]  ;;  %v1028_v58 = vld [vmem:[%s1266_s5 + $0x84] sm:$0xf]  ;;  %v879_v60 = vor.u32 %v1013_v52, %v878_v51 }
  0x52   : > { %677 = vmatpush.bf16.msra.mxu3 %v971_v30  ;;  %v944_v59 = vld [vmem:[%s1266_s5 + $0x88] sm:$0xf0]  ;;  %v870_v61 = vld [vmem:[%s1371_s0] sm:$0xf]  ;;  %v1011_v62 = vld [vmem:[%s1371_s0 + $0x4] sm:$0xf0]  ;;  %v943_v63 = vor.u32 %v1029_v55, %v942_v53  ;;  %v883_v0 = vor.u32 %v1012_v56, %v880_v57 }
  0x53   : > { %v1010_v1 = vld [vmem:[%s1371_s0 + $0x4] sm:$0xf]  ;;  %v872_v2 = vld [vmem:[%s1371_s0 + $0x8] sm:$0xf0]  ;;  %v947_v3 = vor.u32 %v1028_v58, %v944_v59  ;;  %v871_v4 = vor.u32 %v1011_v62, %v870_v61  ;;  %s1383_s20 = smov (!%p409_p11, %s867_s20), 3  ;;  %s1044_s12 = sshll.u32 (%p1180_p6), %s1115_s14, 4 }
  0x54   : > { %636 = vmatpush.bf16.msra.mxu0 %v895_v36  ;;  %v875_v5 = vor.u32 %v1010_v1, %v872_v2  ;;  %s411_s25 = scalar_lea.vmem %s1373_s2, %s1383_s20  ;;  %s728_s30 = scalar_lea.vmem (%p1180_p6), %s1374_s3, %s1044_s12 }
  0x55   : > { %650 = vmatpush.bf16.msra.mxu1 %v959_v37  ;;  %664 = vmatpush.bf16.msra.mxu2 %v899_v38  ;;  %v702_v6 = vld [vmem:[%s411_s25] sm:$0x3] }
  0x56   : > { %678 = vmatpush.bf16.msra.mxu3 %v963_v42  ;;  %v704_v8 = vperm.slane %v702_v6, 0  ;;  %v705_v13 = vperm.slane %v702_v6, 1 }
  0x58   : > { %637 = vmatpush.bf16.msra.mxu0 %v887_v48 }
  0x59   : > { %651 = vmatpush.bf16.msra.mxu1 %v951_v49  ;;  %665 = vmatpush.bf16.msra.mxu2 %v891_v50 }
  0x5a   : > { %679 = vmatpush.bf16.msra.mxu3 %v955_v54 }
  0x5c   : > { %638 = vmatpush.bf16.msra.mxu0 %v879_v60 }
  0x5d   : > { %652 = vmatpush.bf16.msra.mxu1 %v943_v63  ;;  %666 = vmatpush.bf16.msra.mxu2 %v883_v0 }
  0x5e   : > { %680 = vmatpush.bf16.msra.mxu3 %v947_v3 }
  0x5f   : > { %639 = vmatmul.bf16.vlgmr.msra.gmra.mxu0 %v871_v4 }
  0x60   : > { %653 = vmatmul.bf16.vlgmr.msra.gmra.mxu1 %v875_v5  ;;  %667 = vmatmul.bf16.vlgmr.msra.gmra.mxu2 %v871_v4 }
  0x61   : > { %681 = vmatmul.bf16.vlgmr.msra.gmra.mxu3 %v875_v5 }
  0xdc   : > { %v640_v7 = vpop.f32.mrf.mxu0 }
  0xdd   : > { %v654_v9 = vpop.f32.mrf.mxu1 }
  0xde   : > { %v655_v10 = vadd.f32 %v654_v9, %v640_v7 }
  0xe0   : > { %v708_v11 = vadd.f32 %v704_v8, %v655_v10 }
  0xe2   : > { %712 = vst [vmem:[%s393_s27] sm:$0xff] %v708_v11 }
  0xe3   : > { %v668_v12 = vpop.f32.mrf.mxu2 }
  0xe4   : > { %v682_v14 = vpop.f32.mrf.mxu3  ;;  %v642_v15 = vpop.f32.mrf.mxu0 }
  0xe5   : > { %v683_v16 = vadd.f32 %v682_v14, %v668_v12  ;;  %v656_v17 = vpop.f32.mrf.mxu1 }
  0xe6   : > { %v657_v18 = vadd.f32 %v656_v17, %v642_v15 }
  0xe7   : > { %v709_v19 = vadd.f32 %v705_v13, %v683_v16 }
  0xe8   : > { %v710_v20 = vadd.f32 %v704_v8, %v657_v18 }
  0xe9   : > { %713 = vst [vmem:[%s393_s27 + $0x8] sm:$0xff] %v709_v19  ;;  %v741_v25 = vld [vmem:[%s393_s27] sm:$0xff] (%p1180_p6) }
  0xea   : > { %714 = vst [vmem:[%s393_s27 + $0x10] sm:$0xff] %v710_v20 }
  0xeb   : > { %v670_v21 = vpop.f32.mrf.mxu2  ;;  %742 = vst [vmem:[%s728_s30] sm:$0xff] (%p1180_p6), %v741_v25 }
  0xec   : > { %v684_v22 = vpop.f32.mrf.mxu3 }
  0xed   : > { %v685_v23 = vadd.f32 %v684_v22, %v670_v21  ;;  %722 = sbr.rel (!%p1180_p6) target bundleno = 250 (0xfa), region = 82 }
  0xef   : > { %v711_v24 = vadd.f32 %v705_v13, %v685_v23 }
  0xf0   : > { %v743_v26 = vld [vmem:[%s393_s27 + $0x8] sm:$0xff] (%p1180_p6) }
  0xf1   : > { %715 = vst [vmem:[%s393_s27 + $0x18] sm:$0xff] %v711_v24  ;;  %v745_v27 = vld [vmem:[%s393_s27 + $0x10] sm:$0xff] (%p1180_p6) }
  0xf2   : > { %744 = vst [vmem:[%s728_s30 + $0x8] sm:$0xff] %v743_v26 }
  0xf3   : > { %746 = vst [vmem:[%s728_s30 + $0x20] sm:$0xff] %v745_v27 }
  0xf8   : > { %v747_v28 = vld [vmem:[%s393_s27 + $0x18] sm:$0xff] }
  0xf9   : > { %748 = vst [vmem:[%s728_s30 + $0x28] sm:$0xff] %v747_v28 }
  0xfa PF: > { %s13_s16 = sadd.s32 1, %s1123_s16   ;;  %s1376_s12 = smov %s1111_s13 }
  0xfb   : > { %p10_p12 = scmp.ge.s32.totalorder %s13_s16, 4   ;;  %s1377_s13 = smov %s1185_s22 }
  0xfc   : > { %s1378_s14 = smov %s1119_s15  ;;  %s1379_s15 = smov %s1381_s17 }
  0xfd   :  { %12 = sbr.rel (!%p10_p12) target bundleno = 3 (0x3), region = 142 }

// kernel: resnet_forward.70
= control target key start
LH: loop header
LB: loop body
LE: loop exit
PB: predicated region body
PF: predicated region fallthrough
CT: control target
= control target key end

     0   :  { %v14_v0 = vlaneseq  ;;  %v120_v9 = vmov 0.0   ;;  %vm56_vm1 = vcmask 1040384   ;;  %vm58_vm2 = vcmask 1042434   ;;  %s184_s0 = inlined_call_operand.vmem [shape: f32[8,512], index: 0, kind: input, shape index: {}]   ;;  %s185_s1 = inlined_call_operand.vmem [shape: f32[1,512], index: 1, kind: output, shape index: {0}]   ;;  %s186_s2 = inlined_call_operand.vmem [shape: f32[1,512], index: 2, kind: output, shape index: {1}]  }
   0x1   :  { %v20_v1 = vld [vmem:[%s184_s0] sm:$0xff]  ;;  %v21_v2 = vld [vmem:[%s184_s0 + $0x8] sm:$0xff]  ;;  %v22_v3 = vld [vmem:[%s184_s0 + $0x10] sm:$0xff]  ;;  %vm60_vm3 = vcmask 1041408  }
   0x2   :  { %vm145_vm0 = vcmp.lt.s32.totalorder %v14_v0, 512  ;;  %v23_v5 = vld [vmem:[%s184_s0 + $0x18] sm:$0xff]  ;;  %v25_v6 = vrot.slane %v20_v1, 4  ;;  %v31_v7 = vrot.slane %v21_v2, 4  ;;  %v37_v8 = vrot.slane %v22_v3, 4 }
   0x3   :  { %18 = vst.msk [vmem:[%s185_s1] sm:$0xf] %vm145_vm0, %v120_v9  ;;  %v43_v10 = vrot.slane %v23_v5, 4  ;;  %v70_v11 = vmul.f32 %v20_v1, %v20_v1  ;;  %v71_v12 = vmul.f32 %v21_v2, %v21_v2  ;;  %v72_v13 = vmul.f32 %v22_v3, %v22_v3 }
   0x4   :  { %v26_v14 = vadd.f32 %v25_v6, %v20_v1  ;;  %v32_v15 = vadd.f32 %v31_v7, %v21_v2  ;;  %v38_v16 = vadd.f32 %v37_v8, %v22_v3  ;;  %19 = vst.msk [vmem:[%s186_s2] sm:$0xf] %vm145_vm0, %v120_v9  ;;  %v73_v17 = vmul.f32 %v23_v5, %v23_v5 }
   0x5   :  { %v44_v18 = vadd.f32 %v43_v10, %v23_v5  ;;  %v74_v19 = vrot.slane %v70_v11, 4  ;;  %v80_v20 = vrot.slane %v71_v12, 4  ;;  %v86_v21 = vrot.slane %v72_v13, 4 }
   0x6   :  { %v27_v22 = vrot.slane %v26_v14, 2  ;;  %v33_v23 = vrot.slane %v32_v15, 2  ;;  %v39_v24 = vrot.slane %v38_v16, 2  ;;  %v92_v25 = vrot.slane %v73_v17, 4 }
   0x7   :  { %v45_v26 = vrot.slane %v44_v18, 2  ;;  %v75_v27 = vadd.f32 %v74_v19, %v70_v11  ;;  %v81_v28 = vadd.f32 %v80_v20, %v71_v12  ;;  %v87_v29 = vadd.f32 %v86_v21, %v72_v13 }
   0x8   :  { %v28_v30 = vadd.f32 %v27_v22, %v26_v14  ;;  %v34_v31 = vadd.f32 %v33_v23, %v32_v15  ;;  %v40_v32 = vadd.f32 %v39_v24, %v38_v16  ;;  %v93_v33 = vadd.f32 %v92_v25, %v73_v17 }
   0x9   :  { %v46_v34 = vadd.f32 %v45_v26, %v44_v18  ;;  %v76_v35 = vrot.slane %v75_v27, 2  ;;  %v82_v36 = vrot.slane %v81_v28, 2  ;;  %v88_v37 = vrot.slane %v87_v29, 2 }
   0xa   :  { %v29_v38 = vrot.slane %v28_v30, 1  ;;  %v35_v39 = vrot.slane %v34_v31, 1  ;;  %v41_v40 = vrot.slane %v40_v32, 1  ;;  %v94_v41 = vrot.slane %v93_v33, 2  ;;  %v24_v61 = vld [vmem:[%s185_s1] sm:$0xf] }
   0xb   :  { %v47_v42 = vrot.slane %v46_v34, 1  ;;  %v77_v43 = vadd.f32 %v76_v35, %v75_v27  ;;  %v83_v44 = vadd.f32 %v82_v36, %v81_v28  ;;  %v89_v45 = vadd.f32 %v88_v37, %v87_v29  ;;  %v69_v7 = vld [vmem:[%s186_s2] sm:$0xf] }
   0xc   :  { %v30_v46 = vadd.f32 %v29_v38, %v28_v30  ;;  %v36_v47 = vadd.f32 %v35_v39, %v34_v31  ;;  %v42_v48 = vadd.f32 %v41_v40, %v40_v32  ;;  %v95_v49 = vadd.f32 %v94_v41, %v93_v33 }
   0xd   :  { %v48_v50 = vadd.f32 %v47_v42, %v46_v34  ;;  %v78_v51 = vrot.slane %v77_v43, 1  ;;  %v84_v52 = vrot.slane %v83_v44, 1  ;;  %v90_v53 = vrot.slane %v89_v45, 1 }
   0xe   :  { %v53_v54 = vrot.slane %v36_v47, 7  ;;  %v54_v55 = vrot.slane %v42_v48, 6  ;;  %v96_v56 = vrot.slane %v95_v49, 1 }
   0xf   :  { %v55_v57 = vrot.slane %v48_v50, 5  ;;  %v79_v58 = vadd.f32 %v78_v51, %v77_v43  ;;  %v85_v59 = vadd.f32 %v84_v52, %v83_v44  ;;  %v91_v60 = vadd.f32 %v90_v53, %v89_v45 }
  0x10   :  { %v57_v62 = vsel %vm56_vm1, %v30_v46, %v53_v54  ;;  %v97_v63 = vadd.f32 %v96_v56, %v95_v49 }
  0x11   :  { %v59_v0 = vsel %vm58_vm2, %v54_v55, %v55_v57  ;;  %v102_v1 = vrot.slane %v85_v59, 7  ;;  %v103_v2 = vrot.slane %v91_v60, 6 }
  0x12   :  { %v61_v3 = vsel %vm60_vm3, %v57_v62, %v59_v0  ;;  %v104_v5 = vrot.slane %v97_v63, 5 }
  0x13   :  { %v63_v6 = vadd.f32 %v61_v3, %v24_v61  ;;  %v105_v8 = vsel %vm56_vm1, %v79_v58, %v102_v1 }
  0x14   :  { %v106_v9 = vsel %vm58_vm2, %v103_v2, %v104_v5 }
  0x15   :  { %68 = vst.msk [vmem:[%s185_s1] sm:$0xf] %vm145_vm0, %v63_v6  ;;  %v107_v10 = vsel %vm60_vm3, %v105_v8, %v106_v9 }
  0x16   :  { %v109_v11 = vadd.f32 %v107_v10, %v69_v7 }
  0x18   :  { %110 = vst.msk [vmem:[%s186_s2] sm:$0xf] %vm145_vm0, %v109_v11 }

// kernel: resnet_forward.71
= control target key start
LH: loop header
LB: loop body
LE: loop exit
PB: predicated region body
PF: predicated region fallthrough
CT: control target
= control target key end

     0   :  { %s104_s0 = inlined_call_operand.vmem [shape: f32[8,512], index: 0, kind: input, shape index: {}]   ;;  %s105_s1 = inlined_call_operand.vmem [shape: f32[1,512], index: 1, kind: input, shape index: {}]   ;;  %s106_s2 = inlined_call_operand.vmem [shape: f32[1,512], index: 2, kind: input, shape index: {}]   ;;  %s107_s3 = inlined_call_operand.vmem [shape: f32[8,512], index: 3, kind: output, shape index: {}]  }
   0x1   :  { %v14_v0 = vld [vmem:[%s104_s0] sm:$0xff]  ;;  %v15_v5 = vld [vmem:[%s104_s0 + $0x8] sm:$0xff]  ;;  %v16_v8 = vld [vmem:[%s104_s0 + $0x10] sm:$0xff] }
   0x2   :  { %v18_v1 = vld [vmem:[%s105_s1] sm:$0xf]  ;;  %v17_v11 = vld [vmem:[%s104_s0 + $0x18] sm:$0xff] }
   0x3   :  { %v32_v2 = vld [vmem:[%s106_s2] sm:$0xf]  ;;  %v20_v3 = vperm.slane %v18_v1, 0  ;;  %v21_v6 = vperm.slane %v18_v1, 1  ;;  %v22_v9 = vperm.slane %v18_v1, 2  ;;  %v23_v12 = vperm.slane %v18_v1, 3 }
   0x4   :  { %v34_v4 = vperm.slane %v32_v2, 0  ;;  %v35_v7 = vperm.slane %v32_v2, 1  ;;  %v36_v10 = vperm.slane %v32_v2, 2  ;;  %v37_v13 = vperm.slane %v32_v2, 3 }
   0x5   :  { %v28_v14 = vmul.f32 %v20_v3, %v14_v0  ;;  %v29_v15 = vmul.f32 %v21_v6, %v15_v5  ;;  %v30_v16 = vmul.f32 %v22_v9, %v16_v8  ;;  %v31_v17 = vmul.f32 %v23_v12, %v17_v11 }
   0x7   :  { %v42_v18 = vadd.f32 %v34_v4, %v28_v14  ;;  %v43_v19 = vadd.f32 %v35_v7, %v29_v15  ;;  %v44_v20 = vadd.f32 %v36_v10, %v30_v16  ;;  %v45_v21 = vadd.f32 %v37_v13, %v31_v17 }
   0x9   :  { %46 = vst [vmem:[%s107_s3] sm:$0xff] %v42_v18 }
   0xa   :  { %47 = vst [vmem:[%s107_s3 + $0x8] sm:$0xff] %v43_v19 }
   0xb   :  { %48 = vst [vmem:[%s107_s3 + $0x10] sm:$0xff] %v44_v20 }
   0xc   :  { %49 = vst [vmem:[%s107_s3 + $0x18] sm:$0xff] %v45_v21 }

// kernel: resnet_forward.67
= control target key start
LH: loop header
LB: loop body
LE: loop exit
PB: predicated region body
PF: predicated region fallthrough
CT: control target
= control target key end

     0   :  { %s108_s0 = inlined_call_operand.vmem [shape: f32[8,512], index: 0, kind: input, shape index: {}]   ;;  %s109_s1 = inlined_call_operand.vmem [shape: f32[1,512], index: 1, kind: input, shape index: {}]   ;;  %s110_s2 = inlined_call_operand.vmem [shape: f32[1,512], index: 2, kind: input, shape index: {}]   ;;  %s111_s3 = inlined_call_operand.vmem [shape: f32[8,512], index: 3, kind: output, shape index: {}]  }
   0x1   :  { %v14_v0 = vld [vmem:[%s108_s0] sm:$0xff]  ;;  %v15_v5 = vld [vmem:[%s108_s0 + $0x8] sm:$0xff]  ;;  %v16_v8 = vld [vmem:[%s108_s0 + $0x10] sm:$0xff] }
   0x2   :  { %v18_v1 = vld [vmem:[%s109_s1] sm:$0xf]  ;;  %v17_v11 = vld [vmem:[%s108_s0 + $0x18] sm:$0xff] }
   0x3   :  { %v32_v2 = vld [vmem:[%s110_s2] sm:$0xf]  ;;  %v20_v3 = vperm.slane %v18_v1, 0  ;;  %v21_v6 = vperm.slane %v18_v1, 1  ;;  %v22_v9 = vperm.slane %v18_v1, 2  ;;  %v23_v12 = vperm.slane %v18_v1, 3 }
   0x4   :  { %v34_v4 = vperm.slane %v32_v2, 0  ;;  %v35_v7 = vperm.slane %v32_v2, 1  ;;  %v36_v10 = vperm.slane %v32_v2, 2  ;;  %v37_v13 = vperm.slane %v32_v2, 3 }
   0x5   :  { %v28_v14 = vmul.f32 %v20_v3, %v14_v0  ;;  %v29_v15 = vmul.f32 %v21_v6, %v15_v5  ;;  %v30_v16 = vmul.f32 %v22_v9, %v16_v8  ;;  %v31_v17 = vmul.f32 %v23_v12, %v17_v11 }
   0x7   :  { %v42_v18 = vadd.f32 %v34_v4, %v28_v14  ;;  %v43_v19 = vadd.f32 %v35_v7, %v29_v15  ;;  %v44_v20 = vadd.f32 %v36_v10, %v30_v16  ;;  %v45_v21 = vadd.f32 %v37_v13, %v31_v17 }
   0x9   :  { %v46_v22 = vmax.f32 %v42_v18, 0.0  ;;  %v47_v23 = vmax.f32 %v43_v19, 0.0  ;;  %v48_v24 = vmax.f32 %v44_v20, 0.0  ;;  %v49_v25 = vmax.f32 %v45_v21, 0.0 }
   0xb   :  { %50 = vst [vmem:[%s111_s3] sm:$0xff] %v46_v22 }
   0xc   :  { %51 = vst [vmem:[%s111_s3 + $0x8] sm:$0xff] %v47_v23 }
   0xd   :  { %52 = vst [vmem:[%s111_s3 + $0x10] sm:$0xff] %v48_v24 }
   0xe   :  { %53 = vst [vmem:[%s111_s3 + $0x18] sm:$0xff] %v49_v25 }

// kernel: resnet_forward.73
= control target key start
LH: loop header
LB: loop body
LE: loop exit
PB: predicated region body
PF: predicated region fallthrough
CT: control target
= control target key end

     0   :  { %s136_s0 = inlined_call_operand.vmem [shape: f32[8,512], index: 0, kind: input, shape index: {}]   ;;  %s137_s1 = inlined_call_operand.vmem [shape: f32[1,512], index: 1, kind: input, shape index: {}]   ;;  %s138_s2 = inlined_call_operand.vmem [shape: f32[1,512], index: 2, kind: input, shape index: {}]   ;;  %s139_s3 = inlined_call_operand.vmem [shape: f32[8,512], index: 3, kind: input, shape index: {}]   ;;  %s140_s4 = inlined_call_operand.vmem [shape: f32[8,512], index: 4, kind: output, shape index: {}]  }
   0x1   :  { %v17_v0 = vld [vmem:[%s136_s0] sm:$0xff]  ;;  %v18_v5 = vld [vmem:[%s136_s0 + $0x8] sm:$0xff]  ;;  %v19_v8 = vld [vmem:[%s136_s0 + $0x10] sm:$0xff] }
   0x2   :  { %v21_v1 = vld [vmem:[%s137_s1] sm:$0xf]  ;;  %v20_v14 = vld [vmem:[%s136_s0 + $0x18] sm:$0xff]  ;;  %v50_v17 = vld [vmem:[%s139_s3 + $0x8] sm:$0xff] }
   0x3   :  { %v35_v2 = vld [vmem:[%s138_s2] sm:$0xf]  ;;  %v23_v3 = vperm.slane %v21_v1, 0  ;;  %v24_v6 = vperm.slane %v21_v1, 1  ;;  %v25_v9 = vperm.slane %v21_v1, 2  ;;  %v26_v11 = vperm.slane %v21_v1, 3 }
   0x4   :  { %v37_v4 = vperm.slane %v35_v2, 0  ;;  %v38_v7 = vperm.slane %v35_v2, 1  ;;  %v39_v10 = vperm.slane %v35_v2, 2  ;;  %v40_v15 = vperm.slane %v35_v2, 3  ;;  %v49_v16 = vld [vmem:[%s139_s3] sm:$0xff]  ;;  %v51_v22 = vld [vmem:[%s139_s3 + $0x10] sm:$0xff] }
   0x5   :  { %v31_v12 = vmul.f32 %v23_v3, %v17_v0  ;;  %v32_v13 = vmul.f32 %v24_v6, %v18_v5  ;;  %v33_v18 = vmul.f32 %v25_v9, %v19_v8  ;;  %v34_v19 = vmul.f32 %v26_v11, %v20_v14  ;;  %v52_v23 = vld [vmem:[%s139_s3 + $0x18] sm:$0xff] }
   0x7   :  { %v45_v20 = vadd.f32 %v37_v4, %v31_v12  ;;  %v46_v21 = vadd.f32 %v38_v7, %v32_v13  ;;  %v47_v24 = vadd.f32 %v39_v10, %v33_v18  ;;  %v48_v25 = vadd.f32 %v40_v15, %v34_v19 }
   0x9   :  { %v53_v26 = vadd.f32 %v49_v16, %v45_v20  ;;  %v54_v27 = vadd.f32 %v50_v17, %v46_v21  ;;  %v55_v28 = vadd.f32 %v51_v22, %v47_v24  ;;  %v56_v29 = vadd.f32 %v52_v23, %v48_v25 }
   0xb   :  { %v57_v30 = vmax.f32 %v53_v26, 0.0  ;;  %v58_v31 = vmax.f32 %v54_v27, 0.0  ;;  %v59_v32 = vmax.f32 %v55_v28, 0.0  ;;  %v60_v33 = vmax.f32 %v56_v29, 0.0 }
   0xd   :  { %61 = vst [vmem:[%s140_s4] sm:$0xff] %v57_v30 }
   0xe   :  { %62 = vst [vmem:[%s140_s4 + $0x8] sm:$0xff] %v58_v31 }
   0xf   :  { %63 = vst [vmem:[%s140_s4 + $0x10] sm:$0xff] %v59_v32 }
  0x10   :  { %64 = vst [vmem:[%s140_s4 + $0x18] sm:$0xff] %v60_v33 }

// kernel: resnet_forward.68
= control target key start
LH: loop header
LB: loop body
LE: loop exit
PB: predicated region body
PF: predicated region fallthrough
CT: control target
= control target key end

     0   :  { %s1281_s12 = smov 0   ;;  %s1283_s13 = smov 0   ;;  %s1603_s0 = inlined_call_operand.vmem [shape: bf16[16,4608], index: 0, kind: input, shape index: {}]   ;;  %s1604_s1 = inlined_call_operand.vmem [shape: bf16[4608,512], index: 1, kind: input, shape index: {}]   ;;  %s1605_s2 = inlined_call_operand.vmem [shape: f32[1,512], index: 2, kind: input, shape index: {}]   ;;  %s1606_s3 = inlined_call_operand.vmem [shape: f32[16,512], index: 3, kind: output, shape index: {}]  }
   0x1   :  { %s1285_s14 = smov 0   ;;  %s1287_s15 = smov 0  }
   0x2   :  { %s1289_s16 = smov 0   ;;  %s1291_s17 = smov 0  }
   0x3   :  { %s1293_s18 = smov 0   ;;  %s1295_s19 = smov 0  }
   0x4   :  { %s1297_s20 = smov 0   ;;  %s1299_s21 = smov 0  }
   0x5   :  { %s1301_s22 = smov 0  }
   0x6 LB: > { %s886_s23 = sadd.s32 4294967295, %s1258_s22   ;;  %s25_s24 = sadd.s32 1, %s1250_s20  ;;  %s1258_s22 = sphi %s1301_s22, %s13_s22   ;;  %s1254_s21 = sphi %s1299_s21, %s1627_s21   ;;  %s1250_s20 = sphi %s1297_s20, %s1626_s20   ;;  %s1246_s19 = sphi %s1295_s19, %s1625_s19   ;;  %s1242_s18 = sphi %s1293_s18, %s1624_s18   ;;  %s1238_s17 = sphi %s1291_s17, %s1623_s17   ;;  %s1234_s16 = sphi %s1289_s16, %s1622_s16   ;;  %s1230_s15 = sphi %s1287_s15, %s1621_s15   ;;  %s1226_s14 = sphi %s1285_s14, %s1620_s14   ;;  %s1222_s13 = sphi %s1283_s13, %s1619_s13   ;;  %s1218_s12 = sphi %s1281_s12, %s1618_s12  }
   0x7   : > { %p26_p0 = scmp.ge.s32.totalorder %s25_s24, 18  ;;  %s28_s25 = sadd.s32 1, %s1254_s21 }
   0x8   : > { %s41_s26 = sadd.s32 1, %s1238_s17  ;;  %p48_p1 = scmp.ne.s32.totalorder %s1238_s17, %s1234_s16 }
   0x9   : > { %s1629_s24 = smov (%p26_p0, %s25_s24), 0  ;;  %s1631_s25 = smov (!%p26_p0, %s28_s25), %s1254_s21 }
   0xa   : > { %1609 = sst [smem:[#allocation6_spill]] %s1629_s24  ;;  %s37_s27 = ssub.s32 %s1250_s20, %s1629_s24 }
   0xb   : > { %p49_p2 = scmp.eq.s32.totalorder %s1258_s22, 0  ;;  %p30_p3 = scmp.ge.s32.totalorder %s1631_s25, 2 }
   0xc   : > { %p39_p4 = scmp.eq.s32.totalorder %s37_s27, 0  ;;  %s69_s29 = sadd.s32 1, %s1230_s15 }
   0xd   : > { %p1348_p5 = por %p49_p2, %p48_p1  ;;  %s1633_s25 = smov (%p30_p3, %s1631_s25), 0 }
   0xe   : > { %1611 = sst [smem:[#allocation7_spill]] %s1633_s25  ;;  %s65_s4 = ssub.s32 %s1254_s21, %s1633_s25 }
   0xf   : > { %s1356_s30 = scalar_select %p39_p4, %s1238_s17, %s41_s26  }
  0x10   : > { %p76_p6 = scmp.ne.s32.totalorder %s1230_s15, %s1226_s14  ;;  %s66_s5 = sor.u32 %s65_s4, %s37_s27 }
  0x11   : > { %1612 = sst [smem:[#allocation8_spill]] %s1356_s30  ;;  %p121_p7 = scmp.eq.s32.totalorder %s65_s4, 0 }
  0x12   : > { %p67_p8 = scmp.eq.s32.totalorder %s66_s5, 0  ;;  %p1362_p9 = por %p76_p6, %p49_p2 }
  0x13   : > { %s123_s7 = sadd.s32 1, %s1222_s13  ;;  %p133_p10 = scmp.ne.s32.totalorder %s1222_s13, %s1218_s12 }
  0x14   : > { %s1370_s8 = scalar_select %p67_p8, %s1230_s15, %s69_s29  }
  0x15   : > { %s1373_s9 = scalar_select %p121_p7, %s1222_s13, %s123_s7  }
  0x16   : > { %p134_p11 = scmp.eq.s32.totalorder %s886_s23, 35  ;;  %p889_p13 = scmp.ge.s32.totalorder %s1258_s22, 36 }
  0x18   : > { %p1375_p12 = por %p134_p11, %p133_p10  ;;  %156 = sbr.rel (%p889_p13) target bundleno = 74 (0x4a), region = 16 }
  0x1d   : > { %159 = sbr.rel (!%p1348_p5) target bundleno = 35 (0x23), region = 20  ;;  %s161_s11 = sand.u32 (%p1348_p5), 1, %s1238_s17  }
  0x1e   : > { %s1046_s26 = sshll.u32 (%p1348_p5), %s1250_s20, 3  ;;  %s890_s27 = sshll.u32 (%p1348_p5), %s161_s11, 4 }
  0x1f   : > { %s169_s5 = scalar_lea.vmem (%p1348_p5), %s1603_s0, %s1046_s26  ;;  %s163_s23 = scalar_lea.vmem (%p1348_p5), [#allocation3], %s890_s27 }
  0x20   : > { %v200_v0 = vld [vmem:[%s169_s5] sm:$0xff] (%p1348_p5)  ;;  %v202_v1 = vld [vmem:[%s169_s5 + $0x90] sm:$0xff] (%p1348_p5) }
  0x21   : > { %201 = vst [vmem:[%s163_s23] sm:$0xff] (%p1348_p5), %v200_v0 }
  0x22   : > { %203 = vst [vmem:[%s163_s23 + $0x8] sm:$0xff] %v202_v1 }
  0x23 PF: > { %209 = sbr.rel (!%p1362_p9) target bundleno = 74 (0x4a), region = 58  ;;  %s211_s28 = sand.u32 (%p1362_p9), 1, %s1230_s15  }
  0x24   : > { %s895_s7 = sshll.u32 (%p1362_p9), %s1254_s21, 1  ;;  %s893_s25 = sshll.u32 (%p1362_p9), %s211_s28, 8 }
  0x25   : > { %s1047_s11 = sshll.u32 (%p1362_p9), %s1250_s20, 7  ;;  %s1400_s6 = scalar_lea.vmem (%p1362_p9), [#allocation4], %s893_s25 }
  0x26   : > { %s217_s24 = sadd.s32 (%p1362_p9), %s1047_s11, %s895_s7 }
  0x27   : > { %s897_s30 = sshll.u32 (%p1362_p9), %s217_s24, 2 }
  0x28   : > { %s1395_s4 = scalar_lea.vmem %s1604_s1, %s897_s30 }
  0x29   : > { %v310_v2 = vld [vmem:[%s1395_s4] sm:$0xff]  ;;  %v312_v3 = vld [vmem:[%s1395_s4 + $0x10] sm:$0xff] }
  0x2a   : > { %v314_v4 = vld [vmem:[%s1395_s4 + $0x20] sm:$0xff]  ;;  %311 = vst [vmem:[%s1400_s6] sm:$0xff] %v310_v2  ;;  %v316_v5 = vld [vmem:[%s1395_s4 + $0x30] sm:$0xff] }
  0x2b   : > { %313 = vst [vmem:[%s1400_s6 + $0x8] sm:$0xff] %v312_v3  ;;  %v318_v6 = vld [vmem:[%s1395_s4 + $0x40] sm:$0xff]  ;;  %v320_v7 = vld [vmem:[%s1395_s4 + $0x50] sm:$0xff] }
  0x2c   : > { %315 = vst [vmem:[%s1400_s6 + $0x10] sm:$0xff] %v314_v4  ;;  %v322_v8 = vld [vmem:[%s1395_s4 + $0x60] sm:$0xff]  ;;  %v324_v9 = vld [vmem:[%s1395_s4 + $0x70] sm:$0xff] }
  0x2d   : > { %317 = vst [vmem:[%s1400_s6 + $0x18] sm:$0xff] %v316_v5  ;;  %v326_v10 = vld [vmem:[%s1395_s4 + $0x80] sm:$0xff]  ;;  %v328_v11 = vld [vmem:[%s1395_s4 + $0x90] sm:$0xff] }
  0x2e   : > { %319 = vst [vmem:[%s1400_s6 + $0x20] sm:$0xff] %v318_v6  ;;  %v330_v12 = vld [vmem:[%s1395_s4 + $0xa0] sm:$0xff]  ;;  %v332_v13 = vld [vmem:[%s1395_s4 + $0xb0] sm:$0xff] }
  0x2f   : > { %321 = vst [vmem:[%s1400_s6 + $0x28] sm:$0xff] %v320_v7  ;;  %v334_v14 = vld [vmem:[%s1395_s4 + $0xc0] sm:$0xff]  ;;  %v336_v15 = vld [vmem:[%s1395_s4 + $0xd0] sm:$0xff] }
  0x30   : > { %323 = vst [vmem:[%s1400_s6 + $0x30] sm:$0xff] %v322_v8  ;;  %v338_v16 = vld [vmem:[%s1395_s4 + $0xe0] sm:$0xff]  ;;  %v340_v17 = vld [vmem:[%s1395_s4 + $0xf0] sm:$0xff] }
  0x31   : > { %325 = vst [vmem:[%s1400_s6 + $0x38] sm:$0xff] %v324_v9  ;;  %v342_v18 = vld [vmem:[%s1395_s4 + $0x100] sm:$0xff]  ;;  %v344_v19 = vld [vmem:[%s1395_s4 + $0x110] sm:$0xff] }
  0x32   : > { %327 = vst [vmem:[%s1400_s6 + $0x40] sm:$0xff] %v326_v10  ;;  %v346_v20 = vld [vmem:[%s1395_s4 + $0x120] sm:$0xff]  ;;  %v348_v21 = vld [vmem:[%s1395_s4 + $0x130] sm:$0xff] }
  0x33   : > { %329 = vst [vmem:[%s1400_s6 + $0x48] sm:$0xff] %v328_v11  ;;  %v350_v22 = vld [vmem:[%s1395_s4 + $0x140] sm:$0xff]  ;;  %v352_v23 = vld [vmem:[%s1395_s4 + $0x150] sm:$0xff] }
  0x34   : > { %331 = vst [vmem:[%s1400_s6 + $0x50] sm:$0xff] %v330_v12  ;;  %v354_v24 = vld [vmem:[%s1395_s4 + $0x160] sm:$0xff]  ;;  %v356_v25 = vld [vmem:[%s1395_s4 + $0x170] sm:$0xff] }
  0x35   : > { %333 = vst [vmem:[%s1400_s6 + $0x58] sm:$0xff] %v332_v13  ;;  %v358_v26 = vld [vmem:[%s1395_s4 + $0x180] sm:$0xff]  ;;  %v360_v27 = vld [vmem:[%s1395_s4 + $0x190] sm:$0xff] }
  0x36   : > { %335 = vst [vmem:[%s1400_s6 + $0x60] sm:$0xff] %v334_v14  ;;  %v362_v28 = vld [vmem:[%s1395_s4 + $0x1a0] sm:$0xff]  ;;  %v364_v29 = vld [vmem:[%s1395_s4 + $0x1b0] sm:$0xff] }
  0x37   : > { %337 = vst [vmem:[%s1400_s6 + $0x68] sm:$0xff] %v336_v15  ;;  %v366_v30 = vld [vmem:[%s1395_s4 + $0x1c0] sm:$0xff]  ;;  %v368_v31 = vld [vmem:[%s1395_s4 + $0x1d0] sm:$0xff] }
  0x38   : > { %339 = vst [vmem:[%s1400_s6 + $0x70] sm:$0xff] %v338_v16  ;;  %v370_v32 = vld [vmem:[%s1395_s4 + $0x1e0] sm:$0xff]  ;;  %v372_v33 = vld [vmem:[%s1395_s4 + $0x1f0] sm:$0xff] }
  0x39   : > { %341 = vst [vmem:[%s1400_s6 + $0x78] sm:$0xff] %v340_v17 }
  0x3a   : > { %343 = vst [vmem:[%s1400_s6 + $0x80] sm:$0xff] %v342_v18 }
  0x3b   : > { %345 = vst [vmem:[%s1400_s6 + $0x88] sm:$0xff] %v344_v19 }
  0x3c   : > { %347 = vst [vmem:[%s1400_s6 + $0x90] sm:$0xff] %v346_v20 }
  0x3d   : > { %349 = vst [vmem:[%s1400_s6 + $0x98] sm:$0xff] %v348_v21 }
  0x3e   : > { %351 = vst [vmem:[%s1400_s6 + $0xa0] sm:$0xff] %v350_v22 }
  0x3f   : > { %353 = vst [vmem:[%s1400_s6 + $0xa8] sm:$0xff] %v352_v23 }
  0x40   : > { %355 = vst [vmem:[%s1400_s6 + $0xb0] sm:$0xff] %v354_v24 }
  0x41   : > { %357 = vst [vmem:[%s1400_s6 + $0xb8] sm:$0xff] %v356_v25 }
  0x42   : > { %359 = vst [vmem:[%s1400_s6 + $0xc0] sm:$0xff] %v358_v26 }
  0x43   : > { %361 = vst [vmem:[%s1400_s6 + $0xc8] sm:$0xff] %v360_v27 }
  0x44   : > { %363 = vst [vmem:[%s1400_s6 + $0xd0] sm:$0xff] %v362_v28 }
  0x45   : > { %365 = vst [vmem:[%s1400_s6 + $0xd8] sm:$0xff] %v364_v29 }
  0x46   : > { %367 = vst [vmem:[%s1400_s6 + $0xe0] sm:$0xff] %v366_v30 }
  0x47   : > { %369 = vst [vmem:[%s1400_s6 + $0xe8] sm:$0xff] %v368_v31 }
  0x48   : > { %371 = vst [vmem:[%s1400_s6 + $0xf0] sm:$0xff] %v370_v32 }
  0x49   : > { %373 = vst [vmem:[%s1400_s6 + $0xf8] sm:$0xff] %v372_v33 }
  0x4a PF: > { %p898_p0 = scmp.ge.s32.totalorder %s1258_s22, 1  ;;  %p386_p1 = scmp.lt.s32.totalorder %s1258_s22, 37 }
  0x4c   : > { %p387_p2 = pnand %p898_p0, %p386_p1 }
  0x4d   : > { %s393_s24 = sand.u32 (!%p387_p2), 1, %s1234_s16   ;;  %s400_s25 = sand.u32 (!%p387_p2), 1, %s1226_s14  }
  0x4e   : > { %390 = sbr.rel (%p387_p2) target bundleno = 294 (0x126), region = 100  ;;  %s899_s30 = sshll.u32 (!%p387_p2), %s393_s24, 4 }
  0x4f   : > { %s900_s27 = sshll.u32 (!%p387_p2), %s400_s25, 8  ;;  %s427_s5 = sand.u32 (!%p387_p2), 1, %s1218_s12  }
  0x50   : > { %s902_s23 = sshll.u32 (!%p387_p2), %s1246_s19, 1  ;;  %s901_s28 = sshll.u32 (!%p387_p2), %s427_s5, 5 }
  0x51   : > { %p435_p3 = scmp.lt.s32.totalorder (!%p387_p2), %s902_s23, 3  ;;  %s1475_s26 = scalar_lea.vmem (!%p387_p2), [#allocation3], %s899_s30 }
  0x52   : > { %s1477_s4 = scalar_lea.vmem (!%p387_p2), [#allocation4], %s900_s27  ;;  %s1479_s6 = scalar_lea.vmem (!%p387_p2), [#allocation5], %s901_s28 }
  0x53   : > { %s1635_s23 = smov (!%p435_p3, %s902_s23), 3  ;;  %p903_p4 = scmp.ne.s32.totalorder %s1242_s18, 0 }
  0x54   : > { %s437_s29 = scalar_lea.vmem %s1605_s2, %s1635_s23 }
  0x55   : > { %444 = sbr.rel (%p903_p4) target bundleno = 95 (0x5f), region = 112 }
  0x5a   : > { %v1260_v34 = vmov 0.0  }
  0x5b   : > { %445 = vst [vmem:[#allocation2 + $0x10] sm:$0xff] %v1260_v34 }
  0x5c   : > { %446 = vst [vmem:[#allocation2] sm:$0xff] %v1260_v34 }
  0x5d   : > { %447 = vst [vmem:[#allocation2 + $0x18] sm:$0xff] %v1260_v34 }
  0x5e   : > { %448 = vst [vmem:[#allocation2 + $0x8] sm:$0xff] %v1260_v34 }
  0x5f PF: > { %v970_v35 = vld [vmem:[%s1477_s4 + $0x70] sm:$0xf]  ;;  %v1065_v36 = vld [vmem:[%s1477_s4 + $0x74] sm:$0xf0]  ;;  %v1064_v40 = vld [vmem:[%s1477_s4 + $0x74] sm:$0xf] }
  0x60   : > { %v1034_v37 = vld [vmem:[%s1477_s4 + $0xf0] sm:$0xf]  ;;  %v971_v38 = vor.u32 %v1065_v36, %v970_v35  ;;  %v1081_v39 = vld [vmem:[%s1477_s4 + $0xf4] sm:$0xf0]  ;;  %v972_v41 = vld [vmem:[%s1477_s4 + $0x78] sm:$0xf0] }
  0x61   : > { %v1035_v42 = vor.u32 %v1081_v39, %v1034_v37  ;;  %v975_v43 = vor.u32 %v1064_v40, %v972_v41  ;;  %v1080_v44 = vld [vmem:[%s1477_s4 + $0xf4] sm:$0xf]  ;;  %v1036_v45 = vld [vmem:[%s1477_s4 + $0xf8] sm:$0xf0]  ;;  %v962_v46 = vld [vmem:[%s1477_s4 + $0x60] sm:$0xf] }
  0x62   : > { %657 = vmatpush.bf16.msra.mxu0 %v971_v38  ;;  %v1039_v47 = vor.u32 %v1080_v44, %v1036_v45  ;;  %v1063_v48 = vld [vmem:[%s1477_s4 + $0x64] sm:$0xf0]  ;;  %v1026_v49 = vld [vmem:[%s1477_s4 + $0xe0] sm:$0xf]  ;;  %v1062_v53 = vld [vmem:[%s1477_s4 + $0x64] sm:$0xf] }
  0x63   : > { %v1079_v50 = vld [vmem:[%s1477_s4 + $0xe4] sm:$0xf0]  ;;  %671 = vmatpush.bf16.msra.mxu1 %v1035_v42  ;;  %685 = vmatpush.bf16.msra.mxu2 %v975_v43  ;;  %v963_v51 = vor.u32 %v1063_v48, %v962_v46  ;;  %v964_v54 = vld [vmem:[%s1477_s4 + $0x68] sm:$0xf0]  ;;  %v1078_v55 = vld [vmem:[%s1477_s4 + $0xe4] sm:$0xf] }
  0x64   : > { %v1027_v52 = vor.u32 %v1079_v50, %v1026_v49  ;;  %699 = vmatpush.bf16.msra.mxu3 %v1039_v47  ;;  %v967_v56 = vor.u32 %v1062_v53, %v964_v54  ;;  %v1028_v57 = vld [vmem:[%s1477_s4 + $0xe8] sm:$0xf0]  ;;  %v954_v58 = vld [vmem:[%s1477_s4 + $0x50] sm:$0xf]  ;;  %v1061_v59 = vld [vmem:[%s1477_s4 + $0x54] sm:$0xf0] }
  0x65   : > { %v1031_v60 = vor.u32 %v1078_v55, %v1028_v57  ;;  %v1018_v61 = vld [vmem:[%s1477_s4 + $0xd0] sm:$0xf]  ;;  %v1077_v62 = vld [vmem:[%s1477_s4 + $0xd4] sm:$0xf0]  ;;  %v1060_v63 = vld [vmem:[%s1477_s4 + $0x54] sm:$0xf]  ;;  %v955_v0 = vor.u32 %v1061_v59, %v954_v58 }
  0x66   : > { %658 = vmatpush.bf16.msra.mxu0 %v963_v51  ;;  %v956_v1 = vld [vmem:[%s1477_s4 + $0x58] sm:$0xf0]  ;;  %v1076_v2 = vld [vmem:[%s1477_s4 + $0xd4] sm:$0xf]  ;;  %v1019_v4 = vor.u32 %v1077_v62, %v1018_v61  ;;  %v946_v6 = vld [vmem:[%s1477_s4 + $0x40] sm:$0xf] }
  0x67   : > { %v1020_v3 = vld [vmem:[%s1477_s4 + $0xd8] sm:$0xf0]  ;;  %672 = vmatpush.bf16.msra.mxu1 %v1027_v52  ;;  %686 = vmatpush.bf16.msra.mxu2 %v967_v56  ;;  %v959_v5 = vor.u32 %v1060_v63, %v956_v1  ;;  %v1059_v7 = vld [vmem:[%s1477_s4 + $0x44] sm:$0xf0]  ;;  %v1010_v8 = vld [vmem:[%s1477_s4 + $0xc0] sm:$0xf] }
  0x68   : > { %700 = vmatpush.bf16.msra.mxu3 %v1031_v60  ;;  %v1023_v9 = vor.u32 %v1076_v2, %v1020_v3  ;;  %v1075_v10 = vld [vmem:[%s1477_s4 + $0xc4] sm:$0xf0]  ;;  %v1058_v11 = vld [vmem:[%s1477_s4 + $0x44] sm:$0xf]  ;;  %v948_v12 = vld [vmem:[%s1477_s4 + $0x48] sm:$0xf0]  ;;  %v947_v15 = vor.u32 %v1059_v7, %v946_v6 }
  0x69   : > { %v1074_v13 = vld [vmem:[%s1477_s4 + $0xc4] sm:$0xf]  ;;  %v1012_v14 = vld [vmem:[%s1477_s4 + $0xc8] sm:$0xf0]  ;;  %v1011_v16 = vor.u32 %v1075_v10, %v1010_v8  ;;  %v951_v17 = vor.u32 %v1058_v11, %v948_v12  ;;  %v938_v18 = vld [vmem:[%s1477_s4 + $0x30] sm:$0xf] }
  0x6a   : > { %659 = vmatpush.bf16.msra.mxu0 %v955_v0  ;;  %v1057_v19 = vld [vmem:[%s1477_s4 + $0x34] sm:$0xf0]  ;;  %v1002_v20 = vld [vmem:[%s1477_s4 + $0xb0] sm:$0xf]  ;;  %v1015_v21 = vor.u32 %v1074_v13, %v1012_v14  ;;  %v1056_v23 = vld [vmem:[%s1477_s4 + $0x34] sm:$0xf] }
  0x6b   : > { %673 = vmatpush.bf16.msra.mxu1 %v1019_v4  ;;  %687 = vmatpush.bf16.msra.mxu2 %v959_v5  ;;  %v1073_v22 = vld [vmem:[%s1477_s4 + $0xb4] sm:$0xf0]  ;;  %v940_v24 = vld [vmem:[%s1477_s4 + $0x38] sm:$0xf0]  ;;  %v1072_v25 = vld [vmem:[%s1477_s4 + $0xb4] sm:$0xf]  ;;  %v939_v27 = vor.u32 %v1057_v19, %v938_v18 }
  0x6c   : > { %701 = vmatpush.bf16.msra.mxu3 %v1023_v9  ;;  %v1004_v26 = vld [vmem:[%s1477_s4 + $0xb8] sm:$0xf0]  ;;  %v1003_v28 = vor.u32 %v1073_v22, %v1002_v20  ;;  %v943_v29 = vor.u32 %v1056_v23, %v940_v24  ;;  %v930_v30 = vld [vmem:[%s1477_s4 + $0x20] sm:$0xf]  ;;  %v1055_v31 = vld [vmem:[%s1477_s4 + $0x24] sm:$0xf0] }
  0x6d   : > { %v994_v32 = vld [vmem:[%s1477_s4 + $0xa0] sm:$0xf]  ;;  %v1007_v33 = vor.u32 %v1072_v25, %v1004_v26  ;;  %v1071_v34 = vld [vmem:[%s1477_s4 + $0xa4] sm:$0xf0]  ;;  %v1054_v35 = vld [vmem:[%s1477_s4 + $0x24] sm:$0xf]  ;;  %v931_v39 = vor.u32 %v1055_v31, %v930_v30 }
  0x6e   : > { %660 = vmatpush.bf16.msra.mxu0 %v947_v15  ;;  %v932_v36 = vld [vmem:[%s1477_s4 + $0x28] sm:$0xf0]  ;;  %v1070_v37 = vld [vmem:[%s1477_s4 + $0xa4] sm:$0xf]  ;;  %v995_v40 = vor.u32 %v1071_v34, %v994_v32  ;;  %v922_v42 = vld [vmem:[%s1477_s4 + $0x10] sm:$0xf] }
  0x6f   : > { %674 = vmatpush.bf16.msra.mxu1 %v1011_v16  ;;  %688 = vmatpush.bf16.msra.mxu2 %v951_v17  ;;  %v996_v38 = vld [vmem:[%s1477_s4 + $0xa8] sm:$0xf0]  ;;  %v935_v41 = vor.u32 %v1054_v35, %v932_v36  ;;  %v1053_v43 = vld [vmem:[%s1477_s4 + $0x14] sm:$0xf0]  ;;  %v986_v44 = vld [vmem:[%s1477_s4 + $0x90] sm:$0xf] }
  0x70   : > { %702 = vmatpush.bf16.msra.mxu3 %v1015_v21  ;;  %v999_v45 = vor.u32 %v1070_v37, %v996_v38  ;;  %v1069_v46 = vld [vmem:[%s1477_s4 + $0x94] sm:$0xf0]  ;;  %v1052_v47 = vld [vmem:[%s1477_s4 + $0x14] sm:$0xf]  ;;  %v924_v48 = vld [vmem:[%s1477_s4 + $0x18] sm:$0xf0]  ;;  %v923_v51 = vor.u32 %v1053_v43, %v922_v42 }
  0x71   : > { %v1068_v49 = vld [vmem:[%s1477_s4 + $0x94] sm:$0xf]  ;;  %v988_v50 = vld [vmem:[%s1477_s4 + $0x98] sm:$0xf0]  ;;  %v987_v52 = vor.u32 %v1069_v46, %v986_v44  ;;  %v927_v53 = vor.u32 %v1052_v47, %v924_v48  ;;  %v914_v54 = vld [vmem:[%s1477_s4] sm:$0xf] }
  0x72   : > { %661 = vmatpush.bf16.msra.mxu0 %v939_v27  ;;  %v1051_v55 = vld [vmem:[%s1477_s4 + $0x4] sm:$0xf0]  ;;  %v978_v56 = vld [vmem:[%s1477_s4 + $0x80] sm:$0xf]  ;;  %v991_v57 = vor.u32 %v1068_v49, %v988_v50  ;;  %v1050_v59 = vld [vmem:[%s1477_s4 + $0x4] sm:$0xf] }
  0x73   : > { %675 = vmatpush.bf16.msra.mxu1 %v1003_v28  ;;  %689 = vmatpush.bf16.msra.mxu2 %v943_v29  ;;  %v1067_v58 = vld [vmem:[%s1477_s4 + $0x84] sm:$0xf0]  ;;  %v916_v60 = vld [vmem:[%s1477_s4 + $0x8] sm:$0xf0]  ;;  %v1066_v61 = vld [vmem:[%s1477_s4 + $0x84] sm:$0xf]  ;;  %v915_v63 = vor.u32 %v1051_v55, %v914_v54 }
  0x74   : > { %703 = vmatpush.bf16.msra.mxu3 %v1007_v33  ;;  %v980_v62 = vld [vmem:[%s1477_s4 + $0x88] sm:$0xf0]  ;;  %v906_v0 = vld [vmem:[%s1475_s26] sm:$0xf]  ;;  %v1049_v1 = vld [vmem:[%s1475_s26 + $0x4] sm:$0xf0]  ;;  %v979_v2 = vor.u32 %v1067_v58, %v978_v56  ;;  %v919_v3 = vor.u32 %v1050_v59, %v916_v60 }
  0x75   : > { %v1048_v4 = vld [vmem:[%s1475_s26 + $0x4] sm:$0xf]  ;;  %v908_v5 = vld [vmem:[%s1475_s26 + $0x8] sm:$0xf0]  ;;  %v983_v6 = vor.u32 %v1066_v61, %v980_v62  ;;  %v907_v7 = vor.u32 %v1049_v1, %v906_v0  ;;  %p1040_p5 = scmp.ne.s32.totalorder %s1242_s18, 17 }
  0x76   : > { %662 = vmatpush.bf16.msra.mxu0 %v931_v39  ;;  %v911_v8 = vor.u32 %v1048_v4, %v908_v5  ;;  %v449_v10 = vld [vmem:[#allocation2 + $0x10] sm:$0xff]  ;;  %v450_v15 = vld [vmem:[#allocation2] sm:$0xff]  ;;  %v451_v19 = vld [vmem:[#allocation2 + $0x18] sm:$0xff] }
  0x77   : > { %676 = vmatpush.bf16.msra.mxu1 %v995_v40  ;;  %690 = vmatpush.bf16.msra.mxu2 %v935_v41  ;;  %v452_v25 = vld [vmem:[#allocation2 + $0x8] sm:$0xff] }
  0x78   : > { %704 = vmatpush.bf16.msra.mxu3 %v999_v45 }
  0x7a   : > { %663 = vmatpush.bf16.msra.mxu0 %v923_v51 }
  0x7b   : > { %677 = vmatpush.bf16.msra.mxu1 %v987_v52  ;;  %691 = vmatpush.bf16.msra.mxu2 %v927_v53 }
  0x7c   : > { %705 = vmatpush.bf16.msra.mxu3 %v991_v57 }
  0x7e   : > { %664 = vmatpush.bf16.msra.mxu0 %v915_v63 }
  0x7f   : > { %678 = vmatpush.bf16.msra.mxu1 %v979_v2  ;;  %692 = vmatpush.bf16.msra.mxu2 %v919_v3 }
  0x80   : > { %706 = vmatpush.bf16.msra.mxu3 %v983_v6 }
  0x81   : > { %665 = vmatmul.bf16.vlgmr.msra.gmra.mxu0 %v907_v7 }
  0x82   : > { %679 = vmatmul.bf16.vlgmr.msra.gmra.mxu1 %v911_v8  ;;  %693 = vmatmul.bf16.vlgmr.msra.gmra.mxu2 %v907_v7 }
  0x83   : > { %707 = vmatmul.bf16.vlgmr.msra.gmra.mxu3 %v911_v8 }
  0xfe   : > { %v666_v9 = vpop.f32.mrf.mxu0 }
  0xff   : > { %v680_v11 = vpop.f32.mrf.mxu1 }
 0x100   : > { %v681_v12 = vadd.f32 %v680_v11, %v666_v9 }
 0x102   : > { %v713_v13 = vadd.f32 %v681_v12, %v449_v10 }
 0x104   : > { %717 = vst [vmem:[#allocation2 + $0x10] sm:$0xff] %v713_v13 }
 0x105   : > { %v694_v14 = vpop.f32.mrf.mxu2 }
 0x106   : > { %v708_v16 = vpop.f32.mrf.mxu3  ;;  %v668_v17 = vpop.f32.mrf.mxu0 }
 0x107   : > { %v709_v18 = vadd.f32 %v708_v16, %v694_v14  ;;  %v682_v20 = vpop.f32.mrf.mxu1 }
 0x108   : > { %v683_v21 = vadd.f32 %v682_v20, %v668_v17 }
 0x109   : > { %v714_v22 = vadd.f32 %v709_v18, %v450_v15 }
 0x10a   : > { %v715_v23 = vadd.f32 %v683_v21, %v451_v19 }
 0x10b   : > { %718 = vst [vmem:[#allocation2] sm:$0xff] %v714_v22 }
 0x10c   : > { %719 = vst [vmem:[#allocation2 + $0x18] sm:$0xff] %v715_v23 }
 0x10d   : > { %v696_v24 = vpop.f32.mrf.mxu2 }
 0x10e   : > { %v710_v26 = vpop.f32.mrf.mxu3 }
 0x10f   : > { %v711_v27 = vadd.f32 %v710_v26, %v696_v24  ;;  %724 = sbr.rel (%p1040_p5) target bundleno = 286 (0x11e), region = 116 }
 0x111   : > { %v716_v28 = vadd.f32 %v711_v27, %v452_v25 }
 0x113   : > { %720 = vst [vmem:[#allocation2 + $0x8] sm:$0xff] %v716_v28 }
 0x114   : > { %v725_v29 = vld [vmem:[#allocation2 + $0x10] sm:$0xff]  ;;  %v729_v30 = vld [vmem:[%s437_s29] sm:$0x3]  ;;  %v727_v34 = vld [vmem:[#allocation2 + $0x18] sm:$0xff] }
 0x115   : > { %v726_v31 = vld [vmem:[#allocation2] sm:$0xff]  ;;  %v731_v32 = vperm.slane %v729_v30, 0  ;;  %v732_v33 = vperm.slane %v729_v30, 1 }
 0x117   : > { %v735_v36 = vadd.f32 %v731_v32, %v725_v29  ;;  %v736_v37 = vadd.f32 %v732_v33, %v726_v31  ;;  %v737_v38 = vadd.f32 %v731_v32, %v727_v34 }
 0x119   : > { %739 = vst [vmem:[%s1479_s6] sm:$0xff] %v735_v36 }
 0x11a   : > { %v728_v35 = vld [vmem:[#allocation2 + $0x8] sm:$0xff]  ;;  %740 = vst [vmem:[%s1479_s6 + $0x8] sm:$0xff] %v736_v37 }
 0x11b   : > { %v738_v39 = vadd.f32 %v732_v33, %v728_v35  ;;  %741 = vst [vmem:[%s1479_s6 + $0x10] sm:$0xff] %v737_v38 }
 0x11d   : > { %742 = vst [vmem:[%s1479_s6 + $0x18] sm:$0xff] %v738_v39 }
 0x11e PF: > { %749 = sbr.rel (!%p1375_p12) target bundleno = 294 (0x126), region = 120  ;;  %s1082_s16 = sshll.u32 (%p1375_p12), %s1246_s19, 4 }
 0x11f   : > { %s755_s25 = scalar_lea.vmem (%p1375_p12), %s1606_s3, %s1082_s16 }
 0x120   : > { %v768_v40 = vld [vmem:[%s1479_s6] sm:$0xff] (%p1375_p12) }
 0x121   : > { %v770_v41 = vld [vmem:[%s1479_s6 + $0x8] sm:$0xff] (%p1375_p12)  ;;  %769 = vst [vmem:[%s755_s25] sm:$0xff] (%p1375_p12), %v768_v40 }
 0x122   : > { %v772_v42 = vld [vmem:[%s1479_s6 + $0x10] sm:$0xff] (%p1375_p12)  ;;  %771 = vst [vmem:[%s755_s25 + $0x8] sm:$0xff] (%p1375_p12), %v770_v41 }
 0x123   : > { %773 = vst [vmem:[%s755_s25 + $0x20] sm:$0xff] %v772_v42 }
 0x124   : > { %v774_v43 = vld [vmem:[%s1479_s6 + $0x18] sm:$0xff] }
 0x125   : > { %775 = vst [vmem:[%s755_s25 + $0x28] sm:$0xff] %v774_v43 }
 0x126 PF: > { %s13_s22 = sadd.s32 1, %s1258_s22   ;;  %s1615_s19 = sld [smem:[#allocation8_spill]] }
 0x127   : > { %p10_p6 = scmp.ge.s32.totalorder %s13_s22, 38   ;;  %s1616_s10 = sld [smem:[#allocation6_spill]] }
 0x128   : > { %s1617_s30 = sld [smem:[#allocation7_spill]]  ;;  %s1618_s12 = smov %s1222_s13 }
 0x129   : > { %s1619_s13 = smov %s1373_s9  ;;  %s1620_s14 = smov %s1230_s15 }
 0x12a   : > { %s1621_s15 = smov %s1370_s8  ;;  %s1622_s16 = smov %s1238_s17 }
 0x12b   : > { %s1624_s18 = smov %s1250_s20  ;;  %12 = sbr.rel (!%p10_p6) target bundleno = 6 (0x6), region = 185 }
 0x12c   : > { %s1623_s17 = smov %s1615_s19  ;;  %s1625_s19 = smov %s1254_s21 }
 0x12d   : > { %s1626_s20 = smov %s1616_s10 }
 0x12e   : > { %s1627_s21 = smov %s1617_s30 }

// kernel: resnet_forward.74
= control target key start
LH: loop header
LB: loop body
LE: loop exit
PB: predicated region body
PF: predicated region fallthrough
CT: control target
= control target key end

     0   :  { %s43_s0 = inlined_call_operand.vmem [shape: f32[2,1,512], index: 0, kind: input, shape index: {}]   ;;  %s44_s1 = inlined_call_operand.vmem [shape: f32[2,512], index: 1, kind: output, shape index: {}]  }
   0x1   :  { %v8_v0 = vld [vmem:[%s43_s0] sm:$0xf]  ;;  %v9_v1 = vld [vmem:[%s43_s0 + $0x4] sm:$0xf] }
   0x2   :  { %14 = vst [vmem:[#allocation1] ss:$2 sm:$0xff] %v8_v0 }
   0x3   :  { %16 = vst [vmem:[#allocation1 + $0x1] ss:$2 sm:$0xff] %v9_v1 }
   0xa   :  { %v17_v2 = vld [vmem:[#allocation1] sm:$0xff] }
   0xb   :  { %19 = vst [vmem:[%s44_s1] sm:$0xff] %v17_v2 }

// kernel: resnet_forward.75
= control target key start
LH: loop header
LB: loop body
LE: loop exit
PB: predicated region body
PF: predicated region fallthrough
CT: control target
= control target key end

     0   :  { %s809_s12 = smov 0   ;;  %s811_s13 = smov 0   ;;  %s909_s0 = inlined_call_operand.vmem [shape: bf16[16,512], index: 0, kind: input, shape index: {}]   ;;  %s910_s1 = inlined_call_operand.vmem [shape: bf16[512,128], index: 1, kind: input, shape index: {}]   ;;  %s911_s2 = inlined_call_operand.vmem [shape: f32[1,128], index: 2, kind: input, shape index: {}]   ;;  %s912_s3 = inlined_call_operand.vmem [shape: f32[16,128], index: 3, kind: output, shape index: {}]  }
   0x1   :  { %s813_s14 = smov 0   ;;  %s815_s15 = smov 0  }
   0x2   :  { %s817_s16 = smov 0  }
   0x3 LB: > { %s25_s17 = sadd.s32 1, %s782_s15  ;;  %p48_p1 = scmp.ne.s32.totalorder %s774_s13, %s770_s12  ;;  %s786_s16 = sphi %s817_s16, %s13_s16   ;;  %s782_s15 = sphi %s815_s15, %s916_s15   ;;  %s778_s14 = sphi %s813_s14, %s915_s14   ;;  %s774_s13 = sphi %s811_s13, %s914_s13   ;;  %s770_s12 = sphi %s809_s12, %s913_s12  }
   0x4   : > { %p26_p0 = scmp.ge.s32.totalorder %s25_s17, 2  ;;  %p49_p2 = scmp.eq.s32.totalorder %s786_s16, 0 }
   0x5   : > { %s41_s19 = sadd.s32 1, %s774_s13  ;;  %p601_p5 = scmp.ge.s32.totalorder %s786_s16, 2 }
   0x6   : > { %s918_s17 = smov (%p26_p0, %s25_s17), 0  ;;  %p50_p3 = por %p49_p2, %p48_p1 }
   0x7   : > { %s37_s18 = ssub.s32 %s782_s15, %s918_s17  ;;  %162 = sbr.rel (%p601_p5) target bundleno = 18 (0x12), region = 20 }
   0x8   : > { %p39_p4 = scmp.eq.s32.totalorder %s37_s18, 0 }
   0xa   : > { %s844_s20 = scalar_select %p39_p4, %s774_s13, %s41_s19  }
   0xc   : > { %165 = sbr.rel (!%p50_p3) target bundleno = 18 (0x12), region = 24  ;;  %s167_s21 = sand.u32 (%p50_p3), 1, %s774_s13  }
   0xd   : > { %s687_s22 = sshll.u32 (%p50_p3), %s782_s15, 3  ;;  %s602_s23 = sshll.u32 (%p50_p3), %s167_s21, 4 }
   0xe   : > { %s175_s26 = scalar_lea.vmem (%p50_p3), %s909_s0, %s687_s22  ;;  %s169_s27 = scalar_lea.vmem (%p50_p3), [#allocation3], %s602_s23 }
   0xf   : > { %v206_v0 = vld [vmem:[%s175_s26] sm:$0xff] (%p50_p3)  ;;  %v208_v1 = vld [vmem:[%s175_s26 + $0x10] sm:$0xff] (%p50_p3) }
  0x10   : > { %207 = vst [vmem:[%s169_s27] sm:$0xff] (%p50_p3), %v206_v0 }
  0x11   : > { %209 = vst [vmem:[%s169_s27 + $0x8] sm:$0xff] %v208_v1 }
  0x12 PF: > { %p605_p6 = scmp.ge.s32.totalorder %s786_s16, 1  ;;  %p226_p7 = scmp.lt.s32.totalorder %s786_s16, 3 }
  0x14   : > { %p227_p8 = pnand %p605_p6, %p226_p7 }
  0x15   : > { %s233_s28 = sand.u32 (!%p227_p8), 1, %s770_s12   ;;  %s607_s29 = sshll.u32 (!%p227_p8), %s778_s14, 5 }
  0x16   : > { %230 = sbr.rel (%p227_p8) target bundleno = 217 (0xd9), region = 66  ;;  %s606_s30 = sshll.u32 (!%p227_p8), %s233_s28, 4 }
  0x17   : > { %p273_p9 = scmp.lt.s32.totalorder (!%p227_p8), %s607_s29, 63  ;;  %s861_s8 = scalar_lea.vmem (!%p227_p8), [#allocation3], %s606_s30 }
  0x18   : > { %p609_p10 = scmp.ne.s32.totalorder (!%p227_p8), %s778_s14, 0 }
  0x1b   : > { %s920_s29 = smov (!%p273_p9, %s607_s29), 63  ;;  %296 = sbr.rel (%p609_p10) target bundleno = 35 (0x23), region = 74 }
  0x1c   : > { %s608_s4 = sshll.u32 %s920_s29, 2 }
  0x1d   : > { %s859_s7 = scalar_lea.vmem %s910_s1, %s608_s4 }
  0x20   : > { %v788_v2 = vmov 0.0  }
  0x21   : > { %297 = vst [vmem:[#allocation2] sm:$0xff] %v788_v2 }
  0x22   : > { %298 = vst [vmem:[#allocation2 + $0x8] sm:$0xff] %v788_v2 }
  0x23 PF: > { %v697_v3 = vld [vmem:[%s859_s7 + $0x38] sm:$0xff]  ;;  %v696_v5 = vld [vmem:[%s859_s7 + $0x30] sm:$0xff]  ;;  %v695_v7 = vld [vmem:[%s859_s7 + $0x28] sm:$0xff]  ;;  %p682_p11 = scmp.ne.s32.totalorder %s778_s14, 1 }
  0x24   : > { %v705_v4 = vld [vmem:[%s859_s7 + $0x78] sm:$0xff]  ;;  %441 = vmatpush.bf16.msra.mxu0 %v697_v3  ;;  %v704_v6 = vld [vmem:[%s859_s7 + $0x70] sm:$0xff]  ;;  %v703_v8 = vld [vmem:[%s859_s7 + $0x68] sm:$0xff] }
  0x25   : > { %455 = vmatpush.bf16.msra.mxu1 %v705_v4  ;;  %v694_v9 = vld [vmem:[%s859_s7 + $0x20] sm:$0xff]  ;;  %v693_v11 = vld [vmem:[%s859_s7 + $0x18] sm:$0xff]  ;;  %v692_v13 = vld [vmem:[%s859_s7 + $0x10] sm:$0xff] }
  0x26   : > { %v702_v10 = vld [vmem:[%s859_s7 + $0x60] sm:$0xff]  ;;  %v701_v12 = vld [vmem:[%s859_s7 + $0x58] sm:$0xff]  ;;  %v700_v14 = vld [vmem:[%s859_s7 + $0x50] sm:$0xff] }
  0x27   : > { %v691_v15 = vld [vmem:[%s859_s7 + $0x8] sm:$0xff]  ;;  %v690_v17 = vld [vmem:[%s859_s7] sm:$0xff] }
  0x28   : > { %442 = vmatpush.bf16.msra.mxu0 %v696_v5  ;;  %v699_v16 = vld [vmem:[%s859_s7 + $0x48] sm:$0xff]  ;;  %v698_v18 = vld [vmem:[%s859_s7 + $0x40] sm:$0xff] }
  0x29   : > { %456 = vmatpush.bf16.msra.mxu1 %v704_v6  ;;  %v612_v19 = vld [vmem:[%s861_s8] sm:$0xf]  ;;  %v689_v20 = vld [vmem:[%s861_s8 + $0x4] sm:$0xf0]  ;;  %v688_v21 = vld [vmem:[%s861_s8 + $0x4] sm:$0xf] }
  0x2a   : > { %v614_v22 = vld [vmem:[%s861_s8 + $0x8] sm:$0xf0]  ;;  %v613_v23 = vor.u32 %v689_v20, %v612_v19  ;;  %v299_v26 = vld [vmem:[#allocation2] sm:$0xff] }
  0x2b   : > { %v617_v24 = vor.u32 %v688_v21, %v614_v22  ;;  %v300_v31 = vld [vmem:[#allocation2 + $0x8] sm:$0xff] }
  0x2c   : > { %443 = vmatpush.bf16.msra.mxu0 %v695_v7 }
  0x2d   : > { %457 = vmatpush.bf16.msra.mxu1 %v703_v8 }
  0x30   : > { %444 = vmatpush.bf16.msra.mxu0 %v694_v9 }
  0x31   : > { %458 = vmatpush.bf16.msra.mxu1 %v702_v10 }
  0x34   : > { %445 = vmatpush.bf16.msra.mxu0 %v693_v11 }
  0x35   : > { %459 = vmatpush.bf16.msra.mxu1 %v701_v12 }
  0x38   : > { %446 = vmatpush.bf16.msra.mxu0 %v692_v13 }
  0x39   : > { %460 = vmatpush.bf16.msra.mxu1 %v700_v14 }
  0x3c   : > { %447 = vmatpush.bf16.msra.mxu0 %v691_v15 }
  0x3d   : > { %461 = vmatpush.bf16.msra.mxu1 %v699_v16 }
  0x40   : > { %448 = vmatpush.bf16.msra.mxu0 %v690_v17 }
  0x41   : > { %462 = vmatpush.bf16.msra.mxu1 %v698_v18 }
  0x43   : > { %449 = vmatmul.bf16.vlgmr.msra.gmra.mxu0 %v613_v23 }
  0x44   : > { %463 = vmatmul.bf16.vlgmr.msra.gmra.mxu1 %v617_v24 }
  0xc0   : > { %v450_v25 = vpop.f32.mrf.mxu0 }
  0xc1   : > { %v464_v27 = vpop.f32.mrf.mxu1 }
  0xc2   : > { %v465_v28 = vadd.f32 %v464_v27, %v450_v25 }
  0xc4   : > { %v469_v29 = vadd.f32 %v465_v28, %v299_v26 }
  0xc6   : > { %471 = vst [vmem:[#allocation2] sm:$0xff] %v469_v29 }
  0xc8   : > { %v452_v30 = vpop.f32.mrf.mxu0 }
  0xc9   : > { %v466_v32 = vpop.f32.mrf.mxu1 }
  0xca   : > { %v467_v33 = vadd.f32 %v466_v32, %v452_v30  ;;  %476 = sbr.rel (%p682_p11) target bundleno = 217 (0xd9), region = 78 }
  0xcc   : > { %v470_v34 = vadd.f32 %v467_v33, %v300_v31 }
  0xce   : > { %472 = vst [vmem:[#allocation2 + $0x8] sm:$0xff] %v470_v34 }
  0xcf   : > { %v477_v35 = vld [vmem:[#allocation2] sm:$0xff] }
  0xd0   : > { %v747_v36 = vld [vmem:[%s911_s2] ss:$0 sm:$0xff] }
  0xd1   : > { %v483_v38 = vadd.f32 %v747_v36, %v477_v35 }
  0xd3   : > { %485 = vst [vmem:[%s912_s3] sm:$0xff] %v483_v38 }
  0xd5   : > { %v478_v37 = vld [vmem:[#allocation2 + $0x8] sm:$0xff] }
  0xd6   : > { %v484_v39 = vadd.f32 %v747_v36, %v478_v37 }
  0xd8   : > { %486 = vst [vmem:[%s912_s3 + $0x8] sm:$0xff] %v484_v39 }
  0xd9 PF: > { %s13_s16 = sadd.s32 1, %s786_s16   ;;  %s913_s12 = smov %s774_s13 }
  0xda   : > { %p10_p12 = scmp.ge.s32.totalorder %s13_s16, 4   ;;  %s914_s13 = smov %s844_s20 }
  0xdb   : > { %s915_s14 = smov %s782_s15  ;;  %s916_s15 = smov %s918_s17 }
  0xdc   :  { %12 = sbr.rel (!%p10_p12) target bundleno = 3 (0x3), region = 119 }

</bundles_post_ra>
